<compile_context>
chip_gen: v5e
topology: v5e:2x2
jax: 0.10.0
libtpu: 0.0.40
codegen_flags: <defaults>
</compile_context>

<pallas_src>
import math

import jax
import jax.numpy as jnp
import numpy as np
from jax.experimental import pallas as pl
from jax.experimental.pallas import tpu as pltpu

# Kept at "highest": f32-exact matmuls are needed to hold the 2e-5 attention
# tolerance vs. the f32 reference, and the MXU is nowhere near the bottleneck.
jax.config.update("jax_default_matmul_precision", "highest")

# Hyperparameters (module-level globals in the PyTorch source).
d_model = 32
d_k = 8
d_v = 8
n_heads = 4
d_ff = 64
n_layers = 2
tgt_len = 5
src_len = 5
tgt_vocab_size = 11

LN_EPS = 1e-5
SP = 8                        # padded sequence length (sublane aligned)
HDK = n_heads * d_k           # 32
HDV = n_heads * d_v           # 32
PACK_ROWS = 3 * d_model + d_ff + 8   # 32(w_self)+32(w_cross)+32(w1)+64(w2)+8(vec) = 168
OUT_LANES = 128               # lane-dense output slab width

# The PyTorch Decoder hard-codes these positional indices.
POS_IDS = jnp.array([[5, 1, 2, 3, 4]], dtype=jnp.int32)


# ---------------------------------------------------------------------------
# Pallas kernel: one decoder layer for one batch tile; layers = inner grid axis.
# ---------------------------------------------------------------------------
def _layer_norm(z, gamma, beta):
    mu = jnp.mean(z, axis=-1, keepdims=True)
    var = jnp.mean((z - mu) ** 2, axis=-1, keepdims=True)
    return (z - mu) * jax.lax.rsqrt(var + LN_EPS) * gamma + beta


def decoder_stack_kernel(x_ref, enc_ref, smask_ref, emask_ref, w_ref,
                         out_ref, state_ref):
    layer = pl.program_id(1)
    bt = smask_ref.shape[0]
    rows = bt * SP

    # Layer 0: seed the carried decoder state from the embedding block.
    @pl.when(layer == 0)
    def _():
        state_ref[...] = x_ref[...]

    x = state_ref[...]                        # (rows, d_model)
    enc = enc_ref[...]                        # (rows, d_model)

    # Packed per-layer parameter slab (all row offsets are multiples of 8).
    ws = w_ref[0:d_model, :]                                # [wq*s | wk | wv | wo]
    wc = w_ref[d_model:2 * d_model, :]                      # cross-attn, same layout
    w1 = w_ref[2 * d_model:3 * d_model, 0:d_ff]             # (d_model, d_ff)
    w2 = w_ref[3 * d_model:3 * d_model + d_ff, 0:d_model]   # (d_ff, d_model)
    vec = w_ref[3 * d_model + d_ff:PACK_ROWS, :]            # (8, 128) biases / LN

    def attend(qp, kvp, mask4):
        # qp: (rows, HDK); kvp: (rows, HDK+HDV); mask4: (bt, H, SP, sk) additive.
        sk = mask4.shape[3]
        q3 = (qp.reshape(bt, SP, n_heads, d_k)
              .transpose(0, 2, 1, 3).reshape(bt * n_heads, SP, d_k))
        k3 = (kvp[:, :HDK].reshape(bt, sk, n_heads, d_k)
              .transpose(0, 2, 1, 3).reshape(bt * n_heads, sk, d_k))
        v3 = (kvp[:, HDK:].reshape(bt, sk, n_heads, d_v)
              .transpose(0, 2, 1, 3).reshape(bt * n_heads, sk, d_v))
        # Heads-batched score / context matmuls (single batched dot each).
        s = jnp.einsum("bqd,bkd->bqk", q3, k3,
                       preferred_element_type=jnp.float32)
        s = s + mask4.reshape(bt * n_heads, SP, sk)
        m = jnp.max(s, axis=-1, keepdims=True)
        e = jnp.exp(s - m)
        a = e * pl.reciprocal(jnp.sum(e, axis=-1, keepdims=True), approx=False)
        ctx = jnp.einsum("bqk,bkd->bqd", a, v3,
                         preferred_element_type=jnp.float32)
        ctx = (ctx.reshape(bt, n_heads, SP, d_v)
               .transpose(0, 2, 1, 3).reshape(rows, n_heads * d_v))
        a_flat = (a.reshape(bt, n_heads, SP, sk)
                  .transpose(0, 2, 1, 3).reshape(rows, n_heads * sk))
        return ctx, a_flat

    # ---- self attention: fused QKV projection (scale folded into wq/bq) ----
    proj = jnp.dot(x, ws, preferred_element_type=jnp.float32) + vec[0:1, :]
    ctx, a_self = attend(proj[:, :HDK], proj[:, HDK:3 * HDK], smask_ref[...])
    out1 = (jnp.dot(ctx, ws[:, 3 * HDK:], preferred_element_type=jnp.float32)
            + vec[0:1, 3 * HDK:3 * HDK + d_model])
    x1 = _layer_norm(out1 + x, vec[3:4, 0:d_model], vec[3:4, d_model:2 * d_model])

    # ---- cross attention: Q from decoder state, fused K/V from encoder ----
    qp = jnp.dot(x1, wc[:, :HDK], preferred_element_type=jnp.float32) + vec[1:2, :HDK]
    kvp = (jnp.dot(enc, wc[:, HDK:3 * HDK], preferred_element_type=jnp.float32)
           + vec[1:2, HDK:3 * HDK])
    ctx2, a_enc = attend(qp, kvp, emask_ref[...])
    out2 = (jnp.dot(ctx2, wc[:, 3 * HDK:], preferred_element_type=jnp.float32)
            + vec[1:2, 3 * HDK:3 * HDK + d_model])
    x2 = _layer_norm(out2 + x1, vec[3:4, 2 * d_model:3 * d_model],
                     vec[3:4, 3 * d_model:4 * d_model])

    # ---- position-wise feed-forward ----
    h = jnp.maximum(jnp.dot(x2, w1, preferred_element_type=jnp.float32)
                    + vec[2:3, :d_ff], 0.0)
    f = (jnp.dot(h, w2, preferred_element_type=jnp.float32)
         + vec[2:3, d_ff:d_ff + d_model])
    y = _layer_norm(f + x2, vec[4:5, 0:d_model], vec[4:5, d_model:2 * d_model])

    # Carry state to the next layer; emit ONE lane-dense 128-wide output slab.
    state_ref[...] = y
    pad = jnp.zeros((rows, OUT_LANES - d_model - 2 * n_heads * SP), jnp.float32)
    out_ref[...] = jnp.concatenate([y, a_self, a_enc, pad], axis=-1)


# ---------------------------------------------------------------------------
# pallas_call wrapper: the whole decoder stack in one launch.
# ---------------------------------------------------------------------------
def _batch_tile(B):
    """Whole batch per step on single-TC chips; 2 parallel steps on v7x."""
    kind = ""
    try:
        kind = jax.devices()[0].device_kind.lower()
    except Exception:
        pass
    two_core = ("v7" in kind) or ("7x" in kind)
    bt = max(B // 2, 1) if two_core else B
    while B % bt:
        bt -= 1
    return bt


def decoder_stack_pallas(x_p, enc_p, smaskf, emaskf, w_stack, bt):
    B = smaskf.shape[0]
    n_steps = B // bt

    grid_spec = pltpu.PrefetchScalarGridSpec(
        num_scalar_prefetch=0,
        grid=(n_steps, n_layers),
        in_specs=[
            pl.BlockSpec((bt * SP, d_model), lambda i, l: (i, 0)),          # embeddings
            pl.BlockSpec((bt * SP, d_model), lambda i, l: (i, 0)),          # encoder outs
            pl.BlockSpec((bt, n_heads, SP, SP), lambda i, l: (i, 0, 0, 0)),  # self mask
            pl.BlockSpec((bt, n_heads, SP, SP), lambda i, l: (i, 0, 0, 0)),  # dec-enc mask
            pl.BlockSpec((None, PACK_ROWS, 128), lambda i, l: (l, 0, 0)),    # layer weights
        ],
        out_specs=pl.BlockSpec((None, bt * SP, OUT_LANES), lambda i, l: (l, i, 0)),
        scratch_shapes=[pltpu.VMEM((bt * SP, d_model), jnp.float32)],        # carried state
    )
    return pl.pallas_call(
        decoder_stack_kernel,
        grid_spec=grid_spec,
        out_shape=jax.ShapeDtypeStruct((n_layers, B * SP, OUT_LANES), jnp.float32),
        compiler_params=pltpu.CompilerParams(
            dimension_semantics=("parallel", "arbitrary")),
    )(x_p, enc_p, smaskf, emaskf, w_stack)


# ---------------------------------------------------------------------------
# Wrapper-side prep (embeddings, masks, padding) and one-time weight packing.
# ---------------------------------------------------------------------------
def get_sinusoid_encoding_table(n_position, dm):
    pos = np.arange(n_position, dtype=np.float64)[:, None]
    hid = np.arange(dm, dtype=np.float64)[None, :]
    table = pos / np.power(10000.0, 2.0 * np.floor(hid / 2.0) / dm)
    table[:, 0::2] = np.sin(table[:, 0::2])
    table[:, 1::2] = np.cos(table[:, 1::2])
    return jnp.asarray(table, dtype=jnp.float32)


def build_masks(dec_inputs, enc_inputs):
    B, S = dec_inputs.shape
    Se = enc_inputs.shape[1]
    pad = jnp.broadcast_to((dec_inputs == 0)[:, None, :], (B, S, S))
    sub = jnp.broadcast_to(
        jnp.triu(jnp.ones((S, S), jnp.int32), k=1).astype(bool)[None], (B, S, S))
    self_mask = pad | sub
    enc_mask = jnp.broadcast_to((enc_inputs == 0)[:, None, :], (B, S, Se))
    return self_mask, enc_mask


def pack_params(params):
    """One-time packing of per-layer params into (n_layers, PACK_ROWS, 128);
    1/sqrt(d_k) is folded into wq/bq so the kernel never scales scores."""
    scale = 1.0 / math.sqrt(d_k)
    slabs = []
    for lp in params["layers"]:
        sa, ca, fp = lp["self_attn"], lp["cross_attn"], lp["ffn"]
        w_self = jnp.concatenate([sa["wq"] * scale, sa["wk"], sa["wv"], sa["wo"]], axis=1)
        w_cross = jnp.concatenate([ca["wq"] * scale, ca["wk"], ca["wv"], ca["wo"]], axis=1)
        w1p = jnp.pad(fp["w1"], ((0, 0), (0, 128 - d_ff)))          # (32, 128)
        w2p = jnp.pad(fp["w2"], ((0, 0), (0, 128 - d_model)))       # (64, 128)
        vec = jnp.zeros((8, 128), jnp.float32)
        vec = vec.at[0].set(jnp.concatenate([sa["bq"] * scale, sa["bk"], sa["bv"], sa["bo"]]))
        vec = vec.at[1].set(jnp.concatenate([ca["bq"] * scale, ca["bk"], ca["bv"], ca["bo"]]))
        vec = vec.at[2, :d_ff + d_model].set(jnp.concatenate([fp["b1"], fp["b2"]]))
        vec = vec.at[3].set(jnp.concatenate([sa["ln_g"], sa["ln_b"], ca["ln_g"], ca["ln_b"]]))
        vec = vec.at[4, :2 * d_model].set(jnp.concatenate([fp["ln_g"], fp["ln_b"]]))
        slabs.append(jnp.concatenate([w_self, w_cross, w1p, w2p, vec], axis=0))
    return jnp.stack(slabs, axis=0)                                  # (n_layers, 168, 128)


def decoder_forward(dec_inputs, enc_inputs, enc_outputs, params, w_stack):
    B, S = dec_inputs.shape
    Se = enc_inputs.shape[1]
    assert S == tgt_len and S <= SP and Se <= SP

    # TODO(synk): embedding gathers + mask construction are tiny int/bool prep done
    # with plain jnp; all decoder-layer compute runs inside the fused Pallas kernel.
    x = params["tgt_emb"][dec_inputs] + params["pos_emb"][POS_IDS]   # (B, S, d_model)
    self_mask, enc_mask = build_masks(dec_inputs, enc_inputs)

    # Pad sequences to SP (sublane aligned) and flatten to (B*SP, d_model).
    x_p = jnp.pad(x, ((0, 0), (0, SP - S), (0, 0))).reshape(B * SP, d_model)
    enc_p = jnp.pad(enc_outputs, ((0, 0), (0, SP - Se), (0, 0))).reshape(B * SP, d_model)

    # Additive float masks (-1e9 at masked / padded positions), pre-broadcast
    # over heads so the kernel only does one add per score block.
    def addmask(m):
        mp = jnp.pad(m, ((0, 0), (0, SP - m.shape[1]), (0, SP - m.shape[2])),
                     constant_values=True)
        mf = jnp.where(mp, jnp.float32(-1e9), jnp.float32(0.0))
        return jnp.broadcast_to(mf[:, None, :, :], (B, n_heads, SP, SP))

    smaskf = addmask(self_mask)
    emaskf = addmask(enc_mask)

    bt = _batch_tile(B)
    out = decoder_stack_pallas(x_p, enc_p, smaskf, emaskf, w_stack, bt)

    # Unpack the lane-dense slab: y in lanes 0:32, self-attn 32:64, cross 64:96.
    dec_out = out[n_layers - 1, :, :d_model].reshape(B, SP, d_model)[:, :S, :]
    self_attns, enc_attns = [], []
    for l in range(n_layers):
        sa = out[l, :, d_model:d_model + n_heads * SP]
        sa = sa.reshape(B, SP, n_heads, SP).transpose(0, 2, 1, 3)[:, :, :S, :S]
        ea = out[l, :, d_model + n_heads * SP:d_model + 2 * n_heads * SP]
        ea = ea.reshape(B, SP, n_heads, SP).transpose(0, 2, 1, 3)[:, :, :S, :Se]
        self_attns.append(sa)
        enc_attns.append(ea)
    return dec_out, self_attns, enc_attns


# ---------------------------------------------------------------------------
# Parameter init (mirrors the PyTorch module's parameterization).
# ---------------------------------------------------------------------------
def _linear_init(kw, kb, fan_in, fan_out):
    bound = 1.0 / math.sqrt(fan_in)
    w = jax.random.uniform(kw, (fan_in, fan_out), jnp.float32, -bound, bound)
    b = jax.random.uniform(kb, (fan_out,), jnp.float32, -bound, bound)
    return w, b


def _mha_init(keys):
    wq, bq = _linear_init(keys[0], keys[1], d_model, n_heads * d_k)
    wk, bk = _linear_init(keys[2], keys[3], d_model, n_heads * d_k)
    wv, bv = _linear_init(keys[4], keys[5], d_model, n_heads * d_v)
    wo, bo = _linear_init(keys[6], keys[7], n_heads * d_v, d_model)
    ln_g = 1.0 + 0.1 * jax.random.normal(keys[8], (d_model,), jnp.float32)
    ln_b = 0.1 * jax.random.normal(keys[9], (d_model,), jnp.float32)
    return dict(wq=wq, bq=bq, wk=wk, bk=bk, wv=wv, bv=bv, wo=wo, bo=bo,
                ln_g=ln_g, ln_b=ln_b)


def init_params(key):
    keys = jax.random.split(key, 1 + n_layers)
    tgt_emb = 0.5 * jax.random.normal(keys[0], (tgt_vocab_size, d_model), jnp.float32)
    pos_emb = get_sinusoid_encoding_table(tgt_len + 1, d_model)
    layers = []
    for l in range(n_layers):
        lk = jax.random.split(keys[1 + l], 26)
        self_p = _mha_init(lk[0:10])
        cross_p = _mha_init(lk[10:20])
        w1, b1 = _linear_init(lk[20], lk[21], d_model, d_ff)
        w2, b2 = _linear_init(lk[22], lk[23], d_ff, d_model)
        ln_g = 1.0 + 0.1 * jax.random.normal(lk[24], (d_model,), jnp.float32)
        ln_b = 0.1 * jax.random.normal(lk[25], (d_model,), jnp.float32)
        ffn_p = dict(w1=w1, b1=b1, w2=w2, b2=b2, ln_g=ln_g, ln_b=ln_b)
        layers.append(dict(self_attn=self_p, cross_attn=cross_p, ffn=ffn_p))
    return dict(tgt_emb=tgt_emb, pos_emb=pos_emb, layers=layers)


# ---------------------------------------------------------------------------
# Pure-JAX reference mirroring the PyTorch forward.
# ---------------------------------------------------------------------------
def _ref_layer_norm(z, g, b):
    mu = z.mean(-1, keepdims=True)
    var = ((z - mu) ** 2).mean(-1, keepdims=True)
    return (z - mu) / jnp.sqrt(var + LN_EPS) * g + b


def _ref_mha(Q, K, V, mask_bool, p):
    B, Sq, _ = Q.shape
    Sk = K.shape[1]
    q = (Q @ p["wq"] + p["bq"]).reshape(B, Sq, n_heads, d_k).transpose(0, 2, 1, 3)
    k = (K @ p["wk"] + p["bk"]).reshape(B, Sk, n_heads, d_k).transpose(0, 2, 1, 3)
    v = (V @ p["wv"] + p["bv"]).reshape(B, Sk, n_heads, d_v).transpose(0, 2, 1, 3)
    scores = jnp.einsum("bhqd,bhkd->bhqk", q, k) / math.sqrt(d_k)
    scores = jnp.where(mask_bool[:, None, :, :], jnp.float32(-1e9), scores)
    attn = jax.nn.softmax(scores, axis=-1)
    ctx = jnp.einsum("bhqk,bhkd->bhqd", attn, v).transpose(0, 2, 1, 3)
    ctx = ctx.reshape(B, Sq, n_heads * d_v)
    out = ctx @ p["wo"] + p["bo"]
    return _ref_layer_norm(out + Q, p["ln_g"], p["ln_b"]), attn


def _ref_ffn(x, p):
    h = jnp.maximum(x @ p["w1"] + p["b1"], 0.0)
    out = h @ p["w2"] + p["b2"]
    return _ref_layer_norm(out + x, p["ln_g"], p["ln_b"])


def reference_decoder(dec_inputs, enc_inputs, enc_outputs, params):
    x = params["tgt_emb"][dec_inputs] + params["pos_emb"][POS_IDS]
    self_mask, enc_mask = build_masks(dec_inputs, enc_inputs)
    self_attns, enc_attns = [], []
    for lp in params["layers"]:
        x, sa = _ref_mha(x, x, x, self_mask, lp["self_attn"])
        self_attns.append(sa)
        x, ea = _ref_mha(x, enc_outputs, enc_outputs, enc_mask, lp["cross_attn"])
        enc_attns.append(ea)
        x = _ref_ffn(x, lp["ffn"])
    return x, self_attns, enc_attns


# ---------------------------------------------------------------------------
if __name__ == "__main__":
    key = jax.random.PRNGKey(0)
    k_enc, k_par = jax.random.split(key)

    B = 4
    dec_inputs = jnp.array([[1, 2, 3, 4, 0],
                            [5, 6, 7, 8, 9],
                            [1, 3, 5, 7, 0],
                            [2, 4, 6, 8, 10]], dtype=jnp.int32)
    enc_inputs = jnp.array([[1, 2, 3, 0, 0],
                            [4, 5, 6, 7, 8],
                            [9, 1, 2, 2, 0],
                            [3, 3, 1, 0, 0]], dtype=jnp.int32)
    enc_outputs = jax.random.normal(k_enc, (B, src_len, d_model), jnp.float32)
    params = init_params(k_par)

    # Weights packed once, outside the timed forward path.
    w_stack = jax.block_until_ready(pack_params(params))

    dec_out, self_attns, enc_attns = decoder_forward(dec_inputs, enc_inputs,
                                                     enc_outputs, params, w_stack)
    jax.block_until_ready((dec_out, self_attns, enc_attns))

    ref_out, ref_self, ref_enc = reference_decoder(dec_inputs, enc_inputs,
                                                   enc_outputs, params)

    assert jnp.allclose(dec_out, ref_out, atol=2e-4, rtol=2e-4), "decoder output mismatch"
    for l in range(n_layers):
        assert jnp.allclose(self_attns[l], ref_self[l], atol=2e-5, rtol=2e-5), \
            f"self-attention mismatch in layer {l}"
        assert jnp.allclose(enc_attns[l], ref_enc[l], atol=2e-5, rtol=2e-5), \
            f"dec-enc attention mismatch in layer {l}"

    print("KERNEL_OK")
</pallas_src>

<mosaic_0001>
module attributes {stable_mosaic.version = 11 : i64} {
  func.func @decoder_stack_kernel(%arg0: i32, %arg1: i32, %arg2: memref<32x32xf32, #tpu.memory_space<vmem>>, %arg3: memref<32x32xf32, #tpu.memory_space<vmem>>, %arg4: memref<4x4x8x8xf32, #tpu.memory_space<vmem>>, %arg5: memref<4x4x8x8xf32, #tpu.memory_space<vmem>>, %arg6: memref<1x168x128xf32, #tpu.memory_space<vmem>>, %arg7: memref<1x32x128xf32, #tpu.memory_space<vmem>>, %arg8: memref<32x32xf32, #tpu.memory_space<vmem>>) attributes {dimension_semantics = [#tpu.dimension_semantics<parallel>, #tpu.dimension_semantics<arbitrary>], iteration_bounds = array<i64: 1, 2>, scalar_prefetch = 0 : i64, scratch_operands = 1 : i64, tpu.core_type = #tpu.core_type<tc>, window_params = [{transform_indices = @transform_0, window_bounds = array<i64: 32, 32>}, {transform_indices = @transform_1, window_bounds = array<i64: 32, 32>}, {transform_indices = @transform_2, window_bounds = array<i64: 4, 4, 8, 8>}, {transform_indices = @transform_3, window_bounds = array<i64: 4, 4, 8, 8>}, {transform_indices = @transform_4, window_bounds = array<i64: 1, 168, 128>}, {transform_indices = @transform_5, window_bounds = array<i64: 1, 32, 128>}]} {
    %c0_i32 = arith.constant 0 : i32
    %0 = arith.cmpi eq, %arg1, %c0_i32 : i32
    %1 = arith.extui %0 : i1 to i32
    %c0_i32_0 = arith.constant 0 : i32
    %2 = arith.cmpi ne, %1, %c0_i32_0 : i32
    scf.if %2 {
      %c0_59 = arith.constant 0 : index
      %c0_60 = arith.constant 0 : index
      %196 = vector.load %arg2[%c0_59, %c0_60] : memref<32x32xf32, #tpu.memory_space<vmem>>, vector<32x32xf32>
      %c0_61 = arith.constant 0 : index
      %c0_62 = arith.constant 0 : index
      %197 = vector.load %arg8[%c0_61, %c0_62] : memref<32x32xf32, #tpu.memory_space<vmem>>, vector<32x32xf32>
      tpu.vector_store %arg8[%c0_61, %c0_62], %196 {strides = array<i32>} : memref<32x32xf32, #tpu.memory_space<vmem>>, vector<32x32xf32>,
    } else {
    }
    %c0 = arith.constant 0 : index
    %c0_1 = arith.constant 0 : index
    %3 = vector.load %arg8[%c0, %c0_1] : memref<32x32xf32, #tpu.memory_space<vmem>>, vector<32x32xf32>
    %c0_2 = arith.constant 0 : index
    %c0_3 = arith.constant 0 : index
    %4 = vector.load %arg3[%c0_2, %c0_3] : memref<32x32xf32, #tpu.memory_space<vmem>>, vector<32x32xf32>
    %c0_4 = arith.constant 0 : index
    %c0_5 = arith.constant 0 : index
    %c0_6 = arith.constant 0 : index
    %5 = vector.load %arg6[%c0_4, %c0_5, %c0_6] : memref<1x168x128xf32, #tpu.memory_space<vmem>>, vector<1x32x128xf32>
    %6 = vector.shape_cast %5 : vector<1x32x128xf32> to vector<32x128xf32>
    %c0_7 = arith.constant 0 : index
    %c32 = arith.constant 32 : index
    %c0_8 = arith.constant 0 : index
    %7 = vector.load %arg6[%c0_7, %c32, %c0_8] : memref<1x168x128xf32, #tpu.memory_space<vmem>>, vector<1x32x128xf32>
    %8 = vector.shape_cast %7 : vector<1x32x128xf32> to vector<32x128xf32>
    %c0_9 = arith.constant 0 : index
    %c64 = arith.constant 64 : index
    %c0_10 = arith.constant 0 : index
    %9 = vector.load %arg6[%c0_9, %c64, %c0_10] : memref<1x168x128xf32, #tpu.memory_space<vmem>>, vector<1x32x64xf32>
    %10 = vector.shape_cast %9 : vector<1x32x64xf32> to vector<32x64xf32>
    %c0_11 = arith.constant 0 : index
    %c96 = arith.constant 96 : index
    %c0_12 = arith.constant 0 : index
    %11 = vector.load %arg6[%c0_11, %c96, %c0_12] : memref<1x168x128xf32, #tpu.memory_space<vmem>>, vector<1x64x32xf32>
    %12 = vector.shape_cast %11 : vector<1x64x32xf32> to vector<64x32xf32>
    %c0_13 = arith.constant 0 : index
    %c160 = arith.constant 160 : index
    %c0_14 = arith.constant 0 : index
    %13 = vector.load %arg6[%c0_13, %c160, %c0_14] : memref<1x168x128xf32, #tpu.memory_space<vmem>>, vector<1x8x128xf32>
    %14 = vector.shape_cast %13 : vector<1x8x128xf32> to vector<8x128xf32>
    %cst = arith.constant dense<0.000000e+00> : vector<32x128xf32>
    %15 = tpu.matmul %3, %6, %cst {dimension_numbers = #tpu.dot_dimension_numbers<[1], [0], [0], [1], [0, 0, 1, 1], [], []>, precision = #tpu.contract_precision<fp32>} : vector<32x32xf32>, vector<32x128xf32>, vector<32x128xf32> -> vector<32x128xf32>
    %16 = vector.extract_strided_slice %14 {offsets = [0, 0], sizes = [1, 128], strides = [1, 1]} : vector<8x128xf32> to vector<1x128xf32>
    %17 = vector.broadcast %16 : vector<1x128xf32> to vector<32x128xf32>
    %18 = arith.addf %15, %17 : vector<32x128xf32>
    %19 = vector.extract_strided_slice %18 {offsets = [0, 0], sizes = [32, 32], strides = [1, 1]} : vector<32x128xf32> to vector<32x32xf32>
    %20 = vector.extract_strided_slice %18 {offsets = [0, 32], sizes = [32, 64], strides = [1, 1]} : vector<32x128xf32> to vector<32x64xf32>
    %c0_15 = arith.constant 0 : index
    %c0_16 = arith.constant 0 : index
    %c0_17 = arith.constant 0 : index
    %c0_18 = arith.constant 0 : index
    %21 = vector.load %arg4[%c0_15, %c0_16, %c0_17, %c0_18] : memref<4x4x8x8xf32, #tpu.memory_space<vmem>>, vector<4x4x8x8xf32>
    %22 = vector.shape_cast %19 : vector<32x32xf32> to vector<4x8x4x8xf32>
    %23 = tpu.transpose %22, [0, 2, 1, 3] : vector<4x8x4x8xf32> -> vector<4x4x8x8xf32>
    %24 = vector.shape_cast %23 : vector<4x4x8x8xf32> to vector<16x8x8xf32>
    %25 = vector.extract_strided_slice %20 {offsets = [0, 0], sizes = [32, 32], strides = [1, 1]} : vector<32x64xf32> to vector<32x32xf32>
    %26 = vector.shape_cast %25 : vector<32x32xf32> to vector<4x8x4x8xf32>
    %27 = tpu.transpose %26, [0, 2, 1, 3] : vector<4x8x4x8xf32> -> vector<4x4x8x8xf32>
    %28 = vector.shape_cast %27 : vector<4x4x8x8xf32> to vector<16x8x8xf32>
    %29 = vector.extract_strided_slice %20 {offsets = [0, 32], sizes = [32, 32], strides = [1, 1]} : vector<32x64xf32> to vector<32x32xf32>
    %30 = vector.shape_cast %29 : vector<32x32xf32> to vector<4x8x4x8xf32>
    %31 = tpu.transpose %30, [0, 2, 1, 3] : vector<4x8x4x8xf32> -> vector<4x4x8x8xf32>
    %32 = vector.shape_cast %31 : vector<4x4x8x8xf32> to vector<16x8x8xf32>
    "tpu.trace_start"() <{level = 10 : i32, message = "bqd,bkd->bqk"}> : () -> ()
    %cst_19 = arith.constant dense<0.000000e+00> : vector<16x8x8xf32>
    %33 = tpu.matmul %24, %28, %cst_19 {dimension_numbers = #tpu.dot_dimension_numbers<[2], [2], [1], [1], [0, 0, 0, 1, 1, 1], [0], [0]>, precision = #tpu.contract_precision<fp32>} : vector<16x8x8xf32>, vector<16x8x8xf32>, vector<16x8x8xf32> -> vector<16x8x8xf32>
    "tpu.trace_stop"() : () -> ()
    %34 = vector.shape_cast %21 : vector<4x4x8x8xf32> to vector<16x8x8xf32>
    %35 = arith.addf %33, %34 : vector<16x8x8xf32>
    %cst_20 = arith.constant dense<0xFF800000> : vector<16x8xf32>
    %36 = vector.multi_reduction <maximumf>, %35, %cst_20 [2] : vector<16x8x8xf32> to vector<16x8xf32>
    %37 = vector.shape_cast %36 : vector<16x8xf32> to vector<16x8x1xf32>
    %38 = vector.broadcast %37 : vector<16x8x1xf32> to vector<16x8x8xf32>
    %39 = arith.subf %35, %38 : vector<16x8x8xf32>
    %40 = math.exp %39 : vector<16x8x8xf32>
    %cst_21 = arith.constant dense<0.000000e+00> : vector<16x8xf32>
    %41 = vector.multi_reduction <add>, %40, %cst_21 [2] : vector<16x8x8xf32> to vector<16x8xf32>
    %42 = vector.shape_cast %41 : vector<16x8xf32> to vector<16x8x1xf32>
    %43 = tpu.reciprocal %42 : vector<16x8x1xf32> -> vector<16x8x1xf32>
    %44 = vector.broadcast %43 : vector<16x8x1xf32> to vector<16x8x8xf32>
    %45 = arith.mulf %40, %44 : vector<16x8x8xf32>
    "tpu.trace_start"() <{level = 10 : i32, message = "bqk,bkd->bqd"}> : () -> ()
    %cst_22 = arith.constant dense<0.000000e+00> : vector<16x8x8xf32>
    %46 = tpu.matmul %45, %32, %cst_22 {dimension_numbers = #tpu.dot_dimension_numbers<[2], [1], [1], [2], [0, 0, 0, 1, 1, 2], [0], [0]>, precision = #tpu.contract_precision<fp32>} : vector<16x8x8xf32>, vector<16x8x8xf32>, vector<16x8x8xf32> -> vector<16x8x8xf32>
    "tpu.trace_stop"() : () -> ()
    %47 = vector.shape_cast %46 : vector<16x8x8xf32> to vector<4x4x8x8xf32>
    %48 = tpu.transpose %47, [0, 2, 1, 3] : vector<4x4x8x8xf32> -> vector<4x8x4x8xf32>
    %49 = vector.shape_cast %48 : vector<4x8x4x8xf32> to vector<32x32xf32>
    %50 = vector.shape_cast %45 : vector<16x8x8xf32> to vector<4x4x8x8xf32>
    %51 = tpu.transpose %50, [0, 2, 1, 3] : vector<4x4x8x8xf32> -> vector<4x8x4x8xf32>
    %52 = vector.shape_cast %51 : vector<4x8x4x8xf32> to vector<32x32xf32>
    %53 = vector.extract_strided_slice %6 {offsets = [0, 96], sizes = [32, 32], strides = [1, 1]} : vector<32x128xf32> to vector<32x32xf32>
    %cst_23 = arith.constant dense<0.000000e+00> : vector<32x32xf32>
    %54 = tpu.matmul %49, %53, %cst_23 {dimension_numbers = #tpu.dot_dimension_numbers<[1], [0], [0], [1], [0, 0, 1, 1], [], []>, precision = #tpu.contract_precision<fp32>} : vector<32x32xf32>, vector<32x32xf32>, vector<32x32xf32> -> vector<32x32xf32>
    %55 = vector.extract_strided_slice %14 {offsets = [0, 96], sizes = [1, 32], strides = [1, 1]} : vector<8x128xf32> to vector<1x32xf32>
    %56 = vector.broadcast %55 : vector<1x32xf32> to vector<32x32xf32>
    %57 = arith.addf %54, %56 : vector<32x32xf32>
    %58 = arith.addf %57, %3 : vector<32x32xf32>
    %59 = vector.extract_strided_slice %14 {offsets = [3, 0], sizes = [1, 32], strides = [1, 1]} : vector<8x128xf32> to vector<1x32xf32>
    %60 = vector.extract_strided_slice %14 {offsets = [3, 32], sizes = [1, 32], strides = [1, 1]} : vector<8x128xf32> to vector<1x32xf32>
    %cst_24 = arith.constant dense<0.000000e+00> : vector<32xf32>
    %61 = vector.multi_reduction <add>, %58, %cst_24 [1] : vector<32x32xf32> to vector<32xf32>
    %62 = vector.shape_cast %61 : vector<32xf32> to vector<32x1xf32>
    %cst_25 = arith.constant 3.200000e+01 : f32
    %63 = vector.broadcast %cst_25 : f32 to vector<32x1xf32>
    %64 = arith.divf %62, %63 : vector<32x1xf32>
    %65 = vector.broadcast %64 : vector<32x1xf32> to vector<32x32xf32>
    %66 = arith.subf %58, %65 : vector<32x32xf32>
    %67 = arith.mulf %66, %66 : vector<32x32xf32>
    %cst_26 = arith.constant dense<0.000000e+00> : vector<32xf32>
    %68 = vector.multi_reduction <add>, %67, %cst_26 [1] : vector<32x32xf32> to vector<32xf32>
    %69 = vector.shape_cast %68 : vector<32xf32> to vector<32x1xf32>
    %cst_27 = arith.constant 3.200000e+01 : f32
    %70 = vector.broadcast %cst_27 : f32 to vector<32x1xf32>
    %71 = arith.divf %69, %70 : vector<32x1xf32>
    %72 = vector.broadcast %64 : vector<32x1xf32> to vector<32x32xf32>
    %73 = arith.subf %58, %72 : vector<32x32xf32>
    %cst_28 = arith.constant 9.99999974E-6 : f32
    %74 = vector.broadcast %cst_28 : f32 to vector<32x1xf32>
    %75 = arith.addf %71, %74 : vector<32x1xf32>
    %76 = math.rsqrt %75 : vector<32x1xf32>
    %77 = vector.broadcast %76 : vector<32x1xf32> to vector<32x32xf32>
    %78 = arith.mulf %73, %77 : vector<32x32xf32>
    %79 = vector.broadcast %59 : vector<1x32xf32> to vector<32x32xf32>
    %80 = arith.mulf %78, %79 : vector<32x32xf32>
    %81 = vector.broadcast %60 : vector<1x32xf32> to vector<32x32xf32>
    %82 = arith.addf %80, %81 : vector<32x32xf32>
    %83 = vector.extract_strided_slice %8 {offsets = [0, 0], sizes = [32, 32], strides = [1, 1]} : vector<32x128xf32> to vector<32x32xf32>
    %cst_29 = arith.constant dense<0.000000e+00> : vector<32x32xf32>
    %84 = tpu.matmul %82, %83, %cst_29 {dimension_numbers = #tpu.dot_dimension_numbers<[1], [0], [0], [1], [0, 0, 1, 1], [], []>, precision = #tpu.contract_precision<fp32>} : vector<32x32xf32>, vector<32x32xf32>, vector<32x32xf32> -> vector<32x32xf32>
    %85 = vector.extract_strided_slice %14 {offsets = [1, 0], sizes = [1, 32], strides = [1, 1]} : vector<8x128xf32> to vector<1x32xf32>
    %86 = vector.broadcast %85 : vector<1x32xf32> to vector<32x32xf32>
    %87 = arith.addf %84, %86 : vector<32x32xf32>
    %88 = vector.extract_strided_slice %8 {offsets = [0, 32], sizes = [32, 64], strides = [1, 1]} : vector<32x128xf32> to vector<32x64xf32>
    %cst_30 = arith.constant dense<0.000000e+00> : vector<32x64xf32>
    %89 = tpu.matmul %4, %88, %cst_30 {dimension_numbers = #tpu.dot_dimension_numbers<[1], [0], [0], [1], [0, 0, 1, 1], [], []>, precision = #tpu.contract_precision<fp32>} : vector<32x32xf32>, vector<32x64xf32>, vector<32x64xf32> -> vector<32x64xf32>
    %90 = vector.extract_strided_slice %14 {offsets = [1, 32], sizes = [1, 64], strides = [1, 1]} : vector<8x128xf32> to vector<1x64xf32>
    %91 = vector.broadcast %90 : vector<1x64xf32> to vector<32x64xf32>
    %92 = arith.addf %89, %91 : vector<32x64xf32>
    %c0_31 = arith.constant 0 : index
    %c0_32 = arith.constant 0 : index
    %c0_33 = arith.constant 0 : index
    %c0_34 = arith.constant 0 : index
    %93 = vector.load %arg5[%c0_31, %c0_32, %c0_33, %c0_34] : memref<4x4x8x8xf32, #tpu.memory_space<vmem>>, vector<4x4x8x8xf32>
    %94 = vector.shape_cast %87 : vector<32x32xf32> to vector<4x8x4x8xf32>
    %95 = tpu.transpose %94, [0, 2, 1, 3] : vector<4x8x4x8xf32> -> vector<4x4x8x8xf32>
    %96 = vector.shape_cast %95 : vector<4x4x8x8xf32> to vector<16x8x8xf32>
    %97 = vector.extract_strided_slice %92 {offsets = [0, 0], sizes = [32, 32], strides = [1, 1]} : vector<32x64xf32> to vector<32x32xf32>
    %98 = vector.shape_cast %97 : vector<32x32xf32> to vector<4x8x4x8xf32>
    %99 = tpu.transpose %98, [0, 2, 1, 3] : vector<4x8x4x8xf32> -> vector<4x4x8x8xf32>
    %100 = vector.shape_cast %99 : vector<4x4x8x8xf32> to vector<16x8x8xf32>
    %101 = vector.extract_strided_slice %92 {offsets = [0, 32], sizes = [32, 32], strides = [1, 1]} : vector<32x64xf32> to vector<32x32xf32>
    %102 = vector.shape_cast %101 : vector<32x32xf32> to vector<4x8x4x8xf32>
    %103 = tpu.transpose %102, [0, 2, 1, 3] : vector<4x8x4x8xf32> -> vector<4x4x8x8xf32>
    %104 = vector.shape_cast %103 : vector<4x4x8x8xf32> to vector<16x8x8xf32>
    "tpu.trace_start"() <{level = 10 : i32, message = "bqd,bkd->bqk"}> : () -> ()
    %cst_35 = arith.constant dense<0.000000e+00> : vector<16x8x8xf32>
    %105 = tpu.matmul %96, %100, %cst_35 {dimension_numbers = #tpu.dot_dimension_numbers<[2], [2], [1], [1], [0, 0, 0, 1, 1, 1], [0], [0]>, precision = #tpu.contract_precision<fp32>} : vector<16x8x8xf32>, vector<16x8x8xf32>, vector<16x8x8xf32> -> vector<16x8x8xf32>
    "tpu.trace_stop"() : () -> ()
    %106 = vector.shape_cast %93 : vector<4x4x8x8xf32> to vector<16x8x8xf32>
    %107 = arith.addf %105, %106 : vector<16x8x8xf32>
    %cst_36 = arith.constant dense<0xFF800000> : vector<16x8xf32>
    %108 = vector.multi_reduction <maximumf>, %107, %cst_36 [2] : vector<16x8x8xf32> to vector<16x8xf32>
    %109 = vector.shape_cast %108 : vector<16x8xf32> to vector<16x8x1xf32>
    %110 = vector.broadcast %109 : vector<16x8x1xf32> to vector<16x8x8xf32>
    %111 = arith.subf %107, %110 : vector<16x8x8xf32>
    %112 = math.exp %111 : vector<16x8x8xf32>
    %cst_37 = arith.constant dense<0.000000e+00> : vector<16x8xf32>
    %113 = vector.multi_reduction <add>, %112, %cst_37 [2] : vector<16x8x8xf32> to vector<16x8xf32>
    %114 = vector.shape_cast %113 : vector<16x8xf32> to vector<16x8x1xf32>
    %115 = tpu.reciprocal %114 : vector<16x8x1xf32> -> vector<16x8x1xf32>
    %116 = vector.broadcast %115 : vector<16x8x1xf32> to vector<16x8x8xf32>
    %117 = arith.mulf %112, %116 : vector<16x8x8xf32>
    "tpu.trace_start"() <{level = 10 : i32, message = "bqk,bkd->bqd"}> : () -> ()
    %cst_38 = arith.constant dense<0.000000e+00> : vector<16x8x8xf32>
    %118 = tpu.matmul %117, %104, %cst_38 {dimension_numbers = #tpu.dot_dimension_numbers<[2], [1], [1], [2], [0, 0, 0, 1, 1, 2], [0], [0]>, precision = #tpu.contract_precision<fp32>} : vector<16x8x8xf32>, vector<16x8x8xf32>, vector<16x8x8xf32> -> vector<16x8x8xf32>
    "tpu.trace_stop"() : () -> ()
    %119 = vector.shape_cast %118 : vector<16x8x8xf32> to vector<4x4x8x8xf32>
    %120 = tpu.transpose %119, [0, 2, 1, 3] : vector<4x4x8x8xf32> -> vector<4x8x4x8xf32>
    %121 = vector.shape_cast %120 : vector<4x8x4x8xf32> to vector<32x32xf32>
    %122 = vector.shape_cast %117 : vector<16x8x8xf32> to vector<4x4x8x8xf32>
    %123 = tpu.transpose %122, [0, 2, 1, 3] : vector<4x4x8x8xf32> -> vector<4x8x4x8xf32>
    %124 = vector.shape_cast %123 : vector<4x8x4x8xf32> to vector<32x32xf32>
    %125 = vector.extract_strided_slice %8 {offsets = [0, 96], sizes = [32, 32], strides = [1, 1]} : vector<32x128xf32> to vector<32x32xf32>
    %cst_39 = arith.constant dense<0.000000e+00> : vector<32x32xf32>
    %126 = tpu.matmul %121, %125, %cst_39 {dimension_numbers = #tpu.dot_dimension_numbers<[1], [0], [0], [1], [0, 0, 1, 1], [], []>, precision = #tpu.contract_precision<fp32>} : vector<32x32xf32>, vector<32x32xf32>, vector<32x32xf32> -> vector<32x32xf32>
    %127 = vector.extract_strided_slice %14 {offsets = [1, 96], sizes = [1, 32], strides = [1, 1]} : vector<8x128xf32> to vector<1x32xf32>
    %128 = vector.broadcast %127 : vector<1x32xf32> to vector<32x32xf32>
    %129 = arith.addf %126, %128 : vector<32x32xf32>
    %130 = arith.addf %129, %82 : vector<32x32xf32>
    %131 = vector.extract_strided_slice %14 {offsets = [3, 64], sizes = [1, 32], strides = [1, 1]} : vector<8x128xf32> to vector<1x32xf32>
    %132 = vector.extract_strided_slice %14 {offsets = [3, 96], sizes = [1, 32], strides = [1, 1]} : vector<8x128xf32> to vector<1x32xf32>
    %cst_40 = arith.constant dense<0.000000e+00> : vector<32xf32>
    %133 = vector.multi_reduction <add>, %130, %cst_40 [1] : vector<32x32xf32> to vector<32xf32>
    %134 = vector.shape_cast %133 : vector<32xf32> to vector<32x1xf32>
    %cst_41 = arith.constant 3.200000e+01 : f32
    %135 = vector.broadcast %cst_41 : f32 to vector<32x1xf32>
    %136 = arith.divf %134, %135 : vector<32x1xf32>
    %137 = vector.broadcast %136 : vector<32x1xf32> to vector<32x32xf32>
    %138 = arith.subf %130, %137 : vector<32x32xf32>
    %139 = arith.mulf %138, %138 : vector<32x32xf32>
    %cst_42 = arith.constant dense<0.000000e+00> : vector<32xf32>
    %140 = vector.multi_reduction <add>, %139, %cst_42 [1] : vector<32x32xf32> to vector<32xf32>
    %141 = vector.shape_cast %140 : vector<32xf32> to vector<32x1xf32>
    %cst_43 = arith.constant 3.200000e+01 : f32
    %142 = vector.broadcast %cst_43 : f32 to vector<32x1xf32>
    %143 = arith.divf %141, %142 : vector<32x1xf32>
    %144 = vector.broadcast %136 : vector<32x1xf32> to vector<32x32xf32>
    %145 = arith.subf %130, %144 : vector<32x32xf32>
    %cst_44 = arith.constant 9.99999974E-6 : f32
    %146 = vector.broadcast %cst_44 : f32 to vector<32x1xf32>
    %147 = arith.addf %143, %146 : vector<32x1xf32>
    %148 = math.rsqrt %147 : vector<32x1xf32>
    %149 = vector.broadcast %148 : vector<32x1xf32> to vector<32x32xf32>
    %150 = arith.mulf %145, %149 : vector<32x32xf32>
    %151 = vector.broadcast %131 : vector<1x32xf32> to vector<32x32xf32>
    %152 = arith.mulf %150, %151 : vector<32x32xf32>
    %153 = vector.broadcast %132 : vector<1x32xf32> to vector<32x32xf32>
    %154 = arith.addf %152, %153 : vector<32x32xf32>
    %cst_45 = arith.constant dense<0.000000e+00> : vector<32x64xf32>
    %155 = tpu.matmul %154, %10, %cst_45 {dimension_numbers = #tpu.dot_dimension_numbers<[1], [0], [0], [1], [0, 0, 1, 1], [], []>, precision = #tpu.contract_precision<fp32>} : vector<32x32xf32>, vector<32x64xf32>, vector<32x64xf32> -> vector<32x64xf32>
    %156 = vector.extract_strided_slice %14 {offsets = [2, 0], sizes = [1, 64], strides = [1, 1]} : vector<8x128xf32> to vector<1x64xf32>
    %157 = vector.broadcast %156 : vector<1x64xf32> to vector<32x64xf32>
    %158 = arith.addf %155, %157 : vector<32x64xf32>
    %cst_46 = arith.constant 0.000000e+00 : f32
    %159 = vector.broadcast %cst_46 : f32 to vector<32x64xf32>
    %160 = arith.maximumf %158, %159 : vector<32x64xf32>
    %cst_47 = arith.constant dense<0.000000e+00> : vector<32x32xf32>
    %161 = tpu.matmul %160, %12, %cst_47 {dimension_numbers = #tpu.dot_dimension_numbers<[1], [0], [0], [1], [0, 0, 1, 1], [], []>, precision = #tpu.contract_precision<fp32>} : vector<32x64xf32>, vector<64x32xf32>, vector<32x32xf32> -> vector<32x32xf32>
    %162 = vector.extract_strided_slice %14 {offsets = [2, 64], sizes = [1, 32], strides = [1, 1]} : vector<8x128xf32> to vector<1x32xf32>
    %163 = vector.broadcast %162 : vector<1x32xf32> to vector<32x32xf32>
    %164 = arith.addf %161, %163 : vector<32x32xf32>
    %165 = arith.addf %164, %154 : vector<32x32xf32>
    %166 = vector.extract_strided_slice %14 {offsets = [4, 0], sizes = [1, 32], strides = [1, 1]} : vector<8x128xf32> to vector<1x32xf32>
    %167 = vector.extract_strided_slice %14 {offsets = [4, 32], sizes = [1, 32], strides = [1, 1]} : vector<8x128xf32> to vector<1x32xf32>
    %cst_48 = arith.constant dense<0.000000e+00> : vector<32xf32>
    %168 = vector.multi_reduction <add>, %165, %cst_48 [1] : vector<32x32xf32> to vector<32xf32>
    %169 = vector.shape_cast %168 : vector<32xf32> to vector<32x1xf32>
    %cst_49 = arith.constant 3.200000e+01 : f32
    %170 = vector.broadcast %cst_49 : f32 to vector<32x1xf32>
    %171 = arith.divf %169, %170 : vector<32x1xf32>
    %172 = vector.broadcast %171 : vector<32x1xf32> to vector<32x32xf32>
    %173 = arith.subf %165, %172 : vector<32x32xf32>
    %174 = arith.mulf %173, %173 : vector<32x32xf32>
    %cst_50 = arith.constant dense<0.000000e+00> : vector<32xf32>
    %175 = vector.multi_reduction <add>, %174, %cst_50 [1] : vector<32x32xf32> to vector<32xf32>
    %176 = vector.shape_cast %175 : vector<32xf32> to vector<32x1xf32>
    %cst_51 = arith.constant 3.200000e+01 : f32
    %177 = vector.broadcast %cst_51 : f32 to vector<32x1xf32>
    %178 = arith.divf %176, %177 : vector<32x1xf32>
    %179 = vector.broadcast %171 : vector<32x1xf32> to vector<32x32xf32>
    %180 = arith.subf %165, %179 : vector<32x32xf32>
    %cst_52 = arith.constant 9.99999974E-6 : f32
    %181 = vector.broadcast %cst_52 : f32 to vector<32x1xf32>
    %182 = arith.addf %178, %181 : vector<32x1xf32>
    %183 = math.rsqrt %182 : vector<32x1xf32>
    %184 = vector.broadcast %183 : vector<32x1xf32> to vector<32x32xf32>
    %185 = arith.mulf %180, %184 : vector<32x32xf32>
    %186 = vector.broadcast %166 : vector<1x32xf32> to vector<32x32xf32>
    %187 = arith.mulf %185, %186 : vector<32x32xf32>
    %188 = vector.broadcast %167 : vector<1x32xf32> to vector<32x32xf32>
    %189 = arith.addf %187, %188 : vector<32x32xf32>
    %c0_53 = arith.constant 0 : index
    %c0_54 = arith.constant 0 : index
    %190 = vector.load %arg8[%c0_53, %c0_54] : memref<32x32xf32, #tpu.memory_space<vmem>>, vector<32x32xf32>
    tpu.vector_store %arg8[%c0_53, %c0_54], %189 {strides = array<i32>} : memref<32x32xf32, #tpu.memory_space<vmem>>, vector<32x32xf32>,
    %cst_55 = arith.constant 0.000000e+00 : f32
    %191 = vector.broadcast %cst_55 : f32 to vector<32x32xf32>
    %192 = tpu.concatenate %189, %52, %124, %191 in 1 : vector<32x32xf32>, vector<32x32xf32>, vector<32x32xf32>, vector<32x32xf32> -> vector<32x128xf32>
    %c0_56 = arith.constant 0 : index
    %c0_57 = arith.constant 0 : index
    %c0_58 = arith.constant 0 : index
    %193 = vector.load %arg7[%c0_56, %c0_57, %c0_58] : memref<1x32x128xf32, #tpu.memory_space<vmem>>, vector<1x32x128xf32>
    %194 = vector.shape_cast %193 : vector<1x32x128xf32> to vector<32x128xf32>
    %195 = vector.shape_cast %192 : vector<32x128xf32> to vector<1x32x128xf32>
    tpu.vector_store %arg7[%c0_56, %c0_57, %c0_58], %195 {strides = array<i32>} : memref<1x32x128xf32, #tpu.memory_space<vmem>>, vector<1x32x128xf32>,
    return
  }
  func.func @transform_0(%arg0: i32, %arg1: i32) -> (i32, i32) {
    %c0_i32 = arith.constant 0 : i32
    %c0_i32_0 = arith.constant 0 : i32
    return %arg0, %c0_i32 : i32, i32
  }
  func.func @transform_1(%arg0: i32, %arg1: i32) -> (i32, i32) {
    %c0_i32 = arith.constant 0 : i32
    %c0_i32_0 = arith.constant 0 : i32
    return %arg0, %c0_i32 : i32, i32
  }
  func.func @transform_2(%arg0: i32, %arg1: i32) -> (i32, i32, i32, i32) {
    %c0_i32 = arith.constant 0 : i32
    %c0_i32_0 = arith.constant 0 : i32
    %c0_i32_1 = arith.constant 0 : i32
    %c0_i32_2 = arith.constant 0 : i32
    return %arg0, %c0_i32, %c0_i32_0, %c0_i32_1 : i32, i32, i32, i32
  }
  func.func @transform_3(%arg0: i32, %arg1: i32) -> (i32, i32, i32, i32) {
    %c0_i32 = arith.constant 0 : i32
    %c0_i32_0 = arith.constant 0 : i32
    %c0_i32_1 = arith.constant 0 : i32
    %c0_i32_2 = arith.constant 0 : i32
    return %arg0, %c0_i32, %c0_i32_0, %c0_i32_1 : i32, i32, i32, i32
  }
  func.func @transform_4(%arg0: i32, %arg1: i32) -> (i32, i32, i32) {
    %c0_i32 = arith.constant 0 : i32
    %c0_i32_0 = arith.constant 0 : i32
    %c0_i32_1 = arith.constant 0 : i32
    return %arg1, %c0_i32, %c0_i32_0 : i32, i32, i32
  }
  func.func @transform_5(%arg0: i32, %arg1: i32) -> (i32, i32, i32) {
    %c0_i32 = arith.constant 0 : i32
    %c0_i32_0 = arith.constant 0 : i32
    return %arg1, %arg0, %c0_i32 : i32, i32, i32
  }
}

</mosaic_0001>

<bundles_post_ra>
// kernel: tpu_custom_call.1
= control target key start
LH: loop header
LB: loop body
LE: loop exit
PB: predicated region body
PF: predicated region fallthrough
CT: control target
= control target key end

     0   :  { %s25594_s0 = inlined_call_operand.hbm [shape: f32[32,32], index: 0, kind: input, shape index: {}]   ;;  %s25595_s1 = inlined_call_operand.hbm [shape: f32[32,32], index: 1, kind: input, shape index: {}]   ;;  %s25596_s2 = inlined_call_operand.hbm [shape: f32[4,4,8,8], index: 2, kind: input, shape index: {}]   ;;  %s25597_s3 = inlined_call_operand.hbm [shape: f32[4,4,8,8], index: 3, kind: input, shape index: {}]   ;;  %s25598_s4 = inlined_call_operand.hbm [shape: f32[2,168,128], index: 4, kind: input, shape index: {}]   ;;  %s25599_s5 = inlined_call_operand.hbm [shape: f32[2,32,128], index: 5, kind: output, shape index: {}]  }
   0x1   :  { %25617 = sst [smem:[#allocation42_spill]] %s25594_s0 }
   0x2   :  { %25618 = sst [smem:[#allocation43_spill]] %s25595_s1 }
   0x3   :  { %25619 = sst [smem:[#allocation44_spill]] %s25596_s2 }
   0x4   :  { %10 = vsyncpa [#allocation4], 0 }
   0x5   :  { %11 = vsyncpa [#allocation7], 0 }
   0x6   :  { %12 = vsyncpa [#allocation10], 0 }
   0x7   :  { %13 = vsyncpa [#allocation5], 0 }
   0x8   :  { %15 = vsyncpa [#allocation5 + $0x1], 0  ;;  %s19032_s18 = smov 0   ;;  %s19034_s19 = smov 0  }
   0x9   :  { %s19036_s20 = smov 0   ;;  %s19038_s21 = smov 0  }
   0xa   :  { %s19040_s22 = smov 0   ;;  %s19042_s23 = smov 0  }
   0xb LB: > { %s19063_s24 = sadd.s32 4294967295, %s18981_s23   ;;  %s18419_s25 = sadd.s32 4294967294, %s18981_s23   ;;  %s18981_s23 = sphi %s19042_s23, %s21_s23   ;;  %s18977_s22 = sphi %s19040_s22, %s25730_s22   ;;  %s18973_s21 = sphi %s19038_s21, %s25729_s21   ;;  %s18969_s20 = sphi %s19036_s20, %s25728_s20   ;;  %s18965_s19 = sphi %s19034_s19, %s25727_s19   ;;  %s18961_s18 = sphi %s19032_s18, %s25726_s18  }
   0xc   : > { %p157_p0 = scmp.ne.s32.totalorder %s18965_s19, %s18961_s18  ;;  %p158_p1 = scmp.eq.s32.totalorder %s19063_s24, 0 }
   0xd   : > { %p183_p2 = scmp.eq.s32.totalorder %s19063_s24, 1  ;;  %p189_p3 = scmp.eq.s32.totalorder %s18419_s25, 1 }
   0xe   : > { %p19072_p4 = por %p158_p1, %p157_p0  ;;  %p18420_p5 = scmp.ge.s32.totalorder %s18981_s23, 1 }
   0xf   : > { %p19077_p6 = por %p189_p3, %p157_p0  ;;  %p196_p7 = scmp.lt.s32.totalorder %s18981_s23, 3 }
  0x10   : > { %s25622_s0 = sld [smem:[#allocation42_spill]]  ;;  %s18983_s7 = smov [#allocation3]  }
  0x11   : > { %p19085_p8 = pnand %p18420_p5, %p196_p7  ;;  %s212_s8 = sshll.u32 %s18983_s7, 4  ;;  %s213_s8 = int_to_ptr.vmem [resolvable:$true] %s212_s8 }
  0x12   : > { %p18425_p11 = scmp.ge.s32.totalorder %s18981_s23, 2  ;;  %s25625_s1 = sld [smem:[#allocation43_spill]] }
  0x13   : > { %p18471_p9 = pneg %p19085_p8  ;;  %s25600_s13 = smov 128  }
  0x14   : > { %s25601_s14 = smov 8   ;;  %s18986_s15 = smov [#allocation6]  }
  0x15   : > { %p19093_p10 = pnand %p18471_p9, %p158_p1  ;;  %s229_s16 = sshll.u32 %s18986_s15, 4  ;;  %s230_s16 = int_to_ptr.vmem [resolvable:$true] %s229_s16 }
  0x16   : > { %s210_s30 = sshll.u32 %s25622_s0, 4  ;;  %s25626_s2 = sld [smem:[#allocation44_spill]]  ;;  %s211_s30 = int_to_ptr.hbm [resolvable:$true] %s210_s30 }
  0x17   : > { %18474 = dma.hbm_to_vmem [thread:$0]  (!%p19093_p10), %s211_s30, 512, %s213_s8, [#allocation4], %s25600_s13, %s25600_s13, %s25601_s14  }
  0x18   : > { %s227_s12 = sshll.u32 %s25625_s1, 4  ;;  %s263_s7 = sshll.u32 %s25597_s3, 4  ;;  %s228_s12 = int_to_ptr.hbm [resolvable:$true] %s227_s12  ;;  %s264_s7 = int_to_ptr.hbm [resolvable:$true] %s263_s7 }
  0x19   : > { %18477 = dma.hbm_to_vmem [thread:$0]  (!%p19093_p10), %s228_s12, 512, %s230_s16, [#allocation7], %s25600_s13, %s25600_s13, %s25601_s14  }
  0x1a   : > { %s18987_s8 = smov [#allocation8]   ;;  %s18988_s11 = smov [#allocation9]  }
  0x1b   : > { %s247_s10 = sshll.u32 %s18987_s8, 4  ;;  %s265_s12 = sshll.u32 %s18988_s11, 4  ;;  %s248_s10 = int_to_ptr.vmem [resolvable:$true] %s247_s10  ;;  %s266_s12 = int_to_ptr.vmem [resolvable:$true] %s265_s12 }
  0x1c   : > { %s245_s28 = sshll.u32 %s25626_s2, 4  ;;  %s30_s15 = sadd.s32 1, %s18977_s22  ;;  %s246_s28 = int_to_ptr.hbm [resolvable:$true] %s245_s28 }
  0x1d   : > { %18480 = dma.hbm_to_vmem [thread:$0]  (!%p19093_p10), %s246_s28, 2048, %s248_s10, [#allocation7], %s25600_s13, %s25600_s13, %s25601_s14  }
  0x1e   : > { %18483 = dma.hbm_to_vmem [thread:$0]  (!%p19093_p10), %s264_s7, 2048, %s266_s12, [#allocation10], %s25600_s13, %s25600_s13, %s25601_s14  }
  0x1f   : > { %s144_s16 = sadd.s32 1, %s18969_s20  ;;  %p31_p12 = scmp.ge.s32.totalorder %s30_s15, 2 }
  0x20   : > { %p151_p13 = scmp.ne.s32.totalorder %s18969_s20, %s18965_s19  ;;  %p152_p0 = scmp.eq.s32.totalorder %s18981_s23, 0 }
  0x21   : > { %p18496_p3 = scmp.lt.s32.totalorder %s18981_s23, 2  ;;  %s25732_s15 = smov (%p31_p12, %s30_s15), 0 }
  0x22   : > { %p153_p5 = por %p152_p0, %p151_p13  ;;  %p19137_p7 = por %p183_p2, %p151_p13 }
  0x23   : > { %s141_s9 = ssub.s32 %s18977_s22, %s25732_s15  ;;  %s279_s25 = sand.u32 1, %s18981_s23  }
  0x24   : > { %p142_p9 = scmp.eq.s32.totalorder %s141_s9, 0  ;;  %s281_s28 = sand.u32 1, %s18969_s20  }
  0x25   : > { %s18449_s29 = smul.u32 168, %s18977_s22  ;;  %p18485_p10 = pnand %p18496_p3, %p153_p5 }
  0x26   : > { %s19147_s30 = scalar_select %p142_p9, %s18969_s20, %s144_s16  }
  0x27   : > { %s18448_s7 = smul.u32 168, %s281_s28  ;;  %s288_s11 = scalar_lea.hbm %s25598_s4, %s18449_s29 }
  0x28   : > { %s289_s12 = sshll.u32 %s288_s11, 4  ;;  %s280_s0 = scalar_lea.sflag [#allocation4], %s279_s25  ;;  %s290_s12 = int_to_ptr.hbm [resolvable:$true] %s289_s12 }
  0x29   : > { %s283_s13 = scalar_lea.vmem [#allocation11], %s18448_s7  ;;  %s25628_s1 = smov 8  }
  0x2a   : > { %s291_s14 = sshll.u32 %s283_s13, 4  ;;  %s25629_s2 = smov 128   ;;  %s292_s14 = int_to_ptr.vmem [resolvable:$true] %s291_s14 }
  0x2b   : > { %18487 = dma.hbm_to_vmem [thread:$0]  (!%p18485_p10), %s290_s12, 2688, %s292_s14, %s280_s0, %s25629_s2, %s25629_s2, %s25628_s1  }
  0x2c   : > { %303 = sbr.rel (%p19085_p8) target bundleno = 4528 (0x11b0), region = 40 }
  0x31   : > { %18940 = dma.done.wait (%p158_p1), [#allocation4], 512  }
  0x32   : > { %18942 = vsyncadd (%p158_p1), [#allocation4], 4294966784 }
  0x33   : > { %18944 = dma.done.wait (%p158_p1), [#allocation7], 2560  }
  0x34   : > { %18946 = vsyncadd (%p158_p1), [#allocation7], 4294964736 }
  0x35   : > { %18948 = dma.done.wait (%p158_p1), [#allocation10], 2048  }
  0x36   : > { %18950 = vsyncadd (%p158_p1), [#allocation10], 4294965248  ;;  %s325_s0 = sand.u32 1, %s19063_s24   ;;  %s19173_s1 = sand.u32 1, %s18965_s19  }
  0x37   : > { %s18450_s2 = smul.u32 168, %s19173_s1  ;;  %s326_s6 = scalar_lea.sflag [#allocation4], %s325_s0 }
  0x39   : > { %s19176_s13 = scalar_lea.vmem [#allocation11], %s18450_s2 }
  0x3a   : > { %18952 = dma.done.wait (%p19072_p4), %s326_s6, 2688  }
  0x3b   : > { %18954 = vsyncadd (%p19072_p4), %s326_s6, 4294964608  ;;  %s18432_s14 = sshll.u32 %s19173_s1, 5  ;;  %p18433_p1 = scmp.ne.s32.totalorder %s18973_s21, 0 }
  0x3c   : > { %s19183_s16 = scalar_lea.vmem [#allocation12], %s18432_s14 }
  0x3d   : > { %365 = sbr.rel (%p18433_p1) target bundleno = 71 (0x47), region = 64 }
  0x42   : > { %v366_v0 = vld [vmem:[#allocation3] sm:$0xff]  ;;  %vm370_vm0 = vcmask 261120   ;;  %v367_v1 = vld [vmem:[#allocation3 + $0x8] sm:$0xff]  ;;  %v368_v2 = vld [vmem:[#allocation3 + $0x10] sm:$0xff] }
  0x43   : > { %371 = vst.msk [vmem:[#allocation2] sm:$0xff] %vm370_vm0, %v366_v0  ;;  %v369_v3 = vld [vmem:[#allocation3 + $0x18] sm:$0xff] }
  0x44   : > { %372 = vst.msk [vmem:[#allocation2 + $0x8] sm:$0xff] %vm370_vm0, %v367_v1 }
  0x45   : > { %373 = vst.msk [vmem:[#allocation2 + $0x10] sm:$0xff] %vm370_vm0, %v368_v2 }
  0x46   : > { %374 = vst.msk [vmem:[#allocation2 + $0x18] sm:$0xff] %vm370_vm0, %v369_v3 }
  0x47 PF: > { %v386_v4 = vld [vmem:[%s19176_s13 + $0x18] sm:$0xff]  ;;  %v385_v5 = vld [vmem:[%s19176_s13 + $0x10] sm:$0xff]  ;;  %v384_v6 = vld [vmem:[%s19176_s13 + $0x8] sm:$0xff]  ;;  %vm405_vm1 = vcmask 261120   ;;  %s18989_s24 = smov 104   ;;  %s18990_s26 = smov 120  }
  0x48   : > { %v19189_v7 = vand.u32 4294901760, %v386_v4  ;;  %v19191_v8 = vand.u32 4294901760, %v385_v5  ;;  %v19193_v9 = vand.u32 4294901760, %v384_v6  ;;  %v383_v10 = vld [vmem:[%s19176_s13] sm:$0xff]  ;;  %s18991_s9 = smov 96   ;;  %s18992_s25 = smov 112  }
  0x49   : > { %v19196_v13 = vand.u32 4294901760, %v383_v10  ;;  %v403_v61 = vld [vmem:[%s19176_s13 + $0xa0] sm:$0xff]  ;;  %vm753_vm2 = vcmask 1047556   ;;  %vm2169_vm3 = vcmask 64512   ;;  %s18995_s28 = smov 64   ;;  %s18996_s29 = smov 32  }
  0x4a   : > { %v375_v16 = vld [vmem:[#allocation2] sm:$0xff]  ;;  %18440 = vmatpush.msra.mxu2 %v19189_v7  ;;  %v484_v18 = vsub.f32 %v386_v4, %v19189_v7  ;;  %v490_v20 = vsub.f32 %v385_v5, %v19191_v8  ;;  %v496_v21 = vsub.f32 %v384_v6, %v19193_v9  ;;  %431 = vmatpush.msra.mxu0 %v19189_v7  ;;  %v19257_v63 = vperm.slane %v403_v61, 0  ;;  %s18997_s7 = smov 16   ;;  %s18998_s8 = smov 8  }
  0x4b   : > { %v376_v17 = vld [vmem:[#allocation2 + $0x8] sm:$0xff]  ;;  %v502_v22 = vsub.f32 %v383_v10, %v19196_v13  ;;  %v407_v24 = vsel %vm405_vm1, %v375_v16, 0  ;;  %s18999_s10 = smov 24   ;;  %s18439_s11 = sshll.u32 %s18973_s21, 5 }
  0x4c   : > { %v377_v11 = vld [vmem:[#allocation2 + $0x10] sm:$0xff]  ;;  %v410_v25 = vsel %vm405_vm1, %v376_v17, 0  ;;  %18441 = vmatpush.msra.mxu2 %v19191_v8  ;;  %v485_v26 = vand.u32 4294901760, %v484_v18  ;;  %v491_v28 = vand.u32 4294901760, %v490_v20  ;;  %v497_v29 = vand.u32 4294901760, %v496_v21  ;;  %433 = vmatpush.msra.mxu0 %v19191_v8  ;;  %s18284_s2 = scalar_lea.hbm %s25599_s5, %s18439_s11  ;;  %s18285_s6 = sshll.u32 %s19183_s16, 4  ;;  %s18286_s6 = int_to_ptr.vmem [resolvable:$true] %s18285_s6 }
  0x4d   : > { %v378_v12 = vld [vmem:[#allocation2 + $0x18] sm:$0xff]  ;;  %v413_v14 = vsel %vm405_vm1, %v377_v11, 0  ;;  %v503_v30 = vand.u32 4294901760, %v502_v22  ;;  %v438_v32 = vand.u32 4294901760, %v407_v24  ;;  %v19220_v33 = vand.u32 4294901760, %v410_v25  ;;  %s18287_s21 = sshll.u32 %s18284_s2, 4  ;;  %s18288_s21 = int_to_ptr.hbm [resolvable:$true] %s18287_s21 }
  0x4e   : > { %v416_v15 = vsel %vm405_vm1, %v378_v12, 0  ;;  %v19202_v19 = vand.u32 4294901760, %v413_v14  ;;  %18442 = vmatpush.msra.mxu2 %v19193_v9  ;;  %v486_v34 = vsub.f32 %v484_v18, %v485_v26  ;;  %v492_v36 = vsub.f32 %v490_v20, %v491_v28  ;;  %435 = vmatpush.msra.mxu0 %v19193_v9  ;;  %s18901_s14 = sshra.s32 %s18288_s21, 4  ;;  %s18902_s14 = int_to_ptr.hbm [resolvable:$true] %s18901_s14 }
  0x4f   : > { %v19208_v23 = vand.u32 4294901760, %v416_v15  ;;  %v498_v37 = vsub.f32 %v496_v21, %v497_v29  ;;  %v504_v38 = vsub.f32 %v502_v22, %v503_v30  ;;  %v439_v39 = vsub.f32 %v407_v24, %v438_v32  ;;  %p18908_p12 = scmp.lt.s32.totalorder %s18902_s14, %s25599_s5 }
  0x50   : > { %v19214_v27 = vsub.f32 %v413_v14, %v19202_v19  ;;  %v447_v40 = vsub.f32 %v410_v25, %v19220_v33  ;;  %18443 = vmatpush.msra.mxu2 %v19196_v13  ;;  %v487_v41 = vand.u32 4294901760, %v486_v34  ;;  %v493_v43 = vand.u32 4294901760, %v492_v36  ;;  %437 = vmatpush.msra.mxu0 %v19196_v13 }
  0x51   : > { %v19218_v31 = vsub.f32 %v416_v15, %v19208_v23  ;;  %v440_v45 = vand.u32 4294901760, %v439_v39  ;;  %v499_v47 = vand.u32 4294901760, %v498_v37  ;;  %v505_v50 = vand.u32 4294901760, %v504_v38 }
  0x52   : > { %v456_v35 = vand.u32 4294901760, %v19214_v27  ;;  %538 = vmatpush.msrb.mxu2 %v484_v18  ;;  %629 = vmatpush.msrb.mxu0 %v485_v26  ;;  %v448_v49 = vand.u32 4294901760, %v447_v40  ;;  %v18993_v37 = vmov 1983009808  }
  0x53   : > { %v464_v44 = vand.u32 4294901760, %v19218_v31  ;;  %18444 = vmatpush.msra.mxu3 %v487_v41  ;;  %488 = vmatpush.msra.mxu1 %v487_v41  ;;  %v441_v48 = vsub.f32 %v439_v39, %v440_v45  ;;  %v758_v38 = vunpack.c.l.s4 %v18993_v37 }
  0x54   : > { %v457_v42 = vsub.f32 %v19214_v27, %v456_v35  ;;  %541 = vmatpush.msrb.mxu2 %v490_v20  ;;  %633 = vmatpush.msrb.mxu0 %v491_v28  ;;  %v449_v53 = vsub.f32 %v447_v40, %v448_v49 }
  0x55   : > { %18445 = vmatpush.msra.mxu3 %v493_v43  ;;  %v465_v51 = vsub.f32 %v19218_v31, %v464_v44  ;;  %494 = vmatpush.msra.mxu1 %v493_v43  ;;  %v442_v52 = vand.u32 4294901760, %v441_v48 }
  0x56   : > { %v458_v46 = vand.u32 4294901760, %v457_v42  ;;  %544 = vmatpush.msrb.mxu2 %v496_v21  ;;  %637 = vmatpush.msrb.mxu0 %v497_v29  ;;  %v450_v55 = vand.u32 4294901760, %v449_v53  ;;  %v19312_v42 = vunpack.c.0.s8 %v758_v38 }
  0x57   : > { %18446 = vmatpush.msra.mxu3 %v499_v47  ;;  %500 = vmatpush.msra.mxu1 %v499_v47  ;;  %v466_v54 = vand.u32 4294901760, %v465_v51 }
  0x58   : > { %459 = vmatmul.f32.vlgmr.msra.gmra.mxu2 %v458_v46  ;;  %443 = vmatmul.f32.vlgmr.msra.gmra.mxu0 %v442_v52 }
  0x59   : > { %18447 = vmatpush.msra.mxu3 %v505_v50  ;;  %547 = vmatpush.msrb.mxu2 %v502_v22 }
  0x5a   : > { %516 = vmatmul.f32.vlgmr.msra.gmra.mxu3 %v19202_v19  ;;  %506 = vmatpush.msra.mxu1 %v505_v50  ;;  %v18994_v50 = vmov 1934713408  }
  0x5b   : > { %582 = vmatpush.msrb.mxu3 %v19189_v7  ;;  %508 = vmatmul.f32.vlgmr.msra.gmra.mxu1 %v438_v32  ;;  %v782_v51 = vunpack.c.l.s4 %v18994_v50 }
  0x5c   : > { %672 = vmatpush.msrb.mxu1 %v19189_v7  ;;  %641 = vmatpush.msrb.mxu0 %v503_v30 }
  0x5d   : > { %584 = vmatpush.msrb.mxu3 %v19191_v8 }
  0x5e   : > { %674 = vmatpush.msrb.mxu1 %v19191_v8 }
  0x5f   : > { %586 = vmatpush.msrb.mxu3 %v19193_v9 }
  0x60   : > { %467 = vmatmul.f32.gmra.mxu2 %v466_v54  ;;  %451 = vmatmul.f32.gmra.mxu0 %v450_v55 }
  0x61   : > { %676 = vmatpush.msrb.mxu1 %v19193_v9  ;;  %588 = vmatpush.msrb.mxu3 %v19196_v13 }
  0x62   : > { %520 = vmatmul.f32.gmra.mxu3 %v19208_v23 }
  0x63   : > { %678 = vmatpush.msrb.mxu1 %v19196_v13 }
  0x64   : > { %512 = vmatmul.f32.gmra.mxu1 %v19220_v33 }
  0x68   : > { %550 = vmatmul.f32.vlgmr.msrb.gmra.mxu2 %v439_v39  ;;  %643 = vmatmul.f32.vlgmr.msrb.gmra.mxu0 %v438_v32 }
  0x6a   : > { %592 = vmatmul.f32.vlgmr.msrb.gmra.mxu3 %v440_v45 }
  0x6c   : > { %680 = vmatmul.f32.vlgmr.msrb.gmra.mxu1 %v438_v32 }
  0x70   : > { %555 = vmatmul.f32.gmra.mxu2 %v447_v40  ;;  %647 = vmatmul.f32.gmra.mxu0 %v19220_v33 }
  0x72   : > { %598 = vmatmul.f32.gmra.mxu3 %v448_v49 }
  0x74   : > { %684 = vmatmul.f32.gmra.mxu1 %v19220_v33 }
  0x78   : > { %560 = vmatmul.f32.gmra.mxu2 %v19214_v27  ;;  %651 = vmatmul.f32.gmra.mxu0 %v19202_v19 }
  0x7a   : > { %604 = vmatmul.f32.gmra.mxu3 %v456_v35 }
  0x7c   : > { %688 = vmatmul.f32.gmra.mxu1 %v19202_v19 }
  0x80   : > { %565 = vmatmul.f32.gmra.mxu2 %v19218_v31  ;;  %655 = vmatmul.f32.gmra.mxu0 %v19208_v23 }
  0x82   : > { %610 = vmatmul.f32.gmra.mxu3 %v464_v44 }
  0x84   : > { %692 = vmatmul.f32.gmra.mxu1 %v19208_v23 }
  0xd5   : > { %v444_v57 = vpop.f32.mrf.mxu0 }
  0xd6   : > { %v445_v2 = vadd.f32 %v444_v57, %v19257_v63  ;;  %v19327_v57 = vunpack.c.0.s8 %v782_v51 }
  0xd8   : > { %v509_v58 = vpop.f32.mrf.mxu1 }
  0xd9   : > { %v510_v4 = vadd.f32 %v509_v58, %v445_v2 }
  0xdb   : > { %v460_v56 = vpop.f32.mrf.mxu2 }
  0xdc   : > { %v461_v26 = vadd.f32 %v460_v56, %v19257_v63 }
  0xdd   : > { %v517_v59 = vpop.f32.mrf.mxu3  ;;  %v452_v62 = vpop.f32.mrf.mxu0 }
  0xde   : > { %v453_v11 = vadd.f32 %v452_v62, %v19257_v63  ;;  %v518_v28 = vadd.f32 %v517_v59, %v461_v26 }
  0xe1   : > { %v513_v1 = vpop.f32.mrf.mxu1 }
  0xe2   : > { %v514_v14 = vadd.f32 %v513_v1, %v453_v11 }
  0xe3   : > { %v19254_v60 = vpop.f32.mrf.mxu2 }
  0xe5   : > { %v19259_v0 = vpop.f32.mrf.mxu3  ;;  %v644_v7 = vpop.f32.mrf.mxu0 }
  0xe9   : > { %v681_v9 = vpop.f32.mrf.mxu1 }
  0xeb   : > { %v551_v3 = vpop.f32.mrf.mxu2 }
  0xec   : > { %v552_v5 = vadd.f32 %v551_v3, %v510_v4 }
  0xed   : > { %v593_v6 = vpop.f32.mrf.mxu3  ;;  %v648_v18 = vpop.f32.mrf.mxu0 }
  0xee   : > { %v594_v8 = vadd.f32 %v593_v6, %v552_v5 }
  0xf0   : > { %v645_v10 = vadd.f32 %v644_v7, %v594_v8 }
  0xf1   : > { %v685_v20 = vpop.f32.mrf.mxu1 }
  0xf2   : > { %v19263_v12 = vadd.f32 %v681_v9, %v645_v10 }
  0xf3   : > { %v556_v13 = vpop.f32.mrf.mxu2 }
  0xf4   : > { %740 = vrot.lane.b32.xlu1 %v19263_v12, %s18989_s24  ;;  %716 = vrot.lane.b32.xlu0 %v19263_v12, %s18990_s26  ;;  %v557_v16 = vadd.f32 %v556_v13, %v514_v14  ;;  %v755_v39 = vrot.slane %v19263_v12, 4 }
  0xf5   : > { %v599_v15 = vpop.f32.mrf.mxu3  ;;  %v652_v32 = vpop.f32.mrf.mxu0 }
  0xf6   : > { %v600_v17 = vadd.f32 %v599_v15, %v557_v16 }
  0xf8   : > { %v649_v19 = vadd.f32 %v648_v18, %v600_v17 }
  0xf9   : > { %v689_v35 = vpop.f32.mrf.mxu1 }
  0xfa   : > { %v19273_v21 = vadd.f32 %v685_v20, %v649_v19 }
  0xfb   : > { %v561_v27 = vpop.f32.mrf.mxu2 }
  0xfc   : > { %1193 = vrot.lane.b32.xlu1 %v19263_v12, %s18991_s9  ;;  %728 = vrot.lane.b32.xlu0 %v19263_v12, %s18992_s25  ;;  %v562_v30 = vadd.f32 %v561_v27, %v518_v28 }
  0xfd   : > { %v605_v29 = vpop.f32.mrf.mxu3 }
  0xfe   : > { %v606_v31 = vadd.f32 %v605_v29, %v562_v30 }
 0x100   : > { %v653_v34 = vadd.f32 %v652_v32, %v606_v31  ;;  %v469_v32 = vadd.f32 %v19254_v60, %v19257_v63 }
 0x102   : > { %v19302_v36 = vadd.f32 %v689_v35, %v653_v34 }
 0x104   : > { %718 = vrot.lane.b32.xlu1 %v19273_v21, %s18990_s26 }
 0x10c   : > { %1195 = vrot.lane.b32.xlu1 %v19273_v21, %s18991_s9 }
 0x166   : > { %v19279_v22 = vpop.permute.xlu1 %740  ;;  %v19281_v23 = vpop.permute.xlu0 %716 }
 0x167   : > { %1217 = vrot.lane.b32.xlu0 %v19279_v22, %s18991_s9  ;;  %1201 = vrot.lane.b32.xlu2 %v19281_v23, %s18991_s9  ;;  %v767_v43 = vrot.slane %v19281_v23, 4  ;;  %v765_v46 = vrot.slane %v19279_v22, 4 }
 0x169   : > { %v768_v47 = vsel %vm753_vm2, %v19279_v22, %v767_v43  ;;  %v766_v52 = vsel %vm753_vm2, %v765_v46, %v19281_v23 }
 0x16a   : > { %v776_v53 = vperm.slane %v768_v47, %v19312_v42  ;;  %v772_v56 = vperm.slane %v766_v52, %v19312_v42 }
 0x16c   : > { %v789_v61 = vrot.slane %v776_v53, 4  ;;  %v777_v3 = vrot.slane %v772_v56, 4 }
 0x16e   : > { %v19287_v24 = vpop.permute.xlu0 %728  ;;  %v19293_v25 = vpop.permute.xlu1 %1193 }
 0x16f   : > { %742 = vrot.lane.b32.xlu0 %v19273_v21, %s18989_s24  ;;  %1209 = vrot.lane.b32.xlu2 %v19287_v24, %s18991_s9  ;;  %v752_v40 = vrot.slane %v19287_v24, 4  ;;  %v756_v41 = vsel %vm753_vm2, %v19287_v24, %v755_v39  ;;  %v1243_v28 = vrot.slane %v19293_v25, 4 }
 0x170   : > { %v764_v45 = vperm.slane %v756_v41, %v19312_v42 }
 0x171   : > { %v754_v44 = vsel %vm753_vm2, %v752_v40, %v19263_v12  ;;  %v566_v40 = vpop.f32.mrf.mxu2 }
 0x172   : > { %v760_v48 = vperm.slane %v754_v44, %v19312_v42  ;;  %v791_v49 = vrot.slane %v764_v45, 4  ;;  %v790_v1 = vsel %vm753_vm2, %v789_v61, %v764_v45  ;;  %v522_v44 = vadd.f32 %v19259_v0, %v469_v32  ;;  %v611_v45 = vpop.f32.mrf.mxu3 }
 0x173   : > { %v796_v6 = vperm.slane %v790_v1, %v19327_v57 }
 0x174   : > { %v779_v54 = vrot.slane %v760_v48, 4  ;;  %v792_v55 = vsel %vm753_vm2, %v776_v53, %v791_v49  ;;  %v778_v5 = vsel %vm753_vm2, %v777_v3, %v760_v48  ;;  %v567_v51 = vadd.f32 %v566_v40, %v522_v44 }
 0x175   : > { %v800_v59 = vperm.slane %v792_v55, %v19327_v57  ;;  %v784_v9 = vperm.slane %v778_v5, %v19327_v57  ;;  %v805_v10 = vrot.slane %v796_v6, 4 }
 0x176   : > { %v19298_v33 = vpop.permute.xlu1 %718  ;;  %v780_v58 = vsel %vm753_vm2, %v772_v56, %v779_v54  ;;  %v612_v56 = vadd.f32 %v611_v45, %v567_v51 }
 0x177   : > { %730 = vrot.lane.b32.xlu2 %v19273_v21, %s18992_s25  ;;  %v788_v62 = vperm.slane %v780_v58, %v19327_v57  ;;  %v807_v4 = vrot.slane %v800_v59, 4  ;;  %v801_v15 = vrot.slane %v784_v9, 4  ;;  %v806_v16 = vsel %vm753_vm2, 0.0, %v805_v10 }
 0x179   : > { %v803_v7 = vrot.slane %v788_v62, 4  ;;  %v808_v8 = vsel %vm753_vm2, 0.0, %v807_v4  ;;  %v802_v19 = vsel %vm753_vm2, 0.0, %v801_v15  ;;  %v988_v30 = vsel %vm753_vm2, %v807_v4, %v796_v6  ;;  %v656_v4 = vpop.f32.mrf.mxu0 }
 0x17a   : > { %v993_v13 = vrot.slane %v808_v8, 4  ;;  %v992_v38 = vperm.slane %v988_v30, %v19312_v42  ;;  %v657_v15 = vadd.f32 %v656_v4, %v612_v56 }
 0x17b   : > { %v804_v11 = vsel %vm753_vm2, 0.0, %v803_v7  ;;  %v977_v37 = vsel %vm753_vm2, %v803_v7, %v784_v9 }
 0x17c   : > { %v982_v17 = vrot.slane %v804_v11, 4  ;;  %v994_v18 = vsel %vm753_vm2, %v993_v13, %v806_v16  ;;  %v981_v50 = vperm.slane %v977_v37, %v19312_v42  ;;  %v1013_v59 = vrot.slane %v992_v38, 4 }
 0x17d   : > { %v998_v26 = vperm.slane %v994_v18, %v19312_v42 }
 0x17e   : > { %v983_v20 = vsel %vm753_vm2, %v982_v17, %v802_v19  ;;  %v1001_v19 = vrot.slane %v981_v50, 4 }
 0x17f   : > { %1203 = vrot.lane.b32.xlu2 %v19298_v33, %s18991_s9  ;;  %v19350_v31 = vperm.slane %v983_v20, %v19312_v42  ;;  %v1011_v34 = vrot.slane %v998_v26, 4 }
 0x181   : > { %v999_v43 = vrot.slane %v19350_v31, 4  ;;  %v1012_v60 = vsel %vm753_vm2, %v1011_v34, %v992_v38 }
 0x182   : > { %v1018_v55 = vperm.slane %v1012_v60, %v19327_v57 }
 0x183   : > { %v1000_v54 = vsel %vm753_vm2, %v999_v43, %v981_v50 }
 0x184   : > { %v1006_v6 = vperm.slane %v1000_v54, %v19327_v57  ;;  %v1023_v10 = vrot.slane %v1018_v55, 4 }
 0x186   : > { %v1024_v34 = vsel %vm753_vm2, %v1023_v10, %v1006_v6  ;;  %v1025_v45 = vrot.slane %v1006_v6, 4 }
 0x187   : > { %720 = vrot.lane.b32.xlu2 %v19302_v36, %s18990_s26  ;;  %v2171_v50 = vsel %vm2169_vm3, %v1024_v34, 0 }
 0x188   : > { %v19417_v54 = vand.u32 4294901760, %v2171_v50 }
 0x18f   : > { %1197 = vrot.lane.b32.xlu2 %v19302_v36, %s18991_s9 }
 0x1c1   : > { %v1202_v2 = vpop.permute.xlu2 %1201 }
 0x1c2   : > { %v1255_v46 = vrot.slane %v1202_v2, 4 }
 0x1c9   : > { %v1210_v14 = vpop.permute.xlu2 %1209 }
 0x1ca   : > { %v1241_v29 = vrot.slane %v1210_v14, 4  ;;  %v1244_v35 = vsel %vm753_vm2, %v1210_v14, %v1243_v28  ;;  %v1014_v14 = vsel %vm753_vm2, %v998_v26, %v1013_v59  ;;  %v1026_v59 = vsel %vm753_vm2, %v1018_v55, %v1025_v45 }
 0x1cb   : > { %v1252_v41 = vperm.slane %v1244_v35, %v19312_v42  ;;  %v19397_v35 = vperm.slane %v1014_v14, %v19327_v57  ;;  %v2323_v4 = vsel %vm2169_vm3, %v1026_v59, 0 }
 0x1cc   : > { %v1242_v39 = vsel %vm753_vm2, %v1241_v29, %v19293_v25  ;;  %v19437_v10 = vand.u32 4294901760, %v2323_v4 }
 0x1cd   : > { %v1248_v47 = vperm.slane %v1242_v39, %v19312_v42  ;;  %v1279_v53 = vrot.slane %v1252_v41, 4  ;;  %v1027_v56 = vrot.slane %v19397_v35, 4 }
 0x1cf   : > { %v1267_v61 = vrot.slane %v1248_v47, 4 }
 0x1d1   : > { %v19343_v27 = vpop.permute.xlu2 %730 }
 0x1d2   : > { %1211 = vrot.lane.b32.xlu0 %v19343_v27, %s18991_s9 }
 0x1d9   : > { %v1218_v48 = vpop.permute.xlu0 %1217  ;;  %v19364_v49 = vpop.permute.xlu2 %1203 }
 0x1da   : > { %v1253_v25 = vrot.slane %v1218_v48, 4  ;;  %v1256_v52 = vsel %vm753_vm2, %v1218_v48, %v1255_v46  ;;  %732 = vrot.lane.b32.xlu0 %v19302_v36, %s18992_s25  ;;  %v1002_v46 = vsel %vm753_vm2, %v19350_v31, %v1001_v19 }
 0x1db   : > { %v1264_v0 = vperm.slane %v1256_v52, %v19312_v42 }
 0x1dc   : > { %v1254_v58 = vsel %vm753_vm2, %v1253_v25, %v1202_v2 }
 0x1dd   : > { %v1260_v62 = vperm.slane %v1254_v58, %v19312_v42  ;;  %v1277_v1 = vrot.slane %v1264_v0, 4  ;;  %v1280_v3 = vsel %vm753_vm2, %v1264_v0, %v1279_v53  ;;  %v19414_v53 = vperm.slane %v1002_v46, %v19327_v57 }
 0x1de   : > { %v1288_v5 = vperm.slane %v1280_v3, %v19327_v57  ;;  %v19427_v3 = vsub.f32 %v2171_v50, %v19417_v54 }
 0x1df   : > { %v1265_v7 = vrot.slane %v1260_v62, 4  ;;  %v1268_v8 = vsel %vm753_vm2, %v1260_v62, %v1267_v61  ;;  %v1278_v9 = vsel %vm753_vm2, %v1277_v1, %v1252_v41  ;;  %v693_v41 = vpop.f32.mrf.mxu1 }
 0x1e0   : > { %v1276_v2 = vperm.slane %v1268_v8, %v19327_v57  ;;  %v1284_v11 = vperm.slane %v1278_v9, %v19327_v57  ;;  %v1295_v13 = vrot.slane %v1288_v5, 4  ;;  %v19411_v52 = vadd.f32 %v693_v41, %v657_v15 }
 0x1e1   : > { %v1266_v16 = vsel %vm753_vm2, %v1265_v7, %v1248_v47  ;;  %v19384_v17 = vpop.permute.xlu0 %742  ;;  %v19386_v18 = vpop.permute.xlu2 %720  ;;  %v1028_v5 = vsel %vm753_vm2, %v1027_v56, %v19414_v53 }
 0x1e2   : > { %v1272_v20 = vperm.slane %v1266_v16, %v19327_v57  ;;  %v1291_v28 = vrot.slane %v1276_v2, 4  ;;  %v1293_v29 = vrot.slane %v1284_v11, 4  ;;  %v1296_v30 = vsel %vm753_vm2, 0.0, %v1295_v13  ;;  %1219 = vrot.lane.b32.xlu1 %v19384_v17, %s18991_s9  ;;  %1205 = vrot.lane.b32.xlu0 %v19386_v18, %s18991_s9 }
 0x1e3   : > { %v1476_v26 = vsel %vm753_vm2, %v1295_v13, %v1284_v11  ;;  %v1481_v32 = vrot.slane %v1296_v30, 4  ;;  %v2475_v2 = vsel %vm2169_vm3, %v1028_v5, 0  ;;  %v2195_v11 = vand.u32 4294901760, %v19427_v3 }
 0x1e4   : > { %v1289_v37 = vrot.slane %v1272_v20, 4  ;;  %v1292_v38 = vsel %vm753_vm2, 0.0, %v1291_v28  ;;  %v1294_v39 = vsel %vm753_vm2, 0.0, %v1293_v29  ;;  %v1465_v40 = vsel %vm753_vm2, %v1291_v28, %v1272_v20 }
 0x1e5   : > { %v1470_v43 = vrot.slane %v1292_v38, 4  ;;  %v1482_v44 = vsel %vm753_vm2, %v1481_v32, %v1294_v39  ;;  %v1480_v47 = vperm.slane %v1476_v26, %v19312_v42  ;;  %v1469_v25 = vperm.slane %v1465_v40, %v19312_v42 }
 0x1e6   : > { %v1290_v60 = vsel %vm753_vm2, 0.0, %v1289_v37  ;;  %v1486_v48 = vperm.slane %v1482_v44, %v19312_v42  ;;  %v19445_v20 = vand.u32 4294901760, %v2475_v2  ;;  %v19450_v30 = vsub.f32 %v2323_v4, %v19437_v10 }
 0x1e7   : > { %v1471_v51 = vsel %vm753_vm2, %v1470_v43, %v1290_v60  ;;  %v1501_v58 = vrot.slane %v1480_v47, 4  ;;  %v1489_v61 = vrot.slane %v1469_v25, 4  ;;  %v2196_v34 = vsub.f32 %v19427_v3, %v2195_v11 }
 0x1e8   : > { %v1499_v0 = vrot.slane %v1486_v48, 4  ;;  %v1475_v31 = vperm.slane %v1471_v51, %v19312_v42  ;;  %v19464_v44 = vsub.f32 %v2475_v2, %v19445_v20  ;;  %v1029_v4 = vrot.slane %v19414_v53, 4 }
 0x1e9   : > { %v1502_v8 = vsel %vm753_vm2, %v1486_v48, %v1501_v58  ;;  %v2197_v60 = vand.u32 4294901760, %v2196_v34 }
 0x1ea   : > { %744 = vrot.lane.b32.xlu1 %v19302_v36, %s18989_s24  ;;  %722 = vrot.lane.b32.xlu0 %v19411_v52, %s18990_s26  ;;  %v1487_v62 = vrot.slane %v1475_v31, 4  ;;  %v1500_v1 = vsel %vm753_vm2, %v1499_v0, %v1480_v47  ;;  %v1490_v7 = vsel %vm753_vm2, %v1475_v31, %v1489_v61  ;;  %v1510_v14 = vperm.slane %v1502_v8, %v19327_v57 }
 0x1eb   : > { %v1506_v9 = vperm.slane %v1500_v1, %v19327_v57  ;;  %v1498_v13 = vperm.slane %v1490_v7, %v19327_v57  ;;  %v2347_v47 = vand.u32 4294901760, %v19450_v30  ;;  %v2499_v0 = vand.u32 4294901760, %v19464_v44 }
 0x1ec   : > { %v1488_v6 = vsel %vm753_vm2, %v1487_v62, %v1469_v25  ;;  %v1515_v19 = vrot.slane %v1510_v14, 4  ;;  %v1030_v8 = vsel %vm753_vm2, %v19397_v35, %v1029_v4 }
 0x1ed   : > { %v1494_v55 = vperm.slane %v1488_v6, %v19327_v57  ;;  %v1511_v15 = vrot.slane %v1506_v9, 4  ;;  %v1517_v41 = vrot.slane %v1498_v13, 4  ;;  %v2500_v62 = vsub.f32 %v19464_v44, %v2499_v0 }
 0x1ee   : > { %v1516_v37 = vsel %vm753_vm2, %v1515_v19, %v1498_v13  ;;  %v2348_v35 = vsub.f32 %v19450_v30, %v2347_v47 }
 0x1ef   : > { %v1513_v16 = vrot.slane %v1494_v55, 4  ;;  %v1512_v28 = vsel %vm753_vm2, %v1511_v15, %v1494_v55  ;;  %v2478_v40 = vsel %vm2169_vm3, %v1516_v37, 0  ;;  %v1518_v51 = vsel %vm753_vm2, %v1510_v14, %v1517_v41 }
 0x1f0   : > { %v2174_v26 = vsel %vm2169_vm3, %v1512_v28, 0  ;;  %v19461_v43 = vand.u32 4294901760, %v2478_v40  ;;  %v2630_v58 = vsel %vm2169_vm3, %v1518_v51, 0  ;;  %v2501_v6 = vand.u32 4294901760, %v2500_v62 }
 0x1f1   : > { %v1514_v29 = vsel %vm753_vm2, %v1506_v9, %v1513_v16  ;;  %v2191_v38 = vand.u32 4294901760, %v2174_v26  ;;  %v2647_v1 = vand.u32 4294901760, %v2630_v58  ;;  %v2627_v55 = vsel %vm2169_vm3, %v1030_v8, 0 }
 0x1f2   : > { %1199 = vrot.lane.b32.xlu0 %v19411_v52, %s18991_s9  ;;  %v2326_v32 = vsel %vm2169_vm3, %v1514_v29, 0  ;;  %v2522_v48 = vsub.f32 %v2478_v40, %v19461_v43  ;;  %v2649_v2 = vand.u32 4294901760, %v2627_v55  ;;  %v2349_v14 = vand.u32 4294901760, %v2348_v35 }
 0x1f3   : > { %v19458_v39 = vand.u32 4294901760, %v2326_v32  ;;  %2192 = vmatpush.xpose.msra.mxu2 %v2191_v38  ;;  %v2218_v45 = vsub.f32 %v2174_v26, %v2191_v38  ;;  %v2674_v7 = vsub.f32 %v2630_v58, %v2647_v1  ;;  %v809_v28 = vrot.slane %v19343_v27, 4 }
 0x1f4   : > { %v2523_v25 = vand.u32 4294901760, %v2522_v48  ;;  %v2650_v13 = vsub.f32 %v2627_v55, %v2649_v2  ;;  %v823_v29 = vrot.slane %v19298_v33, 4 }
 0x1f5   : > { %2420 = vmatpush.xpose.msra.mxu1 %v19458_v39  ;;  %v2370_v46 = vsub.f32 %v2326_v32, %v19458_v39  ;;  %v2219_v50 = vand.u32 4294901760, %v2218_v45  ;;  %v810_v32 = vsel %vm753_vm2, %v809_v28, %v19273_v21 }
 0x1f6   : > { %2198 = vmatmul.f32.vlgmr.msra.gmra.mxu2 %v2197_v60  ;;  %v2524_v56 = vsub.f32 %v2522_v48, %v2523_v25  ;;  %v2651_v15 = vand.u32 4294901760, %v2650_v13  ;;  %v824_v26 = vsel %vm753_vm2, %v19384_v17, %v823_v29  ;;  %v1311_v29 = vrot.slane %v19364_v49, 4 }
 0x1f7   : > { %2245 = vmatpush.xpose.msrb.mxu2 %v2218_v45  ;;  %2397 = vmatpush.xpose.msra.mxu0 %v2370_v46  ;;  %v2220_v31 = vsub.f32 %v2218_v45, %v2219_v50  ;;  %v2371_v5 = vand.u32 4294901760, %v2370_v46 }
 0x1f8   : > { %2424 = vmatmul.f32.vlgmr.msra.gmra.mxu1 %v2347_v47  ;;  %v2525_v61 = vand.u32 4294901760, %v2524_v56 }
 0x1f9   : > { %v2221_v59 = vand.u32 4294901760, %v2220_v31  ;;  %v2372_v53 = vsub.f32 %v2370_v46, %v2371_v5 }
 0x1fa   : > { %2400 = vmatmul.f32.vlgmr.msra.gmra.mxu0 %v19450_v30  ;;  %2526 = vmatpush.xpose.msrb.mxu1 %v2525_v61 }
 0x1fb   : > { %2294 = vmatpush.xpose.msra.mxu2 %v2219_v50  ;;  %2496 = vmatpush.xpose.msrb.mxu0 %v19461_v43  ;;  %v2373_v9 = vand.u32 4294901760, %v2372_v53  ;;  %v1196_v53 = vpop.permute.xlu1 %1195 }
 0x1fc   : > { %2222 = vmatpush.xpose.msra.mxu3 %v2221_v59  ;;  %v1299_v35 = vrot.slane %v1196_v53, 4 }
 0x1fe   : > { %2620 = vmatpush.xpose.msra.mxu1 %v19461_v43  ;;  %2248 = vmatmul.f32.vlgmr.msrb.gmra.mxu2 %v19427_v3  ;;  %v2675_v3 = vand.u32 4294901760, %v2674_v7 }
 0x1ff   : > { %2598 = vmatpush.xpose.msra.mxu0 %v2523_v25  ;;  %2224 = vmatmul.f32.vlgmr.msra.gmra.mxu3 %v19417_v54 }
 0x200   : > { %2268 = vmatpush.xpose.msrb.mxu3 %v2191_v38  ;;  %2344 = vmatpush.xpose.msrb.mxu2 %v19458_v39 }
 0x201   : > { %2528 = vmatmul.f32.vlgmr.msrb.gmra.mxu1 %v19445_v20 }
 0x202   : > { %2502 = vmatmul.f32.vlgmr.msrb.gmra.mxu0 %v2501_v6  ;;  %2724 = vmatpush.xpose.msrb.mxu1 %v2647_v1 }
 0x203   : > { %2701 = vmatpush.xpose.msrb.mxu0 %v2674_v7 }
 0x204   : > { %2316 = vmatpush.xpose.msra.mxu3 %v2191_v38  ;;  %v832_v38 = vperm.slane %v824_v26, %v19312_v42 }
 0x206   : > { %2296 = vmatmul.f32.vlgmr.msra.gmra.mxu2 %v19417_v54 }
 0x207   : > { %2272 = vmatmul.f32.vlgmr.msrb.gmra.mxu3 %v2195_v11  ;;  %2446 = vmatpush.xpose.msra.mxu2 %v2371_v5  ;;  %v2676_v11 = vsub.f32 %v2674_v7, %v2675_v3 }
 0x208   : > { %2374 = vmatpush.xpose.msrb.mxu3 %v2373_v9 }
 0x209   : > { %2622 = vmatmul.f32.vlgmr.msra.gmra.mxu1 %v19445_v20  ;;  %v2677_v16 = vand.u32 4294901760, %v2676_v11 }
 0x20a   : > { %2600 = vmatmul.f32.vlgmr.msra.gmra.mxu0 %v19445_v20  ;;  %v811_v20 = vrot.slane %v19273_v21, 4 }
 0x20c   : > { %v812_v30 = vsel %vm753_vm2, %v19343_v27, %v811_v20 }
 0x20d   : > { %v820_v34 = vperm.slane %v812_v30, %v19312_v42 }
 0x20e   : > { %2350 = vmatmul.f32.vlgmr.msrb.gmra.mxu2 %v2349_v14 }
 0x20f   : > { %2318 = vmatmul.f32.vlgmr.msra.gmra.mxu3 %v19417_v54  ;;  %2549 = vmatpush.xpose.msrb.mxu2 %v2522_v48  ;;  %v2652_v54 = vsub.f32 %v2650_v13, %v2651_v15  ;;  %v847_v40 = vrot.slane %v820_v34, 4 }
 0x210   : > { %2468 = vmatpush.xpose.msra.mxu3 %v19458_v39  ;;  %v816_v39 = vperm.slane %v810_v32, %v19312_v42 }
 0x211   : > { %2728 = vmatmul.f32.vlgmr.msrb.gmra.mxu1 %v2651_v15  ;;  %v2653_v19 = vand.u32 4294901760, %v2652_v54 }
 0x212   : > { %2704 = vmatmul.f32.vlgmr.msrb.gmra.mxu0 %v2650_v13  ;;  %v835_v45 = vrot.slane %v816_v39, 4 }
 0x216   : > { %2448 = vmatmul.f32.vlgmr.msra.gmra.mxu2 %v19437_v10 }
 0x217   : > { %2376 = vmatmul.f32.vlgmr.msrb.gmra.mxu3 %v19437_v10  ;;  %2648 = vmatpush.xpose.msra.mxu2 %v2647_v1 }
 0x218   : > { %2572 = vmatpush.xpose.msrb.mxu3 %v19461_v43  ;;  %v845_v43 = vrot.slane %v832_v38, 4 }
 0x21a   : > { %v846_v48 = vsel %vm753_vm2, %v845_v43, %v820_v34 }
 0x21b   : > { %v852_v25 = vperm.slane %v846_v48, %v19327_v57 }
 0x21d   : > { %v861_v58 = vrot.slane %v852_v25, 4 }
 0x21e   : > { %2552 = vmatmul.f32.vlgmr.msrb.gmra.mxu2 %v19464_v44  ;;  %v848_v44 = vsel %vm753_vm2, %v832_v38, %v847_v40 }
 0x21f   : > { %2470 = vmatmul.f32.vlgmr.msra.gmra.mxu3 %v19437_v10  ;;  %2750 = vmatpush.xpose.msrb.mxu2 %v2675_v3  ;;  %v821_v10 = vrot.slane %v19384_v17, 4  ;;  %v856_v47 = vperm.slane %v848_v44, %v19327_v57  ;;  %v862_v5 = vsel %vm753_vm2, 0.0, %v861_v58 }
 0x220   : > { %2678 = vmatpush.xpose.msra.mxu3 %v2677_v16 }
 0x221   : > { %v822_v37 = vsel %vm753_vm2, %v821_v10, %v19298_v33 }
 0x222   : > { %v828_v41 = vperm.slane %v822_v37, %v19312_v42 }
 0x224   : > { %v833_v46 = vrot.slane %v828_v41, 4  ;;  %v836_v60 = vsel %vm753_vm2, %v828_v41, %v835_v45 }
 0x225   : > { %v844_v50 = vperm.slane %v836_v60, %v19327_v57 }
 0x226   : > { %2654 = vmatmul.f32.vlgmr.msra.gmra.mxu2 %v2653_v19  ;;  %v834_v51 = vsel %vm753_vm2, %v833_v46, %v816_v39 }
 0x227   : > { %2576 = vmatmul.f32.vlgmr.msrb.gmra.mxu3 %v2499_v0  ;;  %v863_v0 = vrot.slane %v856_v47, 4  ;;  %v840_v31 = vperm.slane %v834_v51, %v19327_v57  ;;  %v859_v56 = vrot.slane %v844_v50, 4 }
 0x228   : > { %2772 = vmatpush.xpose.msrb.mxu3 %v2647_v1 }
 0x229   : > { %v864_v59 = vsel %vm753_vm2, 0.0, %v863_v0  ;;  %v857_v61 = vrot.slane %v840_v31, 4  ;;  %v860_v62 = vsel %vm753_vm2, 0.0, %v859_v56  ;;  %v1042_v14 = vsel %vm753_vm2, %v863_v0, %v852_v25 }
 0x22a   : > { %v1047_v1 = vrot.slane %v864_v59, 4  ;;  %v1036_v6 = vrot.slane %v860_v62, 4  ;;  %v1031_v16 = vsel %vm753_vm2, %v859_v56, %v840_v31  ;;  %v19543_v54 = vperm.slane %v1042_v14, %v19312_v42 }
 0x22b   : > { %v858_v7 = vsel %vm753_vm2, 0.0, %v857_v61  ;;  %v19555_v34 = vperm.slane %v1031_v16, %v19312_v42 }
 0x22c   : > { %v1048_v8 = vsel %vm753_vm2, %v1047_v1, %v862_v5  ;;  %v1037_v55 = vsel %vm753_vm2, %v1036_v6, %v858_v7 }
 0x22d   : > { %v19529_v9 = vperm.slane %v1048_v8, %v19312_v42  ;;  %v19537_v15 = vperm.slane %v1037_v55, %v19312_v42 }
 0x22e   : > { %2752 = vmatmul.f32.vlgmr.msrb.gmra.mxu2 %v2649_v2 }
 0x22f   : > { %2680 = vmatmul.f32.vlgmr.msra.gmra.mxu3 %v2649_v2  ;;  %v1065_v3 = vrot.slane %v19529_v9, 4  ;;  %v1053_v28 = vrot.slane %v19537_v15, 4 }
 0x231   : > { %v1066_v30 = vsel %vm753_vm2, %v1065_v3, %v19543_v54  ;;  %v1054_v41 = vsel %vm753_vm2, %v1053_v28, %v19555_v34 }
 0x232   : > { %v1072_v43 = vperm.slane %v1066_v30, %v19327_v57  ;;  %v1060_v50 = vperm.slane %v1054_v41, %v19327_v57  ;;  %v1067_v41 = vrot.slane %v19543_v54, 4 }
 0x234   : > { %v1077_v31 = vrot.slane %v1072_v43, 4 }
 0x237   : > { %2774 = vmatmul.f32.vlgmr.msrb.gmra.mxu3 %v2649_v2 }
 0x244   : > { %v1212_v4 = vpop.permute.xlu0 %1211 }
 0x245   : > { %v1297_v13 = vrot.slane %v1212_v4, 4  ;;  %v1300_v11 = vsel %vm753_vm2, %v1212_v4, %v1299_v35 }
 0x246   : > { %v1308_v20 = vperm.slane %v1300_v11, %v19312_v42 }
 0x247   : > { %v1298_v19 = vsel %vm753_vm2, %v1297_v13, %v1196_v53  ;;  %v1078_v53 = vsel %vm753_vm2, %v1077_v31, %v1060_v50 }
 0x248   : > { %v1304_v10 = vperm.slane %v1298_v19, %v19312_v42  ;;  %v1335_v39 = vrot.slane %v1308_v20, 4  ;;  %v2779_v28 = vsel %vm2169_vm3, %v1078_v53, 0 }
 0x24a   : > { %v1323_v45 = vrot.slane %v1304_v10, 4 }
 0x24c   : > { %v19531_v2 = vpop.permute.xlu0 %732 }
 0x24d   : > { %1213 = vrot.lane.b32.xlu1 %v19531_v2, %s18991_s9 }
 0x254   : > { %v1220_v26 = vpop.permute.xlu1 %1219  ;;  %v19552_v32 = vpop.permute.xlu0 %1205 }
 0x255   : > { %v1309_v37 = vrot.slane %v1220_v26, 4  ;;  %v1312_v38 = vsel %vm753_vm2, %v1220_v26, %v1311_v29  ;;  %734 = vrot.lane.b32.xlu1 %v19411_v52, %s18992_s25 }
 0x256   : > { %v1320_v40 = vperm.slane %v1312_v38, %v19312_v42  ;;  %v19598_v38 = vand.u32 4294901760, %v2779_v28 }
 0x257   : > { %v1310_v44 = vsel %vm753_vm2, %v1309_v37, %v19364_v49 }
 0x258   : > { %v1316_v46 = vperm.slane %v1310_v44, %v19312_v42  ;;  %v1333_v60 = vrot.slane %v1320_v40, 4  ;;  %v1336_v47 = vsel %vm753_vm2, %v1320_v40, %v1335_v39 }
 0x259   : > { %v1344_v48 = vperm.slane %v1336_v47, %v19327_v57 }
 0x25a   : > { %v1321_v51 = vrot.slane %v1316_v46, 4  ;;  %v1324_v25 = vsel %vm753_vm2, %v1316_v46, %v1323_v45  ;;  %v1334_v0 = vsel %vm753_vm2, %v1333_v60, %v1308_v20  ;;  %v2802_v46 = vsub.f32 %v2779_v28, %v19598_v38 }
 0x25b   : > { %v1332_v56 = vperm.slane %v1324_v25, %v19327_v57  ;;  %v1340_v49 = vperm.slane %v1334_v0, %v19327_v57  ;;  %v1351_v58 = vrot.slane %v1344_v48, 4 }
 0x25c   : > { %v1322_v59 = vsel %vm753_vm2, %v1321_v51, %v1304_v10  ;;  %v19575_v61 = vpop.permute.xlu1 %744  ;;  %v19577_v62 = vpop.permute.xlu0 %722  ;;  %v1079_v10 = vrot.slane %v1060_v50, 4  ;;  %v1055_v51 = vrot.slane %v19555_v34, 4 }
 0x25d   : > { %v1328_v1 = vperm.slane %v1322_v59, %v19327_v57  ;;  %v1347_v4 = vrot.slane %v1332_v56, 4  ;;  %v1349_v5 = vrot.slane %v1340_v49, 4  ;;  %v1352_v6 = vsel %vm753_vm2, 0.0, %v1351_v58  ;;  %1221 = vrot.lane.b32.xlu2 %v19575_v61, %s18991_s9  ;;  %1207 = vrot.lane.b32.xlu1 %v19577_v62, %s18991_s9 }
 0x25e   : > { %v1530_v7 = vsel %vm753_vm2, %v1351_v58, %v1340_v49  ;;  %v1535_v8 = vrot.slane %v1352_v6, 4  ;;  %v1080_v47 = vsel %vm753_vm2, %v1072_v43, %v1079_v10  ;;  %v2803_v56 = vand.u32 4294901760, %v2802_v46 }
 0x25f   : > { %v1345_v55 = vrot.slane %v1328_v1, 4  ;;  %v1348_v35 = vsel %vm753_vm2, 0.0, %v1347_v4  ;;  %v1350_v13 = vsel %vm753_vm2, 0.0, %v1349_v5  ;;  %v1519_v14 = vsel %vm753_vm2, %v1347_v4, %v1328_v1 }
 0x260   : > { %v1524_v3 = vrot.slane %v1348_v35, 4  ;;  %v1536_v11 = vsel %vm753_vm2, %v1535_v8, %v1350_v13  ;;  %v1534_v19 = vperm.slane %v1530_v7, %v19312_v42  ;;  %v1523_v30 = vperm.slane %v1519_v14, %v19312_v42 }
 0x261   : > { %v1346_v16 = vsel %vm753_vm2, 0.0, %v1345_v55  ;;  %v1540_v20 = vperm.slane %v1536_v11, %v19312_v42  ;;  %v2931_v31 = vsel %vm2169_vm3, %v1080_v47, 0  ;;  %v1056_v6 = vsel %vm753_vm2, %v19537_v15, %v1055_v51 }
 0x262   : > { %v1525_v29 = vsel %vm753_vm2, %v1524_v3, %v1346_v16  ;;  %v1543_v39 = vrot.slane %v1523_v30, 4  ;;  %v1555_v40 = vrot.slane %v1534_v19, 4  ;;  %v19621_v1 = vand.u32 4294901760, %v2931_v31 }
 0x263   : > { %v1553_v26 = vrot.slane %v1540_v20, 4  ;;  %v1529_v37 = vperm.slane %v1525_v29, %v19312_v42  ;;  %v2804_v8 = vsub.f32 %v2802_v46, %v2803_v56  ;;  %v1064_v11 = vperm.slane %v1056_v6, %v19327_v57  ;;  %v696_v6 = vld [vmem:[#allocation8] sm:$0xff] }
 0x264   : > { %v1556_v50 = vsel %vm753_vm2, %v1540_v20, %v1555_v40  ;;  %v19634_v3 = vsub.f32 %v2931_v31, %v19621_v1 }
 0x265   : > { %746 = vrot.lane.b32.xlu2 %v19411_v52, %s18989_s24  ;;  %1681 = vrot.lane.b32.xlu1 %v19263_v12, %s18995_s28  ;;  %v1541_v44 = vrot.slane %v1529_v37, 4  ;;  %v1554_v45 = vsel %vm753_vm2, %v1553_v26, %v1534_v19  ;;  %v1544_v60 = vsel %vm753_vm2, %v1529_v37, %v1543_v39  ;;  %v1068_v12 = vsel %vm753_vm2, %v19529_v9, %v1067_v41 }
 0x266   : > { %v1560_v25 = vperm.slane %v1554_v45, %v19327_v57  ;;  %v1552_v0 = vperm.slane %v1544_v60, %v19327_v57  ;;  %v1564_v43 = vperm.slane %v1556_v50, %v19327_v57  ;;  %v1076_v9 = vperm.slane %v1068_v12, %v19327_v57 }
 0x267   : > { %v1542_v48 = vsel %vm753_vm2, %v1541_v44, %v1523_v30  ;;  %v2805_v20 = vand.u32 4294901760, %v2804_v8  ;;  %v2955_v26 = vand.u32 4294901760, %v19634_v3  ;;  %v1083_v51 = vrot.slane %v1064_v11, 4 }
 0x268   : > { %v1548_v54 = vperm.slane %v1542_v48, %v19327_v57  ;;  %v1565_v49 = vrot.slane %v1560_v25, 4  ;;  %v1571_v34 = vrot.slane %v1552_v0, 4  ;;  %v1569_v59 = vrot.slane %v1564_v43, 4 }
 0x269   : > { %v1081_v16 = vrot.slane %v1076_v9, 4  ;;  %v2956_v47 = vsub.f32 %v19634_v3, %v2955_v26 }
 0x26a   : > { %v1567_v58 = vrot.slane %v1548_v54, 4  ;;  %v1566_v4 = vsel %vm753_vm2, %v1565_v49, %v1548_v54  ;;  %v1570_v53 = vsel %vm753_vm2, %v1569_v59, %v1552_v0  ;;  %v1572_v13 = vsel %vm753_vm2, %v1564_v43, %v1571_v34 }
 0x26b   : > { %v2782_v7 = vsel %vm2169_vm3, %v1566_v4, 0  ;;  %v3086_v14 = vsel %vm2169_vm3, %v1570_v53, 0  ;;  %v3238_v28 = vsel %vm2169_vm3, %v1572_v13, 0  ;;  %v1082_v37 = vsel %vm753_vm2, %v1081_v16, %v1064_v11 }
 0x26c   : > { %v1568_v5 = vsel %vm753_vm2, %v1560_v25, %v1567_v58  ;;  %v2799_v55 = vand.u32 4294901760, %v2782_v7  ;;  %v19640_v10 = vand.u32 4294901760, %v3086_v14  ;;  %v19644_v41 = vand.u32 4294901760, %v3238_v28 }
 0x26d   : > { %1705 = vrot.lane.b32.xlu1 %v19279_v22, %s18995_s28  ;;  %v2934_v22 = vsel %vm2169_vm3, %v1568_v5, 0  ;;  %v3083_v60 = vsel %vm2169_vm3, %v1082_v37, 0  ;;  %v2957_v12 = vand.u32 4294901760, %v2956_v47  ;;  %v1084_v0 = vsel %vm753_vm2, %v1076_v9, %v1083_v51 }
 0x26e   : > { %v2951_v35 = vand.u32 4294901760, %v2934_v22  ;;  %2800 = vmatpush.xpose.msra.mxu0 %v2799_v55  ;;  %2876 = vmatpush.xpose.msra.mxu3 %v2799_v55  ;;  %v2826_v15 = vsub.f32 %v2782_v7, %v2799_v55  ;;  %v3282_v48 = vsub.f32 %v3238_v28, %v19644_v41  ;;  %v19650_v50 = vand.u32 4294901760, %v3083_v60 }
 0x26f   : > { %v3235_v49 = vsel %vm2169_vm3, %v1084_v0, 0  ;;  %v879_v11 = vrot.slane %v19386_v18, 4  ;;  %v865_v16 = vrot.slane %v19531_v2, 4 }
 0x270   : > { %v2978_v19 = vsub.f32 %v2934_v22, %v2951_v35  ;;  %2853 = vmatpush.xpose.msra.mxu2 %v2826_v15  ;;  %v2827_v29 = vand.u32 4294901760, %v2826_v15  ;;  %v3283_v54 = vand.u32 4294901760, %v3282_v48  ;;  %v3106_v25 = vsub.f32 %v3083_v60, %v19650_v50 }
 0x271   : > { %2806 = vmatmul.f32.vlgmr.msra.gmra.mxu0 %v2805_v20  ;;  %2880 = vmatmul.f32.vlgmr.msra.gmra.mxu3 %v2803_v56  ;;  %v3257_v4 = vand.u32 4294901760, %v3235_v49  ;;  %v877_v20 = vrot.slane %v19575_v61, 4  ;;  %v880_v28 = vsel %vm753_vm2, %v19575_v61, %v879_v11  ;;  %v866_v37 = vsel %vm753_vm2, %v865_v16, %v19302_v36 }
 0x272   : > { %v2979_v30 = vand.u32 4294901760, %v2978_v19  ;;  %2902 = vmatpush.xpose.msrb.mxu0 %v2827_v29  ;;  %v2828_v39 = vsub.f32 %v2826_v15, %v2827_v29  ;;  %v3284_v43 = vsub.f32 %v3282_v48, %v3283_v54  ;;  %v3107_v58 = vand.u32 4294901760, %v3106_v25 }
 0x273   : > { %2856 = vmatmul.f32.vlgmr.msra.gmra.mxu2 %v2802_v46  ;;  %v3258_v7 = vsub.f32 %v3235_v49, %v3257_v4 }
 0x274   : > { %2952 = vmatpush.xpose.msrb.mxu2 %v2951_v35  ;;  %v2980_v40 = vsub.f32 %v2978_v19, %v2979_v30  ;;  %v2829_v44 = vand.u32 4294901760, %v2828_v39  ;;  %v3285_v5 = vand.u32 4294901760, %v3284_v43  ;;  %v3108_v9 = vsub.f32 %v3106_v25, %v3107_v58 }
 0x275   : > { %1683 = vrot.lane.b32.xlu1 %v19273_v21, %s18995_s28  ;;  %v3130_v21 = vsub.f32 %v3086_v14, %v19640_v10  ;;  %v867_v14 = vrot.slane %v19302_v36, 4  ;;  %v888_v39 = vperm.slane %v880_v28, %v19312_v42 }
 0x276   : > { %3005 = vmatpush.xpose.msra.mxu0 %v2978_v19  ;;  %v2981_v45 = vand.u32 4294901760, %v2980_v40  ;;  %2830 = vmatpush.xpose.msra.mxu1 %v2829_v44  ;;  %v3109_v22 = vand.u32 4294901760, %v3108_v9  ;;  %v878_v44 = vsel %vm753_vm2, %v877_v20, %v19386_v18 }
 0x277   : > { %v3131_v46 = vand.u32 4294901760, %v3130_v21  ;;  %v868_v15 = vsel %vm753_vm2, %v19531_v2, %v867_v14  ;;  %v901_v60 = vrot.slane %v888_v39, 4  ;;  %v1367_v14 = vrot.slane %v19552_v32, 4 }
 0x278   : > { %3054 = vmatpush.xpose.msra.mxu2 %v2979_v30  ;;  %2982 = vmatpush.xpose.msrb.mxu3 %v2981_v45  ;;  %v872_v45 = vperm.slane %v866_v37, %v19312_v42 }
 0x279   : > { %2832 = vmatmul.f32.vlgmr.msra.gmra.mxu1 %v19598_v38  ;;  %2904 = vmatmul.f32.vlgmr.msrb.gmra.mxu0 %v19598_v38  ;;  %v3132_v31 = vsub.f32 %v3130_v21, %v3131_v46  ;;  %v2199_v56 = vpop.f32.mrf.mxu2 }
 0x27a   : > { %2924 = vmatpush.xpose.msrb.mxu1 %v2799_v55  ;;  %3104 = vmatpush.xpose.msrb.mxu0 %v19640_v10  ;;  %v2200_v8 = vadd.f32 %v2199_v56, %v696_v6  ;;  %v891_v51 = vrot.slane %v872_v45, 4  ;;  %v1198_v6 = vpop.permute.xlu2 %1197 }
 0x27b   : > { %2958 = vmatmul.f32.vlgmr.msrb.gmra.mxu2 %v2957_v12  ;;  %2984 = vmatmul.f32.vlgmr.msrb.gmra.mxu3 %v19621_v1  ;;  %v3133_v34 = vand.u32 4294901760, %v3132_v31 }
 0x27c   : > { %3076 = vmatpush.xpose.msra.mxu3 %v2951_v35  ;;  %3157 = vmatpush.xpose.msrb.mxu2 %v3130_v21 }
 0x27e   : > { %3028 = vmatpush.xpose.msra.mxu1 %v2951_v35  ;;  %v3259_v35 = vand.u32 4294901760, %v3258_v7 }
 0x280   : > { %3180 = vmatpush.xpose.msrb.mxu3 %v19640_v10  ;;  %v3260_v13 = vsub.f32 %v3258_v7, %v3259_v35 }
 0x281   : > { %2926 = vmatmul.f32.vlgmr.msrb.gmra.mxu1 %v19598_v38  ;;  %3008 = vmatmul.f32.vlgmr.msra.gmra.mxu0 %v19634_v3  ;;  %v2249_v53 = vpop.f32.mrf.mxu2 }
 0x282   : > { %v2225_v59 = vpop.f32.mrf.mxu3  ;;  %3134 = vmatpush.xpose.msrb.mxu1 %v3133_v34  ;;  %3206 = vmatpush.xpose.msra.mxu0 %v3131_v46  ;;  %v3261_v19 = vand.u32 4294901760, %v3260_v13 }
 0x283   : > { %3056 = vmatmul.f32.vlgmr.msra.gmra.mxu2 %v19621_v1  ;;  %3078 = vmatmul.f32.vlgmr.msra.gmra.mxu3 %v19621_v1  ;;  %v2226_v38 = vadd.f32 %v2225_v59, %v2200_v8 }
 0x284   : > { %3256 = vmatpush.xpose.msra.mxu2 %v19644_v41  ;;  %3286 = vmatpush.xpose.msra.mxu3 %v3285_v5 }
 0x285   : > { %v2250_v1 = vadd.f32 %v2249_v53, %v2226_v38 }
 0x289   : > { %3032 = vmatmul.f32.vlgmr.msra.gmra.mxu1 %v2955_v26  ;;  %3110 = vmatmul.f32.vlgmr.msrb.gmra.mxu0 %v3109_v22  ;;  %v2297_v29 = vpop.f32.mrf.mxu2 }
 0x28a   : > { %v2273_v55 = vpop.f32.mrf.mxu3  ;;  %3228 = vmatpush.xpose.msra.mxu1 %v19640_v10  ;;  %3309 = vmatpush.xpose.msrb.mxu0 %v3282_v48  ;;  %v876_v10 = vperm.slane %v868_v15, %v19312_v42 }
 0x28b   : > { %3160 = vmatmul.f32.vlgmr.msrb.gmra.mxu2 %v3106_v25  ;;  %3184 = vmatmul.f32.vlgmr.msrb.gmra.mxu3 %v3107_v58  ;;  %v2274_v3 = vadd.f32 %v2273_v55, %v2250_v1 }
 0x28c   : > { %3358 = vmatpush.xpose.msrb.mxu2 %v3283_v54  ;;  %3380 = vmatpush.xpose.msrb.mxu3 %v19644_v41  ;;  %v903_v21 = vrot.slane %v876_v10, 4  ;;  %v902_v25 = vsel %vm753_vm2, %v901_v60, %v876_v10 }
 0x28d   : > { %v2298_v26 = vadd.f32 %v2297_v29, %v2274_v3  ;;  %v908_v31 = vperm.slane %v902_v25, %v19327_v57 }
 0x28e   : > { %v904_v47 = vsel %vm753_vm2, %v888_v39, %v903_v21 }
 0x28f   : > { %v912_v46 = vperm.slane %v904_v47, %v19327_v57  ;;  %v917_v58 = vrot.slane %v908_v31, 4 }
 0x291   : > { %3136 = vmatmul.f32.vlgmr.msrb.gmra.mxu1 %v19650_v50  ;;  %3208 = vmatmul.f32.vlgmr.msra.gmra.mxu0 %v19650_v50  ;;  %v918_v9 = vsel %vm753_vm2, 0.0, %v917_v58 }
 0x292   : > { %v2319_v30 = vpop.f32.mrf.mxu3  ;;  %3332 = vmatpush.xpose.msrb.mxu1 %v19644_v41  ;;  %v884_v41 = vperm.slane %v878_v44, %v19312_v42 }
 0x293   : > { %3262 = vmatmul.f32.vlgmr.msra.gmra.mxu2 %v3261_v19  ;;  %3288 = vmatmul.f32.vlgmr.msra.gmra.mxu3 %v3257_v4  ;;  %v19682_v40 = vadd.f32 %v2319_v30, %v2298_v26 }
 0x294   : > { %v889_v12 = vrot.slane %v884_v41, 4  ;;  %v892_v54 = vsel %vm753_vm2, %v884_v41, %v891_v51 }
 0x295   : > { %v4602_v48 = vsel %vm2169_vm3, %v19682_v40, -inf  ;;  %v900_v0 = vperm.slane %v892_v54, %v19327_v57 }
 0x296   : > { %v890_v56 = vsel %vm753_vm2, %v889_v12, %v872_v45 }
 0x297   : > { %v896_v43 = vperm.slane %v890_v56, %v19327_v57  ;;  %v915_v49 = vrot.slane %v900_v0, 4 }
 0x299   : > { %3230 = vmatmul.f32.vlgmr.msra.gmra.mxu1 %v19650_v50  ;;  %3312 = vmatmul.f32.vlgmr.msrb.gmra.mxu0 %v3258_v7  ;;  %v919_v50 = vrot.slane %v912_v46, 4  ;;  %v916_v5 = vsel %vm753_vm2, 0.0, %v915_v49  ;;  %v1085_v16 = vsel %vm753_vm2, %v915_v49, %v896_v43 }
 0x29a   : > { %v1090_v7 = vrot.slane %v916_v5, 4  ;;  %v19728_v30 = vperm.slane %v1085_v16, %v19312_v42  ;;  %v19769_v16 = vpop.f32.mrf.mxu0 }
 0x29b   : > { %3360 = vmatmul.f32.vlgmr.msrb.gmra.mxu2 %v3257_v4  ;;  %3382 = vmatmul.f32.vlgmr.msrb.gmra.mxu3 %v3257_v4  ;;  %v920_v34 = vsel %vm753_vm2, 0.0, %v919_v50  ;;  %v913_v4 = vrot.slane %v896_v43, 4  ;;  %v1096_v55 = vsel %vm753_vm2, %v919_v50, %v908_v31 }
 0x29c   : > { %v1101_v59 = vrot.slane %v920_v34, 4  ;;  %v19717_v11 = vperm.slane %v1096_v55, %v19312_v42 }
 0x29d   : > { %v914_v22 = vsel %vm753_vm2, 0.0, %v913_v4 }
 0x29e   : > { %v1102_v8 = vsel %vm753_vm2, %v1101_v59, %v918_v9  ;;  %v1091_v38 = vsel %vm753_vm2, %v1090_v7, %v914_v22 }
 0x29f   : > { %4603 = vmax.xlane.f32.xlu1 %v4602_v48  ;;  %v19705_v53 = vperm.slane %v1102_v8, %v19312_v42  ;;  %v19711_v13 = vperm.slane %v1091_v38, %v19312_v42  ;;  %v19761_v38 = vpop.f32.mrf.mxu2 }
 0x2a1   : > { %3336 = vmatmul.f32.vlgmr.msrb.gmra.mxu1 %v3259_v35  ;;  %v1119_v35 = vrot.slane %v19705_v53, 4  ;;  %v1107_v19 = vrot.slane %v19711_v13, 4 }
 0x2a3   : > { %v1120_v20 = vsel %vm753_vm2, %v1119_v35, %v19717_v11  ;;  %v1108_v44 = vsel %vm753_vm2, %v1107_v19, %v19728_v30 }
 0x2a4   : > { %v1126_v10 = vperm.slane %v1120_v20, %v19327_v57  ;;  %v1114_v47 = vperm.slane %v1108_v44, %v19327_v57 }
 0x2a6   : > { %v1131_v48 = vrot.slane %v1126_v10, 4 }
 0x2a8   : > { %v1132_v49 = vsel %vm753_vm2, %v1131_v48, %v1114_v47 }
 0x2a9   : > { %v3387_v9 = vsel %vm2169_vm3, %v1132_v49, 0 }
 0x2aa   : > { %v19772_v20 = vand.u32 4294901760, %v3387_v9 }
 0x2b7   : > { %v1222_v1 = vpop.permute.xlu2 %1221 }
 0x2b8   : > { %v1365_v3 = vrot.slane %v1222_v1, 4  ;;  %1707 = vrot.lane.b32.xlu1 %v19384_v17, %s18995_s28  ;;  %v1368_v15 = vsel %vm753_vm2, %v1222_v1, %v1367_v14  ;;  %v1355_v17 = vrot.slane %v1198_v6, 4  ;;  %v19764_v1 = vpop.f32.mrf.mxu3 }
 0x2b9   : > { %v1376_v29 = vperm.slane %v1368_v15, %v19312_v42 }
 0x2ba   : > { %v1366_v28 = vsel %vm753_vm2, %v1365_v3, %v19552_v32 }
 0x2bb   : > { %v1372_v26 = vperm.slane %v1366_v28, %v19312_v42  ;;  %v1389_v32 = vrot.slane %v1376_v29, 4  ;;  %v1133_v28 = vrot.slane %v1114_v47, 4 }
 0x2bd   : > { %v1377_v51 = vrot.slane %v1372_v26, 4 }
 0x2bf   : > { %v1214_v37 = vpop.permute.xlu1 %1213  ;;  %v19732_v39 = vpop.permute.xlu2 %746 }
 0x2c0   : > { %v1353_v45 = vrot.slane %v1214_v37, 4  ;;  %v1356_v21 = vsel %vm753_vm2, %v1214_v37, %v1355_v17  ;;  %1223 = vrot.lane.b32.xlu0 %v19732_v39, %s18991_s9  ;;  %v1121_v37 = vrot.slane %v19717_v11, 4 }
 0x2c1   : > { %v1364_v41 = vperm.slane %v1356_v21, %v19312_v42 }
 0x2c2   : > { %v1354_v60 = vsel %vm753_vm2, %v1353_v45, %v1198_v6 }
 0x2c3   : > { %v1360_v46 = vperm.slane %v1354_v60, %v19312_v42  ;;  %v1390_v12 = vsel %vm753_vm2, %v1389_v32, %v1364_v41  ;;  %v1391_v54 = vrot.slane %v1364_v41, 4  ;;  %v19784_v32 = vsub.f32 %v3387_v9, %v19772_v20 }
 0x2c4   : > { %v1396_v25 = vperm.slane %v1390_v12, %v19327_v57  ;;  %v1134_v41 = vsel %vm753_vm2, %v1126_v10, %v1133_v28 }
 0x2c5   : > { %v1378_v0 = vsel %vm753_vm2, %v1377_v51, %v1360_v46  ;;  %v1379_v31 = vrot.slane %v1360_v46, 4  ;;  %v1392_v50 = vsel %vm753_vm2, %v1376_v29, %v1391_v54  ;;  %v1109_v51 = vrot.slane %v19728_v30, 4  ;;  %v19793_v46 = vpop.f32.mrf.mxu1 }
 0x2c6   : > { %v1384_v56 = vperm.slane %v1378_v0, %v19327_v57  ;;  %v1400_v43 = vperm.slane %v1392_v50, %v19327_v57  ;;  %v1405_v4 = vrot.slane %v1396_v25, 4  ;;  %v3539_v0 = vsel %vm2169_vm3, %v1134_v41, 0 }
 0x2c7   : > { %v1380_v58 = vsel %vm753_vm2, %v1372_v26, %v1379_v31  ;;  %v19751_v34 = vpop.permute.xlu1 %734  ;;  %v19801_v31 = vpop.f32.mrf.mxu3  ;;  %v3411_v50 = vand.u32 4294901760, %v19784_v32 }
 0x2c8   : > { %v1388_v59 = vperm.slane %v1380_v58, %v19327_v57  ;;  %v1407_v5 = vrot.slane %v1400_v43, 4  ;;  %1215 = vrot.lane.b32.xlu2 %v19751_v34, %s18991_s9  ;;  %1689 = vrot.lane.b32.xlu0 %v19281_v23, %s18995_s28  ;;  %v1401_v6 = vrot.slane %v1384_v56, 4  ;;  %v1406_v3 = vsel %vm753_vm2, 0.0, %v1405_v4 }
 0x2c9   : > { %v19816_v4 = vand.u32 4294901760, %v3539_v0 }
 0x2ca   : > { %v1403_v7 = vrot.slane %v1388_v59, 4  ;;  %v1408_v8 = vsel %vm753_vm2, 0.0, %v1407_v5  ;;  %v1584_v22 = vsel %vm753_vm2, %v1407_v5, %v1396_v25  ;;  %v1402_v29 = vsel %vm753_vm2, 0.0, %v1401_v6  ;;  %v19798_v25 = vpop.f32.mrf.mxu2 }
 0x2cb   : > { %v1588_v55 = vperm.slane %v1584_v22, %v19312_v42  ;;  %v1589_v35 = vrot.slane %v1408_v8, 4  ;;  %v1110_v5 = vsel %vm753_vm2, %v19711_v13, %v1109_v51  ;;  %v3412_v22 = vsub.f32 %v19784_v32, %v3411_v50 }
 0x2cc   : > { %v1404_v14 = vsel %vm753_vm2, 0.0, %v1403_v7  ;;  %v1573_v23 = vsel %vm753_vm2, %v1403_v7, %v1384_v56  ;;  %v19808_v56 = vpop.f32.mrf.mxu0 }
 0x2cd   : > { %v1578_v15 = vrot.slane %v1404_v14, 4  ;;  %v1590_v19 = vsel %vm753_vm2, %v1589_v35, %v1406_v3  ;;  %v1609_v26 = vrot.slane %v1588_v55, 4  ;;  %v1577_v45 = vperm.slane %v1573_v23, %v19312_v42 }
 0x2ce   : > { %v1594_v17 = vperm.slane %v1590_v19, %v19312_v42  ;;  %v19830_v23 = vsub.f32 %v3539_v0, %v19816_v4 }
 0x2cf   : > { %v1579_v44 = vsel %vm753_vm2, %v1578_v15, %v1402_v29  ;;  %v1597_v47 = vrot.slane %v1577_v45, 4  ;;  %v19833_v29 = vpop.f32.mrf.mxu1  ;;  %v19840_v41 = vpop.f32.mrf.mxu3 }
 0x2d0   : > { %v1607_v21 = vrot.slane %v1594_v17, 4  ;;  %1697 = vrot.lane.b32.xlu2 %v19287_v24, %s18995_s28  ;;  %1699 = vrot.lane.b32.xlu0 %v19343_v27, %s18995_s28  ;;  %v1583_v60 = vperm.slane %v1579_v44, %v19312_v42  ;;  %v1610_v48 = vsel %vm753_vm2, %v1594_v17, %v1609_v26  ;;  %v1122_v24 = vsel %vm753_vm2, %v19705_v53, %v1121_v37 }
 0x2d1   : > { %v1618_v10 = vperm.slane %v1610_v48, %v19327_v57  ;;  %v19806_v53 = vperm.slane %v1122_v24, %v19327_v57  ;;  %v3413_v17 = vand.u32 4294901760, %v3412_v22 }
 0x2d2   : > { %v1608_v11 = vsel %vm753_vm2, %v1607_v21, %v1588_v55  ;;  %v1595_v27 = vrot.slane %v1583_v60, 4  ;;  %v1598_v54 = vsel %vm753_vm2, %v1583_v60, %v1597_v47  ;;  %v19835_v26 = vpop.f32.mrf.mxu2  ;;  %v3563_v60 = vand.u32 4294901760, %v19830_v23 }
 0x2d3   : > { %v1614_v12 = vperm.slane %v1608_v11, %v19327_v57  ;;  %v1606_v58 = vperm.slane %v1598_v54, %v19327_v57  ;;  %v1623_v59 = vrot.slane %v1618_v10, 4  ;;  %v1135_v14 = vrot.slane %v19806_v53, 4 }
 0x2d4   : > { %v1596_v30 = vsel %vm753_vm2, %v1595_v27, %v1577_v45  ;;  %v19844_v47 = vpop.f32.mrf.mxu0  ;;  %v3564_v0 = vsub.f32 %v19830_v23, %v3563_v60 }
 0x2d5   : > { %v1602_v43 = vperm.slane %v1596_v30, %v19327_v57  ;;  %v1619_v49 = vrot.slane %v1614_v12, 4  ;;  %v1624_v7 = vsel %vm753_vm2, %v1623_v59, %v1606_v58  ;;  %v1625_v55 = vrot.slane %v1606_v58, 4 }
 0x2d6   : > { %v3694_v13 = vsel %vm2169_vm3, %v1624_v7, 0 }
 0x2d7   : > { %v1620_v9 = vsel %vm753_vm2, %v1619_v49, %v1602_v43  ;;  %v1621_v6 = vrot.slane %v1602_v43, 4  ;;  %v1626_v15 = vsel %vm753_vm2, %v1618_v10, %v1625_v55  ;;  %v19837_v45 = vand.u32 4294901760, %v3694_v13  ;;  %v697_v49 = vld [vmem:[#allocation8 + $0x8] sm:$0xff]  ;;  %v19859_v59 = vpop.f32.mrf.mxu1 }
 0x2d8   : > { %1691 = vrot.lane.b32.xlu2 %v19298_v33, %s18995_s28  ;;  %1685 = vrot.lane.b32.xlu0 %v19302_v36, %s18995_s28  ;;  %v3390_v8 = vsel %vm2169_vm3, %v1620_v9, 0  ;;  %v1118_v36 = vperm.slane %v1110_v5, %v19327_v57  ;;  %v3846_v21 = vsel %vm2169_vm3, %v1626_v15, 0  ;;  %v3565_v5 = vand.u32 4294901760, %v3564_v0 }
 0x2d9   : > { %v3407_v35 = vand.u32 4294901760, %v3390_v8  ;;  %v1622_v33 = vsel %vm753_vm2, %v1614_v12, %v1621_v6  ;;  %v19847_v24 = vand.u32 4294901760, %v3846_v21  ;;  %v3738_v54 = vsub.f32 %v3694_v13, %v19837_v45  ;;  %v698_v6 = vld [vmem:[#allocation8 + $0x10] sm:$0xff] }
 0x2da   : > { %v3542_v3 = vsel %vm2169_vm3, %v1622_v33, 0  ;;  %v1136_v11 = vsel %vm753_vm2, %v1135_v14, %v1118_v36  ;;  %v2655_v9 = vpop.f32.mrf.mxu2  ;;  %v2352_v7 = vadd.f32 %v19761_v38, %v697_v49  ;;  %v2504_v38 = vadd.f32 %v19808_v56, %v698_v6  ;;  %v701_v49 = vld [vmem:[#allocation8 + $0x28] sm:$0xff] }
 0x2db   : > { %3408 = vmatpush.xpose.msra.mxu0 %v3407_v35  ;;  %3484 = vmatpush.xpose.msra.mxu3 %v3407_v35  ;;  %v3434_v19 = vsub.f32 %v3390_v8, %v3407_v35  ;;  %v3559_v28 = vand.u32 4294901760, %v3542_v3  ;;  %v3691_v10 = vsel %vm2169_vm3, %v1136_v11, 0  ;;  %v3739_v58 = vand.u32 4294901760, %v3738_v54  ;;  %v2681_v8 = vpop.f32.mrf.mxu3 }
 0x2dc   : > { %v19857_v43 = vand.u32 4294901760, %v3691_v10  ;;  %v2705_v33 = vpop.f32.mrf.mxu0  ;;  %v2378_v14 = vadd.f32 %v19764_v1, %v2352_v7  ;;  %v2530_v1 = vadd.f32 %v19833_v29, %v2504_v38 }
 0x2dd   : > { %3461 = vmatpush.xpose.msra.mxu2 %v3434_v19  ;;  %v3435_v37 = vand.u32 4294901760, %v3434_v19  ;;  %v3586_v44 = vsub.f32 %v3542_v3, %v3559_v28 }
 0x2de   : > { %3414 = vmatmul.f32.vlgmr.msra.gmra.mxu0 %v3413_v17  ;;  %3488 = vmatmul.f32.vlgmr.msra.gmra.mxu3 %v3411_v50  ;;  %v19855_v50 = vsub.f32 %v3846_v21, %v19847_v24  ;;  %v3714_v55 = vsub.f32 %v3691_v10, %v19857_v43  ;;  %v2554_v11 = vadd.f32 %v19835_v26, %v2530_v1 }
 0x2df   : > { %3510 = vmatpush.xpose.msrb.mxu0 %v3435_v37  ;;  %v3587_v48 = vand.u32 4294901760, %v3586_v44  ;;  %v3436_v51 = vsub.f32 %v3434_v19, %v3435_v37  ;;  %v699_v19 = vld [vmem:[#allocation8 + $0x18] sm:$0xff]  ;;  %v2729_v56 = vpop.f32.mrf.mxu1 }
 0x2e0   : > { %3464 = vmatmul.f32.vlgmr.msra.gmra.mxu2 %v19784_v32  ;;  %v1137_v32 = vrot.slane %v1118_v36, 4  ;;  %v3891_v22 = vand.u32 4294901760, %v19855_v50  ;;  %v3740_v36 = vsub.f32 %v3738_v54, %v3739_v58  ;;  %v3715_v15 = vand.u32 4294901760, %v3714_v55 }
 0x2e1   : > { %3560 = vmatpush.xpose.msrb.mxu2 %v3559_v28  ;;  %v3437_v27 = vand.u32 4294901760, %v3436_v51  ;;  %v3588_v12 = vsub.f32 %v3586_v44, %v3587_v48  ;;  %v2656_v37 = vadd.f32 %v2655_v9, %v699_v19 }
 0x2e2   : > { %v3892_v13 = vsub.f32 %v19855_v50, %v3891_v22  ;;  %v3716_v21 = vsub.f32 %v3714_v55, %v3715_v15 }
 0x2e3   : > { %3613 = vmatpush.xpose.msra.mxu0 %v3586_v44  ;;  %3438 = vmatpush.xpose.msra.mxu1 %v3437_v27  ;;  %v3589_v30 = vand.u32 4294901760, %v3588_v12  ;;  %v2682_v29 = vadd.f32 %v2681_v8, %v2656_v37  ;;  %v2775_v51 = vpop.f32.mrf.mxu3  ;;  %v2578_v12 = vadd.f32 %v19840_v41, %v2554_v11 }
 0x2e4   : > { %v3893_v44 = vand.u32 4294901760, %v3892_v13  ;;  %v935_v13 = vrot.slane %v19577_v62, 4 }
 0x2e5   : > { %3662 = vmatpush.xpose.msra.mxu2 %v3587_v48  ;;  %3590 = vmatpush.xpose.msrb.mxu3 %v3589_v30  ;;  %v2753_v48 = vpop.f32.mrf.mxu2  ;;  %v2706_v10 = vadd.f32 %v2705_v33, %v2682_v29 }
 0x2e6   : > { %3440 = vmatmul.f32.vlgmr.msra.gmra.mxu1 %v19772_v20  ;;  %3512 = vmatmul.f32.vlgmr.msrb.gmra.mxu0 %v19772_v20  ;;  %v936_v1 = vsel %vm753_vm2, %v19732_v39, %v935_v13 }
 0x2e7   : > { %3532 = vmatpush.xpose.msrb.mxu1 %v3407_v35  ;;  %3712 = vmatpush.xpose.msrb.mxu0 %v19837_v45  ;;  %v1138_v35 = vsel %vm753_vm2, %v19806_v53, %v1137_v32  ;;  %v2402_v53 = vadd.f32 %v19769_v16, %v2378_v14 }
 0x2e8   : > { %3566 = vmatmul.f32.vlgmr.msrb.gmra.mxu2 %v3565_v5  ;;  %3592 = vmatmul.f32.vlgmr.msrb.gmra.mxu3 %v19816_v4  ;;  %v3843_v3 = vsel %vm2169_vm3, %v1138_v35, 0 }
 0x2e9   : > { %3684 = vmatpush.xpose.msra.mxu3 %v3559_v28  ;;  %3765 = vmatpush.xpose.msrb.mxu2 %v3738_v54  ;;  %v19878_v17 = vand.u32 4294901760, %v3843_v3  ;;  %v3717_v54 = vand.u32 4294901760, %v3716_v21  ;;  %v702_v21 = vld [vmem:[#allocation8 + $0x30] sm:$0xff] }
 0x2eb   : > { %3636 = vmatpush.xpose.msra.mxu1 %v3559_v28  ;;  %v3741_v28 = vand.u32 4294901760, %v3740_v36  ;;  %v19889_v27 = vsub.f32 %v3843_v3, %v19878_v17 }
 0x2ed   : > { %3788 = vmatpush.xpose.msrb.mxu3 %v19837_v45 }
 0x2ee   : > { %3534 = vmatmul.f32.vlgmr.msrb.gmra.mxu1 %v19772_v20  ;;  %3616 = vmatmul.f32.vlgmr.msra.gmra.mxu0 %v19830_v23  ;;  %v19883_v16 = vpop.f32.mrf.mxu0  ;;  %v2426_v20 = vadd.f32 %v19793_v46, %v2402_v53  ;;  %v2602_v46 = vadd.f32 %v19844_v47, %v2578_v12  ;;  %v2730_v23 = vadd.f32 %v2729_v56, %v2706_v10  ;;  %v933_v53 = vrot.slane %v19732_v39, 4 }
 0x2ef   : > { %3742 = vmatpush.xpose.msrb.mxu1 %v3741_v28  ;;  %3814 = vmatpush.xpose.msra.mxu0 %v3739_v58 }
 0x2f0   : > { %3664 = vmatmul.f32.vlgmr.msra.gmra.mxu2 %v19816_v4  ;;  %3686 = vmatmul.f32.vlgmr.msra.gmra.mxu3 %v19816_v4  ;;  %v2450_v26 = vadd.f32 %v19798_v25, %v2426_v20  ;;  %v3867_v4 = vand.u32 4294901760, %v19889_v27  ;;  %v19913_v47 = vadd.f32 %v19859_v59, %v2602_v46 }
 0x2f1   : > { %3864 = vmatpush.xpose.msra.mxu2 %v19847_v24  ;;  %3894 = vmatpush.xpose.msra.mxu3 %v3893_v44 }
 0x2f2   : > { %v19904_v25 = vadd.f32 %v19801_v31, %v2450_v26  ;;  %v4608_v58 = vsel %vm2169_vm3, %v19913_v47, -inf }
 0x2f4   : > { %v4605_v31 = vsel %vm2169_vm3, %v19904_v25, -inf }
 0x2f6   : > { %3640 = vmatmul.f32.vlgmr.msra.gmra.mxu1 %v3563_v60  ;;  %3718 = vmatmul.f32.vlgmr.msrb.gmra.mxu0 %v3717_v54  ;;  %v19899_v0 = vpop.f32.mrf.mxu1  ;;  %v19901_v41 = vpop.f32.mrf.mxu2 }
 0x2f7   : > { %3836 = vmatpush.xpose.msra.mxu1 %v19837_v45  ;;  %3917 = vmatpush.xpose.msrb.mxu0 %v19855_v50  ;;  %v19906_v60 = vpop.f32.mrf.mxu3  ;;  %v19908_v30 = vpop.f32.mrf.mxu0  ;;  %v3868_v45 = vsub.f32 %v19889_v27, %v3867_v4  ;;  %v2754_v50 = vadd.f32 %v2753_v48, %v2730_v23  ;;  %v934_v48 = vsel %vm753_vm2, %v933_v53, %v19577_v62 }
 0x2f8   : > { %3768 = vmatmul.f32.vlgmr.msrb.gmra.mxu2 %v3714_v55  ;;  %3792 = vmatmul.f32.vlgmr.msrb.gmra.mxu3 %v3715_v15  ;;  %v940_v46 = vperm.slane %v934_v48, %v19312_v42 }
 0x2f9   : > { %3966 = vmatpush.xpose.msrb.mxu2 %v3891_v22  ;;  %3988 = vmatpush.xpose.msrb.mxu3 %v19847_v24  ;;  %v3869_v32 = vand.u32 4294901760, %v3868_v45  ;;  %v19925_v9 = vadd.f32 %v2775_v51, %v2754_v50  ;;  %v923_v22 = vrot.slane %v19411_v52, 4 }
 0x2fb   : > { %v924_v35 = vsel %vm753_vm2, %v19751_v34, %v923_v22  ;;  %v4611_v33 = vsel %vm2169_vm3, %v19925_v9, -inf }
 0x2fc   : > { %v932_v14 = vperm.slane %v924_v35, %v19312_v42 }
 0x2fe   : > { %3744 = vmatmul.f32.vlgmr.msrb.gmra.mxu1 %v19857_v43  ;;  %3816 = vmatmul.f32.vlgmr.msra.gmra.mxu0 %v19857_v43  ;;  %v19922_v59 = vpop.f32.mrf.mxu1  ;;  %v2959_v5 = vpop.f32.mrf.mxu2  ;;  %v959_v44 = vrot.slane %v932_v14, 4 }
 0x2ff   : > { %3940 = vmatpush.xpose.msrb.mxu1 %v19847_v24  ;;  %v2960_v6 = vadd.f32 %v2959_v5, %v701_v49  ;;  %v2985_v7 = vpop.f32.mrf.mxu3  ;;  %v3009_v8 = vpop.f32.mrf.mxu0  ;;  %v921_v24 = vrot.slane %v19751_v34, 4 }
 0x300   : > { %3870 = vmatmul.f32.vlgmr.msra.gmra.mxu2 %v3869_v32  ;;  %3896 = vmatmul.f32.vlgmr.msra.gmra.mxu3 %v19878_v17 }
 0x301   : > { %4606 = vmax.xlane.f32.xlu2 %v4605_v31  ;;  %v2986_v55 = vadd.f32 %v2985_v7, %v2960_v6 }
 0x302   : > { %4609 = vmax.xlane.f32.xlu0 %v4608_v58  ;;  %v703_v58 = vld [vmem:[#allocation8 + $0x38] sm:$0xff] }
 0x303   : > { %v3010_v36 = vadd.f32 %v3009_v8, %v2986_v55  ;;  %v945_v8 = vrot.slane %v940_v46, 4 }
 0x306   : > { %3838 = vmatmul.f32.vlgmr.msra.gmra.mxu1 %v19857_v43  ;;  %3920 = vmatmul.f32.vlgmr.msrb.gmra.mxu0 %v19889_v27  ;;  %v3033_v38 = vpop.f32.mrf.mxu1  ;;  %v3057_v3 = vpop.f32.mrf.mxu2  ;;  %v922_v43 = vsel %vm753_vm2, %v921_v24, %v19411_v52 }
 0x307   : > { %v3034_v15 = vadd.f32 %v3033_v38, %v3010_v36  ;;  %v3079_v19 = vpop.f32.mrf.mxu3  ;;  %v3111_v28 = vpop.f32.mrf.mxu0  ;;  %v928_v37 = vperm.slane %v922_v43, %v19312_v42 }
 0x308   : > { %3968 = vmatmul.f32.vlgmr.msrb.gmra.mxu2 %v19878_v17  ;;  %3990 = vmatmul.f32.vlgmr.msrb.gmra.mxu3 %v19878_v17  ;;  %v944_v17 = vperm.slane %v936_v1, %v19312_v42  ;;  %v3112_v20 = vadd.f32 %v3111_v28, %v702_v21 }
 0x309   : > { %4612 = vmax.xlane.f32.xlu2 %v4611_v33  ;;  %v3058_v56 = vadd.f32 %v3057_v3, %v3034_v15  ;;  %v947_v51 = vrot.slane %v928_v37, 4  ;;  %v946_v36 = vsel %vm753_vm2, %v945_v8, %v928_v37  ;;  %v1208_v37 = vpop.permute.xlu1 %1207 }
 0x30a   : > { %v960_v27 = vsel %vm753_vm2, %v944_v17, %v959_v44  ;;  %v957_v45 = vrot.slane %v944_v17, 4  ;;  %v952_v15 = vperm.slane %v946_v36, %v19327_v57  ;;  %v1423_v36 = vrot.slane %v1208_v37, 4 }
 0x30b   : > { %v19945_v11 = vadd.f32 %v3079_v19, %v3058_v56  ;;  %v948_v50 = vsel %vm753_vm2, %v940_v46, %v947_v51 }
 0x30c   : > { %v958_v49 = vsel %vm753_vm2, %v957_v45, %v932_v14  ;;  %v956_v5 = vperm.slane %v948_v50, %v19327_v57  ;;  %v969_v21 = vrot.slane %v952_v15, 4 }
 0x30d   : > { %v4617_v29 = vsel %vm2169_vm3, %v19945_v11, -inf  ;;  %v964_v24 = vperm.slane %v958_v49, %v19327_v57 }
 0x30e   : > { %3944 = vmatmul.f32.vlgmr.msrb.gmra.mxu1 %v3867_v4  ;;  %v3137_v12 = vpop.f32.mrf.mxu1  ;;  %v3161_v54 = vpop.f32.mrf.mxu2  ;;  %4618 = vmax.xlane.f32.xlu1 %v4617_v29  ;;  %v968_v4 = vperm.slane %v960_v27, %v19327_v57  ;;  %v971_v3 = vrot.slane %v956_v5, 4 }
 0x30f   : > { %v3138_v26 = vadd.f32 %v3137_v12, %v3112_v20  ;;  %v3185_v10 = vpop.f32.mrf.mxu3  ;;  %v3209_v32 = vpop.f32.mrf.mxu0  ;;  %v973_v19 = vrot.slane %v964_v24, 4 }
 0x310   : > { %v975_v6 = vrot.slane %v968_v4, 4  ;;  %v972_v1 = vsel %vm753_vm2, 0.0, %v971_v3 }
 0x311   : > { %v3162_v23 = vadd.f32 %v3161_v54, %v3138_v26  ;;  %v974_v17 = vsel %vm753_vm2, 0.0, %v973_v19  ;;  %v1144_v20 = vrot.slane %v972_v1, 4  ;;  %v1200_v26 = vpop.permute.xlu0 %1199 }
 0x312   : > { %v976_v13 = vsel %vm753_vm2, 0.0, %v975_v6  ;;  %v1411_v50 = vrot.slane %v1200_v26, 4 }
 0x313   : > { %v3186_v31 = vadd.f32 %v3185_v10, %v3162_v23  ;;  %v1155_v28 = vrot.slane %v976_v13, 4  ;;  %v970_v10 = vsel %vm753_vm2, 0.0, %v969_v21 }
 0x314   : > { %v1145_v4 = vsel %vm753_vm2, %v1144_v20, %v970_v10 }
 0x315   : > { %v3210_v7 = vadd.f32 %v3209_v32, %v3186_v31  ;;  %v1156_v29 = vsel %vm753_vm2, %v1155_v28, %v974_v17  ;;  %v1150_v32 = vsel %vm753_vm2, %v975_v6, %v964_v24  ;;  %v19983_v49 = vperm.slane %v1145_v4, %v19312_v42 }
 0x316   : > { %v3231_v22 = vpop.f32.mrf.mxu1  ;;  %v3263_v55 = vpop.f32.mrf.mxu2 }
 0x317   : > { %v19959_v35 = vadd.f32 %v3231_v22, %v3210_v7  ;;  %v3264_v33 = vadd.f32 %v3263_v55, %v703_v58  ;;  %v3289_v38 = vpop.f32.mrf.mxu3  ;;  %v3313_v53 = vpop.f32.mrf.mxu0  ;;  %v19987_v7 = vperm.slane %v1150_v32, %v19312_v42  ;;  %v1139_v22 = vsel %vm753_vm2, %v971_v3, %v952_v15  ;;  %v700_v55 = vld [vmem:[#allocation8 + $0x20] sm:$0xff] }
 0x318   : > { %v1682_v58 = vpop.permute.xlu1 %1681  ;;  %v1161_v6 = vrot.slane %v19983_v49, 4  ;;  %v2808_v13 = vadd.f32 %v19883_v16, %v700_v55 }
 0x319   : > { %v3290_v14 = vadd.f32 %v3289_v38, %v3264_v33  ;;  %v4620_v43 = vsel %vm2169_vm3, %v19959_v35, -inf }
 0x31a   : > { %4621 = vmax.xlane.f32.xlu0 %v4620_v43  ;;  %v19998_v43 = vperm.slane %v1139_v22, %v19312_v42 }
 0x31b   : > { %v3314_v56 = vadd.f32 %v3313_v53, %v3290_v14  ;;  %v2834_v53 = vadd.f32 %v19899_v0, %v2808_v13 }
 0x31e   : > { %v3337_v44 = vpop.f32.mrf.mxu1  ;;  %v3361_v51 = vpop.f32.mrf.mxu2 }
 0x31f   : > { %v3338_v48 = vadd.f32 %v3337_v44, %v3314_v56  ;;  %v3383_v12 = vpop.f32.mrf.mxu3  ;;  %v1162_v44 = vsel %vm753_vm2, %v1161_v6, %v19998_v43 }
 0x320   : > { %v20013_v0 = vperm.slane %v1162_v44, %v19327_v57 }
 0x321   : > { %1693 = vrot.lane.b32.xlu2 %v19386_v18, %s18995_s28  ;;  %v3362_v27 = vadd.f32 %v3361_v51, %v3338_v48  ;;  %v19973_v18 = vperm.slane %v1156_v29, %v19312_v42  ;;  %v1731_v51 = vrot.slane %v1682_v58, 4 }
 0x322   : > { %v1216_v54 = vpop.permute.xlu2 %1215 }
 0x323   : > { %v19975_v46 = vadd.f32 %v3383_v12, %v3362_v27  ;;  %v1409_v23 = vrot.slane %v1216_v54, 4  ;;  %v1173_v31 = vrot.slane %v19973_v18, 4  ;;  %v1412_v5 = vsel %vm753_vm2, %v1216_v54, %v1411_v50  ;;  %v1706_v27 = vpop.permute.xlu1 %1705 }
 0x324   : > { %v1420_v33 = vperm.slane %v1412_v5, %v19312_v42  ;;  %v1741_v32 = vrot.slane %v1706_v27, 4 }
 0x325   : > { %v4623_v45 = vsel %vm2169_vm3, %v19975_v46, -inf  ;;  %v1410_v8 = vsel %vm753_vm2, %v1409_v23, %v1200_v26  ;;  %v1174_v24 = vsel %vm753_vm2, %v1173_v31, %v19987_v7  ;;  %v2858_v26 = vadd.f32 %v19901_v41, %v2834_v53 }
 0x326   : > { %4624 = vmax.xlane.f32.xlu0 %v4623_v45  ;;  %v1416_v38 = vperm.slane %v1410_v8, %v19312_v42  ;;  %v20002_v15 = vperm.slane %v1174_v24, %v19327_v57  ;;  %v1447_v1 = vrot.slane %v1420_v33, 4 }
 0x328   : > { %v1435_v16 = vrot.slane %v1416_v38, 4  ;;  %v1185_v54 = vrot.slane %v20002_v15, 4 }
 0x32a   : > { %v1698_v19 = vpop.permute.xlu2 %1697 }
 0x32b   : > { %v1729_v17 = vrot.slane %v1698_v19, 4  ;;  %v1732_v5 = vsel %vm753_vm2, %v1698_v19, %v1731_v51 }
 0x32d   : > { %v1730_v31 = vsel %vm753_vm2, %v1729_v17, %v1682_v58 }
 0x32e   : > { %v1736_v58 = vperm.slane %v1730_v31, %v19312_v42 }
 0x332   : > { %v1224_v14 = vpop.permute.xlu0 %1223 }
 0x333   : > { %v1421_v28 = vrot.slane %v1224_v14, 4  ;;  %v1424_v3 = vsel %vm753_vm2, %v1224_v14, %v1423_v36  ;;  %v1186_v14 = vsel %vm753_vm2, %v1185_v54, %v20013_v0 }
 0x334   : > { %v1432_v56 = vperm.slane %v1424_v3, %v19312_v42  ;;  %v1740_v3 = vperm.slane %v1732_v5, %v19312_v42 }
 0x335   : > { %v1422_v21 = vsel %vm753_vm2, %v1421_v28, %v1208_v37 }
 0x336   : > { %v1428_v48 = vperm.slane %v1422_v21, %v19312_v42  ;;  %v1445_v20 = vrot.slane %v1432_v56, 4  ;;  %v1448_v29 = vsel %vm753_vm2, %v1432_v56, %v1447_v1  ;;  %v3995_v21 = vsel %vm2169_vm3, %v1186_v14, 0 }
 0x337   : > { %v1456_v12 = vperm.slane %v1448_v29, %v19327_v57  ;;  %v1767_v51 = vrot.slane %v1740_v3, 4 }
 0x338   : > { %v1433_v10 = vrot.slane %v1428_v48, 4  ;;  %v1436_v37 = vsel %vm753_vm2, %v1428_v48, %v1435_v16  ;;  %v1446_v4 = vsel %vm753_vm2, %v1445_v20, %v1420_v33  ;;  %v2882_v33 = vadd.f32 %v19906_v60, %v2858_v26 }
 0x339   : > { %v1444_v23 = vperm.slane %v1436_v37, %v19327_v57  ;;  %v1452_v45 = vperm.slane %v1446_v4, %v19327_v57  ;;  %v1463_v50 = vrot.slane %v1456_v12, 4  ;;  %v1755_v48 = vrot.slane %v1736_v58, 4 }
 0x33a   : > { %v1434_v8 = vsel %vm753_vm2, %v1433_v10, %v1416_v38  ;;  %v1690_v22 = vpop.permute.xlu0 %1689  ;;  %v2906_v17 = vadd.f32 %v19908_v30, %v2882_v33  ;;  %v20044_v26 = vand.u32 4294901760, %v3995_v21 }
 0x33b   : > { %v1440_v41 = vperm.slane %v1434_v8, %v19327_v57  ;;  %v1459_v55 = vrot.slane %v1444_v23, 4  ;;  %v1461_v6 = vrot.slane %v1452_v45, 4  ;;  %v1464_v24 = vsel %vm753_vm2, 0.0, %v1463_v50 }
 0x33c   : > { %v1742_v36 = vsel %vm753_vm2, %v1741_v32, %v1690_v22  ;;  %v1743_v13 = vrot.slane %v1690_v22, 4  ;;  %v1643_v28 = vrot.slane %v1464_v24, 4  ;;  %v20050_v23 = vadd.f32 %v19922_v59, %v2906_v17 }
 0x33d   : > { %v1457_v19 = vrot.slane %v1440_v41, 4  ;;  %v1460_v38 = vsel %vm753_vm2, 0.0, %v1459_v55  ;;  %v1462_v53 = vsel %vm753_vm2, 0.0, %v1461_v6  ;;  %v1748_v44 = vperm.slane %v1742_v36, %v19312_v42 }
 0x33e   : > { %v1632_v1 = vrot.slane %v1460_v38, 4  ;;  %v1744_v56 = vsel %vm753_vm2, %v1706_v27, %v1743_v13  ;;  %v1644_v29 = vsel %vm753_vm2, %v1643_v28, %v1462_v53  ;;  %v1627_v54 = vsel %vm753_vm2, %v1459_v55, %v1440_v41 }
 0x33f   : > { %v1458_v60 = vsel %vm753_vm2, 0.0, %v1457_v19  ;;  %v1752_v16 = vperm.slane %v1744_v56, %v19312_v42  ;;  %v1753_v12 = vrot.slane %v1748_v44, 4  ;;  %v1756_v27 = vsel %vm753_vm2, %v1748_v44, %v1755_v48 }
 0x340   : > { %v1633_v20 = vsel %vm753_vm2, %v1632_v1, %v1458_v60  ;;  %v1648_v10 = vperm.slane %v1644_v29, %v19312_v42  ;;  %v1764_v31 = vperm.slane %v1756_v27, %v19327_v57  ;;  %v1631_v5 = vperm.slane %v1627_v54, %v19312_v42 }
 0x341   : > { %v1765_v37 = vrot.slane %v1752_v16, 4  ;;  %v1768_v4 = vsel %vm753_vm2, %v1752_v16, %v1767_v51  ;;  %v1637_v30 = vperm.slane %v1633_v20, %v19312_v42  ;;  %v1754_v32 = vsel %vm753_vm2, %v1753_v12, %v1736_v58 }
 0x342   : > { %v1187_v8 = vrot.slane %v20013_v0, 4  ;;  %v1175_v22 = vrot.slane %v19987_v7, 4  ;;  %v1638_v41 = vsel %vm753_vm2, %v1463_v50, %v1452_v45  ;;  %v1776_v55 = vperm.slane %v1768_v4, %v19327_v57 }
 0x343   : > { %v1661_v6 = vrot.slane %v1648_v10, 4  ;;  %v1766_v24 = vsel %vm753_vm2, %v1765_v37, %v1740_v3  ;;  %v1649_v33 = vrot.slane %v1637_v30, 4  ;;  %v20061_v59 = vsub.f32 %v3995_v21, %v20044_v26 }
 0x344   : > { %v1760_v36 = vperm.slane %v1754_v32, %v19327_v57  ;;  %v4614_v13 = vsel %vm2169_vm3, %v20050_v23, -inf  ;;  %v1163_v0 = vrot.slane %v19998_v43, 4  ;;  %v1642_v7 = vperm.slane %v1638_v41, %v19312_v42 }
 0x345   : > { %v1779_v14 = vrot.slane %v1764_v31, 4  ;;  %v1651_v45 = vrot.slane %v1631_v5, 4  ;;  %v1188_v50 = vsel %vm753_vm2, %v20002_v15, %v1187_v8  ;;  %v1772_v58 = vperm.slane %v1766_v24, %v19327_v57 }
 0x346   : > { %v1783_v19 = vrot.slane %v1776_v55, 4  ;;  %v1650_v38 = vsel %vm753_vm2, %v1649_v33, %v1631_v5  ;;  %v1662_v28 = vsel %vm753_vm2, %v1661_v6, %v1642_v7  ;;  %v4019_v3 = vand.u32 4294901760, %v20061_v59 }
 0x347   : > { %v1176_v43 = vsel %vm753_vm2, %v19973_v18, %v1175_v22  ;;  %v1777_v53 = vrot.slane %v1760_v36, 4  ;;  %v1656_v1 = vperm.slane %v1650_v38, %v19327_v57  ;;  %v4147_v56 = vsel %vm2169_vm3, %v1188_v50, 0 }
 0x348   : > { %v1164_v15 = vsel %vm753_vm2, %v19983_v49, %v1163_v0  ;;  %v1663_v60 = vrot.slane %v1642_v7, 4  ;;  %v1780_v44 = vsel %vm753_vm2, 0.0, %v1779_v14  ;;  %v1668_v16 = vperm.slane %v1662_v28, %v19327_v57 }
 0x349   : > { %v1652_v21 = vsel %vm753_vm2, %v1637_v30, %v1651_v45  ;;  %v1781_v17 = vrot.slane %v1772_v58, 4  ;;  %v1784_v48 = vsel %vm753_vm2, 0.0, %v1783_v19  ;;  %v1675_v20 = vrot.slane %v1656_v1, 4 }
 0x34a   : > { %4615 = vmax.xlane.f32.xlu2 %v4614_v13  ;;  %v20085_v18 = vperm.slane %v1176_v43, %v19327_v57  ;;  %v1673_v29 = vrot.slane %v1668_v16, 4  ;;  %v4020_v51 = vsub.f32 %v20061_v59, %v4019_v3  ;;  %v20088_v12 = vand.u32 4294901760, %v4147_v56 }
 0x34b   : > { %v20091_v49 = vperm.slane %v1164_v15, %v19327_v57  ;;  %v1778_v54 = vsel %vm753_vm2, 0.0, %v1777_v53  ;;  %v1953_v27 = vsel %vm753_vm2, %v1779_v14, %v1760_v36  ;;  %v1958_v37 = vrot.slane %v1780_v44, 4 }
 0x34c   : > { %v1660_v4 = vperm.slane %v1652_v21, %v19327_v57  ;;  %v1969_v30 = vrot.slane %v1784_v48, 4  ;;  %v1674_v32 = vsel %vm753_vm2, %v1673_v29, %v1656_v1  ;;  %v1676_v31 = vsel %vm753_vm2, %v1668_v16, %v1675_v20 }
 0x34d   : > { %v1664_v5 = vsel %vm753_vm2, %v1648_v10, %v1663_v60  ;;  %v1782_v8 = vsel %vm753_vm2, 0.0, %v1781_v17  ;;  %v3998_v22 = vsel %vm2169_vm3, %v1674_v32, 0  ;;  %v4150_v41 = vsel %vm2169_vm3, %v1676_v31, 0 }
 0x34e   : > { %v1189_v55 = vrot.slane %v20085_v18, 4  ;;  %v20104_v6 = vperm.slane %v1953_v27, %v19312_v42  ;;  %v1964_v24 = vsel %vm753_vm2, %v1783_v19, %v1772_v58  ;;  %v4015_v33 = vand.u32 4294901760, %v3998_v22 }
 0x34f   : > { %v20108_v36 = vsub.f32 %v4147_v56, %v20088_v12  ;;  %v1959_v13 = vsel %vm753_vm2, %v1958_v37, %v1778_v54  ;;  %v4167_v10 = vand.u32 4294901760, %v4150_v41  ;;  %v1672_v0 = vperm.slane %v1664_v5, %v19327_v57 }
 0x350   : > { %v1679_v7 = vrot.slane %v1660_v4, 4  ;;  %v1970_v14 = vsel %vm753_vm2, %v1969_v30, %v1782_v8  ;;  %4016 = vmatpush.xpose.msra.mxu0 %v4015_v33  ;;  %4092 = vmatpush.xpose.msra.mxu3 %v4015_v33  ;;  %v4042_v45 = vsub.f32 %v3998_v22, %v4015_v33  ;;  %v4021_v50 = vand.u32 4294901760, %v4020_v51 }
 0x351   : > { %v4194_v38 = vsub.f32 %v4150_v41, %v4167_v10  ;;  %v1677_v28 = vrot.slane %v1672_v0, 4  ;;  %v1968_v19 = vperm.slane %v1964_v24, %v19312_v42  ;;  %v1963_v43 = vperm.slane %v1959_v13, %v19312_v42 }
 0x352   : > { %v1680_v58 = vsel %vm753_vm2, %v1672_v0, %v1679_v7  ;;  %v1977_v53 = vrot.slane %v20104_v6, 4  ;;  %4069 = vmatpush.xpose.msra.mxu2 %v4042_v45  ;;  %v4043_v1 = vand.u32 4294901760, %v4042_v45  ;;  %v4171_v44 = vand.u32 4294901760, %v20108_v36 }
 0x353   : > { %v4454_v56 = vsel %vm2169_vm3, %v1680_v58, 0  ;;  %4022 = vmatmul.f32.vlgmr.msra.gmra.mxu0 %v4021_v50  ;;  %4096 = vmatmul.f32.vlgmr.msra.gmra.mxu3 %v4019_v3  ;;  %v4195_v15 = vand.u32 4294901760, %v4194_v38  ;;  %v1678_v60 = vsel %vm753_vm2, %v1677_v28, %v1660_v4  ;;  %v1190_v16 = vsel %vm753_vm2, %v1189_v55, %v20091_v49 }
 0x354   : > { %4118 = vmatpush.xpose.msrb.mxu0 %v4043_v1  ;;  %v4044_v21 = vsub.f32 %v4042_v45, %v4043_v1  ;;  %v4302_v17 = vsel %vm2169_vm3, %v1678_v60, 0  ;;  %v20123_v48 = vand.u32 4294901760, %v4454_v56  ;;  %v1974_v20 = vperm.slane %v1970_v14, %v19312_v42  ;;  %v704_v45 = vld [vmem:[#allocation8 + $0x40] sm:$0xff] }
 0x355   : > { %4072 = vmatmul.f32.vlgmr.msra.gmra.mxu2 %v20061_v59  ;;  %v4196_v3 = vsub.f32 %v4194_v38, %v4195_v15  ;;  %v20127_v29 = vand.u32 4294901760, %v4302_v17  ;;  %v1989_v51 = vrot.slane %v1968_v19, 4  ;;  %v4299_v27 = vsel %vm2169_vm3, %v1190_v16, 0 }
 0x356   : > { %4168 = vmatpush.xpose.msrb.mxu2 %v4167_v10  ;;  %v4045_v54 = vand.u32 4294901760, %v4044_v21  ;;  %v1978_v37 = vsel %vm753_vm2, %v1963_v43, %v1977_v53  ;;  %v4172_v30 = vsub.f32 %v20108_v36, %v4171_v44  ;;  %v20137_v5 = vsub.f32 %v4454_v56, %v20123_v48 }
 0x357   : > { %v4197_v4 = vand.u32 4294901760, %v4196_v3  ;;  %v4346_v32 = vsub.f32 %v4302_v17, %v20127_v29  ;;  %v1986_v59 = vperm.slane %v1978_v37, %v19327_v57  ;;  %v1987_v8 = vrot.slane %v1974_v20, 4  ;;  %v20168_v3 = vpop.permute.xlu1 %1683 }
 0x358   : > { %4221 = vmatpush.xpose.msra.mxu0 %v4194_v38  ;;  %4046 = vmatpush.xpose.msra.mxu1 %v4045_v54  ;;  %v1990_v22 = vsel %vm753_vm2, %v1974_v20, %v1989_v51  ;;  %v20140_v41 = vand.u32 4294901760, %v4299_v27  ;;  %v1975_v55 = vrot.slane %v1963_v43, 4  ;;  %v1191_v24 = vrot.slane %v20091_v49, 4 }
 0x359   : > { %4198 = vmatpush.xpose.msrb.mxu3 %v4197_v4  ;;  %v1998_v13 = vperm.slane %v1990_v22, %v19327_v57  ;;  %v4347_v0 = vand.u32 4294901760, %v4346_v32  ;;  %v2005_v7 = vrot.slane %v1986_v59, 4  ;;  %v4173_v14 = vand.u32 4294901760, %v4172_v30 }
 0x35a   : > { %4270 = vmatpush.xpose.msra.mxu2 %v4195_v15  ;;  %v1988_v50 = vsel %vm753_vm2, %v1987_v8, %v1968_v19  ;;  %v4322_v28 = vsub.f32 %v4299_v27, %v20140_v41  ;;  %v1976_v58 = vsel %vm753_vm2, %v1975_v55, %v20104_v6  ;;  %v1192_v43 = vsel %vm753_vm2, %v20085_v18, %v1191_v24 }
 0x35b   : > { %v3415_v31 = vpop.f32.mrf.mxu0  ;;  %4048 = vmatmul.f32.vlgmr.msra.gmra.mxu1 %v20044_v26  ;;  %4120 = vmatmul.f32.vlgmr.msrb.gmra.mxu0 %v20044_v26  ;;  %v2003_v38 = vrot.slane %v1998_v13, 4  ;;  %v20150_v49 = vsel %vm753_vm2, %v1998_v13, %v2005_v7  ;;  %v4348_v19 = vsub.f32 %v4346_v32, %v4347_v0  ;;  %v1994_v15 = vperm.slane %v1988_v50, %v19327_v57 }
 0x35c   : > { %4140 = vmatpush.xpose.msrb.mxu1 %v4015_v33  ;;  %4320 = vmatpush.xpose.msrb.mxu0 %v20127_v29  ;;  %v4499_v33 = vand.u32 4294901760, %v20137_v5  ;;  %v4451_v18 = vsel %vm2169_vm3, %v1192_v43, 0  ;;  %v4323_v17 = vand.u32 4294901760, %v4322_v28  ;;  %v1982_v20 = vperm.slane %v1976_v58, %v19327_v57 }
 0x35d   : > { %4292 = vmatpush.xpose.msra.mxu3 %v4167_v10  ;;  %4174 = vmatmul.f32.vlgmr.msrb.gmra.mxu2 %v4173_v14  ;;  %v20160_v53 = vsel %vm753_vm2, %v2003_v38, %v1986_v59  ;;  %v4349_v51 = vand.u32 4294901760, %v4348_v19  ;;  %v1999_v27 = vrot.slane %v1994_v15, 4  ;;  %v20172_v37 = vand.u32 4294901760, %v4451_v18 }
 0x35e   : > { %4200 = vmatmul.f32.vlgmr.msrb.gmra.mxu3 %v20088_v12  ;;  %4373 = vmatpush.xpose.msrb.mxu2 %v4346_v32  ;;  %v4500_v6 = vsub.f32 %v20137_v5, %v4499_v33  ;;  %v4324_v32 = vsub.f32 %v4322_v28, %v4323_v17  ;;  %v2001_v59 = vrot.slane %v1982_v20, 4 }
 0x35f   : > { %v2000_v55 = vsel %vm753_vm2, %v1999_v27, %v1982_v20  ;;  %v20179_v24 = vsub.f32 %v4451_v18, %v20172_v37  ;;  %v4604_v50 = vpop.xlane.xlu1 %4603 }
 0x360   : > { %4244 = vmatpush.xpose.msra.mxu1 %v4167_v10  ;;  %v3416_v10 = vadd.f32 %v3415_v31, %v704_v45  ;;  %v4501_v4 = vand.u32 4294901760, %v4500_v6  ;;  %v705_v31 = vld [vmem:[#allocation8 + $0x48] sm:$0xff]  ;;  %v2002_v45 = vsel %vm753_vm2, %v1994_v15, %v2001_v59  ;;  %v20184_v58 = vand.u32 4294901760, %v2000_v55 }
 0x361   : > { %4396 = vmatpush.xpose.msrb.mxu3 %v20127_v29  ;;  %v3489_v60 = vpop.f32.mrf.mxu3  ;;  %v4475_v43 = vand.u32 4294901760, %v20179_v24 }
 0x363   : > { %v3441_v1 = vpop.f32.mrf.mxu1  ;;  %v3465_v56 = vpop.f32.mrf.mxu2  ;;  %4142 = vmatmul.f32.vlgmr.msrb.gmra.mxu1 %v20044_v26  ;;  %4224 = vmatmul.f32.vlgmr.msra.gmra.mxu0 %v20108_v36 }
 0x364   : > { %v3442_v16 = vadd.f32 %v3441_v1, %v3416_v10  ;;  %v3513_v21 = vpop.f32.mrf.mxu0  ;;  %4350 = vmatpush.xpose.msrb.mxu1 %v4349_v51  ;;  %4422 = vmatpush.xpose.msra.mxu0 %v4347_v0  ;;  %v20189_v10 = vpop.permute.xlu2 %1691  ;;  %v20195_v1 = vand.u32 4294901760, %v2002_v45 }
 0x365   : > { %4272 = vmatmul.f32.vlgmr.msra.gmra.mxu2 %v20088_v12 }
 0x366   : > { %v3466_v54 = vadd.f32 %v3465_v56, %v3442_v16  ;;  %4294 = vmatmul.f32.vlgmr.msra.gmra.mxu3 %v20088_v12  ;;  %4472 = vmatpush.xpose.msra.mxu2 %v20123_v48  ;;  %v4325_v12 = vand.u32 4294901760, %v4324_v32  ;;  %v4650_v56 = vsub.f32 %v19682_v40, %v4604_v50  ;;  %v20206_v40 = vsub.f32 %v2002_v45, %v20195_v1  ;;  %v707_v50 = vld [vmem:[#allocation8 + $0x58] sm:$0xff] }
 0x367   : > { %4502 = vmatpush.xpose.msra.mxu3 %v4501_v4 }
 0x368   : > { %v3490_v30 = vadd.f32 %v3489_v60, %v3466_v54  ;;  %v5181_v54 = vand.u32 4294901760, %v20206_v40 }
 0x36a   : > { %v3514_v26 = vadd.f32 %v3513_v21, %v3490_v30 }
 0x36b   : > { %v3535_v8 = vpop.f32.mrf.mxu1  ;;  %v3567_v22 = vpop.f32.mrf.mxu2  ;;  %4248 = vmatmul.f32.vlgmr.msra.gmra.mxu1 %v4171_v44  ;;  %4326 = vmatmul.f32.vlgmr.msrb.gmra.mxu0 %v4325_v12  ;;  %v5031_v44 = vsub.f32 %v2000_v55, %v20184_v58 }
 0x36c   : > { %v20181_v13 = vadd.f32 %v3535_v8, %v3514_v26  ;;  %v3568_v0 = vadd.f32 %v3567_v22, %v705_v31  ;;  %v3593_v7 = vpop.f32.mrf.mxu3  ;;  %v3617_v14 = vpop.f32.mrf.mxu0  ;;  %4444 = vmatpush.xpose.msra.mxu1 %v20127_v29  ;;  %4525 = vmatpush.xpose.msrb.mxu0 %v20137_v5  ;;  %v4476_v29 = vsub.f32 %v20179_v24, %v4475_v43 }
 0x36d   : > { %4376 = vmatmul.f32.vlgmr.msrb.gmra.mxu2 %v4322_v28  ;;  %v4666_v28 = vmul.f32 1.442695, %v4650_v56  ;;  %v5032_v21 = vand.u32 4294901760, %v5031_v44  ;;  %v5182_v31 = vsub.f32 %v20206_v40, %v5181_v54 }
 0x36e   : > { %v3594_v38 = vadd.f32 %v3593_v7, %v3568_v0  ;;  %v4626_v19 = vsel %vm2169_vm3, %v20181_v13, -inf  ;;  %4400 = vmatmul.f32.vlgmr.msrb.gmra.mxu3 %v4323_v17  ;;  %4574 = vmatpush.xpose.msrb.mxu2 %v4499_v33  ;;  %v4477_v18 = vand.u32 4294901760, %v4476_v29  ;;  %v706_v17 = vld [vmem:[#allocation8 + $0x50] sm:$0xff] }
 0x36f   : > { %4596 = vmatpush.xpose.msrb.mxu3 %v20123_v48  ;;  %4627 = vmax.xlane.f32.xlu0 %v4626_v19  ;;  %18569 = vpow2.f32 %v4666_v28  ;;  %v5033_v4 = vsub.f32 %v5031_v44, %v5032_v21 }
 0x370   : > { %v3618_v36 = vadd.f32 %v3617_v14, %v3594_v38  ;;  %v5183_v14 = vand.u32 4294901760, %v5182_v31 }
 0x371   : > { %v5034_v22 = vand.u32 4294901760, %v5033_v4 }
 0x373   : > { %v3641_v15 = vpop.f32.mrf.mxu1  ;;  %v3665_v60 = vpop.f32.mrf.mxu2  ;;  %4352 = vmatmul.f32.vlgmr.msrb.gmra.mxu1 %v20140_v41  ;;  %4424 = vmatmul.f32.vlgmr.msra.gmra.mxu0 %v20140_v41 }
 0x374   : > { %v3642_v6 = vadd.f32 %v3641_v15, %v3618_v36  ;;  %v3687_v16 = vpop.f32.mrf.mxu3  ;;  %v3719_v5 = vpop.f32.mrf.mxu0  ;;  %4548 = vmatpush.xpose.msrb.mxu1 %v20123_v48  ;;  %5005 = vmatpush.msra.mxu0 %v20184_v58 }
 0x375   : > { %v4607_v51 = vpop.xlane.xlu2 %4606  ;;  %4478 = vmatmul.f32.vlgmr.msra.gmra.mxu2 %v4477_v18  ;;  %v3720_v27 = vadd.f32 %v3719_v5, %v706_v17  ;;  %v20223_v0 = vpop.eup %18569 }
 0x376   : > { %v3666_v33 = vadd.f32 %v3665_v60, %v3642_v6  ;;  %4504 = vmatmul.f32.vlgmr.msra.gmra.mxu3 %v20172_v37  ;;  %5058 = vmatpush.msra.mxu2 %v5031_v44  ;;  %v4651_v8 = vsub.f32 %v19904_v25, %v4607_v51 }
 0x377   : > { %5081 = vmatpush.msra.mxu3 %v20184_v58 }
 0x378   : > { %v20212_v20 = vadd.f32 %v3687_v16, %v3666_v33  ;;  %v4668_v45 = vmul.f32 1.442695, %v4651_v8 }
 0x37a   : > { %v4629_v30 = vsel %vm2169_vm3, %v20212_v20, -inf  ;;  %18571 = vpow2.f32 %v4668_v45 }
 0x37b   : > { %v3745_v48 = vpop.f32.mrf.mxu1  ;;  %v3769_v32 = vpop.f32.mrf.mxu2  ;;  %4630 = vmax.xlane.f32.xlu0 %v4629_v30  ;;  %4446 = vmatmul.f32.vlgmr.msra.gmra.mxu1 %v20140_v41  ;;  %v4698_v41 = vsel %vm2169_vm3, %v20223_v0, 0.0 }
 0x37c   : > { %v3746_v59 = vadd.f32 %v3745_v48, %v3720_v27  ;;  %v3793_v26 = vpop.f32.mrf.mxu3  ;;  %4528 = vmatmul.f32.vlgmr.msrb.gmra.mxu0 %v20179_v24  ;;  %v3817_v7 = vpop.f32.mrf.mxu0  ;;  %5035 = vmatpush.msra.mxu1 %v5034_v22 }
 0x37d   : > { %5107 = vmatpush.msrb.mxu0 %v5032_v21  ;;  %4576 = vmatmul.f32.vlgmr.msrb.gmra.mxu2 %v20172_v37  ;;  %v4613_v38 = vpop.xlane.xlu2 %4612  ;;  %v20256_v48 = vpop.permute.xlu0 %1699 }
 0x37e   : > { %v3770_v55 = vadd.f32 %v3769_v32, %v3746_v59  ;;  %4598 = vmatmul.f32.vlgmr.msrb.gmra.mxu3 %v20172_v37  ;;  %5154 = vmatpush.msrb.mxu2 %v20195_v1  ;;  %v4653_v29 = vsub.f32 %v19925_v9, %v4613_v38 }
 0x37f   : > { %5184 = vmatpush.msrb.mxu3 %v5183_v14  ;;  %v20267_v14 = vpop.permute.xlu1 %1707 }
 0x380   : > { %v3794_v12 = vadd.f32 %v3793_v26, %v3770_v55  ;;  %v4672_v6 = vmul.f32 1.442695, %v4653_v29  ;;  %v20240_v5 = vpop.eup %18571 }
 0x381   : > { %v4701_v17 = vsel %vm2169_vm3, %v20240_v5, 0.0 }
 0x382   : > { %v3818_v25 = vadd.f32 %v3817_v7, %v3794_v12  ;;  %18573 = vpow2.f32 %v4672_v6  ;;  %v708_v7 = vld [vmem:[#allocation8 + $0x60] sm:$0xff] }
 0x383   : > { %v3839_v19 = vpop.f32.mrf.mxu1  ;;  %v3871_v56 = vpop.f32.mrf.mxu2  ;;  %4699 = vadd.xlane.f32.xlu0 %v4698_v41  ;;  %4552 = vmatmul.f32.vlgmr.msrb.gmra.mxu1 %v4475_v43 }
 0x384   : > { %v20232_v36 = vadd.f32 %v3839_v19, %v3818_v25  ;;  %v3872_v44 = vadd.f32 %v3871_v56, %v707_v50  ;;  %v3897_v15 = vpop.f32.mrf.mxu3  ;;  %5129 = vmatpush.msrb.mxu1 %v20184_v58  ;;  %v3921_v16 = vpop.f32.mrf.mxu0 }
 0x385   : > { %v20254_v4 = vpop.permute.xlu2 %1693  ;;  %v20261_v26 = vpop.permute.xlu0 %1685 }
 0x386   : > { %v3898_v37 = vadd.f32 %v3897_v15, %v3872_v44  ;;  %v4632_v60 = vsel %vm2169_vm3, %v20232_v36, -inf  ;;  %v709_v15 = vld [vmem:[#allocation8 + $0x68] sm:$0xff] }
 0x387   : > { %4633 = vmax.xlane.f32.xlu2 %v4632_v60 }
 0x388   : > { %v3922_v28 = vadd.f32 %v3921_v16, %v3898_v37  ;;  %v20248_v43 = vpop.eup %18573  ;;  %v4619_v37 = vpop.xlane.xlu1 %4618 }
 0x389   : > { %v4707_v27 = vsel %vm2169_vm3, %v20248_v43, 0.0 }
 0x38b   : > { %v3945_v33 = vpop.f32.mrf.mxu1  ;;  %v3969_v9 = vpop.f32.mrf.mxu2 }
 0x38c   : > { %v3946_v21 = vadd.f32 %v3945_v33, %v3922_v28  ;;  %v3991_v51 = vpop.f32.mrf.mxu3 }
 0x38d   : > { %v4610_v22 = vpop.xlane.xlu0 %4609 }
 0x38e   : > { %v3970_v18 = vadd.f32 %v3969_v9, %v3946_v21  ;;  %v4652_v41 = vsub.f32 %v19913_v47, %v4610_v22  ;;  %v4655_v9 = vsub.f32 %v19945_v11, %v4619_v37 }
 0x38f   : > { %4702 = vadd.xlane.f32.xlu2 %v4701_v17 }
 0x390   : > { %v20244_v24 = vadd.f32 %v3991_v51, %v3970_v18  ;;  %v4670_v29 = vmul.f32 1.442695, %v4652_v41 }
 0x392   : > { %v4635_v58 = vsel %vm2169_vm3, %v20244_v24, -inf }
 0x393   : > { %4636 = vmax.xlane.f32.xlu1 %v4635_v58  ;;  %v4676_v58 = vmul.f32 1.442695, %v4655_v9 }
 0x397   : > { %4708 = vadd.xlane.f32.xlu2 %v4707_v27  ;;  %1709 = vrot.lane.b32.xlu0 %v19575_v61, %s18995_s28  ;;  %v20265_v61 = vpop.xlane.xlu0 %4621 }
 0x39f   : > { %v4625_v19 = vpop.xlane.xlu0 %4624 }
 0x3a0   : > { %v4657_v27 = vsub.f32 %v19975_v46, %v4625_v19 }
 0x3bd   : > { %v4616_v30 = vpop.xlane.xlu2 %4615 }
 0x3be   : > { %v4654_v32 = vsub.f32 %v20050_v23, %v4616_v30 }
 0x3c0   : > { %v4674_v31 = vmul.f32 1.442695, %v4654_v32 }
 0x3c2   : > { %18575 = vpow2.f32 %v4674_v31 }
 0x3c3   : > { %18577 = vpow2.f32 %v4670_v29 }
 0x3c4   : > { %18579 = vpow2.f32 %v4676_v58 }
 0x3c8   : > { %v20259_v59 = vpop.eup %18575 }
 0x3c9   : > { %v4710_v8 = vsel %vm2169_vm3, %v20259_v59, 0.0  ;;  %v20276_v32 = vpop.eup %18577 }
 0x3ca   : > { %4711 = vadd.xlane.f32.xlu2 %v4710_v8  ;;  %v20286_v41 = vpop.eup %18579 }
 0x3d0   : > { %v4023_v55 = vpop.f32.mrf.mxu0 }
 0x3d1   : > { %v4024_v12 = vadd.f32 %v4023_v55, %v708_v7  ;;  %v4680_v55 = vmul.f32 1.442695, %v4657_v27 }
 0x3d3   : > { %18581 = vpow2.f32 %v4680_v55 }
 0x3d6   : > { %v4097_v50 = vpop.f32.mrf.mxu3 }
 0x3d8   : > { %v4049_v45 = vpop.f32.mrf.mxu1  ;;  %v4073_v23 = vpop.f32.mrf.mxu2 }
 0x3d9   : > { %v4050_v25 = vadd.f32 %v4049_v45, %v4024_v12  ;;  %v4121_v38 = vpop.f32.mrf.mxu0  ;;  %v4704_v45 = vsel %vm2169_vm3, %v20276_v32, 0.0 }
 0x3db   : > { %v4074_v56 = vadd.f32 %v4073_v23, %v4050_v25  ;;  %v710_v23 = vld [vmem:[#allocation8 + $0x70] sm:$0xff] }
 0x3dd   : > { %v4098_v44 = vadd.f32 %v4097_v50, %v4074_v56 }
 0x3df   : > { %v4122_v60 = vadd.f32 %v4121_v38, %v4098_v44  ;;  %v4656_v44 = vsub.f32 %v19959_v35, %v20265_v61 }
 0x3e0   : > { %v4143_v6 = vpop.f32.mrf.mxu1  ;;  %v4175_v16 = vpop.f32.mrf.mxu2 }
 0x3e1   : > { %v20270_v28 = vadd.f32 %v4143_v6, %v4122_v60  ;;  %v4176_v33 = vadd.f32 %v4175_v16, %v709_v15  ;;  %v4201_v21 = vpop.f32.mrf.mxu3  ;;  %v4225_v18 = vpop.f32.mrf.mxu0  ;;  %v4713_v60 = vsel %vm2169_vm3, %v20286_v41, 0.0 }
 0x3e2   : > { %v4628_v17 = vpop.xlane.xlu0 %4627  ;;  %v20292_v6 = vpop.eup %18581 }
 0x3e3   : > { %v4202_v51 = vadd.f32 %v4201_v21, %v4176_v33  ;;  %v4638_v47 = vsel %vm2169_vm3, %v20270_v28, -inf  ;;  %v4678_v21 = vmul.f32 1.442695, %v4656_v44  ;;  %v4719_v35 = vsel %vm2169_vm3, %v20292_v6, 0.0 }
 0x3e4   : > { %4639 = vmax.xlane.f32.xlu1 %v4638_v47  ;;  %v4658_v27 = vsub.f32 %v20181_v13, %v4628_v17  ;;  %v20309_v44 = vand.u32 4294901760, %v20160_v53 }
 0x3e5   : > { %v4226_v30 = vadd.f32 %v4225_v18, %v4202_v51 }
 0x3e6   : > { %v4682_v55 = vmul.f32 1.442695, %v4658_v27 }
 0x3e8   : > { %v4249_v31 = vpop.f32.mrf.mxu1  ;;  %v4273_v8 = vpop.f32.mrf.mxu2 }
 0x3e9   : > { %v4250_v22 = vadd.f32 %v4249_v31, %v4226_v30  ;;  %v4295_v7 = vpop.f32.mrf.mxu3  ;;  %v4327_v50 = vpop.f32.mrf.mxu0 }
 0x3ea   : > { %v4328_v46 = vadd.f32 %v4327_v50, %v710_v23 }
 0x3eb   : > { %v4274_v12 = vadd.f32 %v4273_v8, %v4250_v22 }
 0x3ec   : > { %4705 = vadd.xlane.f32.xlu1 %v4704_v45 }
 0x3ed   : > { %v20282_v25 = vadd.f32 %v4295_v7, %v4274_v12 }
 0x3ee   : > { %v20278_v11 = vpop.xlane.xlu0 %4630 }
 0x3ef   : > { %v4641_v38 = vsel %vm2169_vm3, %v20282_v25, -inf }
 0x3f0   : > { %v4353_v19 = vpop.f32.mrf.mxu1  ;;  %4642 = vmax.xlane.f32.xlu2 %v4641_v38  ;;  %v4377_v29 = vpop.f32.mrf.mxu2 }
 0x3f1   : > { %v4354_v56 = vadd.f32 %v4353_v19, %v4328_v46  ;;  %v4401_v16 = vpop.f32.mrf.mxu3  ;;  %v4425_v9 = vpop.f32.mrf.mxu0 }
 0x3f3   : > { %v4378_v37 = vadd.f32 %v4377_v29, %v4354_v56 }
 0x3f4   : > { %4714 = vadd.xlane.f32.xlu1 %v4713_v60 }
 0x3f5   : > { %v4402_v33 = vadd.f32 %v4401_v16, %v4378_v37 }
 0x3f6   : > { %v4700_v15 = vpop.xlane.xlu0 %4699 }
 0x3f7   : > { %18583 = vrcp.f32 %v4700_v15  ;;  %v4426_v51 = vadd.f32 %v4425_v9, %v4402_v33  ;;  %v4757_v22 = vand.u32 2147483648, %v4700_v15  ;;  %v4755_v12 = vand.u32 2147483647, %v4700_v15 }
 0x3f8   : > { %v4447_v61 = vpop.f32.mrf.mxu1  ;;  %4720 = vadd.xlane.f32.xlu2 %v4719_v35  ;;  %18585 = vpow2.f32 %v4678_v21  ;;  %vm4751_vm5 = vweird.f32 %v4700_v15  ;;  %v20318_v9 = vsub.f32 %v20160_v53, %v20309_v44 }
 0x3f9   : > { %v20298_v58 = vadd.f32 %v4447_v61, %v4426_v51  ;;  %v4758_v46 = vor.u32 1.1754944e-38, %v4757_v22  ;;  %vm4756_vm7 = vcmp.eq.f32.partialorder %v4755_v12, 8.507059e+37  ;;  %v20335_v12 = vand.u32 4294901760, %v20150_v49 }
 0x3fa   : > { %v20294_v18 = vpop.xlane.xlu2 %4633 }
 0x3fb   : > { %v4644_v31 = vsel %vm2169_vm3, %v20298_v58, -inf }
 0x3fc   : > { %4645 = vmax.xlane.f32.xlu0 %v4644_v31 }
 0x3fd   : > { %v18584_v47 = vpop.eup %18583 }
 0x3fe   : > { %v4747_v30 = vmul.f32 %v18584_v47, %v4700_v15  ;;  %vm4752_vm4 = vweird.f32 %v18584_v47  ;;  %v20303_v23 = vpop.eup %18585 }
 0x3ff   : > { %vm4753_vm6 = vmor %vm4751_vm5, %vm4752_vm4  ;;  %v4716_v19 = vsel %vm2169_vm3, %v20303_v23, 0.0 }
 0x400   : > { %v4748_v8 = vsub.f32 1.0, %v4747_v30  ;;  %v5330_v30 = vand.u32 4294901760, %v20318_v9 }
 0x402   : > { %v4749_v7 = vmul.f32 %v18584_v47, %v4748_v8  ;;  %v4703_v45 = vpop.xlane.xlu2 %4702 }
 0x403   : > { %18587 = vrcp.f32 %v4703_v45  ;;  %vm4765_vm9 = vweird.f32 %v4703_v45 }
 0x404   : > { %v4750_v50 = vadd.f32 %v18584_v47, %v4749_v7  ;;  %18589 = vpow2.f32 %v4682_v55  ;;  %4717 = vadd.xlane.f32.xlu0 %v4716_v19 }
 0x406   : > { %v4754_v13 = vsel %vm4753_vm6, %v18584_v47, %v4750_v50  ;;  %v4637_v17 = vpop.xlane.xlu1 %4636 }
 0x407   : > { %v4759_v38 = vsel %vm4756_vm7, %v4758_v46, %v4754_v13  ;;  %v4661_v56 = vsub.f32 %v20244_v24, %v4637_v17  ;;  %v4771_v24 = vand.u32 2147483648, %v4703_v45  ;;  %v5331_v13 = vsub.f32 %v20318_v9, %v5330_v30 }
 0x408   : > { %v20312_v37 = vmul.f32 %v20223_v0, %v4759_v38  ;;  %v4769_v0 = vand.u32 2147483647, %v4703_v45 }
 0x409   : > { %v18588_v29 = vpop.eup %18587  ;;  %v4688_v15 = vmul.f32 1.442695, %v4661_v56  ;;  %v4772_v8 = vor.u32 1.1754944e-38, %v4771_v24 }
 0x40a   : > { %v4761_v60 = vmul.f32 %v18588_v29, %v4703_v45  ;;  %v4709_v16 = vpop.xlane.xlu2 %4708  ;;  %v20314_v33 = vpop.eup %18589  ;;  %v4987_v51 = vsel %vm2169_vm3, %v20312_v37, 0  ;;  %vm4766_vm8 = vweird.f32 %v18588_v29  ;;  %vm4770_vm11 = vcmp.eq.f32.partialorder %v4769_v0, 8.507059e+37 }
 0x40b   : > { %18591 = vpow2.f32 %v4688_v15  ;;  %v20322_v61 = vand.u32 4294901760, %v4987_v51  ;;  %v4722_v47 = vsel %vm2169_vm3, %v20314_v33, 0.0  ;;  %vm4767_vm10 = vmor %vm4765_vm9, %vm4766_vm8  ;;  %v4799_v19 = vand.u32 2147483648, %v4709_v16 }
 0x40c   : > { %v4762_v21 = vsub.f32 1.0, %v4761_v60  ;;  %18593 = vrcp.f32 %v4709_v16  ;;  %4723 = vadd.xlane.f32.xlu0 %v4722_v47  ;;  %v5332_v60 = vand.u32 4294901760, %v5331_v13  ;;  %vm4793_vm13 = vweird.f32 %v4709_v16 }
 0x40d   : > { %5037 = vmatmul.f32.vlgmr.msra.gmra.mxu1 %v20322_v61  ;;  %v5007_v53 = vsub.f32 %v4987_v51, %v20322_v61  ;;  %1701 = vrot.lane.b32.xlu1 %v19531_v2, %s18995_s28  ;;  %v4800_v24 = vor.u32 1.1754944e-38, %v4799_v19 }
 0x40e   : > { %v4763_v35 = vmul.f32 %v18588_v29, %v4762_v21  ;;  %5230 = vmatpush.msra.mxu1 %v20195_v1 }
 0x40f   : > { %5061 = vmatmul.f32.vlgmr.msra.gmra.mxu2 %v5007_v53  ;;  %v5008_v7 = vand.u32 4294901760, %v5007_v53 }
 0x410   : > { %v4764_v27 = vadd.f32 %v18588_v29, %v4763_v35  ;;  %5256 = vmatpush.msra.mxu2 %v5181_v54  ;;  %1687 = vrot.lane.b32.xlu2 %v19411_v52, %s18995_s28 }
 0x411   : > { %v20329_v31 = vpop.eup %18591  ;;  %5085 = vmatmul.f32.vlgmr.msra.gmra.mxu3 %v5008_v7  ;;  %v5009_v2 = vsub.f32 %v5007_v53, %v5008_v7  ;;  %v4479_v7 = vpop.f32.mrf.mxu2 }
 0x412   : > { %v18594_v22 = vpop.eup %18593  ;;  %v4768_v55 = vsel %vm4767_vm10, %v18588_v29, %v4764_v27  ;;  %5278 = vmatpush.msra.mxu3 %v20195_v1  ;;  %v4731_v38 = vsel %vm2169_vm3, %v20329_v31, 0.0  ;;  %v4797_v29 = vand.u32 2147483647, %v4709_v16 }
 0x413   : > { %v4773_v45 = vsel %vm4770_vm11, %v4772_v8, %v4768_v55  ;;  %v4789_v50 = vmul.f32 %v18594_v22, %v4709_v16  ;;  %v5010_v56 = vand.u32 4294901760, %v5009_v2  ;;  %vm4794_vm12 = vweird.f32 %v18594_v22  ;;  %v711_v55 = vld [vmem:[#allocation8 + $0x78] sm:$0xff]  ;;  %v4505_v2 = vpop.f32.mrf.mxu3 }
 0x414   : > { %v4971_v46 = vmul.f32 %v20240_v5, %v4773_v45  ;;  %v20351_v5 = vsub.f32 %v20150_v49, %v20335_v12  ;;  %4732 = vadd.xlane.f32.xlu0 %v4731_v38  ;;  %vm4795_vm14 = vmor %vm4793_vm13, %vm4794_vm12  ;;  %vm4798_vm15 = vcmp.eq.f32.partialorder %v4797_v29, 8.507059e+37  ;;  %v1787_v38 = vrot.slane %v20168_v3, 4 }
 0x415   : > { %v4790_v17 = vsub.f32 1.0, %v4789_v50  ;;  %5011 = vmatmul.f32.vlgmr.msra.gmra.mxu0 %v5010_v56  ;;  %5131 = vmatmul.f32.vlgmr.msrb.gmra.mxu1 %v20322_v61  ;;  %v4480_v50 = vadd.f32 %v4479_v7, %v711_v55 }
 0x416   : > { %v5136_v54 = vsel %vm2169_vm3, %v4971_v46, 0  ;;  %5207 = vmatpush.msra.mxu0 %v20206_v40  ;;  %5333 = vmatpush.msrb.mxu1 %v5332_v60  ;;  %v5479_v35 = vand.u32 4294901760, %v20351_v5  ;;  %v7886_v47 = vrot.slane %v4971_v46, 4 }
 0x417   : > { %v4791_v52 = vmul.f32 %v18594_v22, %v4790_v17  ;;  %v5155_v15 = vand.u32 4294901760, %v5136_v54  ;;  %v4506_v13 = vadd.f32 %v4505_v2, %v4480_v50  ;;  %v4553_v17 = vpop.f32.mrf.mxu1 }
 0x419   : > { %v4792_v21 = vadd.f32 %v18594_v22, %v4791_v52  ;;  %v5156_v1 = vsub.f32 %v5136_v54, %v5155_v15  ;;  %5186 = vmatmul.f32.vlgmr.msrb.gmra.mxu3 %v5155_v15  ;;  %v1785_v54 = vrot.slane %v20256_v48, 4 }
 0x41a   : > { %5379 = vmatpush.msrb.mxu3 %v20309_v44 }
 0x41b   : > { %v4796_v51 = vsel %vm4795_vm14, %v18594_v22, %v4792_v21  ;;  %v5157_v49 = vand.u32 4294901760, %v5156_v1  ;;  %v5480_v22 = vsub.f32 %v20351_v5, %v5479_v35  ;;  %v4599_v60 = vpop.f32.mrf.mxu3 }
 0x41c   : > { %v4801_v0 = vsel %vm4798_vm15, %v4800_v24, %v4796_v51 }
 0x41d   : > { %v20357_v27 = vmul.f32 %v20248_v43, %v4801_v0  ;;  %v5158_v16 = vsub.f32 %v5156_v1, %v5157_v49  ;;  %5109 = vmatmul.f32.vlgmr.msrb.gmra.mxu0 %v20322_v61  ;;  %5234 = vmatmul.f32.vlgmr.msra.gmra.mxu1 %v5157_v49  ;;  %v5481_v45 = vand.u32 4294901760, %v5480_v22  ;;  %v4529_v61 = vpop.f32.mrf.mxu0 }
 0x41e   : > { %5303 = vmatpush.msrb.mxu0 %v20309_v44  ;;  %5427 = vmatpush.msra.mxu1 %v20309_v44  ;;  %v4530_v44 = vadd.f32 %v4529_v61, %v4506_v13 }
 0x41f   : > { %v7884_v40 = vrot.slane %v20357_v27, 4  ;;  %v20363_v53 = vsel %vm753_vm2, %v20357_v27, %v7886_v47  ;;  %v5159_v8 = vand.u32 4294901760, %v5158_v16 }
 0x420   : > { %v4554_v19 = vadd.f32 %v4553_v17, %v4530_v44 }
 0x421   : > { %v20370_v43 = vsel %vm753_vm2, %v7884_v40, %v4971_v46  ;;  %5160 = vmatmul.f32.vlgmr.msrb.gmra.mxu2 %v5159_v8  ;;  %5280 = vmatmul.f32.vlgmr.msra.gmra.mxu3 %v5155_v15  ;;  %v4660_v46 = vsub.f32 %v20232_v36, %v20294_v18  ;;  %v4577_v36 = vpop.f32.mrf.mxu2  ;;  %v1799_v18 = vrot.slane %v20189_v10, 4 }
 0x422   : > { %5356 = vmatpush.msrb.mxu2 %v20318_v9  ;;  %5482 = vmatpush.msra.mxu3 %v5481_v45  ;;  %v1788_v9 = vsel %vm753_vm2, %v20256_v48, %v1787_v38  ;;  %v4578_v52 = vadd.f32 %v4577_v36, %v4554_v19 }
 0x423   : > { %v4686_v56 = vmul.f32 1.442695, %v4660_v46  ;;  %v1796_v29 = vperm.slane %v1788_v9, %v19312_v42  ;;  %v1800_v21 = vsel %vm753_vm2, %v20267_v14, %v1799_v18 }
 0x424   : > { %v1808_v51 = vperm.slane %v1800_v21, %v19312_v42 }
 0x425   : > { %5210 = vmatmul.f32.vlgmr.msra.gmra.mxu0 %v5156_v1  ;;  %18595 = vpow2.f32 %v4686_v56  ;;  %v20394_v1 = vadd.f32 %v4599_v60, %v4578_v52 }
 0x426   : > { %5405 = vmatpush.msra.mxu0 %v5330_v30  ;;  %v4659_v30 = vsub.f32 %v20212_v20, %v20278_v11  ;;  %v1823_v20 = vrot.slane %v1796_v29, 4  ;;  %v1797_v11 = vrot.slane %v20267_v14, 4  ;;  %v1821_v22 = vrot.slane %v1808_v51, 4 }
 0x427   : > { %v4647_v49 = vsel %vm2169_vm3, %v20394_v1, -inf }
 0x428   : > { %1703 = vrot.lane.b32.xlu0 %v19751_v34, %s18995_s28  ;;  %v1786_v34 = vsel %vm753_vm2, %v1785_v54, %v20168_v3  ;;  %v1798_v3 = vsel %vm753_vm2, %v1797_v11, %v20189_v10  ;;  %v1824_v47 = vsel %vm753_vm2, %v1808_v51, %v1823_v20  ;;  %v1822_v55 = vsel %vm753_vm2, %v1821_v22, %v1796_v29 }
 0x429   : > { %5258 = vmatmul.f32.vlgmr.msra.gmra.mxu2 %v5155_v15  ;;  %v4684_v15 = vmul.f32 1.442695, %v4659_v30  ;;  %v1792_v48 = vperm.slane %v1786_v34, %v19312_v42  ;;  %v1804_v14 = vperm.slane %v1798_v3, %v19312_v42  ;;  %v1832_v40 = vperm.slane %v1824_v47, %v19327_v57 }
 0x42a   : > { %5452 = vmatpush.msra.mxu2 %v20335_v12  ;;  %v1828_v13 = vperm.slane %v1822_v55, %v19327_v57 }
 0x42b   : > { %v20398_v24 = vpop.eup %18595  ;;  %18597 = vpow2.f32 %v4684_v15  ;;  %v1811_v0 = vrot.slane %v1792_v48, 4  ;;  %v1839_v45 = vrot.slane %v1832_v40, 4  ;;  %v1809_v2 = vrot.slane %v1804_v14, 4 }
 0x42c   : > { %v4728_v16 = vsel %vm2169_vm3, %v20398_v24, 0.0  ;;  %v1837_v38 = vrot.slane %v1828_v13, 4 }
 0x42d   : > { %v1812_v10 = vsel %vm753_vm2, %v1804_v14, %v1811_v0  ;;  %v1810_v61 = vsel %vm753_vm2, %v1809_v2, %v1792_v48  ;;  %v1840_v17 = vsel %vm753_vm2, 0.0, %v1839_v45  ;;  %v2018_v34 = vsel %vm753_vm2, %v1839_v45, %v1828_v13 }
 0x42e   : > { %v1820_v7 = vperm.slane %v1812_v10, %v19327_v57  ;;  %v1816_v44 = vperm.slane %v1810_v61, %v19327_v57  ;;  %v2023_v19 = vrot.slane %v1840_v17, 4  ;;  %v1838_v9 = vsel %vm753_vm2, 0.0, %v1837_v38 }
 0x42f   : > { %v2022_v21 = vperm.slane %v2018_v34, %v19312_v42  ;;  %v5434_v61 = vsel %vm2169_vm3, %v20357_v27, 0 }
 0x430   : > { %v1835_v46 = vrot.slane %v1820_v7, 4  ;;  %v1833_v54 = vrot.slane %v1816_v44, 4  ;;  %v2024_v36 = vsel %vm753_vm2, %v2023_v19, %v1838_v9 }
 0x431   : > { %v20410_v8 = vpop.eup %18597  ;;  %v2028_v52 = vperm.slane %v2024_v36, %v19312_v42  ;;  %v2043_v2 = vrot.slane %v2022_v21, 4 }
 0x432   : > { %v4725_v50 = vsel %vm2169_vm3, %v20410_v8, 0.0  ;;  %v1836_v56 = vsel %vm753_vm2, 0.0, %v1835_v46  ;;  %v1834_v18 = vsel %vm753_vm2, 0.0, %v1833_v54  ;;  %v2007_v48 = vsel %vm753_vm2, %v1835_v46, %v1816_v44  ;;  %v20458_v46 = vpop.permute.xlu0 %1709 }
 0x433   : > { %v2012_v30 = vrot.slane %v1836_v56, 4  ;;  %v2041_v60 = vrot.slane %v2028_v52, 4  ;;  %v2011_v51 = vperm.slane %v2007_v48, %v19312_v42  ;;  %v20465_v54 = vand.u32 4294901760, %v5434_v61 }
 0x434   : > { %v2044_v27 = vsel %vm753_vm2, %v2028_v52, %v2043_v2 }
 0x435   : > { %v2013_v29 = vsel %vm753_vm2, %v2012_v30, %v1834_v18  ;;  %v2042_v20 = vsel %vm753_vm2, %v2041_v60, %v2022_v21  ;;  %v2031_v19 = vrot.slane %v2011_v51, 4  ;;  %v20473_v48 = vsub.f32 %v5434_v61, %v20465_v54 }
 0x436   : > { %v2017_v15 = vperm.slane %v2013_v29, %v19312_v42 }
 0x437   : > { %4648 = vmax.xlane.f32.xlu1 %v4647_v49  ;;  %v2048_v49 = vperm.slane %v2042_v20, %v19327_v57 }
 0x438   : > { %v2029_v11 = vrot.slane %v2017_v15, 4  ;;  %v20476_v20 = vsel %vm753_vm2, %v2017_v15, %v2031_v19 }
 0x439   : > { %4729 = vadd.xlane.f32.xlu2 %v4728_v16  ;;  %v2053_v40 = vrot.slane %v2048_v49, 4 }
 0x43a   : > { %v2030_v47 = vsel %vm753_vm2, %v2029_v11, %v2011_v51 }
 0x43b   : > { %v2036_v14 = vperm.slane %v2030_v47, %v19327_v57 }
 0x43d   : > { %v20440_v16 = vpop.xlane.xlu2 %4711  ;;  %v2054_v10 = vsel %vm753_vm2, %v2053_v40, %v2036_v14  ;;  %v2055_v36 = vrot.slane %v2036_v14, 4  ;;  %v1855_v40 = vrot.slane %v20254_v4, 4 }
 0x43e   : > { %v4811_v2 = vand.u32 2147483647, %v20440_v16  ;;  %vm4807_vm7 = vweird.f32 %v20440_v16 }
 0x43f   : > { %4726 = vadd.xlane.f32.xlu1 %v4725_v50  ;;  %v20484_v51 = vsel %vm753_vm2, %v2048_v49, %v2055_v36  ;;  %v1853_v49 = vrot.slane %v20458_v46, 4 }
 0x440   : > { %vm20506_vm10 = vcmp.eq.f32.partialorder %v4811_v2, 8.507059e+37 }
 0x451   : > { %1711 = vrot.lane.b32.xlu2 %v19732_v39, %s18995_s28 }
 0x457   : > { %v4640_v3 = vpop.xlane.xlu1 %4639 }
 0x458   : > { %v4662_v0 = vsub.f32 %v20270_v28, %v4640_v3  ;;  %1695 = vrot.lane.b32.xlu1 %v19577_v62, %s18995_s28  ;;  %v20447_v28 = vand.u32 4294901760, %v2054_v10  ;;  %v20487_v3 = vperm.slane %v2044_v27, %v19327_v57  ;;  %v4813_v27 = vand.u32 2147483648, %v20440_v16 }
 0x45a   : > { %v4690_v39 = vmul.f32 1.442695, %v4662_v0  ;;  %v20454_v13 = vsub.f32 %v2054_v10, %v20447_v28 }
 0x45c   : > { %18599 = vpow2.f32 %v4690_v39  ;;  %v5628_v30 = vand.u32 4294901760, %v20454_v13 }
 0x45d   : > { %18601 = vrcp.f32 %v20440_v16 }
 0x45e   : > { %v20481_v52 = vsub.f32 %v20454_v13, %v5628_v30 }
 0x45f   : > { %v4706_v22 = vpop.xlane.xlu1 %4705 }
 0x460   : > { %18603 = vrcp.f32 %v4706_v22  ;;  %v4785_v9 = vand.u32 2147483648, %v4706_v22  ;;  %v4783_v34 = vand.u32 2147483647, %v4706_v22  ;;  %vm4779_vm4 = vweird.f32 %v4706_v22 }
 0x462   : > { %v20445_v55 = vpop.eup %18599  ;;  %v4786_v11 = vor.u32 1.1754944e-38, %v4785_v9  ;;  %vm4784_vm6 = vcmp.eq.f32.partialorder %v4783_v34, 8.507059e+37 }
 0x463   : > { %v4643_v62 = vpop.xlane.xlu2 %4642  ;;  %v4734_v7 = vsel %vm2169_vm3, %v20445_v55, 0.0  ;;  %v20451_v45 = vpop.eup %18601 }
 0x464   : > { %4735 = vadd.xlane.f32.xlu0 %v4734_v7  ;;  %v4803_v17 = vmul.f32 %v20451_v45, %v20440_v16  ;;  %v4663_v15 = vsub.f32 %v20282_v25, %v4643_v62  ;;  %vm4808_vm8 = vweird.f32 %v20451_v45 }
 0x465   : > { %vm20517_vm11 = vmor %vm4807_vm7, %vm4808_vm8 }
 0x466   : > { %v18604_v50 = vpop.eup %18603  ;;  %v4804_v18 = vsub.f32 1.0, %v4803_v17  ;;  %v4692_v19 = vmul.f32 1.442695, %v4663_v15 }
 0x467   : > { %v4775_v44 = vmul.f32 %v18604_v50, %v4706_v22  ;;  %v20462_v38 = vpop.xlane.xlu1 %4714  ;;  %vm4780_vm0 = vweird.f32 %v18604_v50 }
 0x468   : > { %18605 = vrcp.f32 %v20462_v38  ;;  %vm4781_vm5 = vmor %vm4779_vm4, %vm4780_vm0  ;;  %v4805_v47 = vmul.f32 %v20451_v45, %v4804_v18  ;;  %vm4821_vm12 = vweird.f32 %v20462_v38 }
 0x469   : > { %v4776_v56 = vsub.f32 1.0, %v4775_v44 }
 0x46a   : > { %v4806_v44 = vadd.f32 %v20451_v45, %v4805_v47 }
 0x46b   : > { %v4777_v29 = vmul.f32 %v18604_v50, %v4776_v56  ;;  %v20469_v60 = vpop.xlane.xlu2 %4720 }
 0x46c   : > { %18607 = vrcp.f32 %v20469_v60  ;;  %v4810_v16 = vsel %vm20517_vm11, %v20451_v45, %v4806_v44  ;;  %vm4849_vm0 = vweird.f32 %v20469_v60 }
 0x46d   : > { %v4778_v21 = vadd.f32 %v18604_v50, %v4777_v29 }
 0x46e   : > { %v18606_v0 = vpop.eup %18605 }
 0x46f   : > { %v4782_v39 = vsel %vm4781_vm5, %v18604_v50, %v4778_v21  ;;  %v4646_v14 = vpop.xlane.xlu0 %4645  ;;  %v4817_v10 = vmul.f32 %v18606_v0, %v20462_v38  ;;  %v5455_v50 = vand.u32 4294901760, %v20473_v48  ;;  %vm4822_vm9 = vweird.f32 %v18606_v0 }
 0x470   : > { %v4787_v22 = vsel %vm4784_vm6, %v4786_v11, %v4782_v39  ;;  %v4664_v7 = vsub.f32 %v20298_v58, %v4646_v14  ;;  %v4827_v58 = vand.u32 2147483648, %v20462_v38  ;;  %v4855_v11 = vand.u32 2147483648, %v20469_v60  ;;  %vm4823_vm13 = vmor %vm4821_vm12, %vm4822_vm9 }
 0x471   : > { %v20497_v61 = vmul.f32 %v20276_v32, %v4787_v22  ;;  %v4818_v25 = vsub.f32 1.0, %v4817_v10  ;;  %v4825_v32 = vand.u32 2147483647, %v20462_v38  ;;  %v4853_v14 = vand.u32 2147483647, %v20469_v60 }
 0x472   : > { %v18608_v17 = vpop.eup %18607  ;;  %v4694_v62 = vmul.f32 1.442695, %v4664_v7  ;;  %v4828_v39 = vor.u32 1.1754944e-38, %v4827_v58  ;;  %v4856_v45 = vor.u32 1.1754944e-38, %v4855_v11 }
 0x473   : > { %v4845_v56 = vmul.f32 %v18608_v17, %v20469_v60  ;;  %v4819_v9 = vmul.f32 %v18606_v0, %v4818_v25  ;;  %v5285_v29 = vsel %vm2169_vm3, %v20497_v61, 0  ;;  %vm4850_vm14 = vweird.f32 %v18608_v17 }
 0x474   : > { %18609 = vpow2.f32 %v4694_v62  ;;  %v20523_v47 = vand.u32 4294901760, %v5285_v29  ;;  %vm4826_vm15 = vcmp.eq.f32.partialorder %v4825_v32, 8.507059e+37  ;;  %v4814_v62 = vor.u32 1.1754944e-38, %v4813_v27  ;;  %vm4851_vm4 = vmor %vm4849_vm0, %vm4850_vm14 }
 0x475   : > { %v4846_v18 = vsub.f32 1.0, %v4845_v56  ;;  %v4820_v21 = vadd.f32 %v18606_v0, %v4819_v9  ;;  %18611 = vpow2.f32 %v4692_v19  ;;  %vm4854_vm5 = vcmp.eq.f32.partialorder %v4853_v14, 8.507059e+37 }
 0x476   : > { %5335 = vmatmul.f32.vlgmr.msrb.gmra.mxu1 %v20523_v47  ;;  %v5305_v2 = vsub.f32 %v5285_v29, %v20523_v47  ;;  %v1856_v19 = vsel %vm753_vm2, %v20458_v46, %v1855_v40  ;;  %v4815_v56 = vsel %vm20506_vm10, %v4814_v62, %v4810_v16  ;;  %v20551_v9 = vand.u32 4294901760, %v20484_v51 }
 0x477   : > { %v4847_v15 = vmul.f32 %v18608_v17, %v4846_v18  ;;  %v20526_v22 = vpop.xlane.xlu0 %4717  ;;  %v4824_v10 = vsel %vm4823_vm13, %v18606_v0, %v4820_v21  ;;  %5528 = vmatpush.msrb.mxu1 %v20335_v12  ;;  %v5456_v40 = vsub.f32 %v20473_v48, %v5455_v50  ;;  %v20569_v18 = vperm.slane %v20476_v20, %v19327_v57 }
 0x478   : > { %v4829_v38 = vsel %vm4826_vm15, %v4828_v39, %v4824_v10  ;;  %18613 = vrcp.f32 %v20526_v22  ;;  %5359 = vmatmul.f32.vlgmr.msrb.gmra.mxu2 %v5305_v2  ;;  %v5306_v44 = vand.u32 4294901760, %v5305_v2  ;;  %v20573_v29 = vmul.f32 %v20259_v59, %v4815_v56 }
 0x479   : > { %v4848_v7 = vadd.f32 %v18608_v17, %v4847_v15  ;;  %v20538_v58 = vmul.f32 %v20286_v41, %v4829_v38  ;;  %5554 = vmatpush.msrb.mxu2 %v5479_v35  ;;  %v1854_v35 = vsel %vm753_vm2, %v1853_v49, %v20254_v4  ;;  %v5630_v46 = vand.u32 4294901760, %v20481_v52 }
 0x47a   : > { %v20535_v25 = vpop.eup %18609  ;;  %5383 = vmatmul.f32.vlgmr.msrb.gmra.mxu3 %v5306_v44  ;;  %v5307_v27 = vsub.f32 %v5305_v2, %v5306_v44  ;;  %v1864_v20 = vperm.slane %v1856_v19, %v19312_v42  ;;  %v20588_v59 = vsub.f32 %v20484_v51, %v20551_v9  ;;  %v1860_v39 = vperm.slane %v1854_v35, %v19312_v42 }
 0x47b   : > { %v4852_v0 = vsel %vm4851_vm4, %v18608_v17, %v4848_v7  ;;  %v4740_v60 = vsel %vm2169_vm3, %v20535_v25, 0.0  ;;  %v7942_v17 = vrot.slane %v20538_v58, 4  ;;  %v20560_v36 = vpop.eup %18611  ;;  %5576 = vmatpush.msrb.mxu3 %v20335_v12  ;;  %v1843_v12 = vrot.slane %v20261_v26, 4 }
 0x47c   : > { %v4857_v41 = vsel %vm4854_vm5, %v4856_v45, %v4852_v0  ;;  %4741 = vadd.xlane.f32.xlu2 %v4740_v60  ;;  %v5308_v11 = vand.u32 4294901760, %v5307_v27  ;;  %v5457_v52 = vand.u32 4294901760, %v5456_v40  ;;  %v4737_v14 = vsel %vm2169_vm3, %v20560_v36, 0.0 }
 0x47d   : > { %v20555_v32 = vmul.f32 %v20292_v6, %v4857_v41  ;;  %v2057_v6 = vrot.slane %v20487_v3, 4  ;;  %v5583_v7 = vsel %vm2169_vm3, %v20573_v29, 0  ;;  %v1877_v62 = vrot.slane %v1864_v20, 4 }
 0x47e   : > { %v20581_v49 = vpop.eup %18613  ;;  %5429 = vmatmul.f32.vlgmr.msra.gmra.mxu1 %v20523_v47  ;;  %5309 = vmatmul.f32.vlgmr.msrb.gmra.mxu0 %v5308_v11  ;;  %v5777_v0 = vand.u32 4294901760, %v20588_v59  ;;  %v1865_v44 = vrot.slane %v1860_v39, 4  ;;  %v20614_v56 = vand.u32 4294901760, %v5583_v7  ;;  %vm4835_vm6 = vweird.f32 %v20526_v22 }
 0x47f   : > { %v7940_v34 = vrot.slane %v20555_v32, 4  ;;  %v20578_v21 = vsel %vm753_vm2, %v20555_v32, %v7942_v17  ;;  %v1702_v4 = vpop.permute.xlu1 %1701  ;;  %5631 = vmatpush.msra.mxu1 %v5630_v46  ;;  %v4831_v51 = vmul.f32 %v20581_v49, %v20526_v22  ;;  %5505 = vmatpush.msrb.mxu0 %v20351_v5  ;;  %v2058_v2 = vsel %vm753_vm2, %v2057_v6, %v20569_v18 }
 0x480   : > { %v1841_v16 = vrot.slane %v1702_v4, 4  ;;  %v1844_v10 = vsel %vm753_vm2, %v1702_v4, %v1843_v12  ;;  %5458 = vmatmul.f32.vlgmr.msra.gmra.mxu2 %v5457_v52  ;;  %v20616_v41 = vand.u32 4294901760, %v2058_v2  ;;  %v5778_v6 = vsub.f32 %v20588_v59, %v5777_v0 }
 0x481   : > { %v20593_v15 = vsel %vm753_vm2, %v7940_v34, %v20538_v58  ;;  %v1852_v38 = vperm.slane %v1844_v10, %v19312_v42  ;;  %5654 = vmatpush.msra.mxu2 %v20454_v13  ;;  %v4832_v17 = vsub.f32 1.0, %v4831_v51  ;;  %v2059_v34 = vrot.slane %v20569_v18, 4 }
 0x482   : > { %4738 = vadd.xlane.f32.xlu1 %v4737_v14  ;;  %v1842_v45 = vsel %vm753_vm2, %v1841_v16, %v20261_v26  ;;  %5484 = vmatmul.f32.vlgmr.msra.gmra.mxu3 %v20465_v54  ;;  %v5732_v26 = vsel %vm2169_vm3, %v20538_v58, 0  ;;  %v20638_v11 = vsub.f32 %v2058_v2, %v20616_v41  ;;  %v20644_v14 = vpop.xlane.xlu0 %4723  ;;  %vm4836_vm7 = vweird.f32 %v20581_v49 }
 0x483   : > { %v1848_v5 = vperm.slane %v1842_v45, %v19312_v42  ;;  %v1879_v60 = vrot.slane %v1852_v38, 4  ;;  %v1878_v19 = vsel %vm753_vm2, %v1877_v62, %v1852_v38  ;;  %5677 = vmatpush.msra.mxu3 %v20447_v28  ;;  %v20632_v12 = vand.u32 4294901760, %v5732_v26  ;;  %vm20670_vm8 = vmor %vm4835_vm6, %vm4836_vm7 }
 0x484   : > { %v1884_v4 = vperm.slane %v1878_v19, %v19327_v57  ;;  %v4833_v18 = vmul.f32 %v20581_v49, %v4832_v17  ;;  %v5926_v62 = vand.u32 4294901760, %v20638_v11  ;;  %18615 = vrcp.f32 %v20644_v14 }
 0x485   : > { %v1866_v27 = vsel %vm753_vm2, %v1865_v44, %v1848_v5  ;;  %v1867_v40 = vrot.slane %v1848_v5, 4  ;;  %v1880_v35 = vsel %vm753_vm2, %v1864_v20, %v1879_v60  ;;  %v4841_v44 = vand.u32 2147483648, %v20526_v22 }
 0x486   : > { %5532 = vmatmul.f32.vlgmr.msrb.gmra.mxu1 %v5455_v50  ;;  %v1872_v46 = vperm.slane %v1866_v27, %v19327_v57  ;;  %v1888_v58 = vperm.slane %v1880_v35, %v19327_v57  ;;  %5407 = vmatmul.f32.vlgmr.msra.gmra.mxu0 %v20523_v47  ;;  %v5603_v50 = vsub.f32 %v5583_v7, %v20614_v56  ;;  %v1893_v38 = vrot.slane %v1884_v4, 4 }
 0x487   : > { %5725 = vmatpush.msrb.mxu1 %v20447_v28  ;;  %v1868_v20 = vsel %vm753_vm2, %v1860_v39, %v1867_v40  ;;  %5601 = vmatpush.msra.mxu0 %v20447_v28  ;;  %v5779_v39 = vand.u32 4294901760, %v5778_v6  ;;  %v2060_v47 = vsel %vm753_vm2, %v20487_v3, %v2059_v34  ;;  %v20651_v7 = vsub.f32 %v5732_v26, %v20632_v12 }
 0x488   : > { %v1876_v52 = vperm.slane %v1868_v20, %v19327_v57  ;;  %5556 = vmatmul.f32.vlgmr.msrb.gmra.mxu2 %v20465_v54  ;;  %v1895_v16 = vrot.slane %v1888_v58, 4  ;;  %v1889_v10 = vrot.slane %v1872_v46, 4  ;;  %v5604_v2 = vand.u32 4294901760, %v5603_v50 }
 0x489   : > { %5750 = vmatpush.msrb.mxu2 %v20551_v9  ;;  %v4834_v45 = vadd.f32 %v20581_v49, %v4833_v18  ;;  %v1894_v26 = vsel %vm753_vm2, 0.0, %v1893_v38  ;;  %v5753_v27 = vand.u32 4294901760, %v20651_v7  ;;  %vm4863_vm11 = vweird.f32 %v20644_v14 }
 0x48a   : > { %v1891_v51 = vrot.slane %v1876_v52, 4  ;;  %5578 = vmatmul.f32.vlgmr.msrb.gmra.mxu3 %v20465_v54  ;;  %v1896_v28 = vsel %vm753_vm2, 0.0, %v1895_v16  ;;  %v4839_v54 = vand.u32 2147483647, %v20526_v22  ;;  %v1890_v19 = vsel %vm753_vm2, 0.0, %v1889_v10  ;;  %v20699_v52 = vpop.eup %18615 }
 0x48b   : > { %5780 = vmatpush.msrb.mxu3 %v5779_v39  ;;  %v2077_v60 = vrot.slane %v1896_v28, 4  ;;  %v2072_v17 = vsel %vm753_vm2, %v1895_v16, %v1884_v4  ;;  %v5927_v4 = vsub.f32 %v20638_v11, %v5926_v62  ;;  %v4838_v22 = vsel %vm20670_vm8, %v20581_v49, %v4834_v45 }
 0x48c   : > { %v1892_v3 = vsel %vm753_vm2, 0.0, %v1891_v51  ;;  %v2061_v35 = vsel %vm753_vm2, %v1891_v51, %v1872_v46  ;;  %v20692_v46 = vand.u32 4294901760, %v2060_v47  ;;  %vm4840_vm9 = vcmp.eq.f32.partialorder %v4839_v54, 8.507059e+37 }
 0x48d   : > { %v2066_v5 = vrot.slane %v1892_v3, 4  ;;  %v2078_v34 = vsel %vm753_vm2, %v2077_v60, %v1894_v26  ;;  %v20695_v18 = vperm.slane %v2072_v17, %v19312_v42  ;;  %v5605_v49 = vsub.f32 %v5603_v50, %v5604_v2 }
 0x48e   : > { %5633 = vmatmul.f32.vlgmr.msra.gmra.mxu1 %v20614_v56  ;;  %5508 = vmatmul.f32.vlgmr.msrb.gmra.mxu0 %v20473_v48  ;;  %v20688_v20 = vperm.slane %v2078_v34, %v19312_v42  ;;  %v4842_v48 = vor.u32 1.1754944e-38, %v4841_v44  ;;  %v20702_v16 = vperm.slane %v2061_v35, %v19312_v42  ;;  %v4859_v28 = vmul.f32 %v20699_v52, %v20644_v14  ;;  %v20723_v44 = vpop.xlane.xlu0 %4732 }
 0x48f   : > { %5826 = vmatpush.msra.mxu1 %v20551_v9  ;;  %v2067_v6 = vsel %vm753_vm2, %v2066_v5, %v1890_v19  ;;  %5703 = vmatpush.msrb.mxu0 %v5628_v30  ;;  %v5754_v30 = vsub.f32 %v20651_v7, %v5753_v27  ;;  %18617 = vrcp.f32 %v20723_v44  ;;  %vm4864_vm10 = vweird.f32 %v20699_v52 }
 0x490   : > { %v20685_v58 = vperm.slane %v2067_v6, %v19312_v42  ;;  %5657 = vmatmul.f32.vlgmr.msra.gmra.mxu2 %v5603_v50  ;;  %v2095_v13 = vrot.slane %v20688_v20, 4  ;;  %v4843_v10 = vsel %vm4840_vm9, %v4842_v48, %v4838_v22  ;;  %v20711_v50 = vsub.f32 %v2060_v47, %v20692_v46  ;;  %vm20766_vm12 = vmor %vm4863_vm11, %vm4864_vm10 }
 0x491   : > { %5852 = vmatpush.msra.mxu2 %v5777_v0  ;;  %v5928_v0 = vand.u32 4294901760, %v5927_v4  ;;  %v20721_v3 = vmul.f32 %v20303_v23, %v4843_v10  ;;  %v5755_v54 = vand.u32 4294901760, %v5754_v30  ;;  %v4860_v5 = vsub.f32 1.0, %v4859_v28 }
 0x492   : > { %5681 = vmatmul.f32.vlgmr.msra.gmra.mxu3 %v5604_v2  ;;  %v2083_v39 = vrot.slane %v20685_v58, 4  ;;  %v2096_v51 = vsel %vm753_vm2, %v2095_v13, %v20695_v18  ;;  %v5606_v2 = vand.u32 4294901760, %v5605_v49  ;;  %v6075_v60 = vand.u32 4294901760, %v20711_v50 }
 0x493   : > { %5874 = vmatpush.msra.mxu3 %v20551_v9  ;;  %v2102_v9 = vperm.slane %v2096_v51, %v19327_v57  ;;  %v5881_v23 = vsel %vm2169_vm3, %v20721_v3, 0  ;;  %v4861_v17 = vmul.f32 %v20699_v52, %v4860_v5  ;;  %v4869_v13 = vand.u32 2147483648, %v20644_v14 }
 0x494   : > { %v2084_v38 = vsel %vm753_vm2, %v2083_v39, %v20702_v16  ;;  %v6076_v40 = vsub.f32 %v20711_v50, %v6075_v60  ;;  %v20740_v35 = vand.u32 4294901760, %v5881_v23  ;;  %v4867_v39 = vand.u32 2147483647, %v20644_v14 }
 0x495   : > { %v2090_v45 = vperm.slane %v2084_v38, %v19327_v57  ;;  %v2107_v47 = vrot.slane %v2102_v9, 4  ;;  %v20751_v34 = vpop.eup %18617  ;;  %v4862_v4 = vadd.f32 %v20699_v52, %v4861_v17  ;;  %vm4905_vm15 = vweird.f32 %v20723_v44 }
 0x496   : > { %5727 = vmatmul.f32.vlgmr.msrb.gmra.mxu1 %v20614_v56  ;;  %5607 = vmatmul.f32.vlgmr.msra.gmra.mxu0 %v5606_v2  ;;  %v6077_v22 = vand.u32 4294901760, %v6076_v40  ;;  %v4870_v2 = vor.u32 1.1754944e-38, %v4869_v13  ;;  %vm4868_vm13 = vcmp.eq.f32.partialorder %v4867_v39, 8.507059e+37  ;;  %vm4906_vm14 = vweird.f32 %v20751_v34 }
 0x497   : > { %5929 = vmatpush.msrb.mxu1 %v5928_v0  ;;  %5803 = vmatpush.msra.mxu0 %v20588_v59  ;;  %v2108_v19 = vsel %vm753_vm2, %v2107_v47, %v2090_v45  ;;  %v6030_v59 = vsel %vm2169_vm3, %v20555_v32, 0  ;;  %v2109_v49 = vrot.slane %v2090_v45, 4  ;;  %v4866_v10 = vsel %vm20766_vm12, %v20699_v52, %v4862_v4  ;;  %vm20843_vm0 = vmor %vm4905_vm15, %vm4906_vm14 }
 0x498   : > { %5756 = vmatmul.f32.vlgmr.msrb.gmra.mxu2 %v5755_v54  ;;  %v20736_v26 = vand.u32 4294901760, %v2108_v19  ;;  %v20743_v6 = vand.u32 4294901760, %v6030_v59  ;;  %v2085_v0 = vrot.slane %v20702_v16, 4 }
 0x499   : > { %5952 = vmatpush.msrb.mxu2 %v20638_v11  ;;  %v2110_v14 = vsel %vm753_vm2, %v2102_v9, %v2109_v49  ;;  %v4871_v9 = vsel %vm4868_vm13, %v4870_v2, %v4866_v10  ;;  %v20839_v10 = vperm.slane %v20363_v53, %v19312_v42 }
 0x49a   : > { %5782 = vmatmul.f32.vlgmr.msrb.gmra.mxu3 %v20632_v12  ;;  %v20749_v32 = vsub.f32 %v2108_v19, %v20736_v26  ;;  %v20762_v48 = vsub.f32 %v6030_v59, %v20743_v6  ;;  %v20793_v5 = vand.u32 4294901760, %v2110_v14 }
 0x49b   : > { %5975 = vmatpush.msrb.mxu3 %v20616_v41 }
 0x49c   : > { %v6051_v38 = vand.u32 4294901760, %v20762_v48  ;;  %v20811_v17 = vsub.f32 %v2110_v14, %v20793_v5 }
 0x49e   : > { %5830 = vmatmul.f32.vlgmr.msra.gmra.mxu1 %v5753_v27  ;;  %5705 = vmatmul.f32.vlgmr.msrb.gmra.mxu0 %v20614_v56  ;;  %v20753_v27 = vpop.permute.xlu2 %1687  ;;  %v5901_v56 = vsub.f32 %v5881_v23, %v20740_v35  ;;  %v6373_v49 = vand.u32 4294901760, %v20811_v17 }
 0x49f   : > { %6023 = vmatpush.msra.mxu1 %v20616_v41  ;;  %5899 = vmatpush.msrb.mxu0 %v20616_v41  ;;  %v2097_v41 = vrot.slane %v20695_v18, 4  ;;  %v4901_v18 = vmul.f32 %v20751_v34, %v20723_v44 }
 0x4a0   : > { %5854 = vmatmul.f32.vlgmr.msra.gmra.mxu2 %v20632_v12  ;;  %v5902_v51 = vand.u32 4294901760, %v5901_v56 }
 0x4a1   : > { %6048 = vmatpush.msra.mxu2 %v20692_v46  ;;  %v2098_v28 = vsel %vm753_vm2, %v20688_v20, %v2097_v41  ;;  %v4902_v52 = vsub.f32 1.0, %v4901_v18  ;;  %v7874_v18 = vrot.slane %v20312_v37, 4 }
 0x4a2   : > { %5876 = vmatmul.f32.vlgmr.msra.gmra.mxu3 %v20632_v12  ;;  %v6224_v12 = vand.u32 4294901760, %v20749_v32  ;;  %v5903_v20 = vsub.f32 %v5901_v56, %v5902_v51 }
 0x4a3   : > { %6078 = vmatpush.msra.mxu3 %v6077_v22  ;;  %v4903_v19 = vmul.f32 %v20751_v34, %v4902_v52 }
 0x4a4   : > { %v6225_v54 = vsub.f32 %v20749_v32, %v6224_v12  ;;  %v5904_v59 = vand.u32 4294901760, %v5903_v20  ;;  %v7875_v20 = vsel %vm753_vm2, %v20497_v61, %v7874_v18 }
 0x4a6   : > { %5931 = vmatmul.f32.vlgmr.msrb.gmra.mxu1 %v20740_v35  ;;  %5806 = vmatmul.f32.vlgmr.msra.gmra.mxu0 %v20651_v7  ;;  %v20796_v7 = vperm.slane %v2098_v28, %v19327_v57  ;;  %v6226_v23 = vand.u32 4294901760, %v6225_v54  ;;  %v6374_v54 = vsub.f32 %v20811_v17, %v6373_v49 }
 0x4a7   : > { %6124 = vmatpush.msrb.mxu1 %v20692_v46  ;;  %6001 = vmatpush.msra.mxu0 %v5926_v62  ;;  %v2086_v62 = vsel %vm753_vm2, %v20685_v58, %v2085_v0 }
 0x4a8   : > { %5955 = vmatmul.f32.vlgmr.msrb.gmra.mxu2 %v5901_v56  ;;  %v20814_v40 = vperm.slane %v2086_v62, %v19327_v57  ;;  %v2111_v58 = vrot.slane %v20796_v7, 4  ;;  %v4904_v56 = vadd.f32 %v20751_v34, %v4903_v19 }
 0x4a9   : > { %6150 = vmatpush.msrb.mxu2 %v6075_v60  ;;  %v20806_v60 = vmul.f32 %v20314_v33, %v4871_v9  ;;  %v4911_v33 = vand.u32 2147483648, %v20723_v44 }
 0x4aa   : > { %v4649_v45 = vpop.xlane.xlu1 %4648  ;;  %5979 = vmatmul.f32.vlgmr.msrb.gmra.mxu3 %v5902_v51  ;;  %v2112_v30 = vsel %vm753_vm2, %v2111_v58, %v20814_v40 }
 0x4ab   : > { %v4665_v16 = vsub.f32 %v20394_v1, %v4649_v45  ;;  %v6052_v1 = vsub.f32 %v20762_v48, %v6051_v38  ;;  %6172 = vmatpush.msrb.mxu3 %v20692_v46  ;;  %v6179_v13 = vsel %vm2169_vm3, %v20806_v60, 0  ;;  %v4912_v0 = vor.u32 1.1754944e-38, %v4911_v33 }
 0x4ac   : > { %v20791_v47 = vpop.xlane.xlu2 %4729  ;;  %v20854_v2 = vand.u32 4294901760, %v6179_v13  ;;  %v20856_v45 = vand.u32 4294901760, %v2112_v30  ;;  %v7986_v19 = vrot.slane %v20806_v60, 4 }
 0x4ad   : > { %v4696_v11 = vmul.f32 1.442695, %v4665_v16  ;;  %18619 = vrcp.f32 %v20791_v47  ;;  %v6053_v46 = vand.u32 4294901760, %v6052_v1  ;;  %v4897_v53 = vand.u32 2147483648, %v20791_v47 }
 0x4ae   : > { %6025 = vmatmul.f32.vlgmr.msra.gmra.mxu1 %v20740_v35  ;;  %5905 = vmatmul.f32.vlgmr.msrb.gmra.mxu0 %v5904_v59  ;;  %v4895_v16 = vand.u32 2147483647, %v20791_v47  ;;  %vm4891_vm6 = vweird.f32 %v20791_v47  ;;  %v20881_v59 = vsub.f32 %v2112_v30, %v20856_v45  ;;  %v7908_v30 = vrot.slane %v20839_v10, 4 }
 0x4af   : > { %18621 = vpow2.f32 %v4696_v11  ;;  %6227 = vmatpush.msra.mxu1 %v6226_v23  ;;  %6101 = vmatpush.msrb.mxu0 %v20711_v50  ;;  %v4909_v50 = vand.u32 2147483647, %v20723_v44  ;;  %v4908_v44 = vsel %vm20843_vm0, %v20751_v34, %v4904_v56  ;;  %v20866_v34 = vperm.slane %v20370_v43, %v19312_v42  ;;  %v1704_v56 = vpop.permute.xlu0 %1703 }
 0x4b0   : > { %6054 = vmatmul.f32.vlgmr.msra.gmra.mxu2 %v6053_v46  ;;  %v2113_v11 = vrot.slane %v20814_v40, 4  ;;  %v4898_v43 = vor.u32 1.1754944e-38, %v4897_v53  ;;  %v6199_v23 = vsub.f32 %v6179_v13, %v20854_v2  ;;  %vm4896_vm8 = vcmp.eq.f32.partialorder %v4895_v16, 8.507059e+37  ;;  %v18723_v53 = vld [vmem:[%s19176_s13 + $0x18] sm:$0xff] }
 0x4b1   : > { %6250 = vmatpush.msra.mxu2 %v20749_v32  ;;  %vm4910_vm5 = vcmp.eq.f32.partialorder %v4909_v50, 8.507059e+37  ;;  %v6522_v50 = vand.u32 4294901760, %v20881_v59  ;;  %8382 = vrot.lane.b32.xlu2 %v18723_v53, %s18996_s29 }
 0x4b2   : > { %v20818_v4 = vpop.xlane.xlu1 %4726  ;;  %6080 = vmatmul.f32.vlgmr.msra.gmra.mxu3 %v20743_v6  ;;  %v4913_v1 = vsel %vm4910_vm5, %v4912_v0, %v4908_v44  ;;  %v6200_v18 = vand.u32 4294901760, %v6199_v23  ;;  %v1897_v0 = vrot.slane %v1704_v56, 4 }
 0x4b3   : > { %v18620_v22 = vpop.eup %18619  ;;  %18623 = vrcp.f32 %v20818_v4  ;;  %6273 = vmatpush.msra.mxu3 %v20736_v26  ;;  %v20885_v58 = vmul.f32 %v20329_v31, %v4913_v1  ;;  %v4883_v33 = vand.u32 2147483648, %v20818_v4  ;;  %v4881_v13 = vand.u32 2147483647, %v20818_v4 }
 0x4b4   : > { %v4887_v41 = vmul.f32 %v18620_v22, %v20791_v47  ;;  %vm4892_vm4 = vweird.f32 %v18620_v22  ;;  %v7872_v31 = vrot.slane %v20497_v61, 4  ;;  %vm4877_vm10 = vweird.f32 %v20818_v4 }
 0x4b5   : > { %v20831_v39 = vpop.eup %18621  ;;  %vm4893_vm7 = vmor %vm4891_vm6, %vm4892_vm4  ;;  %vm4882_vm12 = vcmp.eq.f32.partialorder %v4881_v13, 8.507059e+37  ;;  %v1898_v32 = vsel %vm753_vm2, %v1897_v0, %v20753_v27  ;;  %v20967_v13 = vperm.slane %v20578_v21, %v19312_v42 }
 0x4b6   : > { %v4888_v14 = vsub.f32 1.0, %v4887_v41  ;;  %v4743_v28 = vsel %vm2169_vm3, %v20831_v39, 0.0  ;;  %6128 = vmatmul.f32.vlgmr.msrb.gmra.mxu1 %v6051_v38  ;;  %6003 = vmatmul.f32.vlgmr.msra.gmra.mxu0 %v20740_v35  ;;  %v6375_v35 = vand.u32 4294901760, %v6374_v54  ;;  %v7873_v54 = vsel %vm753_vm2, %v7872_v31, %v20312_v37 }
 0x4b7   : > { %4744 = vadd.xlane.f32.xlu0 %v4743_v28  ;;  %6321 = vmatpush.msrb.mxu1 %v20736_v26 }
 0x4b8   : > { %v4889_v52 = vmul.f32 %v18620_v22, %v4888_v14  ;;  %6197 = vmatpush.msra.mxu0 %v20736_v26  ;;  %6152 = vmatmul.f32.vlgmr.msrb.gmra.mxu2 %v20743_v6  ;;  %v2114_v26 = vsel %vm753_vm2, %v20796_v7, %v2113_v11  ;;  %v4884_v14 = vor.u32 1.1754944e-38, %v4883_v33  ;;  %v6201_v11 = vsub.f32 %v6199_v23, %v6200_v18 }
 0x4b9   : > { %v18624_v9 = vpop.eup %18623  ;;  %6346 = vmatpush.msrb.mxu2 %v20793_v5  ;;  %v20905_v61 = vand.u32 4294901760, %v2114_v26 }
 0x4ba   : > { %v4890_v62 = vadd.f32 %v18620_v22, %v4889_v52  ;;  %v4873_v38 = vmul.f32 %v18624_v9, %v20818_v4  ;;  %6174 = vmatmul.f32.vlgmr.msrb.gmra.mxu3 %v20743_v6  ;;  %vm4878_vm9 = vweird.f32 %v18624_v9  ;;  %v6626_v4 = vsel %vm2169_vm3, %v20885_v58, 0 }
 0x4bb   : > { %6376 = vmatpush.msrb.mxu3 %v6375_v35  ;;  %vm4879_vm11 = vmor %vm4877_vm10, %vm4878_vm9  ;;  %v1899_v52 = vrot.slane %v20753_v27, 4  ;;  %v20933_v1 = vsub.f32 %v2114_v26, %v20905_v61  ;;  %v7930_v27 = vrot.slane %v20573_v29, 4 }
 0x4bc   : > { %v4894_v40 = vsel %vm4893_vm7, %v18620_v22, %v4890_v62  ;;  %v4874_v47 = vsub.f32 1.0, %v4873_v38  ;;  %v20935_v62 = vand.u32 4294901760, %v6626_v4 }
 0x4bd   : > { %v4899_v46 = vsel %vm4896_vm8, %v4898_v43, %v4894_v40  ;;  %v20946_v43 = vperm.slane %v7873_v54, %v19312_v42 }
 0x4be   : > { %v4980_v41 = vmul.f32 %v20398_v24, %v4899_v46  ;;  %v4875_v22 = vmul.f32 %v18624_v9, %v4874_v47  ;;  %6229 = vmatmul.f32.vlgmr.msra.gmra.mxu1 %v20854_v2  ;;  %v20902_v24 = vperm.slane %v7875_v20, %v19312_v42  ;;  %6104 = vmatmul.f32.vlgmr.msrb.gmra.mxu0 %v20762_v48  ;;  %v6202_v46 = vand.u32 4294901760, %v6201_v11 }
 0x4bf   : > { %6422 = vmatpush.msra.mxu1 %v20793_v5  ;;  %6299 = vmatpush.msrb.mxu0 %v6224_v12  ;;  %v1900_v12 = vsel %vm753_vm2, %v1704_v56, %v1899_v52  ;;  %v1904_v47 = vperm.slane %v1898_v32, %v19312_v42  ;;  %v6671_v56 = vand.u32 4294901760, %v20933_v1 }
 0x4c0   : > { %v7984_v51 = vrot.slane %v4980_v41, 4  ;;  %v20897_v6 = vsel %vm753_vm2, %v4980_v41, %v7986_v19  ;;  %v4876_v7 = vadd.f32 %v18624_v9, %v4875_v22  ;;  %6253 = vmatmul.f32.vlgmr.msra.gmra.mxu2 %v6199_v23  ;;  %v6477_v48 = vsel %vm2169_vm3, %v4980_v41, 0 }
 0x4c1   : > { %6448 = vmatpush.msra.mxu2 %v6373_v49  ;;  %v20942_v19 = vand.u32 4294901760, %v6477_v48  ;;  %v1908_v35 = vperm.slane %v1900_v12, %v19312_v42  ;;  %v20962_v41 = vsub.f32 %v6626_v4, %v20935_v62  ;;  %v7910_v22 = vrot.slane %v20902_v24, 4 }
 0x4c2   : > { %v20909_v28 = vsel %vm753_vm2, %v7984_v51, %v20806_v60  ;;  %v4880_v44 = vsel %vm4879_vm11, %v18624_v9, %v4876_v7  ;;  %v6523_v60 = vsub.f32 %v20881_v59, %v6522_v50  ;;  %v7996_v9 = vrot.slane %v20885_v58, 4  ;;  %6277 = vmatmul.f32.vlgmr.msra.gmra.mxu3 %v6200_v18  ;;  %v18724_v18 = vld [vmem:[%s19176_s13 + $0x10] sm:$0xff] }
 0x4c3   : > { %v4885_v16 = vsel %vm4882_vm12, %v4884_v14, %v4880_v44  ;;  %6470 = vmatpush.msra.mxu3 %v20793_v5  ;;  %v20970_v31 = vsub.f32 %v6477_v48, %v20942_v19  ;;  %8380 = vrot.lane.b32.xlu2 %v18724_v18, %s18996_s29  ;;  %v7896_v51 = vrot.slane %v20866_v34, 4  ;;  %v7928_v7 = vrot.slane %v20721_v3, 4 }
 0x4c4   : > { %v4979_v20 = vmul.f32 %v20410_v8, %v4885_v16  ;;  %v1712_v8 = vpop.permute.xlu2 %1711  ;;  %v6524_v23 = vand.u32 4294901760, %v6523_v60  ;;  %v7931_v44 = vsel %vm753_vm2, %v20721_v3, %v7930_v27  ;;  %v1923_v4 = vrot.slane %v1904_v47, 4  ;;  %v5012_v16 = vpop.f32.mrf.mxu0 }
 0x4c5   : > { %v1909_v33 = vrot.slane %v1712_v8, 4  ;;  %v1935_v53 = vrot.slane %v1908_v35, 4  ;;  %v6647_v54 = vand.u32 4294901760, %v20962_v41  ;;  %v6498_v11 = vand.u32 4294901760, %v20970_v31 }
 0x4c6   : > { %v20938_v37 = vsel %vm753_vm2, %v7996_v9, %v4979_v20  ;;  %v7998_v38 = vrot.slane %v4979_v20, 4  ;;  %v6328_v49 = vsel %vm2169_vm3, %v4979_v20, 0  ;;  %6323 = vmatmul.f32.vlgmr.msrb.gmra.mxu1 %v20854_v2  ;;  %6203 = vmatmul.f32.vlgmr.msra.gmra.mxu0 %v6202_v46  ;;  %v7929_v32 = vsel %vm753_vm2, %v7928_v7, %v20573_v29 }
 0x4c7   : > { %v20948_v40 = vand.u32 4294901760, %v6328_v49  ;;  %6525 = vmatpush.msrb.mxu1 %v6524_v23  ;;  %6399 = vmatpush.msra.mxu0 %v20811_v17  ;;  %v6672_v17 = vsub.f32 %v20933_v1, %v6671_v56  ;;  %v20996_v12 = vperm.slane %v7931_v44, %v19312_v42  ;;  %v21008_v7 = vsel %vm753_vm2, %v7908_v30, %v20902_v24 }
 0x4c8   : > { %v20954_v5 = vsel %vm753_vm2, %v20885_v58, %v7998_v38  ;;  %v5038_v38 = vpop.f32.mrf.mxu1 }
 0x4c9   : > { %v20958_v26 = vsub.f32 %v6328_v49, %v20948_v40  ;;  %v5039_v27 = vadd.f32 %v5038_v38, %v5012_v16  ;;  %v7897_v16 = vsel %vm753_vm2, %v7896_v51, %v20946_v43 }
 0x4ca   : > { %v1696_v58 = vpop.permute.xlu1 %1695  ;;  %6378 = vmatmul.f32.vlgmr.msrb.gmra.mxu3 %v20948_v40 }
 0x4cb   : > { %v1910_v0 = vsel %vm753_vm2, %v1909_v33, %v1696_v58  ;;  %v1911_v14 = vrot.slane %v1696_v58, 4  ;;  %v6349_v21 = vand.u32 4294901760, %v20958_v26  ;;  %6571 = vmatpush.msrb.mxu3 %v20856_v45 }
 0x4cc   : > { %v1916_v52 = vperm.slane %v1910_v0, %v19312_v42  ;;  %v6673_v0 = vand.u32 4294901760, %v6672_v17 }
 0x4cd   : > { %v1912_v60 = vsel %vm753_vm2, %v1712_v8, %v1911_v14  ;;  %v6350_v48 = vsub.f32 %v20958_v26, %v6349_v21  ;;  %v21016_v14 = vsub.f32 %v20970_v31, %v6498_v11 }
 0x4ce   : > { %v1920_v3 = vperm.slane %v1912_v60, %v19312_v42  ;;  %v1921_v9 = vrot.slane %v1916_v52, 4  ;;  %v1924_v20 = vsel %vm753_vm2, %v1916_v52, %v1923_v4  ;;  %6426 = vmatmul.f32.vlgmr.msra.gmra.mxu1 %v6349_v21  ;;  %6301 = vmatmul.f32.vlgmr.msrb.gmra.mxu0 %v20854_v2  ;;  %v21021_v21 = vsub.f32 %v20962_v41, %v6647_v54  ;;  %v18725_v2 = vld [vmem:[%s19176_s13] sm:$0xff] }
 0x4cf   : > { %v1932_v8 = vperm.slane %v1924_v20, %v19327_v57  ;;  %v6351_v49 = vand.u32 4294901760, %v6350_v48  ;;  %6619 = vmatpush.msra.mxu1 %v20856_v45  ;;  %6495 = vmatpush.msrb.mxu0 %v20856_v45  ;;  %v7898_v60 = vrot.slane %v20946_v43, 4 }
 0x4d0   : > { %v1922_v23 = vsel %vm753_vm2, %v1921_v9, %v1904_v47  ;;  %v1933_v46 = vrot.slane %v1920_v3, 4  ;;  %v1936_v33 = vsel %vm753_vm2, %v1920_v3, %v1935_v53  ;;  %8376 = vrot.lane.b32.xlu2 %v18725_v2, %s18996_s29 }
 0x4d1   : > { %v1928_v58 = vperm.slane %v1922_v23, %v19327_v57  ;;  %v1944_v18 = vperm.slane %v1936_v33, %v19327_v57  ;;  %v1947_v29 = vrot.slane %v1932_v8, 4  ;;  %6352 = vmatmul.f32.vlgmr.msrb.gmra.mxu2 %v6351_v49  ;;  %v7899_v51 = vsel %vm753_vm2, %v20866_v34, %v7898_v60 }
 0x4d2   : > { %v1934_v47 = vsel %vm753_vm2, %v1933_v46, %v1908_v35  ;;  %6548 = vmatpush.msrb.mxu2 %v20881_v59  ;;  %6472 = vmatmul.f32.vlgmr.msra.gmra.mxu3 %v20948_v40  ;;  %v21047_v33 = vperm.slane %v20593_v15, %v19312_v42  ;;  %v21054_v34 = vperm.slane %v7929_v32, %v19312_v42  ;;  %v21078_v59 = vpop.f32.mrf.mxu3 }
 0x4d3   : > { %v1940_v30 = vperm.slane %v1934_v47, %v19327_v57  ;;  %v1945_v44 = vrot.slane %v1928_v58, 4  ;;  %v1948_v35 = vsel %vm753_vm2, 0.0, %v1947_v29  ;;  %v1951_v4 = vrot.slane %v1944_v18, 4  ;;  %6674 = vmatpush.msra.mxu3 %v6673_v0 }
 0x4d4   : > { %v2115_v53 = vsel %vm753_vm2, %v1947_v29, %v1928_v58  ;;  %v2120_v52 = vrot.slane %v1948_v35, 4  ;;  %v7964_v58 = vrot.slane %v20967_v13, 4  ;;  %v5062_v29 = vpop.f32.mrf.mxu2  ;;  %v7907_v35 = vperm.slane %v7899_v51, %v19327_v57 }
 0x4d5   : > { %v1946_v48 = vsel %vm753_vm2, 0.0, %v1945_v44  ;;  %v1949_v17 = vrot.slane %v1940_v30, 4  ;;  %v1952_v3 = vsel %vm753_vm2, 0.0, %v1951_v4  ;;  %v2119_v9 = vperm.slane %v2115_v53, %v19312_v42 }
 0x4d6   : > { %v2121_v45 = vsel %vm753_vm2, %v2120_v52, %v1946_v48  ;;  %v2126_v20 = vsel %vm753_vm2, %v1951_v4, %v1940_v30  ;;  %v2131_v38 = vrot.slane %v1952_v3, 4  ;;  %6527 = vmatmul.f32.vlgmr.msrb.gmra.mxu1 %v20942_v19  ;;  %v7966_v30 = vrot.slane %v20996_v12, 4  ;;  %6402 = vmatmul.f32.vlgmr.msra.gmra.mxu0 %v20958_v26 }
 0x4d7   : > { %v1950_v43 = vsel %vm753_vm2, 0.0, %v1949_v17  ;;  %v2125_v8 = vperm.slane %v2121_v45, %v19312_v42  ;;  %v2139_v49 = vrot.slane %v2119_v9, 4  ;;  %v21042_v23 = vpop.xlane.xlu0 %4735  ;;  %v2130_v46 = vperm.slane %v2126_v20, %v19312_v42  ;;  %6720 = vmatpush.msrb.mxu1 %v20905_v61  ;;  %6597 = vmatpush.msra.mxu0 %v6522_v50 }
 0x4d8   : > { %v2132_v18 = vsel %vm753_vm2, %v2131_v38, %v1950_v43  ;;  %18625 = vrcp.f32 %v21042_v23  ;;  %v21060_v44 = vadd.f32 %v5062_v29, %v5039_v27  ;;  %v6649_v53 = vand.u32 4294901760, %v21021_v21 }
 0x4d9   : > { %6450 = vmatmul.f32.vlgmr.msra.gmra.mxu2 %v20948_v40  ;;  %v2136_v47 = vperm.slane %v2132_v18, %v19312_v42  ;;  %v2137_v15 = vrot.slane %v2125_v8, 4  ;;  %v2151_v0 = vrot.slane %v2130_v46, 4  ;;  %v2140_v32 = vsel %vm753_vm2, %v2125_v8, %v2139_v49 }
 0x4da   : > { %6644 = vmatpush.msra.mxu2 %v20905_v61  ;;  %v6500_v40 = vand.u32 4294901760, %v21016_v14  ;;  %v7903_v52 = vperm.slane %v7897_v16, %v19327_v57  ;;  %v7911_v60 = vsel %vm753_vm2, %v20839_v10, %v7910_v22  ;;  %6575 = vmatmul.f32.vlgmr.msrb.gmra.mxu3 %v6498_v11  ;;  %v2148_v14 = vperm.slane %v2140_v32, %v19327_v57 }
 0x4db   : > { %v2138_v4 = vsel %vm753_vm2, %v2137_v15, %v2119_v9  ;;  %v2149_v2 = vrot.slane %v2136_v47, 4  ;;  %v2152_v26 = vsel %vm753_vm2, %v2136_v47, %v2151_v0  ;;  %v21087_v17 = vperm.slane %v21008_v7, %v19327_v57  ;;  %6768 = vmatpush.msrb.mxu3 %v20905_v61  ;;  %v21108_v47 = vpop.f32.mrf.mxu1 }
 0x4dc   : > { %v2144_v27 = vperm.slane %v2138_v4, %v19327_v57  ;;  %v2160_v48 = vperm.slane %v2152_v26, %v19327_v57  ;;  %vm4919_vm13 = vweird.f32 %v21042_v23  ;;  %v7922_v22 = vrot.slane %v7907_v35, 4 }
 0x4dd   : > { %v2150_v50 = vsel %vm753_vm2, %v2149_v2, %v2130_v46  ;;  %v4923_v3 = vand.u32 2147483647, %v21042_v23  ;;  %v7919_v45 = vperm.slane %v7911_v60, %v19327_v57  ;;  %v4925_v20 = vand.u32 2147483648, %v21042_v23  ;;  %v5161_v2 = vpop.f32.mrf.mxu2 }
 0x4de   : > { %v18626_v16 = vpop.eup %18625  ;;  %v2156_v10 = vperm.slane %v2150_v50, %v19327_v57  ;;  %v2163_v24 = vrot.slane %v2144_v27, 4  ;;  %v2165_v9 = vrot.slane %v2160_v48, 4  ;;  %6621 = vmatmul.f32.vlgmr.msra.gmra.mxu1 %v20942_v19  ;;  %v7920_v51 = vrot.slane %v7903_v52, 4  ;;  %6501 = vmatmul.f32.vlgmr.msrb.gmra.mxu0 %v6500_v40 }
 0x4df   : > { %v4915_v11 = vmul.f32 %v18626_v16, %v21042_v23  ;;  %v2167_v49 = vrot.slane %v2148_v14, 4  ;;  %vm4920_vm14 = vweird.f32 %v18626_v16  ;;  %v7923_v29 = vsel %vm753_vm2, 0.0, %v7922_v22  ;;  %6697 = vmatpush.msrb.mxu0 %v20933_v1 }
 0x4e0   : > { %v2161_v7 = vrot.slane %v2156_v10, 4  ;;  %v2164_v38 = vsel %vm753_vm2, %v2156_v10, %v2163_v24  ;;  %v2166_v8 = vsel %vm753_vm2, %v2165_v9, %v2148_v14  ;;  %v7926_v32 = vrot.slane %v7919_v45, 4  ;;  %vm4921_vm0 = vmor %vm4919_vm13, %vm4920_vm14  ;;  %v5187_v24 = vpop.f32.mrf.mxu3 }
 0x4e1   : > { %v4916_v61 = vsub.f32 1.0, %v4915_v11  ;;  %6551 = vmatmul.f32.vlgmr.msrb.gmra.mxu2 %v20970_v31  ;;  %v21099_v43 = vand.u32 4294901760, %v2164_v38  ;;  %v21105_v18 = vand.u32 4294901760, %v2166_v8  ;;  %vm21114_vm15 = vcmp.eq.f32.partialorder %v4923_v3, 8.507059e+37 }
 0x4e2   : > { %6746 = vmatpush.msrb.mxu2 %v6671_v56  ;;  %v2162_v46 = vsel %vm753_vm2, %v2161_v7, %v2144_v27  ;;  %v4926_v56 = vor.u32 1.1754944e-38, %v4925_v20  ;;  %v8096_v4 = vsel %vm753_vm2, %v7922_v22, %v7903_v52  ;;  %6676 = vmatmul.f32.vlgmr.msra.gmra.mxu3 %v20935_v62  ;;  %v7921_v60 = vsel %vm753_vm2, 0.0, %v7920_v51 }
 0x4e3   : > { %v4917_v15 = vmul.f32 %v18626_v16, %v4916_v61  ;;  %v6792_v31 = vand.u32 4294901760, %v2162_v46  ;;  %v21112_v0 = vsub.f32 %v2164_v38, %v21099_v43  ;;  %v21119_v40 = vsub.f32 %v2166_v8, %v21105_v18 }
 0x4e4   : > { %v21132_v14 = vsel %vm753_vm2, %v2160_v48, %v2167_v49  ;;  %v7924_v52 = vrot.slane %v21087_v17, 4  ;;  %v8101_v10 = vrot.slane %v7923_v29, 4  ;;  %v8107_v23 = vsel %vm753_vm2, %v7926_v32, %v21087_v17 }
 0x4e5   : > { %v4918_v27 = vadd.f32 %v18626_v16, %v4917_v15  ;;  %v21123_v1 = vsub.f32 %v2162_v46, %v6792_v31  ;;  %v6969_v26 = vand.u32 4294901760, %v21112_v0  ;;  %6869 = vmatpush.msra.mxu3 %v6792_v31  ;;  %v7118_v50 = vand.u32 4294901760, %v21119_v40  ;;  %v21184_v15 = vpop.f32.mrf.mxu0 }
 0x4e6   : > { %v21141_v9 = vadd.f32 %v5187_v24, %v5161_v2  ;;  %6724 = vmatmul.f32.vlgmr.msrb.gmra.mxu1 %v6647_v54  ;;  %v7952_v45 = vrot.slane %v21047_v33, 4  ;;  %v7965_v54 = vsel %vm753_vm2, %v7964_v58, %v20996_v12  ;;  %6599 = vmatmul.f32.vlgmr.msra.gmra.mxu0 %v20942_v19  ;;  %v21167_v21 = vand.u32 4294901760, %v21132_v14 }
 0x4e7   : > { %v4922_v22 = vsel %vm4921_vm0, %v18626_v16, %v4918_v27  ;;  %v6970_v11 = vsub.f32 %v21112_v0, %v6969_v26  ;;  %v6820_v3 = vand.u32 4294901760, %v21123_v1  ;;  %v8102_v16 = vsel %vm753_vm2, %v8101_v10, %v7921_v60  ;;  %6793 = vmatpush.msra.mxu0 %v6792_v31 }
 0x4e8   : > { %v4927_v48 = vsel %vm21114_vm15, %v4926_v56, %v4922_v22  ;;  %v21158_v7 = vsub.f32 %v21119_v40, %v7118_v50  ;;  %v7927_v38 = vsel %vm753_vm2, 0.0, %v7926_v32  ;;  %v7953_v58 = vsel %vm753_vm2, %v7952_v45, %v21054_v34  ;;  %v21186_v32 = vpop.f32.mrf.mxu1 }
 0x4e9   : > { %v21150_v20 = vmul.f32 %v20445_v55, %v4927_v48  ;;  %6650 = vmatmul.f32.vlgmr.msra.gmra.mxu2 %v6649_v53  ;;  %v6821_v17 = vsub.f32 %v21123_v1, %v6820_v3  ;;  %v6971_v55 = vand.u32 4294901760, %v6970_v11  ;;  %v7971_v53 = vperm.slane %v7965_v54, %v19327_v57 }
 0x4ea   : > { %6846 = vmatpush.msra.mxu2 %v21123_v1  ;;  %v7925_v19 = vsel %vm753_vm2, 0.0, %v7924_v52  ;;  %v7954_v49 = vrot.slane %v21054_v34, 4  ;;  %v7959_v46 = vperm.slane %v7953_v58, %v19327_v57  ;;  %v7967_v29 = vsel %vm753_vm2, %v20967_v13, %v7966_v30  ;;  %6770 = vmatmul.f32.vlgmr.msrb.gmra.mxu3 %v20935_v62 }
 0x4eb   : > { %v6822_v51 = vand.u32 4294901760, %v6821_v17  ;;  %v6775_v61 = vsel %vm2169_vm3, %v21150_v20, 0  ;;  %v7120_v35 = vand.u32 4294901760, %v21158_v7  ;;  %v7975_v56 = vperm.slane %v7967_v29, %v19327_v57  ;;  %6972 = vmatpush.msrb.mxu3 %v6971_v55 }
 0x4ec   : > { %v21176_v8 = vand.u32 4294901760, %v6775_v61  ;;  %v21192_v34 = vperm.slane %v8096_v4, %v19312_v42  ;;  %v8112_v2 = vrot.slane %v7927_v38, 4  ;;  %v7955_v13 = vsel %vm753_vm2, %v21047_v33, %v7954_v49 }
 0x4ed   : > { %6823 = vmatpush.msra.mxu1 %v6822_v51  ;;  %v7980_v30 = vrot.slane %v7971_v53, 4  ;;  %v21200_v27 = vperm.slane %v8107_v23, %v19312_v42  ;;  %v7963_v60 = vperm.slane %v7955_v13, %v19327_v57  ;;  %v7982_v52 = vrot.slane %v7975_v56, 4  ;;  %v21237_v13 = vpop.f32.mrf.mxu2 }
 0x4ee   : > { %v21195_v12 = vsub.f32 %v6775_v61, %v21176_v8  ;;  %v8106_v4 = vperm.slane %v8102_v16, %v19312_v42  ;;  %v8113_v10 = vsel %vm753_vm2, %v8112_v2, %v7925_v19  ;;  %v8042_v24 = vrot.slane %v21150_v20, 4  ;;  %6825 = vmatmul.f32.vlgmr.msra.gmra.mxu1 %v21176_v8  ;;  %6700 = vmatmul.f32.vlgmr.msrb.gmra.mxu0 %v20962_v41 }
 0x4ef   : > { %6917 = vmatpush.msrb.mxu1 %v6792_v31  ;;  %v21202_v1 = vpop.xlane.xlu2 %4741  ;;  %v7976_v31 = vrot.slane %v7959_v46, 4  ;;  %v7978_v11 = vrot.slane %v7963_v60, 4  ;;  %v7983_v23 = vsel %vm753_vm2, 0.0, %v7982_v52  ;;  %v8120_v48 = vrot.slane %v21192_v34, 4  ;;  %6895 = vmatpush.msrb.mxu0 %v6820_v3 }
 0x4f0   : > { %18627 = vrcp.f32 %v21202_v1  ;;  %v4953_v33 = vand.u32 2147483648, %v21202_v1  ;;  %v6796_v22 = vand.u32 4294901760, %v21195_v12  ;;  %v7981_v45 = vsel %vm753_vm2, 0.0, %v7980_v30 }
 0x4f1   : > { %7018 = vmatpush.msra.mxu1 %v21099_v43  ;;  %6748 = vmatmul.f32.vlgmr.msrb.gmra.mxu2 %v20935_v62  ;;  %v8161_v16 = vsel %vm753_vm2, %v7982_v52, %v7971_v53  ;;  %v8166_v17 = vrot.slane %v7983_v23, 4  ;;  %v8132_v54 = vrot.slane %v21200_v27, 4  ;;  %v4951_v62 = vand.u32 2147483647, %v21202_v1 }
 0x4f2   : > { %6942 = vmatpush.msrb.mxu2 %v21099_v43  ;;  %v6797_v55 = vsub.f32 %v21195_v12, %v6796_v22  ;;  %v7979_v38 = vsel %vm753_vm2, 0.0, %v7978_v11  ;;  %v8150_v51 = vsel %vm753_vm2, %v7978_v11, %v7959_v46  ;;  %v21225_v61 = vor.u32 1.1754944e-38, %v4953_v33  ;;  %6873 = vmatmul.f32.vlgmr.msra.gmra.mxu3 %v6796_v22  ;;  %v21243_v33 = vpop.f32.mrf.mxu0  ;;  %v21252_v11 = vpop.f32.mrf.mxu3 }
 0x4f3   : > { %v7977_v41 = vsel %vm753_vm2, 0.0, %v7976_v31  ;;  %v8155_v58 = vrot.slane %v7979_v38, 4  ;;  %v8167_v19 = vsel %vm753_vm2, %v8166_v17, %v7981_v45  ;;  %vm4947_vm4 = vweird.f32 %v21202_v1  ;;  %v21230_v53 = vpop.f32.mrf.mxu1  ;;  %7066 = vmatpush.msra.mxu3 %v21099_v43 }
 0x4f4   : > { %v8171_v49 = vperm.slane %v8167_v19, %v19312_v42  ;;  %v8117_v29 = vperm.slane %v8113_v10, %v19312_v42  ;;  %v8121_v46 = vsel %vm753_vm2, %v8106_v4, %v8120_v48  ;;  %v8118_v56 = vrot.slane %v8106_v4, 4 }
 0x4f5   : > { %v21232_v3 = vpop.xlane.xlu1 %4738  ;;  %v6798_v30 = vand.u32 4294901760, %v6797_v55  ;;  %v8154_v60 = vperm.slane %v8150_v51, %v19312_v42  ;;  %v8165_v52 = vperm.slane %v8161_v16, %v19312_v42  ;;  %vm21246_vm5 = vcmp.eq.f32.partialorder %v4951_v62, 8.507059e+37 }
 0x4f6   : > { %v18628_v2 = vpop.eup %18627  ;;  %18629 = vrcp.f32 %v21232_v3  ;;  %v4937_v4 = vand.u32 2147483647, %v21232_v3  ;;  %v8156_v22 = vsel %vm753_vm2, %v8155_v58, %v7977_v41  ;;  %v8184_v43 = vrot.slane %v8171_v49, 4  ;;  %6919 = vmatmul.f32.vlgmr.msrb.gmra.mxu1 %v21176_v8 }
 0x4f7   : > { %v4943_v31 = vmul.f32 %v18628_v2, %v21202_v1  ;;  %vm4948_vm6 = vweird.f32 %v18628_v2  ;;  %v4939_v23 = vand.u32 2147483648, %v21232_v3  ;;  %v8160_v48 = vperm.slane %v8156_v22, %v19312_v42  ;;  %7121 = vmatpush.msrb.mxu1 %v7120_v35  ;;  %6799 = vmatmul.f32.vlgmr.msra.gmra.mxu0 %v6798_v30 }
 0x4f8   : > { %v8129_v45 = vperm.slane %v8121_v46, %v19327_v57  ;;  %v8185_v17 = vsel %vm753_vm2, %v8184_v43, %v8165_v52  ;;  %v8133_v62 = vsel %vm753_vm2, %v8117_v29, %v8132_v54  ;;  %v8119_v55 = vsel %vm753_vm2, %v8118_v56, %v21192_v34  ;;  %6995 = vmatpush.msra.mxu0 %v21112_v0  ;;  %vm4949_vm9 = vmor %vm4947_vm4, %vm4948_vm6 }
 0x4f9   : > { %v4944_v16 = vsub.f32 1.0, %v4943_v31  ;;  %6849 = vmatmul.f32.vlgmr.msra.gmra.mxu2 %v21195_v12  ;;  %v8172_v38 = vrot.slane %v8160_v48, 4  ;;  %v21268_v51 = vperm.slane %v8185_v17, %v19327_v57  ;;  %v8141_v7 = vperm.slane %v8133_v62, %v19327_v57 }
 0x4fa   : > { %7044 = vmatpush.msra.mxu2 %v6969_v26  ;;  %v21272_v35 = vperm.slane %v8119_v55, %v19327_v57  ;;  %vm4933_vm7 = vweird.f32 %v21232_v3  ;;  %v8130_v54 = vrot.slane %v8117_v29, 4  ;;  %v8174_v34 = vrot.slane %v8154_v60, 4 }
 0x4fb   : > { %v4945_v12 = vmul.f32 %v18628_v2, %v4944_v16  ;;  %v8186_v41 = vrot.slane %v8165_v52, 4  ;;  %v8173_v26 = vsel %vm753_vm2, %v8172_v38, %v8154_v60  ;;  %v8146_v19 = vrot.slane %v8141_v7, 4  ;;  %v5430_v22 = vpop.f32.mrf.mxu1  ;;  %v5360_v0 = vpop.f32.mrf.mxu2 }
 0x4fc   : > { %v18630_v58 = vpop.eup %18629  ;;  %v8144_v46 = vrot.slane %v21272_v35, 4  ;;  %v8148_v56 = vrot.slane %v8129_v45, 4  ;;  %v21280_v43 = vperm.slane %v8173_v26, %v19327_v57  ;;  %v8131_v60 = vsel %vm753_vm2, %v8130_v54, %v21200_v27  ;;  %v5310_v55 = vpop.f32.mrf.mxu0 }
 0x4fd   : > { %v4946_v30 = vadd.f32 %v18628_v2, %v4945_v12  ;;  %v4929_v31 = vmul.f32 %v18630_v58, %v21232_v3  ;;  %vm4934_vm8 = vweird.f32 %v18630_v58  ;;  %v21286_v29 = vsel %vm753_vm2, %v8146_v19, %v8129_v45  ;;  %v5384_v26 = vpop.f32.mrf.mxu3 }
 0x4fe   : > { %25644 = vst [vmem:[#allocation18_spill] sm:$0xff] %v21286_v29  ;;  %v8175_v52 = vsel %vm753_vm2, %v8160_v48, %v8174_v34  ;;  %v8187_v16 = vsel %vm753_vm2, %v8171_v49, %v8186_v41  ;;  %v8198_v38 = vrot.slane %v21280_v43, 4  ;;  %v8137_v12 = vperm.slane %v8131_v60, %v19327_v57  ;;  %vm4935_vm10 = vmor %vm4933_vm7, %vm4934_vm8 }
 0x4ff   : > { %v4950_v17 = vsel %vm4949_vm9, %v18628_v2, %v4946_v30  ;;  %v4930_v62 = vsub.f32 1.0, %v4929_v31  ;;  %v5337_v45 = vadd.f32 %v21230_v53, %v5310_v55  ;;  %v8183_v27 = vperm.slane %v8175_v52, %v19327_v57  ;;  %6897 = vmatmul.f32.vlgmr.msrb.gmra.mxu0 %v21176_v8 }
 0x500   : > { %v4955_v1 = vsel %vm21246_vm5, %v21225_v61, %v4950_v17  ;;  %v8195_v48 = vperm.slane %v8187_v16, %v19327_v57  ;;  %v21303_v54 = vsel %vm753_vm2, %v21268_v51, %v8198_v38  ;;  %v21306_v34 = vsel %vm753_vm2, %v8137_v12, %v8144_v46  ;;  %7091 = vmatpush.msrb.mxu0 %v21105_v18 }
 0x501   : > { %v4984_v49 = vmul.f32 %v20535_v25, %v4955_v1  ;;  %v4931_v2 = vmul.f32 %v18630_v58, %v4930_v62  ;;  %25645 = vst [vmem:[#allocation19_spill] sm:$0xff] %v21303_v54  ;;  %v5361_v41 = vadd.f32 %v5360_v0, %v5337_v45  ;;  %v8202_v53 = vrot.slane %v8183_v27, 4 }
 0x502   : > { %25646 = vst [vmem:[#allocation20_spill] sm:$0xff] %v21306_v34  ;;  %v8200_v61 = vrot.slane %v8195_v48, 4  ;;  %v21310_v10 = vsel %vm753_vm2, %v8141_v7, %v8148_v56  ;;  %vm4938_vm11 = vcmp.eq.f32.partialorder %v4937_v4, 8.507059e+37  ;;  %v4940_v8 = vor.u32 1.1754944e-38, %v4939_v23 }
 0x503   : > { %25647 = vst [vmem:[#allocation21_spill] sm:$0xff] %v21310_v10  ;;  %v8040_v19 = vrot.slane %v4984_v49, 4  ;;  %v21315_v25 = vsel %vm753_vm2, %v4984_v49, %v8042_v24  ;;  %v4932_v30 = vadd.f32 %v18630_v58, %v4931_v2  ;;  %v7073_v46 = vsel %vm2169_vm3, %v4984_v49, 0  ;;  %v5533_v0 = vpop.f32.mrf.mxu1  ;;  %v5459_v16 = vpop.f32.mrf.mxu2 }
 0x504   : > { %v21326_v7 = vand.u32 4294901760, %v7073_v46  ;;  %v21329_v24 = vsel %vm753_vm2, %v8200_v61, %v8183_v27  ;;  %v21336_v60 = vsel %vm753_vm2, %v8195_v48, %v8202_v53  ;;  %v8142_v52 = vrot.slane %v8137_v12, 4  ;;  %v5408_v62 = vpop.f32.mrf.mxu0 }
 0x505   : > { %25648 = vst [vmem:[#allocation22_spill] sm:$0xff] %v21329_v24  ;;  %v21333_v56 = vsel %vm753_vm2, %v8040_v19, %v21150_v20  ;;  %v4936_v31 = vsel %vm4935_vm10, %v18630_v58, %v4932_v30  ;;  %v5087_v4 = vadd.f32 %v21078_v59, %v21060_v44  ;;  %v5385_v23 = vadd.f32 %v5384_v26, %v5361_v41  ;;  %v5485_v38 = vpop.f32.mrf.mxu3 }
 0x506   : > { %25649 = vst [vmem:[#allocation23_spill] sm:$0xff] %v21336_v60  ;;  %v4941_v3 = vsel %vm4938_vm11, %v4940_v8, %v4936_v31  ;;  %v21345_v20 = vsub.f32 %v21132_v14, %v21167_v21  ;;  %v21349_v58 = vsel %vm753_vm2, %v8142_v52, %v21272_v35  ;;  %v5212_v44 = vadd.f32 %v21243_v33, %v21141_v9 }
 0x507   : > { %v21341_v17 = vmul.f32 %v20560_v36, %v4941_v3  ;;  %25650 = vst [vmem:[#allocation24_spill] sm:$0xff] %v21349_v58  ;;  %v5111_v55 = vadd.f32 %v21184_v15, %v5087_v4  ;;  %v5409_v59 = vadd.f32 %v5408_v62, %v5385_v23  ;;  %v21355_v12 = vsub.f32 %v7073_v46, %v21326_v7 }
 0x508   : > { %v7267_v45 = vand.u32 4294901760, %v21345_v20  ;;  %v5236_v26 = vadd.f32 %v21186_v32, %v5212_v44  ;;  %v5486_v48 = vadd.f32 %v5485_v38, %v5459_v16  ;;  %vm7862_vm0 = vcmask 130048  }
 0x509   : > { %v6924_v36 = vsel %vm2169_vm3, %v21341_v17, 0  ;;  %v5431_v14 = vadd.f32 %v5430_v22, %v5409_v59  ;;  %v5133_v35 = vadd.f32 %v21108_v47, %v5111_v55  ;;  %v7094_v9 = vand.u32 4294901760, %v21355_v12 }
 0x50a   : > { %v6943_v1 = vand.u32 4294901760, %v6924_v36  ;;  %v5260_v27 = vadd.f32 %v21237_v13, %v5236_v26  ;;  %v7268_v47 = vsub.f32 %v21345_v20, %v7267_v45  ;;  %vm7867_vm4 = vcmask 195584  }
 0x50b   : > { %v21363_v33 = vpop.f32.mrf.mxu1  ;;  %v5557_v49 = vpop.f32.mrf.mxu2  ;;  %v7370_v2 = vrot.slane %v5431_v14, 4  ;;  %v7372_v32 = vrot.slane %v5133_v35, 4  ;;  %v7095_v13 = vsub.f32 %v21355_v12, %v7094_v9 }
 0x50c   : > { %6974 = vmatmul.f32.vlgmr.msrb.gmra.mxu3 %v6943_v1  ;;  %v6944_v15 = vsub.f32 %v6924_v36, %v6943_v1  ;;  %v5509_v41 = vpop.f32.mrf.mxu0  ;;  %v5282_v30 = vadd.f32 %v21252_v11, %v5260_v27  ;;  %v7269_v52 = vand.u32 4294901760, %v7268_v47 }
 0x50d   : > { %7167 = vmatpush.msrb.mxu3 %v21105_v18  ;;  %v5510_v61 = vadd.f32 %v5509_v41, %v5486_v48  ;;  %v5579_v53 = vpop.f32.mrf.mxu3  ;;  %v7373_v46 = vsel %vm753_vm2, %v5431_v14, %v7372_v32  ;;  %v7096_v3 = vand.u32 4294901760, %v7095_v13  ;;  %v8196_v14 = vrot.slane %v21268_v51, 4 }
 0x50e   : > { %6998 = vmatmul.f32.vlgmr.msra.gmra.mxu0 %v6944_v15  ;;  %v6945_v22 = vand.u32 4294901760, %v6944_v15  ;;  %v7381_v23 = vperm.slane %v7373_v46, %v19312_v42 }
 0x50f   : > { %7193 = vmatpush.msra.mxu0 %v7118_v50  ;;  %v5534_v8 = vadd.f32 %v5533_v0, %v5510_v61  ;;  %v7371_v50 = vsel %vm753_vm2, %v7370_v2, %v5133_v35  ;;  %v8003_v2 = vperm.slane %v20938_v37, %v19312_v42  ;;  %v7991_v37 = vperm.slane %v20909_v28, %v19312_v42 }
 0x510   : > { %7022 = vmatmul.f32.vlgmr.msra.gmra.mxu1 %v6945_v22  ;;  %v6946_v19 = vsub.f32 %v6944_v15, %v6945_v22  ;;  %v7377_v11 = vperm.slane %v7371_v50, %v19312_v42  ;;  %v7408_v36 = vrot.slane %v7381_v23, 4 }
 0x511   : > { %7215 = vmatpush.msra.mxu1 %v21105_v18  ;;  %v5558_v4 = vadd.f32 %v5557_v49, %v5534_v8  ;;  %v7384_v18 = vrot.slane %v5282_v30, 4  ;;  %v21397_v49 = vsel %vm753_vm2, %v8196_v14, %v21280_v43  ;;  %v8008_v50 = vrot.slane %v8003_v2, 4 }
 0x512   : > { %v6947_v31 = vand.u32 4294901760, %v6946_v19  ;;  %v7396_v35 = vrot.slane %v7377_v11, 4  ;;  %25651 = vst [vmem:[#allocation25_spill] sm:$0xff] %v21397_v49 }
 0x513   : > { %v21378_v16 = vpop.f32.mrf.mxu1  ;;  %v5580_v62 = vadd.f32 %v5579_v53, %v5558_v4  ;;  %v21382_v0 = vpop.f32.mrf.mxu2 }
 0x514   : > { %6948 = vmatmul.f32.vlgmr.msrb.gmra.mxu2 %v6947_v31  ;;  %7068 = vmatmul.f32.vlgmr.msra.gmra.mxu3 %v6943_v1  ;;  %v5608_v55 = vpop.f32.mrf.mxu0  ;;  %v7995_v31 = vperm.slane %v20897_v6, %v19312_v42 }
 0x515   : > { %7144 = vmatpush.msrb.mxu2 %v21119_v40  ;;  %7270 = vmatpush.msra.mxu3 %v7269_v52  ;;  %v7382_v44 = vrot.slane %v5580_v62, 4  ;;  %v7385_v59 = vsel %vm753_vm2, %v5580_v62, %v7384_v18  ;;  %v21386_v38 = vpop.f32.mrf.mxu3 }
 0x516   : > { %7097 = vmatmul.f32.vlgmr.msrb.gmra.mxu0 %v7096_v3  ;;  %v7393_v40 = vperm.slane %v7385_v59, %v19312_v42 }
 0x517   : > { %7293 = vmatpush.msrb.mxu0 %v21345_v20  ;;  %v7383_v26 = vsel %vm753_vm2, %v7382_v44, %v5282_v30 }
 0x518   : > { %7123 = vmatmul.f32.vlgmr.msrb.gmra.mxu1 %v21326_v7  ;;  %v7389_v15 = vperm.slane %v7383_v26, %v19312_v42  ;;  %v7406_v27 = vrot.slane %v7393_v40, 4  ;;  %v7409_v48 = vsel %vm753_vm2, %v7393_v40, %v7408_v36  ;;  %v8007_v36 = vperm.slane %v20954_v5, %v19312_v42 }
 0x519   : > { %7316 = vmatpush.msrb.mxu1 %v21167_v21  ;;  %v7417_v22 = vperm.slane %v7409_v48, %v19327_v57  ;;  %v8010_v40 = vrot.slane %v7991_v37, 4  ;;  %v8022_v5 = vrot.slane %v7995_v31, 4 }
 0x51a   : > { %v7394_v51 = vrot.slane %v7389_v15, 4  ;;  %v7397_v41 = vsel %vm753_vm2, %v7389_v15, %v7396_v35  ;;  %v7407_v47 = vsel %vm753_vm2, %v7406_v27, %v7381_v23  ;;  %v8009_v27 = vsel %vm753_vm2, %v8008_v50, %v7991_v37 }
 0x51b   : > { %v21404_v32 = vpop.f32.mrf.mxu1  ;;  %v7405_v43 = vperm.slane %v7397_v41, %v19327_v57  ;;  %v7413_v61 = vperm.slane %v7407_v47, %v19327_v57  ;;  %v8011_v48 = vsel %vm753_vm2, %v8003_v2, %v8010_v40  ;;  %v8020_v41 = vrot.slane %v8007_v36, 4 }
 0x51c   : > { %7046 = vmatmul.f32.vlgmr.msra.gmra.mxu2 %v6943_v1  ;;  %7171 = vmatmul.f32.vlgmr.msrb.gmra.mxu3 %v7094_v9  ;;  %v7424_v1 = vrot.slane %v7417_v22, 4  ;;  %v5757_v9 = vpop.f32.mrf.mxu2  ;;  %v7395_v53 = vsel %vm753_vm2, %v7394_v51, %v7377_v11  ;;  %v5706_v19 = vpop.f32.mrf.mxu0  ;;  %v5635_v11 = vadd.f32 %v21363_v33, %v5608_v55  ;;  %v8015_v50 = vperm.slane %v8009_v27, %v19327_v57 }
 0x51d   : > { %7240 = vmatpush.msra.mxu2 %v21167_v21  ;;  %7364 = vmatpush.msrb.mxu3 %v21167_v21  ;;  %v7401_v13 = vperm.slane %v7395_v53, %v19327_v57  ;;  %v7420_v30 = vrot.slane %v7405_v43, 4  ;;  %v7422_v46 = vrot.slane %v7413_v61, 4  ;;  %v5783_v8 = vpop.f32.mrf.mxu3  ;;  %v8021_v2 = vsel %vm753_vm2, %v8020_v41, %v7995_v31 }
 0x51e   : > { %7195 = vmatmul.f32.vlgmr.msra.gmra.mxu0 %v21326_v7  ;;  %v7425_v21 = vsel %vm753_vm2, 0.0, %v7424_v1  ;;  %v7605_v4 = vsel %vm753_vm2, %v7424_v1, %v7413_v61  ;;  %v5659_v20 = vadd.f32 %v21382_v0, %v5635_v11  ;;  %v8027_v11 = vperm.slane %v8021_v2, %v19327_v57 }
 0x51f   : > { %v7610_v52 = vrot.slane %v7425_v21, 4  ;;  %v7421_v28 = vsel %vm753_vm2, 0.0, %v7420_v30  ;;  %v7418_v3 = vrot.slane %v7401_v13, 4  ;;  %v7423_v23 = vsel %vm753_vm2, 0.0, %v7422_v46 }
 0x520   : > { %7217 = vmatmul.f32.vlgmr.msra.gmra.mxu1 %v21326_v7  ;;  %v7594_v18 = vsel %vm753_vm2, %v7420_v30, %v7401_v13  ;;  %v7599_v44 = vrot.slane %v7421_v28, 4  ;;  %v7609_v7 = vperm.slane %v7605_v4, %v19312_v42  ;;  %v8023_v46 = vsel %vm753_vm2, %v8007_v36, %v8022_v5 }
 0x521   : > { %v7598_v62 = vperm.slane %v7594_v18, %v19312_v42  ;;  %v7419_v6 = vsel %vm753_vm2, 0.0, %v7418_v3  ;;  %v7611_v59 = vsel %vm753_vm2, %v7610_v52, %v7423_v23  ;;  %v8019_v52 = vperm.slane %v8011_v48, %v19327_v57 }
 0x522   : > { %v7600_v33 = vsel %vm753_vm2, %v7599_v44, %v7419_v6  ;;  %v7615_v55 = vperm.slane %v7611_v59, %v19312_v42  ;;  %v7630_v15 = vrot.slane %v7609_v7, 4  ;;  %v5683_v4 = vadd.f32 %v21386_v38, %v5659_v20 }
 0x523   : > { %v5932_v14 = vpop.f32.mrf.mxu1  ;;  %v7618_v35 = vrot.slane %v7598_v62, 4  ;;  %v5784_v28 = vadd.f32 %v5783_v8, %v5757_v9  ;;  %v8031_v8 = vperm.slane %v8023_v46, %v19327_v57  ;;  %v8032_v36 = vrot.slane %v8015_v50, 4 }
 0x524   : > { %7147 = vmatmul.f32.vlgmr.msrb.gmra.mxu2 %v21355_v12  ;;  %v21435_v26 = vpop.f32.mrf.mxu2  ;;  %v7604_v12 = vperm.slane %v7600_v33, %v19312_v42  ;;  %v5807_v22 = vpop.f32.mrf.mxu0  ;;  %v7628_v51 = vrot.slane %v7615_v55, 4  ;;  %v7631_v43 = vsel %vm753_vm2, %v7615_v55, %v7630_v15  ;;  %v8034_v40 = vrot.slane %v8019_v52, 4 }
 0x525   : > { %7342 = vmatpush.msrb.mxu2 %v7267_v45  ;;  %v21441_v45 = vpop.f32.mrf.mxu3  ;;  %v7639_v53 = vperm.slane %v7631_v43, %v19327_v57  ;;  %v5808_v44 = vadd.f32 %v5807_v22, %v5784_v28  ;;  %v8038_v5 = vrot.slane %v8031_v8, 4 }
 0x526   : > { %v7619_v47 = vsel %vm753_vm2, %v7604_v12, %v7618_v35  ;;  %v7616_v61 = vrot.slane %v7604_v12, 4  ;;  %v7629_v37 = vsel %vm753_vm2, %v7628_v51, %v7609_v7  ;;  %v8036_v12 = vrot.slane %v8027_v11, 4 }
 0x527   : > { %v7627_v1 = vperm.slane %v7619_v47, %v19327_v57  ;;  %v7635_v0 = vperm.slane %v7629_v37, %v19327_v57  ;;  %v7644_v21 = vrot.slane %v7639_v53, 4  ;;  %v8035_v48 = vsel %vm753_vm2, 0.0, %v8034_v40 }
 0x528   : > { %v7617_v30 = vsel %vm753_vm2, %v7616_v61, %v7598_v62  ;;  %v5707_v62 = vadd.f32 %v5706_v19, %v5683_v4  ;;  %v8204_v22 = vsel %vm753_vm2, %v8034_v40, %v8015_v50  ;;  %v8037_v20 = vsel %vm753_vm2, 0.0, %v8036_v12 }
 0x529   : > { %v7623_v31 = vperm.slane %v7617_v30, %v19327_v57  ;;  %v7640_v3 = vrot.slane %v7635_v0, 4  ;;  %v7645_v23 = vsel %vm753_vm2, %v7644_v21, %v7627_v1  ;;  %v7646_v35 = vrot.slane %v7627_v1, 4 }
 0x52a   : > { %v21449_v13 = vpop.xlane.xlu0 %4744  ;;  %7830 = vrot.lane.b32.xlu0 %v7645_v23, %s18997_s7  ;;  %v8039_v47 = vsel %vm753_vm2, 0.0, %v8038_v5  ;;  %v8208_v43 = vperm.slane %v8204_v22, %v19312_v42  ;;  %v8209_v61 = vrot.slane %v8035_v48, 4  ;;  %v8215_v1 = vsel %vm753_vm2, %v8038_v5, %v8027_v11 }
 0x52b   : > { %18631 = vrcp.f32 %v21449_v13  ;;  %v21460_v18 = vpop.f32.mrf.mxu1  ;;  %v7642_v6 = vrot.slane %v7623_v31, 4  ;;  %v21465_v59 = vsel %vm753_vm2, %v7640_v3, %v7623_v31  ;;  %v4965_v38 = vand.u32 2147483647, %v21449_v13 }
 0x52c   : > { %v5956_v7 = vpop.f32.mrf.mxu2  ;;  %v5906_v9 = vpop.f32.mrf.mxu0  ;;  %v4967_v27 = vand.u32 2147483648, %v21449_v13  ;;  %v7647_v2 = vsel %vm753_vm2, %v7639_v53, %v7646_v35  ;;  %v8219_v30 = vperm.slane %v8215_v1, %v19312_v42  ;;  %v8228_v50 = vrot.slane %v8208_v43, 4 }
 0x52d   : > { %v5933_v33 = vadd.f32 %v5932_v14, %v5906_v9  ;;  %v7643_v55 = vsel %vm753_vm2, %v7635_v0, %v7642_v6  ;;  %v5980_v19 = vpop.f32.mrf.mxu3  ;;  %v8033_v14 = vsel %vm753_vm2, 0.0, %v8032_v36  ;;  %v8220_v0 = vrot.slane %v8039_v47, 4 }
 0x52e   : > { %7814 = vrot.lane.b32.xlu1 %v7643_v55, %s18998_s8  ;;  %v8210_v21 = vsel %vm753_vm2, %v8209_v61, %v8033_v14  ;;  %v8240_v3 = vrot.slane %v8219_v30, 4  ;;  %v5729_v53 = vadd.f32 %v21378_v16, %v5707_v62  ;;  %vm4961_vm13 = vweird.f32 %v21449_v13 }
 0x52f   : > { %v5957_v41 = vadd.f32 %v5956_v7, %v5933_v33  ;;  %v8214_v28 = vperm.slane %v8210_v21, %v19312_v42  ;;  %v8221_v31 = vsel %vm753_vm2, %v8220_v0, %v8037_v20  ;;  %v5832_v33 = vadd.f32 %v21404_v32, %v5808_v44 }
 0x530   : > { %v8225_v11 = vperm.slane %v8221_v31, %v19312_v42  ;;  %v4968_v55 = vor.u32 1.1754944e-38, %v4967_v27  ;;  %vm4966_vm15 = vcmp.eq.f32.partialorder %v4965_v38, 8.507059e+37  ;;  %v8054_v27 = vrot.slane %v21341_v17, 4 }
 0x531   : > { %v18632_v15 = vpop.eup %18631  ;;  %v5981_v46 = vadd.f32 %v5980_v19, %v5957_v41  ;;  %v8226_v36 = vrot.slane %v8214_v28, 4  ;;  %v8229_v40 = vsel %vm753_vm2, %v8214_v28, %v8228_v50  ;;  %v18726_v19 = vld [vmem:[%s19176_s13 + $0x8] sm:$0xff]  ;;  %v5856_v38 = vadd.f32 %v21435_v26, %v5832_v33 }
 0x532   : > { %v4957_v51 = vmul.f32 %v18632_v15, %v21449_v13  ;;  %vm4962_vm12 = vweird.f32 %v18632_v15  ;;  %7846 = vrot.lane.b32.xlu0 %v7647_v2, %s18999_s10  ;;  %v8238_v16 = vrot.slane %v8225_v11, 4  ;;  %v8241_v13 = vsel %vm753_vm2, %v8225_v11, %v8240_v3 }
 0x533   : > { %v6129_v4 = vpop.f32.mrf.mxu1  ;;  %vm4963_vm14 = vmor %vm4961_vm13, %vm4962_vm12  ;;  %v8227_v35 = vsel %vm753_vm2, %v8226_v36, %v8208_v43  ;;  %v21497_v12 = vperm.slane %v8241_v13, %v19327_v57  ;;  %v21517_v43 = vperm.slane %v8229_v40, %v19327_v57 }
 0x534   : > { %v4958_v37 = vsub.f32 1.0, %v4957_v51  ;;  %v6004_v23 = vpop.f32.mrf.mxu0  ;;  %v6055_v9 = vpop.f32.mrf.mxu2  ;;  %v21501_v32 = vperm.slane %v8227_v35, %v19327_v57  ;;  %v8239_v44 = vsel %vm753_vm2, %v8238_v16, %v8219_v30 }
 0x535   : > { %v6005_v6 = vadd.f32 %v6004_v23, %v5981_v46  ;;  %v6081_v8 = vpop.f32.mrf.mxu3  ;;  %v8254_v14 = vrot.slane %v21497_v12, 4 }
 0x536   : > { %v4959_v52 = vmul.f32 %v18632_v15, %v4958_v37  ;;  %8378 = vrot.lane.b32.xlu1 %v18726_v19, %s18996_s29  ;;  %v6082_v51 = vadd.f32 %v6081_v8, %v6055_v9  ;;  %v8252_v41 = vrot.slane %v21501_v32, 4 }
 0x537   : > { %v6027_v5 = vadd.f32 %v21460_v18, %v6005_v6  ;;  %v21531_v21 = vsel %vm753_vm2, %v8254_v14, %v21517_v43 }
 0x538   : > { %v4960_v7 = vadd.f32 %v18632_v15, %v4959_v52  ;;  %25653 = vst [vmem:[#allocation27_spill] sm:$0xff] %v21531_v21  ;;  %v5878_v52 = vadd.f32 %v21441_v45, %v5856_v38 }
 0x539   : > { %v7426_v61 = vrot.slane %v6027_v5, 4 }
 0x53a   : > { %v4964_v62 = vsel %vm4963_vm14, %v18632_v15, %v4960_v7  ;;  %v21507_v15 = vperm.slane %v8239_v44, %v19327_v57  ;;  %v7440_v9 = vrot.slane %v5878_v52, 4 }
 0x53b   : > { %v4969_v48 = vsel %vm4966_vm15, %v4968_v55, %v4964_v62  ;;  %v21523_v30 = vpop.f32.mrf.mxu1  ;;  %v7427_v23 = vsel %vm753_vm2, %v7426_v61, %v5729_v53 }
 0x53c   : > { %v4985_v22 = vmul.f32 %v20831_v39, %v4969_v48  ;;  %v7428_v39 = vrot.slane %v5729_v53, 4  ;;  %v6105_v1 = vpop.f32.mrf.mxu0  ;;  %v21527_v46 = vsel %vm753_vm2, %v21507_v15, %v8252_v41  ;;  %v6153_v31 = vpop.f32.mrf.mxu2  ;;  %v7433_v36 = vperm.slane %v7427_v23, %v19312_v42 }
 0x53d   : > { %v6106_v2 = vadd.f32 %v6105_v1, %v6082_v51  ;;  %v6175_v0 = vpop.f32.mrf.mxu3  ;;  %25652 = vst [vmem:[#allocation26_spill] sm:$0xff] %v21527_v46 }
 0x53e   : > { %v8052_v18 = vrot.slane %v4985_v22, 4  ;;  %v21513_v20 = vsel %vm753_vm2, %v4985_v22, %v8054_v27  ;;  %v7222_v47 = vsel %vm2169_vm3, %v4985_v22, 0  ;;  %v7429_v28 = vsel %vm753_vm2, %v6027_v5, %v7428_v39 }
 0x53f   : > { %v7241_v37 = vand.u32 4294901760, %v7222_v47  ;;  %v7437_v7 = vperm.slane %v7429_v28, %v19312_v42  ;;  %v7452_v62 = vrot.slane %v7433_v36, 4 }
 0x540   : > { %v21521_v26 = vsel %vm753_vm2, %v8052_v18, %v21341_v17  ;;  %v6130_v17 = vadd.f32 %v6129_v4, %v6106_v2 }
 0x541   : > { %7272 = vmatmul.f32.vlgmr.msra.gmra.mxu3 %v7241_v37  ;;  %v7242_v50 = vsub.f32 %v7222_v47, %v7241_v37  ;;  %v7464_v19 = vrot.slane %v7437_v7, 4 }
 0x542   : > { %v6154_v11 = vadd.f32 %v6153_v31, %v6130_v17  ;;  %v8256_v17 = vrot.slane %v21517_v43, 4 }
 0x543   : > { %7296 = vmatmul.f32.vlgmr.msrb.gmra.mxu0 %v7242_v50  ;;  %v7243_v3 = vand.u32 4294901760, %v7242_v50  ;;  %v21545_v13 = vpop.f32.mrf.mxu1 }
 0x544   : > { %v6176_v8 = vadd.f32 %v6175_v0, %v6154_v11  ;;  %v21538_v40 = vpop.f32.mrf.mxu0  ;;  %v21550_v27 = vpop.f32.mrf.mxu2  ;;  %v21572_v43 = vsel %vm753_vm2, %v21497_v12, %v8256_v17 }
 0x545   : > { %7320 = vmatmul.f32.vlgmr.msrb.gmra.mxu1 %v7243_v3  ;;  %v7244_v6 = vsub.f32 %v7242_v50, %v7243_v3  ;;  %v21541_v55 = vpop.f32.mrf.mxu3  ;;  %25654 = vst [vmem:[#allocation28_spill] sm:$0xff] %v21572_v43 }
 0x546   : > { %v7438_v33 = vrot.slane %v6176_v8, 4  ;;  %v7441_v4 = vsel %vm753_vm2, %v6176_v8, %v7440_v9 }
 0x547   : > { %v7245_v45 = vand.u32 4294901760, %v7244_v6  ;;  %v7449_v53 = vperm.slane %v7441_v4, %v19312_v42 }
 0x548   : > { %v7439_v16 = vsel %vm753_vm2, %v7438_v33, %v5878_v52  ;;  %v8250_v33 = vrot.slane %v21507_v15, 4 }
 0x549   : > { %7246 = vmatmul.f32.vlgmr.msra.gmra.mxu2 %v7245_v45  ;;  %7366 = vmatmul.f32.vlgmr.msrb.gmra.mxu3 %v7241_v37  ;;  %v7445_v35 = vperm.slane %v7439_v16, %v19312_v42  ;;  %v7462_v48 = vrot.slane %v7449_v53, 4  ;;  %v7465_v5 = vsel %vm753_vm2, %v7449_v53, %v7464_v19 }
 0x54a   : > { %v7473_v44 = vperm.slane %v7465_v5, %v19327_v57 }
 0x54b   : > { %v7450_v22 = vrot.slane %v7445_v35, 4  ;;  %v7453_v38 = vsel %vm753_vm2, %v7445_v35, %v7452_v62  ;;  %v7463_v51 = vsel %vm753_vm2, %v7462_v48, %v7437_v7  ;;  %v6427_v8 = vpop.f32.mrf.mxu1  ;;  %v21580_v35 = vsel %vm753_vm2, %v8250_v33, %v21501_v32 }
 0x54c   : > { %v7461_v41 = vperm.slane %v7453_v38, %v19327_v57  ;;  %v7469_v14 = vperm.slane %v7463_v51, %v19327_v57  ;;  %v7480_v18 = vrot.slane %v7473_v44, 4  ;;  %v21557_v39 = vpop.f32.mrf.mxu0  ;;  %25655 = vst [vmem:[#allocation29_spill] sm:$0xff] %v21580_v35 }
 0x54d   : > { %v7451_v47 = vsel %vm753_vm2, %v7450_v22, %v7433_v36  ;;  %v6379_v50 = vpop.f32.mrf.mxu3 }
 0x54e   : > { %v7457_v61 = vperm.slane %v7451_v47, %v19327_v57  ;;  %v7476_v1 = vrot.slane %v7461_v41, 4  ;;  %v7478_v2 = vrot.slane %v7469_v14, 4  ;;  %v7481_v0 = vsel %vm753_vm2, 0.0, %v7480_v18 }
 0x54f   : > { %v7664_v52 = vrot.slane %v7481_v0, 4  ;;  %v7659_v28 = vsel %vm753_vm2, %v7480_v18, %v7469_v14 }
 0x550   : > { %v7477_v31 = vsel %vm753_vm2, 0.0, %v7476_v1  ;;  %v7474_v3 = vrot.slane %v7457_v61, 4  ;;  %v7479_v23 = vsel %vm753_vm2, 0.0, %v7478_v2  ;;  %v7648_v11 = vsel %vm753_vm2, %v7476_v1, %v7457_v61 }
 0x551   : > { %7344 = vmatmul.f32.vlgmr.msrb.gmra.mxu2 %v7241_v37  ;;  %v7652_v7 = vperm.slane %v7648_v11, %v19312_v42  ;;  %v7653_v6 = vrot.slane %v7477_v31, 4  ;;  %v7663_v9 = vperm.slane %v7659_v28, %v19312_v42  ;;  %v7665_v45 = vsel %vm753_vm2, %v7664_v52, %v7479_v23 }
 0x552   : > { %v7475_v37 = vsel %vm753_vm2, 0.0, %v7474_v3  ;;  %v7669_v19 = vperm.slane %v7665_v45, %v19312_v42  ;;  %v6231_v3 = vadd.f32 %v21523_v30, %v21538_v40 }
 0x553   : > { %v7654_v4 = vsel %vm753_vm2, %v7653_v6, %v7475_v37  ;;  %v7672_v16 = vrot.slane %v7652_v7, 4  ;;  %v7684_v62 = vrot.slane %v7663_v9, 4  ;;  %v6528_v17 = vpop.f32.mrf.mxu1 }
 0x554   : > { %v6353_v36 = vpop.f32.mrf.mxu2  ;;  %v7658_v53 = vperm.slane %v7654_v4, %v19312_v42  ;;  %v6403_v48 = vpop.f32.mrf.mxu0  ;;  %v7682_v5 = vrot.slane %v7669_v19, 4  ;;  %v6255_v6 = vadd.f32 %v21550_v27, %v6231_v3 }
 0x555   : > { %v6473_v44 = vpop.f32.mrf.mxu3  ;;  %v7685_v22 = vsel %vm753_vm2, %v7669_v19, %v7684_v62  ;;  %v6380_v45 = vadd.f32 %v6379_v50, %v6353_v36  ;;  %v8383_v3 = vpop.permute.xlu2 %8382 }
 0x556   : > { %v7673_v12 = vsel %vm753_vm2, %v7658_v53, %v7672_v16  ;;  %v7670_v15 = vrot.slane %v7658_v53, 4  ;;  %v7693_v51 = vperm.slane %v7685_v22, %v19327_v57  ;;  %v7683_v41 = vsel %vm753_vm2, %v7682_v5, %v7663_v9 }
 0x557   : > { %v7681_v38 = vperm.slane %v7673_v12, %v19327_v57  ;;  %v7689_v18 = vperm.slane %v7683_v41, %v19327_v57  ;;  %v6279_v4 = vadd.f32 %v21541_v55, %v6255_v6  ;;  %v6404_v30 = vadd.f32 %v6403_v48, %v6380_v45 }
 0x558   : > { %v7671_v14 = vsel %vm753_vm2, %v7670_v15, %v7652_v7  ;;  %v7698_v32 = vrot.slane %v7693_v51, 4 }
 0x559   : > { %v7700_v47 = vrot.slane %v7681_v38, 4  ;;  %v7677_v61 = vperm.slane %v7671_v14, %v19327_v57  ;;  %v7694_v1 = vrot.slane %v7689_v18, 4  ;;  %v6303_v62 = vadd.f32 %v21557_v39, %v6279_v4 }
 0x55a   : > { %v7699_v0 = vsel %vm753_vm2, %v7698_v32, %v7681_v38  ;;  %v6428_v15 = vadd.f32 %v6427_v8, %v6404_v30 }
 0x55b   : > { %v7701_v52 = vsel %vm753_vm2, %v7693_v51, %v7700_v47  ;;  %v7696_v28 = vrot.slane %v7677_v61, 4  ;;  %7832 = vrot.lane.b32.xlu1 %v7699_v0, %s18997_s7  ;;  %v21595_v31 = vsel %vm753_vm2, %v7694_v1, %v7677_v61  ;;  %v6622_v16 = vpop.f32.mrf.mxu1  ;;  %v6325_v22 = vadd.f32 %v21545_v13, %v6303_v62 }
 0x55c   : > { %v6451_v2 = vpop.f32.mrf.mxu2  ;;  %7848 = vrot.lane.b32.xlu2 %v7701_v52, %s18999_s10  ;;  %v6502_v23 = vpop.f32.mrf.mxu0 }
 0x55d   : > { %v7697_v11 = vsel %vm753_vm2, %v7689_v18, %v7696_v28  ;;  %v6576_v7 = vpop.f32.mrf.mxu3  ;;  %v6529_v9 = vadd.f32 %v6528_v17, %v6502_v23  ;;  %v6452_v51 = vadd.f32 %v6451_v2, %v6428_v15  ;;  %v7484_v36 = vrot.slane %v6325_v22, 4 }
 0x55e   : > { %7816 = vrot.lane.b32.xlu0 %v7697_v11, %s18998_s8  ;;  %v21612_v11 = vand.u32 4294901760, %v8383_v3 }
 0x55f   : > { %v6474_v18 = vadd.f32 %v6473_v44, %v6452_v51 }
 0x560   : > { %8568 = vmatpush.msra.mxu3 %v21612_v11  ;;  %8417 = vmatpush.msra.mxu0 %v21612_v11 }
 0x561   : > { %v7496_v8 = vrot.slane %v6474_v18, 4 }
 0x563   : > { %v6725_v55 = vpop.f32.mrf.mxu1 }
 0x564   : > { %v6552_v37 = vpop.f32.mrf.mxu2  ;;  %v6600_v19 = vpop.f32.mrf.mxu0 }
 0x565   : > { %v6553_v33 = vadd.f32 %v6552_v37, %v6529_v9  ;;  %v6677_v5 = vpop.f32.mrf.mxu3 }
 0x567   : > { %v6577_v53 = vadd.f32 %v6576_v7, %v6553_v33  ;;  %v21618_v33 = vsub.f32 %v8383_v3, %v21612_v11 }
 0x569   : > { %v6601_v40 = vadd.f32 %v6600_v19, %v6577_v53  ;;  %8524 = vmatpush.msra.mxu2 %v21618_v33 }
 0x56b   : > { %v6623_v38 = vadd.f32 %v6622_v16, %v6601_v40 }
 0x56c   : > { %v6651_v12 = vpop.f32.mrf.mxu2  ;;  %v6701_v41 = vpop.f32.mrf.mxu0 }
 0x56d   : > { %v6678_v27 = vadd.f32 %v6677_v5, %v6651_v12  ;;  %v7482_v14 = vrot.slane %v6623_v38, 4  ;;  %v7485_v32 = vsel %vm753_vm2, %v6623_v38, %v7484_v36  ;;  %v6771_v13 = vpop.f32.mrf.mxu3 }
 0x56e   : > { %v7493_v1 = vperm.slane %v7485_v32, %v19312_v42  ;;  %v8381_v32 = vpop.permute.xlu2 %8380 }
 0x56f   : > { %v6702_v50 = vadd.f32 %v6701_v41, %v6678_v27  ;;  %v7483_v48 = vsel %vm753_vm2, %v7482_v14, %v6325_v22 }
 0x570   : > { %v7489_v2 = vperm.slane %v7483_v48, %v19312_v42  ;;  %v7520_v17 = vrot.slane %v7493_v1, 4  ;;  %v21638_v48 = vand.u32 4294901760, %v8381_v32 }
 0x571   : > { %v6726_v47 = vadd.f32 %v6725_v55, %v6702_v50 }
 0x572   : > { %v7508_v7 = vrot.slane %v7489_v2, 4  ;;  %8570 = vmatpush.msra.mxu3 %v21638_v48  ;;  %8419 = vmatpush.msra.mxu0 %v21638_v48 }
 0x574   : > { %v6749_v39 = vpop.f32.mrf.mxu2 }
 0x575   : > { %v6750_v61 = vadd.f32 %v6749_v39, %v6726_v47 }
 0x577   : > { %v6772_v0 = vadd.f32 %v6771_v13, %v6750_v61 }
 0x579   : > { %v7494_v52 = vrot.slane %v6772_v0, 4  ;;  %v7497_v28 = vsel %vm753_vm2, %v6772_v0, %v7496_v8 }
 0x57a   : > { %v7505_v44 = vperm.slane %v7497_v28, %v19312_v42 }
 0x57b   : > { %v7495_v23 = vsel %vm753_vm2, %v7494_v52, %v6474_v18 }
 0x57c   : > { %v7501_v6 = vperm.slane %v7495_v23, %v19312_v42  ;;  %v7518_v9 = vrot.slane %v7505_v44, 4  ;;  %v7521_v37 = vsel %vm753_vm2, %v7505_v44, %v7520_v17 }
 0x57d   : > { %v7529_v45 = vperm.slane %v7521_v37, %v19327_v57 }
 0x57e   : > { %v7506_v4 = vrot.slane %v7501_v6, 4  ;;  %v7509_v19 = vsel %vm753_vm2, %v7501_v6, %v7508_v7  ;;  %v7519_v53 = vsel %vm753_vm2, %v7518_v9, %v7493_v1 }
 0x57f   : > { %v7517_v16 = vperm.slane %v7509_v19, %v19327_v57  ;;  %v7525_v62 = vperm.slane %v7519_v53, %v19327_v57  ;;  %v7536_v30 = vrot.slane %v7529_v45, 4 }
 0x580   : > { %v7507_v40 = vsel %vm753_vm2, %v7506_v4, %v7489_v2  ;;  %v21644_v2 = vsub.f32 %v8381_v32, %v21638_v48 }
 0x581   : > { %v7513_v5 = vperm.slane %v7507_v40, %v19327_v57  ;;  %v7532_v12 = vrot.slane %v7517_v16, 4  ;;  %v7534_v22 = vrot.slane %v7525_v62, 4  ;;  %v7537_v15 = vsel %vm753_vm2, 0.0, %v7536_v30 }
 0x582   : > { %v7718_v38 = vrot.slane %v7537_v15, 4  ;;  %v7713_v27 = vsel %vm753_vm2, %v7536_v30, %v7525_v62  ;;  %8527 = vmatpush.msra.mxu2 %v21644_v2  ;;  %v8051_v15 = vperm.slane %v21315_v25, %v19312_v42 }
 0x583   : > { %v7530_v51 = vrot.slane %v7513_v5, 4  ;;  %v7533_v41 = vsel %vm753_vm2, 0.0, %v7532_v12  ;;  %v7535_v50 = vsel %vm753_vm2, 0.0, %v7534_v22  ;;  %v7702_v36 = vsel %vm753_vm2, %v7532_v12, %v7513_v5 }
 0x584   : > { %v7706_v14 = vperm.slane %v7702_v36, %v19312_v42  ;;  %v7707_v55 = vrot.slane %v7533_v41, 4  ;;  %v7717_v18 = vperm.slane %v7713_v27, %v19312_v42  ;;  %v7719_v39 = vsel %vm753_vm2, %v7718_v38, %v7535_v50 }
 0x585   : > { %v7531_v47 = vsel %vm753_vm2, 0.0, %v7530_v51  ;;  %v7723_v1 = vperm.slane %v7719_v39, %v19312_v42  ;;  %v8471_v5 = vand.u32 4294901760, %v21618_v33  ;;  %v8477_v22 = vand.u32 4294901760, %v21644_v2 }
 0x586   : > { %v7708_v61 = vsel %vm753_vm2, %v7707_v55, %v7531_v47  ;;  %v7726_v13 = vrot.slane %v7706_v14, 4  ;;  %v7738_v0 = vrot.slane %v7717_v18, 4  ;;  %v8063_v38 = vperm.slane %v21513_v20, %v19312_v42 }
 0x587   : > { %v7712_v8 = vperm.slane %v7708_v61, %v19312_v42  ;;  %v7736_v52 = vrot.slane %v7723_v1, 4  ;;  %v8472_v12 = vsub.f32 %v21618_v33, %v8471_v5  ;;  %v8478_v51 = vsub.f32 %v21644_v2, %v8477_v22  ;;  %v21686_v61 = vpop.f32.mrf.mxu1 }
 0x588   : > { %v7739_v17 = vsel %vm753_vm2, %v7723_v1, %v7738_v0  ;;  %v8047_v41 = vperm.slane %v21333_v56, %v19312_v42  ;;  %v8078_v36 = vrot.slane %v8051_v15, 4  ;;  %v8076_v55 = vrot.slane %v8063_v38, 4 }
 0x589   : > { %v7727_v28 = vsel %vm753_vm2, %v7712_v8, %v7726_v13  ;;  %v7724_v44 = vrot.slane %v7712_v8, 4  ;;  %v7747_v23 = vperm.slane %v7739_v17, %v19327_v57  ;;  %v7737_v7 = vsel %vm753_vm2, %v7736_v52, %v7717_v18  ;;  %v8377_v52 = vpop.permute.xlu2 %8376 }
 0x58a   : > { %v7735_v3 = vperm.slane %v7727_v28, %v19327_v57  ;;  %v7743_v9 = vperm.slane %v7737_v7, %v19327_v57  ;;  %v8473_v27 = vand.u32 4294901760, %v8472_v12  ;;  %v8479_v50 = vand.u32 4294901760, %v8478_v51 }
 0x58b   : > { %v7725_v6 = vsel %vm753_vm2, %v7724_v44, %v7706_v14  ;;  %v7752_v37 = vrot.slane %v7747_v23, 4  ;;  %v8059_v14 = vperm.slane %v21521_v26, %v19312_v42  ;;  %v8066_v25 = vrot.slane %v8047_v41, 4  ;;  %v21690_v26 = vpop.f32.mrf.mxu0 }
 0x58c   : > { %v7754_v45 = vrot.slane %v7735_v3, 4  ;;  %v7731_v4 = vperm.slane %v7725_v6, %v19327_v57  ;;  %v7748_v19 = vrot.slane %v7743_v9, 4  ;;  %8474 = vmatpush.msra.mxu1 %v8473_v27  ;;  %v8079_v18 = vsel %vm753_vm2, %v8063_v38, %v8078_v36 }
 0x58d   : > { %v7753_v53 = vsel %vm753_vm2, %v7752_v37, %v7735_v3  ;;  %v8087_v20 = vperm.slane %v8079_v18, %v19327_v57  ;;  %v8064_v32 = vrot.slane %v8059_v14, 4  ;;  %v8067_v47 = vsel %vm753_vm2, %v8059_v14, %v8066_v25  ;;  %v21712_v14 = vpop.f32.mrf.mxu3 }
 0x58e   : > { %v7755_v16 = vsel %vm753_vm2, %v7747_v23, %v7754_v45  ;;  %v7750_v62 = vrot.slane %v7731_v4, 4  ;;  %7834 = vrot.lane.b32.xlu1 %v7753_v53, %s18997_s7  ;;  %v21662_v30 = vsel %vm753_vm2, %v7748_v19, %v7731_v4  ;;  %8480 = vmatpush.msra.mxu1 %v8479_v50  ;;  %v8077_v39 = vsel %vm753_vm2, %v8076_v55, %v8051_v15  ;;  %v21695_v23 = vpop.f32.mrf.mxu2 }
 0x58f   : > { %7850 = vrot.lane.b32.xlu2 %v7755_v16, %s18999_s10  ;;  %v8075_v56 = vperm.slane %v8067_v47, %v19327_v57  ;;  %v8083_v1 = vperm.slane %v8077_v39, %v19327_v57  ;;  %v8094_v13 = vrot.slane %v8087_v20, 4  ;;  %v8065_v0 = vsel %vm753_vm2, %v8064_v32, %v8047_v41  ;;  %v21716_v20 = vpop.f32.mrf.mxu1 }
 0x590   : > { %v7751_v40 = vsel %vm753_vm2, %v7743_v9, %v7750_v62  ;;  %v8071_v28 = vperm.slane %v8065_v0, %v19327_v57  ;;  %v21701_v53 = vand.u32 4294901760, %v8377_v52  ;;  %v6827_v2 = vadd.f32 %v21686_v61, %v21690_v26 }
 0x591   : > { %7818 = vrot.lane.b32.xlu0 %v7751_v40, %s18998_s8  ;;  %v8090_v17 = vrot.slane %v8075_v56, 4  ;;  %v8092_v44 = vrot.slane %v8083_v1, 4  ;;  %v8095_v3 = vsel %vm753_vm2, 0.0, %v8094_v13  ;;  %v8269_v7 = vsel %vm753_vm2, %v8094_v13, %v8083_v1 }
 0x592   : > { %v8274_v6 = vrot.slane %v8095_v3, 4  ;;  %v8088_v37 = vrot.slane %v8071_v28, 4  ;;  %v8273_v15 = vperm.slane %v8269_v7, %v19312_v42  ;;  %v8488_v25 = vsub.f32 %v8377_v52, %v21701_v53 }
 0x593   : > { %v8091_v45 = vsel %vm753_vm2, 0.0, %v8090_v17  ;;  %v8093_v4 = vsel %vm753_vm2, 0.0, %v8092_v44  ;;  %v8258_v19 = vsel %vm753_vm2, %v8090_v17, %v8071_v28  ;;  %v21721_v1 = vpop.f32.mrf.mxu0 }
 0x594   : > { %v8262_v16 = vperm.slane %v8258_v19, %v19312_v42  ;;  %v8263_v62 = vrot.slane %v8091_v45, 4  ;;  %v8089_v12 = vsel %vm753_vm2, 0.0, %v8088_v37  ;;  %v8275_v38 = vsel %vm753_vm2, %v8274_v6, %v8093_v4 }
 0x595   : > { %v8279_v51 = vperm.slane %v8275_v38, %v19312_v42  ;;  %v8294_v36 = vrot.slane %v8273_v15, 4  ;;  %v8489_v6 = vand.u32 4294901760, %v8488_v25 }
 0x596   : > { %v8264_v27 = vsel %vm753_vm2, %v8263_v62, %v8089_v12  ;;  %v8282_v41 = vrot.slane %v8262_v16, 4  ;;  %v6975_v12 = vpop.f32.mrf.mxu3 }
 0x597   : > { %v8268_v50 = vperm.slane %v8264_v27, %v19312_v42  ;;  %v8292_v18 = vrot.slane %v8279_v51, 4  ;;  %v8295_v39 = vsel %vm753_vm2, %v8279_v51, %v8294_v36  ;;  %v6949_v13 = vpop.f32.mrf.mxu2  ;;  %v8490_v38 = vsub.f32 %v8488_v25, %v8489_v6 }
 0x599   : > { %v8283_v47 = vsel %vm753_vm2, %v8268_v50, %v8282_v41  ;;  %v8280_v56 = vrot.slane %v8268_v50, 4  ;;  %v8293_v3 = vsel %vm753_vm2, %v8292_v18, %v8273_v15  ;;  %v7023_v50 = vpop.f32.mrf.mxu1 }
 0x59a   : > { %v21725_v28 = vperm.slane %v8283_v47, %v19327_v57  ;;  %v8299_v62 = vperm.slane %v8293_v3, %v19327_v57 }
 0x59b   : > { %v8281_v44 = vsel %vm753_vm2, %v8280_v56, %v8262_v16  ;;  %v6999_v41 = vpop.f32.mrf.mxu0 }
 0x59c   : > { %v7831_v8 = vpop.permute.xlu0 %7830  ;;  %v8287_v37 = vperm.slane %v8281_v44, %v19327_v57  ;;  %v6976_v44 = vadd.f32 %v6975_v12, %v6949_v13  ;;  %v8304_v61 = vrot.slane %v8299_v62, 4 }
 0x59e   : > { %v8306_v16 = vrot.slane %v8287_v37, 4 }
 0x5a0   : > { %v7815_v9 = vpop.permute.xlu1 %7814  ;;  %v21744_v27 = vsel %vm753_vm2, %v8299_v62, %v8306_v16 }
 0x5a1   : > { %v7858_v40 = vsel %vm2169_vm3, %v21465_v59, %v7815_v9  ;;  %25657 = vst [vmem:[#allocation31_spill] sm:$0xff] %v21744_v27 }
 0x5a2   : > { %v7863_v59 = vsel %vm7862_vm0, %v7858_v40, %v7831_v8  ;;  %v21728_v8 = vperm.slane %v8295_v39, %v19327_v57  ;;  %v6851_v39 = vadd.f32 %v21695_v23, %v6827_v2 }
 0x5a3   : > { %v7098_v33 = vpop.f32.mrf.mxu0 }
 0x5a4   : > { %v7847_v55 = vpop.permute.xlu0 %7846  ;;  %v8308_v9 = vrot.slane %v21728_v8, 4 }
 0x5a5   : > { %v7868_v32 = vsel %vm7867_vm4, %v7863_v59, %v7847_v55  ;;  %v7047_v59 = vpop.f32.mrf.mxu2 }
 0x5a6   : > { %v8393_v0 = vsel %vm405_vm1, %v7868_v32, 0  ;;  %v21739_v19 = vsel %vm753_vm2, %v8308_v9, %v21725_v28  ;;  %v8491_v32 = vand.u32 4294901760, %v8490_v38 }
 0x5a7   : > { %v21730_v52 = vand.u32 4294901760, %v8393_v0  ;;  %25656 = vst [vmem:[#allocation30_spill] sm:$0xff] %v21739_v19 }
 0x5a8   : > { %v8379_v17 = vpop.permute.xlu1 %8378 }
 0x5a9   : > { %v8420_v7 = vand.u32 4294901760, %v8379_v17  ;;  %v8425_v45 = vsub.f32 %v8393_v0, %v21730_v52 }
 0x5ab   : > { %v8482_v4 = vsub.f32 %v8379_v17, %v8420_v7  ;;  %8572 = vmatpush.msra.mxu3 %v8420_v7  ;;  %8421 = vmatpush.msra.mxu0 %v8420_v7  ;;  %v8426_v40 = vand.u32 4294901760, %v8425_v45  ;;  %v6875_v17 = vadd.f32 %v21712_v14, %v6851_v39  ;;  %v7196_v3 = vpop.f32.mrf.mxu0 }
 0x5ad   : > { %8530 = vmatpush.msra.mxu2 %v8482_v4  ;;  %8574 = vmatpush.msra.mxu3 %v21701_v53  ;;  %v8483_v15 = vand.u32 4294901760, %v8482_v4  ;;  %v8427_v51 = vsub.f32 %v8425_v45, %v8426_v40  ;;  %v7148_v47 = vpop.f32.mrf.mxu2 }
 0x5ae   : > { %8578 = vmatmul.f32.vlgmr.msra.gmra.mxu3 %v8426_v40  ;;  %8423 = vmatpush.msra.mxu0 %v21701_v53 }
 0x5af   : > { %8533 = vmatpush.msra.mxu2 %v8488_v25  ;;  %v8484_v36 = vsub.f32 %v8482_v4, %v8483_v15  ;;  %v8428_v55 = vand.u32 4294901760, %v8427_v51  ;;  %v7069_v25 = vpop.f32.mrf.mxu3 }
 0x5b0   : > { %8615 = vmatpush.msrb.mxu0 %v8471_v5  ;;  %8536 = vmatmul.f32.vlgmr.msra.gmra.mxu2 %v8425_v45  ;;  %v7124_v5 = vpop.f32.mrf.mxu1  ;;  %v8310_v45 = vrot.slane %v21725_v28, 4 }
 0x5b1   : > { %v8485_v18 = vand.u32 4294901760, %v8484_v36  ;;  %8429 = vmatmul.f32.vlgmr.msra.gmra.mxu0 %v8428_v55 }
 0x5b2   : > { %8619 = vmatpush.msrb.mxu0 %v8477_v22  ;;  %v7125_v22 = vadd.f32 %v7124_v5, %v7098_v33  ;;  %v21763_v23 = vsel %vm753_vm2, %v21728_v8, %v8310_v45 }
 0x5b3   : > { %8486 = vmatpush.msra.mxu1 %v8485_v18  ;;  %25658 = vst [vmem:[#allocation32_spill] sm:$0xff] %v21763_v23 }
 0x5b4   : > { %8623 = vmatpush.msrb.mxu0 %v8483_v15  ;;  %v7149_v56 = vadd.f32 %v7148_v47, %v7125_v22 }
 0x5b5   : > { %8492 = vmatpush.msra.mxu1 %v8491_v32 }
 0x5b6   : > { %8627 = vmatpush.msrb.mxu0 %v8489_v6  ;;  %8494 = vmatmul.f32.vlgmr.msra.gmra.mxu1 %v21730_v52  ;;  %v6899_v6 = vadd.f32 %v21721_v1, %v6875_v17  ;;  %v7849_v18 = vpop.permute.xlu2 %7848 }
 0x5b7   : > { %8658 = vmatpush.msrb.mxu1 %v21612_v11  ;;  %v7172_v0 = vpop.f32.mrf.mxu3 }
 0x5b8   : > { %v7173_v11 = vadd.f32 %v7172_v0, %v7149_v56  ;;  %v6921_v14 = vadd.f32 %v21716_v20, %v6899_v6 }
 0x5b9   : > { %8660 = vmatpush.msrb.mxu1 %v21638_v48  ;;  %v7000_v48 = vadd.f32 %v6999_v41, %v6976_v44 }
 0x5ba   : > { %v7197_v9 = vadd.f32 %v7196_v3, %v7173_v11  ;;  %v7540_v38 = vrot.slane %v6921_v14, 4 }
 0x5bb   : > { %8662 = vmatpush.msrb.mxu1 %v8420_v7  ;;  %v7218_v7 = vpop.f32.mrf.mxu1  ;;  %v7024_v13 = vadd.f32 %v7023_v50, %v7000_v48 }
 0x5bc   : > { %v7219_v16 = vadd.f32 %v7218_v7, %v7197_v9 }
 0x5bd   : > { %8664 = vmatpush.msrb.mxu1 %v21701_v53  ;;  %v21766_v53 = vsel %vm753_vm2, %v8304_v61, %v8287_v37  ;;  %v7048_v12 = vadd.f32 %v7047_v59, %v7024_v13 }
 0x5be   : > { %25659 = vst [vmem:[#allocation33_spill] sm:$0xff] %v21766_v53  ;;  %v7538_v28 = vrot.slane %v7219_v16, 4  ;;  %v7541_v36 = vsel %vm753_vm2, %v7219_v16, %v7540_v38 }
 0x5bf   : > { %v7070_v41 = vadd.f32 %v7069_v25, %v7048_v12  ;;  %v7549_v5 = vperm.slane %v7541_v36, %v19312_v42 }
 0x5c0   : > { %v7297_v40 = vpop.f32.mrf.mxu0  ;;  %v7539_v32 = vsel %vm753_vm2, %v7538_v28, %v6921_v14 }
 0x5c1   : > { %v7552_v2 = vrot.slane %v7070_v41, 4  ;;  %v7576_v44 = vrot.slane %v7549_v5, 4 }
 0x5c3   : > { %v7321_v62 = vpop.f32.mrf.mxu1 }
 0x5c4   : > { %v7273_v26 = vpop.f32.mrf.mxu3 }
 0x5cc   : > { %v7247_v4 = vpop.f32.mrf.mxu2  ;;  %v7367_v47 = vpop.f32.mrf.mxu3 }
 0x5cd   : > { %v7274_v1 = vadd.f32 %v7273_v26, %v7247_v4  ;;  %v7833_v8 = vpop.permute.xlu1 %7832 }
 0x5cf   : > { %v7298_v15 = vadd.f32 %v7297_v40, %v7274_v1 }
 0x5d0   : > { %v7817_v51 = vpop.permute.xlu0 %7816 }
 0x5d1   : > { %v7859_v37 = vsel %vm2169_vm3, %v21595_v31, %v7817_v51  ;;  %v7322_v55 = vadd.f32 %v7321_v62, %v7298_v15  ;;  %v7545_v31 = vperm.slane %v7539_v32, %v19312_v42 }
 0x5d2   : > { %v7864_v20 = vsel %vm7862_vm0, %v7859_v37, %v7833_v8 }
 0x5d3   : > { %v7869_v59 = vsel %vm7867_vm4, %v7864_v20, %v7849_v18  ;;  %v7564_v48 = vrot.slane %v7545_v31, 4 }
 0x5d4   : > { %v7345_v50 = vpop.f32.mrf.mxu2  ;;  %v8396_v25 = vsel %vm405_vm1, %v7869_v59, 0 }
 0x5d5   : > { %v7346_v33 = vadd.f32 %v7345_v50, %v7322_v55  ;;  %v21777_v39 = vand.u32 4294901760, %v8396_v25 }
 0x5d7   : > { %v7368_v22 = vadd.f32 %v7367_v47, %v7346_v33  ;;  %8498 = vmatmul.f32.gmra.mxu1 %v21777_v39  ;;  %v8433_v17 = vsub.f32 %v8396_v25, %v21777_v39 }
 0x5d9   : > { %v7550_v56 = vrot.slane %v7368_v22, 4  ;;  %v7553_v0 = vsel %vm753_vm2, %v7368_v22, %v7552_v2  ;;  %8541 = vmatmul.f32.gmra.mxu2 %v8433_v17  ;;  %v8434_v6 = vand.u32 4294901760, %v8433_v17 }
 0x5da   : > { %v7561_v11 = vperm.slane %v7553_v0, %v19312_v42 }
 0x5db   : > { %v7551_v3 = vsel %vm753_vm2, %v7550_v56, %v7070_v41  ;;  %8584 = vmatmul.f32.gmra.mxu3 %v8434_v6  ;;  %v8435_v26 = vsub.f32 %v8433_v17, %v8434_v6 }
 0x5dc   : > { %v7557_v9 = vperm.slane %v7551_v3, %v19312_v42  ;;  %v7574_v7 = vrot.slane %v7561_v11, 4  ;;  %v7577_v45 = vsel %vm753_vm2, %v7561_v11, %v7576_v44 }
 0x5dd   : > { %v7585_v61 = vperm.slane %v7577_v45, %v19327_v57  ;;  %v8436_v12 = vand.u32 4294901760, %v8435_v26 }
 0x5de   : > { %v7562_v4 = vrot.slane %v7557_v9, 4  ;;  %v7565_v14 = vsel %vm753_vm2, %v7557_v9, %v7564_v48  ;;  %v7575_v13 = vsel %vm753_vm2, %v7574_v7, %v7549_v5 }
 0x5df   : > { %v7573_v16 = vperm.slane %v7565_v14, %v19327_v57  ;;  %v7581_v1 = vperm.slane %v7575_v13, %v19327_v57  ;;  %v7592_v40 = vrot.slane %v7585_v61, 4  ;;  %8437 = vmatmul.f32.gmra.mxu0 %v8436_v12 }
 0x5e0   : > { %v7563_v15 = vsel %vm753_vm2, %v7562_v4, %v7545_v31 }
 0x5e1   : > { %v7569_v38 = vperm.slane %v7563_v15, %v19327_v57  ;;  %v7588_v28 = vrot.slane %v7573_v16, 4  ;;  %v7590_v62 = vrot.slane %v7581_v1, 4  ;;  %v7593_v51 = vsel %vm753_vm2, 0.0, %v7592_v40 }
 0x5e2   : > { %v7772_v41 = vrot.slane %v7593_v51, 4  ;;  %v7767_v36 = vsel %vm753_vm2, %v7592_v40, %v7581_v1 }
 0x5e3   : > { %v7586_v8 = vrot.slane %v7569_v38, 4  ;;  %v7589_v37 = vsel %vm753_vm2, 0.0, %v7588_v28  ;;  %v7591_v55 = vsel %vm753_vm2, 0.0, %v7590_v62  ;;  %v7756_v18 = vsel %vm753_vm2, %v7588_v28, %v7569_v38 }
 0x5e4   : > { %v7760_v20 = vperm.slane %v7756_v18, %v19312_v42  ;;  %v7761_v50 = vrot.slane %v7589_v37, 4  ;;  %v7771_v32 = vperm.slane %v7767_v36, %v19312_v42  ;;  %v7773_v59 = vsel %vm753_vm2, %v7772_v41, %v7591_v55 }
 0x5e5   : > { %v7587_v33 = vsel %vm753_vm2, 0.0, %v7586_v8  ;;  %v7777_v5 = vperm.slane %v7773_v59, %v19312_v42 }
 0x5e6   : > { %v7762_v47 = vsel %vm753_vm2, %v7761_v50, %v7587_v33  ;;  %v7780_v25 = vrot.slane %v7760_v20, 4  ;;  %v7792_v2 = vrot.slane %v7771_v32, 4 }
 0x5e7   : > { %v7766_v22 = vperm.slane %v7762_v47, %v19312_v42  ;;  %v7790_v31 = vrot.slane %v7777_v5, 4 }
 0x5e8   : > { %v7793_v56 = vsel %vm753_vm2, %v7777_v5, %v7792_v2 }
 0x5e9   : > { %v7781_v0 = vsel %vm753_vm2, %v7766_v22, %v7780_v25  ;;  %v7801_v17 = vperm.slane %v7793_v56, %v19327_v57  ;;  %v7778_v44 = vrot.slane %v7766_v22, 4  ;;  %v7791_v11 = vsel %vm753_vm2, %v7790_v31, %v7771_v32  ;;  %v7851_v15 = vpop.permute.xlu2 %7850 }
 0x5ea   : > { %v7789_v3 = vperm.slane %v7781_v0, %v19327_v57  ;;  %v7797_v6 = vperm.slane %v7791_v11, %v19327_v57 }
 0x5eb   : > { %v7806_v48 = vrot.slane %v7801_v17, 4  ;;  %v7779_v9 = vsel %vm753_vm2, %v7778_v44, %v7760_v20 }
 0x5ec   : > { %v7808_v7 = vrot.slane %v7789_v3, 4  ;;  %v7785_v45 = vperm.slane %v7779_v9, %v19327_v57  ;;  %v7802_v61 = vrot.slane %v7797_v6, 4 }
 0x5ed   : > { %v7807_v26 = vsel %vm753_vm2, %v7806_v48, %v7789_v3 }
 0x5ee   : > { %7836 = vrot.lane.b32.xlu1 %v7807_v26, %s18997_s7  ;;  %v7809_v4 = vsel %vm753_vm2, %v7801_v17, %v7808_v7  ;;  %v7804_v14 = vrot.slane %v7785_v45, 4  ;;  %v7803_v13 = vsel %vm753_vm2, %v7802_v61, %v7785_v45 }
 0x5ef   : > { %7852 = vrot.lane.b32.xlu2 %v7809_v4, %s18999_s10 }
 0x5f0   : > { %v7805_v16 = vsel %vm753_vm2, %v7797_v6, %v7804_v14 }
 0x5f1   : > { %7820 = vrot.lane.b32.xlu0 %v7805_v16, %s18998_s8 }
 0x5f9   : > { %8389 = vrot.lane.b32.xlu0 %v19257_v63, %s18996_s29 }
 0x600   : > { %v7835_v40 = vpop.permute.xlu1 %7834 }
 0x603   : > { %v7819_v1 = vpop.permute.xlu0 %7818 }
 0x604   : > { %v7860_v12 = vsel %vm2169_vm3, %v21662_v30, %v7819_v1 }
 0x605   : > { %v7865_v38 = vsel %vm7862_vm0, %v7860_v12, %v7835_v40  ;;  %v18727_v12 = vld [vmem:[#allocation2] sm:$0xff] }
 0x606   : > { %v7870_v28 = vsel %vm7867_vm4, %v7865_v38, %v7851_v15 }
 0x607   : > { %v8399_v62 = vsel %vm405_vm1, %v7870_v28, 0 }
 0x608   : > { %v8440_v51 = vand.u32 4294901760, %v8399_v62 }
 0x60a   : > { %8502 = vmatmul.f32.gmra.mxu1 %v8440_v51  ;;  %v8441_v41 = vsub.f32 %v8399_v62, %v8440_v51 }
 0x60c   : > { %8546 = vmatmul.f32.gmra.mxu2 %v8441_v41  ;;  %v8442_v36 = vand.u32 4294901760, %v8441_v41 }
 0x60e   : > { %8590 = vmatmul.f32.gmra.mxu3 %v8442_v36  ;;  %v8443_v8 = vsub.f32 %v8441_v41, %v8442_v36 }
 0x610   : > { %v8444_v63 = vand.u32 4294901760, %v8443_v8 }
 0x612   : > { %8445 = vmatmul.f32.gmra.mxu0 %v8444_v63 }
 0x62e   : > { %v8430_v22 = vpop.f32.mrf.mxu0 }
 0x633   : > { %v8495_v2 = vpop.f32.mrf.mxu1 }
 0x649   : > { %v7853_v18 = vpop.permute.xlu2 %7852 }
 0x654   : > { %v8499_v31 = vpop.f32.mrf.mxu1 }
 0x65c   : > { %v8438_v56 = vpop.f32.mrf.mxu0 }
 0x660   : > { %v7837_v55 = vpop.permute.xlu1 %7836 }
 0x663   : > { %v7821_v37 = vpop.permute.xlu0 %7820 }
 0x664   : > { %v7861_v30 = vsel %vm2169_vm3, %v7803_v13, %v7821_v37 }
 0x665   : > { %v7866_v20 = vsel %vm7862_vm0, %v7861_v30, %v7837_v55 }
 0x666   : > { %v7871_v50 = vsel %vm7867_vm4, %v7866_v20, %v7853_v18  ;;  %v18728_v18 = vld [vmem:[#allocation2 + $0x8] sm:$0xff] }
 0x667   : > { %v8402_v32 = vsel %vm405_vm1, %v7871_v50, 0 }
 0x668   : > { %v8448_v59 = vand.u32 4294901760, %v8402_v32 }
 0x66a   : > { %8506 = vmatmul.f32.gmra.mxu1 %v8448_v59  ;;  %v8449_v33 = vsub.f32 %v8402_v32, %v8448_v59 }
 0x66b   : > { %v8390_v17 = vpop.permute.xlu0 %8389 }
 0x66c   : > { %8551 = vmatmul.f32.gmra.mxu2 %v8449_v33  ;;  %v8450_v5 = vand.u32 4294901760, %v8449_v33  ;;  %v8431_v3 = vadd.f32 %v8430_v22, %v8390_v17  ;;  %v8439_v9 = vadd.f32 %v8438_v56, %v8390_v17  ;;  %v18729_v56 = vld [vmem:[#allocation2 + $0x10] sm:$0xff] }
 0x66e   : > { %8596 = vmatmul.f32.gmra.mxu3 %v8450_v5  ;;  %v8451_v47 = vsub.f32 %v8449_v33, %v8450_v5  ;;  %v8496_v6 = vadd.f32 %v8495_v2, %v8431_v3  ;;  %v8500_v26 = vadd.f32 %v8499_v31, %v8439_v9  ;;  %v18730_v9 = vld [vmem:[#allocation2 + $0x18] sm:$0xff] }
 0x670   : > { %v8452_v25 = vand.u32 4294901760, %v8451_v47 }
 0x672   : > { %8453 = vmatmul.f32.gmra.mxu0 %v8452_v25  ;;  %8666 = vmatmul.f32.vlgmr.msrb.gmra.mxu1 %v21730_v52 }
 0x67a   : > { %8629 = vmatmul.f32.vlgmr.msrb.gmra.mxu0 %v21730_v52  ;;  %8670 = vmatmul.f32.gmra.mxu1 %v21777_v39  ;;  %v8537_v52 = vpop.f32.mrf.mxu2 }
 0x67b   : > { %v8538_v7 = vadd.f32 %v8537_v52, %v8496_v6 }
 0x682   : > { %8633 = vmatmul.f32.gmra.mxu0 %v21777_v39  ;;  %8674 = vmatmul.f32.gmra.mxu1 %v8440_v51  ;;  %v8579_v39 = vpop.f32.mrf.mxu3  ;;  %v8542_v13 = vpop.f32.mrf.mxu2 }
 0x683   : > { %v8580_v61 = vadd.f32 %v8579_v39, %v8538_v7  ;;  %v8543_v40 = vadd.f32 %v8542_v13, %v8500_v26  ;;  %v19000_v39 = vmov 32.0  }
 0x684   : > { %18633 = vrcp.f32 %v19000_v39 }
 0x687   : > { %v8503_v0 = vpop.f32.mrf.mxu1 }
 0x68a   : > { %8637 = vmatmul.f32.gmra.mxu0 %v8440_v51  ;;  %8678 = vmatmul.f32.gmra.mxu1 %v8448_v59  ;;  %v8585_v38 = vpop.f32.mrf.mxu3 }
 0x68b   : > { %v8586_v51 = vadd.f32 %v8585_v38, %v8543_v40  ;;  %v390_v38 = vld [vmem:[%s19176_s13 + $0x38] sm:$0xff] }
 0x68f   : > { %v8446_v44 = vpop.f32.mrf.mxu0  ;;  %v8547_v63 = vpop.f32.mrf.mxu2 }
 0x690   : > { %v8447_v16 = vadd.f32 %v8446_v44, %v8390_v17 }
 0x692   : > { %8641 = vmatmul.f32.gmra.mxu0 %v8448_v59  ;;  %v8504_v62 = vadd.f32 %v8503_v0, %v8447_v16  ;;  %v8591_v50 = vpop.f32.mrf.mxu3 }
 0x694   : > { %v8548_v37 = vadd.f32 %v8547_v63, %v8504_v62  ;;  %v21848_v62 = vand.u32 4294901760, %v390_v38 }
 0x696   : > { %v8592_v32 = vadd.f32 %v8591_v50, %v8548_v37  ;;  %8971 = vmatpush.msra.mxu1 %v21848_v62  ;;  %8820 = vmatpush.msrb.mxu2 %v21848_v62 }
 0x6e7   : > { %v8507_v11 = vpop.f32.mrf.mxu1 }
 0x6ef   : > { %v8454_v48 = vpop.f32.mrf.mxu0  ;;  %v8667_v45 = vpop.f32.mrf.mxu1 }
 0x6f0   : > { %v8455_v55 = vadd.f32 %v8454_v48, %v8390_v17  ;;  %v8552_v2 = vpop.f32.mrf.mxu2 }
 0x6f1   : > { %v8597_v44 = vpop.f32.mrf.mxu3 }
 0x6f2   : > { %v8508_v59 = vadd.f32 %v8507_v11, %v8455_v55 }
 0x6f4   : > { %v8553_v22 = vadd.f32 %v8552_v2, %v8508_v59 }
 0x6f6   : > { %v8598_v3 = vadd.f32 %v8597_v44, %v8553_v22  ;;  %v387_v22 = vld [vmem:[%s19176_s13 + $0x20] sm:$0xff] }
 0x6f7   : > { %v8630_v4 = vpop.f32.mrf.mxu0  ;;  %v8671_v28 = vpop.f32.mrf.mxu1 }
 0x6f8   : > { %v8631_v14 = vadd.f32 %v8630_v4, %v8580_v61  ;;  %v18634_v61 = vpop.eup %18633 }
 0x6f9   : > { %v8699_v26 = vmul.f32 32.0, %v18634_v61  ;;  %vm8703_vm5 = vweird.f32 %v18634_v61 }
 0x6fa   : > { %v8668_v1 = vadd.f32 %v8667_v45, %v8631_v14 }
 0x6fb   : > { %v8700_v4 = vsub.f32 1.0, %v8699_v26 }
 0x6fc   : > { %v8682_v15 = vadd.f32 %v18727_v12, %v8668_v1 }
 0x6fd   : > { %v8701_v14 = vmul.f32 %v18634_v61, %v8700_v4 }
 0x6fe   : > { %v8686_v41 = vsel %vm405_vm1, %v8682_v15, 0.0 }
 0x6ff   : > { %v8634_v36 = vpop.f32.mrf.mxu0  ;;  %8687 = vadd.xlane.f32.xlu1 %v8686_v41  ;;  %v8675_v5 = vpop.f32.mrf.mxu1  ;;  %v8702_v13 = vadd.f32 %v18634_v61, %v8701_v14  ;;  %v8873_v41 = vsub.f32 %v390_v38, %v21848_v62 }
 0x700   : > { %v8635_v8 = vadd.f32 %v8634_v36, %v8586_v51 }
 0x701   : > { %v21840_v16 = vsel %vm8703_vm5, %v18634_v61, %v8702_v13  ;;  %8927 = vmatpush.msra.mxu0 %v8873_v41 }
 0x702   : > { %v8672_v30 = vadd.f32 %v8671_v28, %v8635_v8  ;;  %25660 = vst [vmem:[#allocation34_spill] sm:$0xff] %v21840_v16 }
 0x704   : > { %v8683_v20 = vadd.f32 %v18728_v18, %v8672_v30 }
 0x706   : > { %v8689_v33 = vsel %vm405_vm1, %v8683_v20, 0.0 }
 0x707   : > { %v8638_v47 = vpop.f32.mrf.mxu0  ;;  %8690 = vadd.xlane.f32.xlu2 %v8689_v33  ;;  %v8679_v52 = vpop.f32.mrf.mxu1  ;;  %v388_v33 = vld [vmem:[%s19176_s13 + $0x28] sm:$0xff] }
 0x708   : > { %v8639_v25 = vadd.f32 %v8638_v47, %v8592_v32  ;;  %v21869_v47 = vand.u32 4294901760, %v388_v33 }
 0x70a   : > { %v8676_v31 = vadd.f32 %v8675_v5, %v8639_v25  ;;  %v389_v5 = vld [vmem:[%s19176_s13 + $0x30] sm:$0xff]  ;;  %v8885_v44 = vsub.f32 %v388_v33, %v21869_v47 }
 0x70b   : > { %v21871_v25 = vand.u32 4294901760, %v389_v5 }
 0x70c   : > { %v8684_v0 = vadd.f32 %v18729_v56, %v8676_v31  ;;  %v21876_v31 = vand.u32 4294901760, %v387_v22 }
 0x70d   : > { %v8879_v56 = vsub.f32 %v389_v5, %v21871_v25  ;;  %8973 = vmatpush.msra.mxu1 %v21871_v25  ;;  %8822 = vmatpush.msrb.mxu2 %v21871_v25 }
 0x70e   : > { %v8692_v17 = vsel %vm405_vm1, %v8684_v0, 0.0 }
 0x70f   : > { %v8642_v6 = vpop.f32.mrf.mxu0  ;;  %8693 = vadd.xlane.f32.xlu0 %v8692_v17  ;;  %8930 = vmatpush.msra.mxu0 %v8879_v56  ;;  %v21888_v17 = vld [vmem:[%s19176_s13 + $0xa0] sm:$0xff]  ;;  %v8880_v26 = vand.u32 4294901760, %v8879_v56 }
 0x710   : > { %v8643_v48 = vadd.f32 %v8642_v6, %v8598_v3  ;;  %8975 = vmatpush.msra.mxu1 %v21869_v47  ;;  %8824 = vmatpush.msrb.mxu2 %v21869_v47  ;;  %v21891_v6 = vperm.slane %v21888_v17, 3 }
 0x711   : > { %8933 = vmatpush.msra.mxu0 %v8885_v44 }
 0x712   : > { %v8680_v11 = vadd.f32 %v8679_v52, %v8643_v48  ;;  %25661 = vst [vmem:[#allocation35_spill] sm:$0xff] %v21891_v6  ;;  %v8891_v48 = vsub.f32 %v387_v22, %v21876_v31  ;;  %8977 = vmatpush.msra.mxu1 %v21876_v31  ;;  %8826 = vmatpush.msrb.mxu2 %v21876_v31 }
 0x714   : > { %v8685_v7 = vadd.f32 %v18730_v9, %v8680_v11  ;;  %8936 = vmatpush.msra.mxu0 %v8891_v48 }
 0x716   : > { %v8695_v45 = vsel %vm405_vm1, %v8685_v7, 0.0 }
 0x717   : > { %8696 = vadd.xlane.f32.xlu1 %v8695_v45  ;;  %v8874_v45 = vand.u32 4294901760, %v8873_v41 }
 0x719   : > { %v8875_v61 = vsub.f32 %v8873_v41, %v8874_v45  ;;  %9018 = vmatpush.msra.mxu2 %v8874_v45 }
 0x71b   : > { %9022 = vmatpush.msra.mxu2 %v8880_v26 }
 0x772   : > { %v8688_v1 = vpop.xlane.xlu1 %8687 }
 0x773   : > { %v8705_v40 = vmul.f32 %v21840_v16, %v8688_v1  ;;  %v8876_v1 = vand.u32 4294901760, %v8875_v61 }
 0x775   : > { %v21843_v12 = vsub.f32 %v8682_v15, %v8705_v40  ;;  %v8881_v40 = vsub.f32 %v8879_v56, %v8880_v26  ;;  %8877 = vmatpush.msrb.mxu3 %v8876_v1 }
 0x777   : > { %v8713_v28 = vmul.f32 %v21843_v12, %v21843_v12 }
 0x779   : > { %v8717_v51 = vsel %vm405_vm1, %v8713_v28, 0.0 }
 0x77a   : > { %v8691_v36 = vpop.xlane.xlu2 %8690  ;;  %8718 = vadd.xlane.f32.xlu2 %v8717_v51  ;;  %v8882_v51 = vand.u32 4294901760, %v8881_v40 }
 0x77b   : > { %v8706_v15 = vmul.f32 %v21840_v16, %v8691_v36  ;;  %v8892_v36 = vand.u32 4294901760, %v8891_v48 }
 0x77c   : > { %8883 = vmatpush.msrb.mxu3 %v8882_v51 }
 0x77d   : > { %v21855_v8 = vsub.f32 %v8683_v20, %v8706_v15  ;;  %v8893_v41 = vsub.f32 %v8891_v48, %v8892_v36 }
 0x77f   : > { %v8714_v63 = vmul.f32 %v21855_v8, %v21855_v8 }
 0x781   : > { %v8720_v37 = vsel %vm405_vm1, %v8714_v63, 0.0 }
 0x782   : > { %v8694_v55 = vpop.xlane.xlu0 %8693  ;;  %8721 = vadd.xlane.f32.xlu0 %v8720_v37 }
 0x783   : > { %v8707_v30 = vmul.f32 %v21840_v16, %v8694_v55 }
 0x785   : > { %v21861_v18 = vsub.f32 %v8684_v0, %v8707_v30 }
 0x787   : > { %v8715_v50 = vmul.f32 %v21861_v18, %v21861_v18 }
 0x789   : > { %v8723_v32 = vsel %vm405_vm1, %v8715_v50, 0.0 }
 0x78a   : > { %8724 = vadd.xlane.f32.xlu1 %v8723_v32  ;;  %v8697_v20 = vpop.xlane.xlu1 %8696  ;;  %v8894_v32 = vand.u32 4294901760, %v8893_v41 }
 0x78b   : > { %v8708_v59 = vmul.f32 %v21840_v16, %v8697_v20 }
 0x78d   : > { %v21873_v2 = vsub.f32 %v8685_v7, %v8708_v59 }
 0x78f   : > { %v8716_v0 = vmul.f32 %v21873_v2, %v21873_v2 }
 0x791   : > { %v8726_v3 = vsel %vm405_vm1, %v8716_v0, 0.0 }
 0x792   : > { %8727 = vadd.xlane.f32.xlu2 %v8726_v3 }
 0x796   : > { %8787 = vrot.lane.b32.xlu0 %v21891_v6, %s18991_s9 }
 0x79e   : > { %9091 = vrot.lane.b32.xlu0 %v388_v33, %s18991_s9 }
 0x7a3   : > { %9095 = vrot.lane.b32.xlu1 %v390_v38, %s18991_s9  ;;  %v8886_v38 = vand.u32 4294901760, %v8885_v44 }
 0x7a5   : > { %v8887_v15 = vsub.f32 %v8885_v44, %v8886_v38  ;;  %9026 = vmatpush.msra.mxu2 %v8886_v38 }
 0x7a7   : > { %v8888_v30 = vand.u32 4294901760, %v8887_v15  ;;  %9030 = vmatpush.msra.mxu2 %v8892_v36 }
 0x7a9   : > { %8889 = vmatpush.msrb.mxu3 %v8888_v30 }
 0x7aa   : > { %9093 = vrot.lane.b32.xlu2 %v389_v5, %s18991_s9 }
 0x7ab   : > { %9089 = vrot.lane.b32.xlu1 %v387_v22, %s18991_s9  ;;  %8895 = vmatpush.msrb.mxu3 %v8894_v32 }
 0x7ad   : > { %9061 = vmatpush.msra.mxu3 %v21848_v62 }
 0x7af   : > { %9063 = vmatpush.msra.mxu3 %v21871_v25 }
 0x7b1   : > { %9065 = vmatpush.msra.mxu3 %v21869_v47 }
 0x7b3   : > { %9067 = vmatpush.msra.mxu3 %v21876_v31 }
 0x7ed   : > { %v8719_v52 = vpop.xlane.xlu2 %8718 }
 0x7ee   : > { %v8729_v11 = vmul.f32 %v8719_v52, %v21840_v16 }
 0x7f0   : > { %v8733_v9 = vadd.f32 1e-05, %v8729_v11 }
 0x7f2   : > { %18635 = vrsqrt.f32 %v8733_v9  ;;  %vm8743_vm7 = vweird.f32 %v8733_v9 }
 0x7f5   : > { %v8722_v7 = vpop.xlane.xlu0 %8721 }
 0x7f6   : > { %v8730_v39 = vmul.f32 %v8722_v7, %v21840_v16 }
 0x7f8   : > { %v18636_v4 = vpop.eup %18635  ;;  %v8734_v14 = vadd.f32 1e-05, %v8730_v39 }
 0x7f9   : > { %v8738_v13 = vmul.f32 %v18636_v4, %v8733_v9  ;;  %vm8744_vm6 = vweird.f32 %v18636_v4 }
 0x7fa   : > { %18637 = vrsqrt.f32 %v8734_v14  ;;  %vm8745_vm8 = vmor %vm8743_vm7, %vm8744_vm6  ;;  %vm8753_vm10 = vweird.f32 %v8734_v14 }
 0x7fb   : > { %v8739_v28 = vmul.f32 %v18636_v4, %v8738_v13 }
 0x7fd   : > { %v8740_v63 = vmul.f32 0.5, %v8739_v28  ;;  %v8725_v37 = vpop.xlane.xlu1 %8724 }
 0x7fe   : > { %v8731_v55 = vmul.f32 %v8725_v37, %v21840_v16 }
 0x7ff   : > { %v8741_v50 = vsub.f32 1.5, %v8740_v63 }
 0x800   : > { %v18638_v20 = vpop.eup %18637  ;;  %v8735_v59 = vadd.f32 1e-05, %v8731_v55 }
 0x801   : > { %v8742_v33 = vmul.f32 %v18636_v4, %v8741_v50  ;;  %v8748_v5 = vmul.f32 %v18638_v20, %v8734_v14  ;;  %vm8754_vm9 = vweird.f32 %v18638_v20 }
 0x802   : > { %18639 = vrsqrt.f32 %v8735_v59  ;;  %vm8755_vm11 = vmor %vm8753_vm10, %vm8754_vm9  ;;  %vm8763_vm13 = vweird.f32 %v8735_v59 }
 0x803   : > { %v8746_v22 = vsel %vm8745_vm8, %v18636_v4, %v8742_v33  ;;  %v8749_v56 = vmul.f32 %v18638_v20, %v8748_v5 }
 0x804   : > { %v8777_v0 = vmul.f32 %v8746_v22, %v21843_v12 }
 0x805   : > { %v8750_v44 = vmul.f32 0.5, %v8749_v56  ;;  %v8728_v3 = vpop.xlane.xlu2 %8727 }
 0x806   : > { %v8732_v48 = vmul.f32 %v8728_v3, %v21840_v16  ;;  %v8782_v52 = vmul.f32 %v21891_v6, %v8777_v0 }
 0x807   : > { %v8751_v11 = vsub.f32 1.5, %v8750_v44 }
 0x808   : > { %v18640_v9 = vpop.eup %18639  ;;  %v8736_v7 = vadd.f32 1e-05, %v8732_v48  ;;  %v21911_v45 = vpop.permute.xlu0 %8787 }
 0x809   : > { %v8752_v39 = vmul.f32 %v18638_v20, %v8751_v11  ;;  %v8758_v62 = vmul.f32 %v18640_v9, %v8735_v59  ;;  %v21914_v12 = vadd.f32 %v21911_v45, %v8782_v52  ;;  %vm8764_vm12 = vweird.f32 %v18640_v9 }
 0x80a   : > { %18641 = vrsqrt.f32 %v8736_v7  ;;  %vm8765_vm14 = vmor %vm8763_vm13, %vm8764_vm12  ;;  %vm8773_vm5 = vweird.f32 %v8736_v7 }
 0x80b   : > { %25662 = vst [vmem:[#allocation36_spill] sm:$0xff] %v21914_v12  ;;  %v8756_v25 = vsel %vm8755_vm11, %v18638_v20, %v8752_v39  ;;  %v8759_v61 = vmul.f32 %v18640_v9, %v8758_v62  ;;  %v8796_v26 = vsel %vm405_vm1, %v21914_v12, 0 }
 0x80c   : > { %v8778_v47 = vmul.f32 %v8756_v25, %v21855_v8  ;;  %v21920_v4 = vand.u32 4294901760, %v8796_v26 }
 0x80d   : > { %v8760_v13 = vmul.f32 0.5, %v8759_v61  ;;  %v9094_v1 = vpop.permute.xlu2 %9093 }
 0x80e   : > { %v8783_v14 = vmul.f32 %v21891_v6, %v8778_v47  ;;  %v8828_v40 = vsub.f32 %v8796_v26, %v21920_v4  ;;  %8897 = vmatmul.f32.vlgmr.msrb.gmra.mxu3 %v21920_v4  ;;  %v21925_v38 = vand.u32 4294901760, %v9094_v1 }
 0x80f   : > { %v8761_v31 = vsub.f32 1.5, %v8760_v13 }
 0x810   : > { %v18642_v28 = vpop.eup %18641  ;;  %v21928_v51 = vadd.f32 %v21911_v45, %v8783_v14  ;;  %8939 = vmatmul.f32.vlgmr.msra.gmra.mxu0 %v8828_v40  ;;  %v8829_v8 = vand.u32 4294901760, %v8828_v40  ;;  %v9092_v36 = vpop.permute.xlu0 %9091  ;;  %v21937_v20 = vsub.f32 %v9094_v1, %v21925_v38 }
 0x811   : > { %v8762_v15 = vmul.f32 %v18640_v9, %v8761_v31  ;;  %v8768_v63 = vmul.f32 %v18642_v28, %v8736_v7  ;;  %v21930_v37 = vand.u32 4294901760, %v9092_v36  ;;  %vm8774_vm15 = vweird.f32 %v18642_v28 }
 0x812   : > { %25663 = vst [vmem:[#allocation37_spill] sm:$0xff] %v21928_v51  ;;  %8981 = vmatmul.f32.vlgmr.msra.gmra.mxu1 %v8829_v8  ;;  %v8830_v41 = vsub.f32 %v8828_v40, %v8829_v8  ;;  %v8799_v55 = vsel %vm405_vm1, %v21928_v51, 0  ;;  %vm8775_vm6 = vmor %vm8773_vm5, %vm8774_vm15 }
 0x813   : > { %v8766_v30 = vsel %vm8765_vm14, %v18640_v9, %v8762_v15  ;;  %v8769_v50 = vmul.f32 %v18642_v28, %v8768_v63  ;;  %v21934_v32 = vand.u32 4294901760, %v8799_v55  ;;  %v21942_v0 = vsub.f32 %v9092_v36, %v21930_v37 }
 0x814   : > { %v8779_v33 = vmul.f32 %v8766_v30, %v21861_v18  ;;  %v8831_v5 = vand.u32 4294901760, %v8830_v41  ;;  %v9190_v18 = vand.u32 4294901760, %v21937_v20 }
 0x815   : > { %v8770_v59 = vmul.f32 0.5, %v8769_v50  ;;  %v8836_v22 = vsub.f32 %v8799_v55, %v21934_v32  ;;  %v9096_v56 = vpop.permute.xlu1 %9095  ;;  %v9196_v25 = vand.u32 4294901760, %v21942_v0 }
 0x816   : > { %v8784_v44 = vmul.f32 %v21891_v6, %v8779_v33  ;;  %8832 = vmatmul.f32.vlgmr.msrb.gmra.mxu2 %v8831_v5  ;;  %8901 = vmatmul.f32.gmra.mxu3 %v21934_v32  ;;  %v21946_v3 = vand.u32 4294901760, %v9096_v56  ;;  %v9191_v14 = vsub.f32 %v21937_v20, %v9190_v18 }
 0x817   : > { %v8771_v48 = vsub.f32 1.5, %v8770_v59  ;;  %v8837_v52 = vand.u32 4294901760, %v8836_v22  ;;  %v9197_v36 = vsub.f32 %v21942_v0, %v9196_v25 }
 0x818   : > { %v21950_v11 = vadd.f32 %v21911_v45, %v8784_v44  ;;  %8944 = vmatmul.f32.gmra.mxu0 %v8836_v22  ;;  %v9183_v9 = vsub.f32 %v9096_v56, %v21946_v3  ;;  %9281 = vmatpush.msrb.mxu3 %v21946_v3  ;;  %v9192_v55 = vand.u32 4294901760, %v9191_v14 }
 0x819   : > { %v8772_v39 = vmul.f32 %v18642_v28, %v8771_v48  ;;  %v8838_v62 = vsub.f32 %v8836_v22, %v8837_v52  ;;  %9130 = vmatpush.msrb.mxu0 %v21946_v3  ;;  %v9198_v59 = vand.u32 4294901760, %v9197_v36 }
 0x81a   : > { %25664 = vst [vmem:[#allocation38_spill] sm:$0xff] %v21950_v11  ;;  %8987 = vmatmul.f32.gmra.mxu1 %v8837_v52  ;;  %v9184_v61 = vand.u32 4294901760, %v9183_v9  ;;  %v8802_v26 = vsel %vm405_vm1, %v21950_v11, 0  ;;  %9237 = vmatpush.msrb.mxu2 %v9183_v9 }
 0x81b   : > { %v8776_v47 = vsel %vm8775_vm6, %v18642_v28, %v8772_v39  ;;  %v8839_v13 = vand.u32 4294901760, %v8838_v62  ;;  %v21958_v1 = vand.u32 4294901760, %v8802_v26  ;;  %9132 = vmatpush.msrb.mxu0 %v21925_v38  ;;  %9283 = vmatpush.msrb.mxu3 %v21925_v38  ;;  %v380_v62 = vld [vmem:[#allocation6 + $0x8] sm:$0xff] }
 0x81c   : > { %v8780_v7 = vmul.f32 %v8776_v47, %v21873_v2  ;;  %v9185_v40 = vsub.f32 %v9183_v9, %v9184_v61  ;;  %9240 = vmatpush.msrb.mxu2 %v21937_v20  ;;  %v379_v2 = vld [vmem:[#allocation6] sm:$0xff]  ;;  %v9109_v47 = vsel %vm405_vm1, %v380_v62, 0 }
 0x81d   : > { %v8844_v31 = vsub.f32 %v8802_v26, %v21958_v1  ;;  %v9090_v8 = vpop.permute.xlu1 %9089  ;;  %9134 = vmatpush.msrb.mxu0 %v21930_v37  ;;  %9285 = vmatpush.msrb.mxu3 %v21930_v37  ;;  %v9106_v30 = vsel %vm405_vm1, %v379_v2, 0 }
 0x81e   : > { %v8785_v28 = vmul.f32 %v21891_v6, %v8780_v7  ;;  %v9186_v15 = vand.u32 4294901760, %v9185_v40  ;;  %8840 = vmatmul.f32.gmra.mxu2 %v8839_v13  ;;  %8905 = vmatmul.f32.gmra.mxu3 %v21958_v1  ;;  %v9135_v63 = vand.u32 4294901760, %v9090_v8  ;;  %v21976_v33 = vand.u32 4294901760, %v9106_v30 }
 0x81f   : > { %v8845_v41 = vand.u32 4294901760, %v8844_v31  ;;  %9243 = vmatpush.msrb.mxu2 %v21942_v0  ;;  %v9145_v13 = vand.u32 4294901760, %v9109_v47 }
 0x820   : > { %v21974_v50 = vadd.f32 %v21911_v45, %v8785_v28  ;;  %8949 = vmatmul.f32.gmra.mxu0 %v8844_v31  ;;  %v9201_v20 = vsub.f32 %v9090_v8, %v9135_v63  ;;  %9187 = vmatpush.msrb.mxu1 %v9186_v15  ;;  %v21981_v0 = vsub.f32 %v9106_v30, %v21976_v33 }
 0x821   : > { %v8846_v5 = vsub.f32 %v8844_v31, %v8845_v41  ;;  %9136 = vmatpush.msrb.mxu0 %v9135_v63  ;;  %9287 = vmatpush.msrb.mxu3 %v9135_v63  ;;  %v9146_v7 = vsub.f32 %v9109_v47, %v9145_v13  ;;  %v381_v31 = vld [vmem:[#allocation6 + $0x10] sm:$0xff] }
 0x822   : > { %25665 = vst [vmem:[#allocation39_spill] sm:$0xff] %v21974_v50  ;;  %8993 = vmatmul.f32.gmra.mxu1 %v8845_v41  ;;  %v9202_v22 = vand.u32 4294901760, %v9201_v20  ;;  %v8805_v56 = vsel %vm405_vm1, %v21974_v50, 0  ;;  %9246 = vmatpush.msrb.mxu2 %v9201_v20  ;;  %v9139_v52 = vand.u32 4294901760, %v21981_v0 }
 0x823   : > { %9328 = vmatpush.msra.mxu0 %v9184_v61  ;;  %v8847_v45 = vand.u32 4294901760, %v8846_v5  ;;  %v21983_v44 = vand.u32 4294901760, %v8805_v56  ;;  %9193 = vmatpush.msrb.mxu1 %v9192_v55  ;;  %v21989_v61 = vperm.slane %v21888_v17, 1  ;;  %v9147_v40 = vand.u32 4294901760, %v9146_v7 }
 0x824   : > { %v9203_v48 = vsub.f32 %v9201_v20, %v9202_v22 }
 0x825   : > { %9332 = vmatpush.msra.mxu0 %v9190_v18  ;;  %v8852_v9 = vsub.f32 %v8805_v56, %v21983_v44  ;;  %9199 = vmatpush.msrb.mxu1 %v9198_v59  ;;  %25666 = vst [vmem:[#allocation40_spill] sm:$0xff] %v21989_v61  ;;  %v9140_v18 = vsub.f32 %v21981_v0, %v9139_v52 }
 0x826   : > { %8848 = vmatmul.f32.gmra.mxu2 %v8847_v45  ;;  %8909 = vmatmul.f32.gmra.mxu3 %v21983_v44  ;;  %v9204_v39 = vand.u32 4294901760, %v9203_v48  ;;  %v9148_v8 = vsub.f32 %v9146_v7, %v9147_v40 }
 0x827   : > { %v8853_v26 = vand.u32 4294901760, %v8852_v9  ;;  %9336 = vmatpush.msra.mxu0 %v9196_v25  ;;  %9102 = vrot.lane.b32.xlu0 %v21989_v61, %s18991_s9  ;;  %v9141_v25 = vand.u32 4294901760, %v9140_v18 }
 0x828   : > { %8954 = vmatmul.f32.gmra.mxu0 %v8852_v9  ;;  %9205 = vmatpush.msrb.mxu1 %v9204_v39  ;;  %v9149_v15 = vand.u32 4294901760, %v9148_v8 }
 0x829   : > { %v8854_v14 = vsub.f32 %v8852_v9, %v8853_v26  ;;  %9340 = vmatpush.msra.mxu0 %v9202_v22 }
 0x82a   : > { %9371 = vmatpush.msra.mxu1 %v21946_v3  ;;  %v9112_v3 = vsel %vm405_vm1, %v381_v31, 0 }
 0x82b   : > { %8999 = vmatmul.f32.gmra.mxu1 %v8853_v26  ;;  %v8855_v17 = vand.u32 4294901760, %v8854_v14  ;;  %v9153_v36 = vand.u32 4294901760, %v9112_v3 }
 0x82c   : > { %9373 = vmatpush.msra.mxu1 %v21925_v38  ;;  %v382_v38 = vld [vmem:[#allocation6 + $0x18] sm:$0xff] }
 0x82d   : > { %v9154_v28 = vsub.f32 %v9112_v3, %v9153_v36 }
 0x82e   : > { %9375 = vmatpush.msra.mxu1 %v21930_v37  ;;  %8856 = vmatmul.f32.gmra.mxu2 %v8855_v17  ;;  %v9115_v37 = vsel %vm405_vm1, %v382_v38, 0 }
 0x82f   : > { %9069 = vmatmul.f32.vlgmr.msra.gmra.mxu3 %v21920_v4  ;;  %v9155_v2 = vand.u32 4294901760, %v9154_v28 }
 0x830   : > { %9377 = vmatpush.msra.mxu1 %v9135_v63  ;;  %9142 = vmatmul.f32.vlgmr.msrb.gmra.mxu0 %v9141_v25  ;;  %v9161_v63 = vand.u32 4294901760, %v9115_v37 }
 0x831   : > { %v9156_v41 = vsub.f32 %v9154_v28, %v9155_v2 }
 0x832   : > { %v9162_v55 = vsub.f32 %v9115_v37, %v9161_v63 }
 0x833   : > { %9207 = vmatmul.f32.vlgmr.msrb.gmra.mxu1 %v21976_v33  ;;  %v9157_v30 = vand.u32 4294901760, %v9156_v41 }
 0x834   : > { %v9163_v20 = vand.u32 4294901760, %v9162_v55 }
 0x836   : > { %9032 = vmatmul.f32.vlgmr.msra.gmra.mxu2 %v21920_v4  ;;  %v9164_v5 = vsub.f32 %v9162_v55, %v9163_v20 }
 0x837   : > { %9073 = vmatmul.f32.gmra.mxu3 %v21934_v32 }
 0x838   : > { %9150 = vmatmul.f32.gmra.mxu0 %v9149_v15  ;;  %v9165_v4 = vand.u32 4294901760, %v9164_v5 }
 0x83b   : > { %9211 = vmatmul.f32.gmra.mxu1 %v9145_v13 }
 0x83e   : > { %9036 = vmatmul.f32.gmra.mxu2 %v21934_v32 }
 0x83f   : > { %9077 = vmatmul.f32.gmra.mxu3 %v21958_v1 }
 0x840   : > { %9158 = vmatmul.f32.gmra.mxu0 %v9157_v30 }
 0x843   : > { %9215 = vmatmul.f32.gmra.mxu1 %v9153_v36 }
 0x846   : > { %9040 = vmatmul.f32.gmra.mxu2 %v21958_v1 }
 0x847   : > { %9081 = vmatmul.f32.gmra.mxu3 %v21983_v44 }
 0x848   : > { %9166 = vmatmul.f32.gmra.mxu0 %v9165_v4 }
 0x84b   : > { %9219 = vmatmul.f32.gmra.mxu1 %v9161_v63 }
 0x84e   : > { %9044 = vmatmul.f32.gmra.mxu2 %v21983_v44 }
 0x84f   : > { %9291 = vmatmul.f32.vlgmr.msrb.gmra.mxu3 %v9139_v52 }
 0x850   : > { %9342 = vmatmul.f32.vlgmr.msra.gmra.mxu0 %v21976_v33 }
 0x853   : > { %9379 = vmatmul.f32.vlgmr.msra.gmra.mxu1 %v21976_v33 }
 0x856   : > { %9249 = vmatmul.f32.vlgmr.msrb.gmra.mxu2 %v21981_v0 }
 0x857   : > { %9297 = vmatmul.f32.gmra.mxu3 %v9147_v40 }
 0x858   : > { %9346 = vmatmul.f32.gmra.mxu0 %v9145_v13 }
 0x85b   : > { %9383 = vmatmul.f32.gmra.mxu1 %v9145_v13 }
 0x85e   : > { %9254 = vmatmul.f32.gmra.mxu2 %v9146_v7 }
 0x85f   : > { %9303 = vmatmul.f32.gmra.mxu3 %v9155_v2 }
 0x860   : > { %9350 = vmatmul.f32.gmra.mxu0 %v9153_v36 }
 0x863   : > { %9387 = vmatmul.f32.gmra.mxu1 %v9153_v36 }
 0x866   : > { %9259 = vmatmul.f32.gmra.mxu2 %v9154_v28 }
 0x867   : > { %9309 = vmatmul.f32.gmra.mxu3 %v9163_v20 }
 0x868   : > { %9354 = vmatmul.f32.gmra.mxu0 %v9161_v63 }
 0x86b   : > { %9391 = vmatmul.f32.gmra.mxu1 %v9161_v63 }
 0x86e   : > { %9264 = vmatmul.f32.gmra.mxu2 %v9162_v55 }
 0x88d   : > { %v8940_v32 = vpop.f32.mrf.mxu0 }
 0x88f   : > { %v8982_v1 = vpop.f32.mrf.mxu1 }
 0x891   : > { %v8898_v59 = vpop.f32.mrf.mxu3 }
 0x895   : > { %v8945_v22 = vpop.f32.mrf.mxu0 }
 0x897   : > { %v8988_v56 = vpop.f32.mrf.mxu1 }
 0x899   : > { %v8833_v33 = vpop.f32.mrf.mxu2  ;;  %v8902_v45 = vpop.f32.mrf.mxu3 }
 0x89a   : > { %v8834_v26 = vadd.f32 %v8833_v33, %v21989_v61  ;;  %v9103_v33 = vpop.permute.xlu0 %9102 }
 0x89c   : > { %v8899_v18 = vadd.f32 %v8898_v59, %v8834_v26 }
 0x89d   : > { %v8950_v0 = vpop.f32.mrf.mxu0 }
 0x89e   : > { %v8941_v17 = vadd.f32 %v8940_v32, %v8899_v18 }
 0x89f   : > { %v8994_v52 = vpop.f32.mrf.mxu1 }
 0x8a0   : > { %v8983_v40 = vadd.f32 %v8982_v1, %v8941_v17 }
 0x8a1   : > { %v8841_v44 = vpop.f32.mrf.mxu2  ;;  %v8906_v48 = vpop.f32.mrf.mxu3 }
 0x8a2   : > { %v8842_v3 = vadd.f32 %v8841_v44, %v21989_v61 }
 0x8a4   : > { %v8903_v2 = vadd.f32 %v8902_v45, %v8842_v3 }
 0x8a5   : > { %v8955_v62 = vpop.f32.mrf.mxu0 }
 0x8a6   : > { %v8946_v41 = vadd.f32 %v8945_v22, %v8903_v2 }
 0x8a8   : > { %v9000_v47 = vpop.f32.mrf.mxu1  ;;  %v8989_v63 = vadd.f32 %v8988_v56, %v8946_v41 }
 0x8a9   : > { %v8849_v9 = vpop.f32.mrf.mxu2  ;;  %v8910_v39 = vpop.f32.mrf.mxu3 }
 0x8aa   : > { %v8850_v32 = vadd.f32 %v8849_v9, %v21989_v61 }
 0x8ac   : > { %v8907_v59 = vadd.f32 %v8906_v48, %v8850_v32 }
 0x8ad   : > { %v9143_v14 = vpop.f32.mrf.mxu0 }
 0x8ae   : > { %v8951_v44 = vadd.f32 %v8950_v0, %v8907_v59  ;;  %v9144_v18 = vadd.f32 %v9143_v14, %v9103_v33 }
 0x8b0   : > { %v9208_v25 = vpop.f32.mrf.mxu1 }
 0x8b1   : > { %v8857_v13 = vpop.f32.mrf.mxu2  ;;  %v9209_v17 = vadd.f32 %v9208_v25, %v9144_v18 }
 0x8b2   : > { %v9070_v7 = vpop.f32.mrf.mxu3  ;;  %v8858_v48 = vadd.f32 %v8857_v13, %v21989_v61 }
 0x8b4   : > { %v8911_v41 = vadd.f32 %v8910_v39, %v8858_v48 }
 0x8b5   : > { %v9151_v28 = vpop.f32.mrf.mxu0 }
 0x8b6   : > { %v9152_v0 = vadd.f32 %v9151_v28, %v9103_v33 }
 0x8b8   : > { %v9212_v38 = vpop.f32.mrf.mxu1 }
 0x8b9   : > { %v9033_v31 = vpop.f32.mrf.mxu2  ;;  %v9213_v25 = vadd.f32 %v9212_v38, %v9152_v0 }
 0x8ba   : > { %v9034_v8 = vadd.f32 %v9033_v31, %v8983_v40  ;;  %v9074_v15 = vpop.f32.mrf.mxu3 }
 0x8bc   : > { %v22014_v36 = vadd.f32 %v9070_v7, %v9034_v8  ;;  %v8995_v7 = vadd.f32 %v8994_v52, %v8951_v44 }
 0x8bd   : > { %v9159_v55 = vpop.f32.mrf.mxu0 }
 0x8be   : > { %9415 = vrot.lane.b32.xlu0 %v22014_v36, %s18990_s26  ;;  %v9160_v44 = vadd.f32 %v9159_v55, %v9103_v33 }
 0x8c0   : > { %v9216_v4 = vpop.f32.mrf.mxu1 }
 0x8c1   : > { %v9037_v37 = vpop.f32.mrf.mxu2 }
 0x8c2   : > { %v9078_v30 = vpop.f32.mrf.mxu3  ;;  %v9038_v20 = vadd.f32 %v9037_v37, %v8989_v63 }
 0x8c4   : > { %v22021_v1 = vadd.f32 %v9074_v15, %v9038_v20  ;;  %v8956_v20 = vadd.f32 %v8955_v62, %v8911_v41 }
 0x8c5   : > { %v9167_v45 = vpop.f32.mrf.mxu0 }
 0x8c6   : > { %9439 = vrot.lane.b32.xlu0 %v22014_v36, %s18989_s24 }
 0x8c8   : > { %v9220_v26 = vpop.f32.mrf.mxu1 }
 0x8c9   : > { %v9041_v5 = vpop.f32.mrf.mxu2 }
 0x8ca   : > { %v9082_v22 = vpop.f32.mrf.mxu3  ;;  %v9042_v40 = vadd.f32 %v9041_v5, %v8995_v7  ;;  %v9001_v5 = vadd.f32 %v9000_v47, %v8956_v20 }
 0x8cc   : > { %v22028_v15 = vadd.f32 %v9078_v30, %v9042_v40 }
 0x8cd   : > { %v9343_v8 = vpop.f32.mrf.mxu0 }
 0x8ce   : > { %9417 = vrot.lane.b32.xlu0 %v22021_v1, %s18990_s26 }
 0x8d0   : > { %v9380_v37 = vpop.f32.mrf.mxu1 }
 0x8d1   : > { %v9045_v56 = vpop.f32.mrf.mxu2 }
 0x8d2   : > { %v9292_v31 = vpop.f32.mrf.mxu3  ;;  %v9046_v39 = vadd.f32 %v9045_v56, %v9001_v5  ;;  %v9217_v56 = vadd.f32 %v9216_v4, %v9160_v44 }
 0x8d4   : > { %v22044_v62 = vadd.f32 %v9082_v22, %v9046_v39 }
 0x8d5   : > { %v9347_v32 = vpop.f32.mrf.mxu0 }
 0x8d6   : > { %9441 = vrot.lane.b32.xlu0 %v22021_v1, %s18989_s24 }
 0x8d8   : > { %v9384_v59 = vpop.f32.mrf.mxu1 }
 0x8d9   : > { %v9250_v9 = vpop.f32.mrf.mxu2 }
 0x8da   : > { %v9251_v3 = vadd.f32 %v9250_v9, %v9209_v17  ;;  %v9298_v30 = vpop.f32.mrf.mxu3  ;;  %v9168_v9 = vadd.f32 %v9167_v45, %v9103_v33 }
 0x8dc   : > { %v9293_v2 = vadd.f32 %v9292_v31, %v9251_v3  ;;  %v9221_v3 = vadd.f32 %v9220_v26, %v9168_v9 }
 0x8dd   : > { %v9351_v55 = vpop.f32.mrf.mxu0 }
 0x8de   : > { %v9344_v63 = vadd.f32 %v9343_v8, %v9293_v2  ;;  %9419 = vrot.lane.b32.xlu0 %v22028_v15, %s18990_s26 }
 0x8e0   : > { %v22032_v52 = vadd.f32 %v9380_v37, %v9344_v63  ;;  %v9388_v40 = vpop.f32.mrf.mxu1 }
 0x8e1   : > { %v9255_v14 = vpop.f32.mrf.mxu2 }
 0x8e2   : > { %9907 = vrot.lane.b32.xlu1 %v22032_v52, %s18992_s25  ;;  %9895 = vrot.lane.b32.xlu2 %v22032_v52, %s18990_s26  ;;  %v9256_v13 = vadd.f32 %v9255_v14, %v9213_v25  ;;  %v9304_v17 = vpop.f32.mrf.mxu3 }
 0x8e4   : > { %v9299_v28 = vadd.f32 %v9298_v30, %v9256_v13  ;;  %v9453_v13 = vrot.slane %v22014_v36, 4 }
 0x8e5   : > { %v9355_v41 = vpop.f32.mrf.mxu0 }
 0x8e6   : > { %9443 = vrot.lane.b32.xlu0 %v22028_v15, %s18989_s24  ;;  %v9348_v38 = vadd.f32 %v9347_v32, %v9299_v28 }
 0x8e8   : > { %v22048_v47 = vadd.f32 %v9384_v59, %v9348_v38  ;;  %v9392_v45 = vpop.f32.mrf.mxu1 }
 0x8e9   : > { %v9260_v18 = vpop.f32.mrf.mxu2 }
 0x8ea   : > { %9919 = vrot.lane.b32.xlu1 %v22032_v52, %s18989_s24  ;;  %9427 = vrot.lane.b32.xlu2 %v22014_v36, %s18992_s25  ;;  %v9261_v7 = vadd.f32 %v9260_v18, %v9217_v56  ;;  %v9310_v2 = vpop.f32.mrf.mxu3 }
 0x8ec   : > { %v9305_v22 = vadd.f32 %v9304_v17, %v9261_v7 }
 0x8ee   : > { %9421 = vrot.lane.b32.xlu0 %v22044_v62, %s18990_s26  ;;  %v9352_v4 = vadd.f32 %v9351_v55, %v9305_v22 }
 0x8f0   : > { %v22062_v31 = vadd.f32 %v9388_v40, %v9352_v4  ;;  %v9933_v4 = vrot.slane %v22032_v52, 4 }
 0x8f1   : > { %v9265_v48 = vpop.f32.mrf.mxu2 }
 0x8f2   : > { %9909 = vrot.lane.b32.xlu1 %v22048_v47, %s18992_s25  ;;  %9897 = vrot.lane.b32.xlu2 %v22048_v47, %s18990_s26  ;;  %v9266_v8 = vadd.f32 %v9265_v48, %v9221_v3 }
 0x8f4   : > { %v9311_v37 = vadd.f32 %v9310_v2, %v9266_v8 }
 0x8f6   : > { %9445 = vrot.lane.b32.xlu0 %v22044_v62, %s18989_s24  ;;  %v9356_v33 = vadd.f32 %v9355_v41, %v9311_v37 }
 0x8f8   : > { %v22072_v0 = vadd.f32 %v9392_v45, %v9356_v33 }
 0x8fa   : > { %9921 = vrot.lane.b32.xlu1 %v22048_v47, %s18989_s24  ;;  %9429 = vrot.lane.b32.xlu2 %v22021_v1, %s18992_s25 }
 0x8fe   : > { %10373 = vrot.lane.b32.xlu0 %v22048_v47, %s18991_s9 }
 0x902   : > { %9911 = vrot.lane.b32.xlu1 %v22062_v31, %s18992_s25  ;;  %9899 = vrot.lane.b32.xlu2 %v22062_v31, %s18990_s26 }
 0x90a   : > { %9923 = vrot.lane.b32.xlu1 %v22062_v31, %s18989_s24  ;;  %9431 = vrot.lane.b32.xlu2 %v22028_v15, %s18992_s25 }
 0x912   : > { %10371 = vrot.lane.b32.xlu1 %v22032_v52, %s18991_s9  ;;  %9901 = vrot.lane.b32.xlu2 %v22072_v0, %s18990_s26 }
 0x91a   : > { %9913 = vrot.lane.b32.xlu1 %v22072_v0, %s18992_s25  ;;  %9433 = vrot.lane.b32.xlu2 %v22044_v62, %s18992_s25  ;;  %s18907_s25 = scalar_lea.hbm %s25599_s5, 64 }
 0x922   : > { %9925 = vrot.lane.b32.xlu1 %v22072_v0, %s18989_s24  ;;  %s18903_s24 = scalar_lea.hbm %s18902_s14, 32 }
 0x923   : > { %p18904_p2 = scmp.ne.s32.totalorder %s18902_s14, %s18903_s24  ;;  %p18909_p13 = scmp.lt.s32.totalorder %s18907_s25, %s18903_s24 }
 0x925   : > { %p18905_p4 = pnand %p18904_p2, %p19137_p7  ;;  %p18910_p0 = por %p18909_p13, %p18908_p12 }
 0x927   : > { %p18906_p8 = pneg %p18905_p4 }
 0x929   : > { %p18911_p3 = pnand %p18910_p0, %p18906_p8 }
 0x930   : > { %v9416_v14 = vpop.permute.xlu0 %9415 }
 0x931   : > { %v9465_v32 = vrot.slane %v9416_v14, 4 }
 0x938   : > { %v9440_v20 = vpop.permute.xlu0 %9439 }
 0x939   : > { %v9466_v38 = vsel %vm753_vm2, %v9440_v20, %v9465_v32  ;;  %v9463_v56 = vrot.slane %v9440_v20, 4 }
 0x93a   : > { %v9474_v7 = vperm.slane %v9466_v38, %v19312_v42 }
 0x93b   : > { %v9464_v40 = vsel %vm753_vm2, %v9463_v56, %v9416_v14 }
 0x93c   : > { %v9896_v26 = vpop.permute.xlu2 %9895  ;;  %v9487_v8 = vrot.slane %v9474_v7, 4  ;;  %v9470_v2 = vperm.slane %v9464_v40, %v19312_v42 }
 0x93d   : > { %10379 = vrot.lane.b32.xlu2 %v9896_v26, %s18991_s9  ;;  %v9945_v9 = vrot.slane %v9896_v26, 4 }
 0x940   : > { %v22094_v59 = vpop.permute.xlu0 %9417 }
 0x944   : > { %v9428_v63 = vpop.permute.xlu2 %9427 }
 0x945   : > { %v9454_v30 = vsel %vm753_vm2, %v9428_v63, %v9453_v13  ;;  %v9451_v39 = vrot.slane %v9428_v63, 4 }
 0x946   : > { %v9462_v28 = vperm.slane %v9454_v30, %v19312_v42 }
 0x947   : > { %v9452_v44 = vsel %vm753_vm2, %v9451_v39, %v22014_v36 }
 0x948   : > { %v9489_v18 = vrot.slane %v9462_v28, 4  ;;  %v9458_v22 = vperm.slane %v9452_v44, %v19312_v42  ;;  %v9442_v37 = vpop.permute.xlu0 %9441  ;;  %v9488_v33 = vsel %vm753_vm2, %v9487_v8, %v9462_v28  ;;  %v9475_v44 = vrot.slane %v9470_v2, 4 }
 0x949   : > { %v9494_v32 = vperm.slane %v9488_v33, %v19327_v57  ;;  %v9509_v8 = vrot.slane %v22021_v1, 4 }
 0x94a   : > { %v9490_v55 = vsel %vm753_vm2, %v9474_v7, %v9489_v18  ;;  %v9477_v48 = vrot.slane %v9458_v22, 4 }
 0x94b   : > { %v9498_v3 = vperm.slane %v9490_v55, %v19327_v57 }
 0x94c   : > { %v22085_v25 = vpop.permute.xlu2 %9897  ;;  %v9478_v14 = vsel %vm753_vm2, %v9470_v2, %v9477_v48 }
 0x94d   : > { %10381 = vrot.lane.b32.xlu2 %v22085_v25, %s18991_s9  ;;  %v9505_v13 = vrot.slane %v9498_v3, 4  ;;  %v9486_v38 = vperm.slane %v9478_v14, %v19327_v57 }
 0x94f   : > { %v9506_v18 = vsel %vm753_vm2, 0.0, %v9505_v13  ;;  %v9501_v48 = vrot.slane %v9486_v38, 4 }
 0x950   : > { %v9691_v3 = vrot.slane %v9506_v18, 4 }
 0x951   : > { %v9502_v38 = vsel %vm753_vm2, 0.0, %v9501_v48 }
 0x954   : > { %v9908_v5 = vpop.permute.xlu1 %9907 }
 0x955   : > { %10387 = vrot.lane.b32.xlu0 %v9908_v5, %s18991_s9  ;;  %v9934_v36 = vsel %vm753_vm2, %v9908_v5, %v9933_v4  ;;  %v9931_v45 = vrot.slane %v9908_v5, 4  ;;  %v9503_v4 = vrot.slane %v9494_v32, 4 }
 0x956   : > { %v9942_v63 = vperm.slane %v9934_v36, %v19312_v42 }
 0x957   : > { %v9932_v5 = vsel %vm753_vm2, %v9931_v45, %v22032_v52  ;;  %v22127_v52 = vpop.permute.xlu0 %9419  ;;  %v9504_v14 = vsel %vm753_vm2, 0.0, %v9503_v4  ;;  %v9680_v4 = vrot.slane %v9502_v38, 4 }
 0x958   : > { %v9969_v28 = vrot.slane %v9942_v63, 4  ;;  %v9938_v40 = vperm.slane %v9932_v5, %v19312_v42  ;;  %v9692_v5 = vsel %vm753_vm2, %v9691_v3, %v9504_v14 }
 0x959   : > { %v9696_v3 = vperm.slane %v9692_v5, %v19312_v42 }
 0x95c   : > { %v9920_v17 = vpop.permute.xlu1 %9919 }
 0x95d   : > { %10395 = vrot.lane.b32.xlu1 %v9920_v17, %s18991_s9  ;;  %v9946_v41 = vsel %vm753_vm2, %v9920_v17, %v9945_v9  ;;  %v9943_v30 = vrot.slane %v9920_v17, 4  ;;  %v9476_v17 = vsel %vm753_vm2, %v9475_v44, %v9458_v22  ;;  %v9430_v9 = vpop.permute.xlu2 %9429  ;;  %v9521_v22 = vrot.slane %v22094_v59, 4 }
 0x95e   : > { %v9954_v39 = vperm.slane %v9946_v41, %v19312_v42  ;;  %v9482_v41 = vperm.slane %v9476_v17, %v19327_v57  ;;  %v9507_v33 = vrot.slane %v9430_v9, 4  ;;  %v9510_v44 = vsel %vm753_vm2, %v9430_v9, %v9509_v8 }
 0x95f   : > { %v9944_v56 = vsel %vm753_vm2, %v9943_v30, %v9896_v26  ;;  %v9519_v30 = vrot.slane %v9442_v37, 4  ;;  %v9518_v58 = vperm.slane %v9510_v44, %v19312_v42  ;;  %v9444_v5 = vpop.permute.xlu0 %9443 }
 0x960   : > { %v9967_v7 = vrot.slane %v9954_v39, 4  ;;  %v9970_v55 = vsel %vm753_vm2, %v9954_v39, %v9969_v28  ;;  %v9950_v2 = vperm.slane %v9944_v56, %v19312_v42  ;;  %v9957_v39 = vrot.slane %v9938_v40, 4 }
 0x961   : > { %v9978_v26 = vperm.slane %v9970_v55, %v19327_v57  ;;  %v9522_v28 = vsel %vm753_vm2, %v9442_v37, %v9521_v22  ;;  %v9520_v37 = vsel %vm753_vm2, %v9519_v30, %v22094_v59  ;;  %v9686_v30 = vsel %vm753_vm2, %v9505_v13, %v9494_v32 }
 0x962   : > { %v9968_v45 = vsel %vm753_vm2, %v9967_v7, %v9942_v63  ;;  %v9955_v18 = vrot.slane %v9950_v2, 4  ;;  %v9958_v56 = vsel %vm753_vm2, %v9950_v2, %v9957_v39  ;;  %v9499_v63 = vrot.slane %v9482_v41, 4 }
 0x963   : > { %v22144_v55 = vperm.slane %v9968_v45, %v19327_v57  ;;  %v22146_v17 = vrot.slane %v9978_v26, 4  ;;  %v9508_v7 = vsel %vm753_vm2, %v9507_v33, %v22021_v1  ;;  %v9530_v9 = vperm.slane %v9522_v28, %v19312_v42 }
 0x964   : > { %v22110_v20 = vpop.permute.xlu1 %9909  ;;  %v9966_v8 = vperm.slane %v9958_v56, %v19327_v57  ;;  %v9514_v2 = vperm.slane %v9508_v7, %v19312_v42  ;;  %v9956_v26 = vsel %vm753_vm2, %v9955_v18, %v9938_v40  ;;  %v9500_v33 = vsel %vm753_vm2, 0.0, %v9499_v63 }
 0x965   : > { %10389 = vrot.lane.b32.xlu1 %v22110_v20, %s18991_s9  ;;  %v9983_v22 = vrot.slane %v22144_v55, 4  ;;  %v9986_v1 = vsel %vm753_vm2, 0.0, %v22146_v17  ;;  %v9681_v59 = vsel %vm753_vm2, %v9680_v4, %v9500_v33  ;;  %v9526_v39 = vperm.slane %v9520_v37, %v19312_v42 }
 0x966   : > { %v9545_v38 = vrot.slane %v9518_v58, 4  ;;  %v9709_v40 = vrot.slane %v9696_v3, 4  ;;  %v9962_v28 = vperm.slane %v9956_v26, %v19327_v57  ;;  %v9981_v44 = vrot.slane %v9966_v8, 4 }
 0x967   : > { %v10171_v18 = vrot.slane %v9986_v1, 4  ;;  %v9543_v56 = vrot.slane %v9530_v9, 4  ;;  %v9533_v7 = vrot.slane %v9514_v2, 4  ;;  %v9984_v63 = vsel %vm753_vm2, 0.0, %v9983_v22 }
 0x968   : > { %v9989_v45 = vrot.slane %v22048_v47, 4  ;;  %v9675_v14 = vsel %vm753_vm2, %v9501_v48, %v9482_v41  ;;  %v9690_v4 = vperm.slane %v9686_v30, %v19312_v42  ;;  %v9575_v13 = vrot.slane %v9444_v5, 4 }
 0x969   : > { %v22174_v37 = vperm.slane %v9681_v59, %v19312_v42  ;;  %v9531_v33 = vrot.slane %v9526_v39, 4  ;;  %v9544_v8 = vsel %vm753_vm2, %v9543_v56, %v9518_v58  ;;  %v9546_v26 = vsel %vm753_vm2, %v9530_v9, %v9545_v38 }
 0x96a   : > { %v9710_v1 = vsel %vm753_vm2, %v9709_v40, %v9690_v4  ;;  %v9979_v22 = vrot.slane %v9962_v28, 4  ;;  %v9982_v49 = vsel %vm753_vm2, 0.0, %v9981_v44  ;;  %v10172_v48 = vsel %vm753_vm2, %v10171_v18, %v9984_v63 }
 0x96b   : > { %v22182_v41 = vperm.slane %v9675_v14, %v19312_v42  ;;  %v9577_v30 = vrot.slane %v22127_v52, 4  ;;  %v9532_v59 = vsel %vm753_vm2, %v9531_v33, %v9514_v2  ;;  %v9534_v32 = vsel %vm753_vm2, %v9526_v39, %v9533_v7 }
 0x96c   : > { %v22125_v36 = vpop.permute.xlu1 %9921  ;;  %v9711_v53 = vrot.slane %v9690_v4, 4  ;;  %v9550_v58 = vperm.slane %v9544_v8, %v19327_v57  ;;  %v9554_v9 = vperm.slane %v9546_v26, %v19327_v57  ;;  %v9576_v38 = vsel %vm753_vm2, %v9575_v13, %v22127_v52 }
 0x96d   : > { %10397 = vrot.lane.b32.xlu0 %v22125_v36, %s18991_s9  ;;  %v9697_v40 = vrot.slane %v22174_v37, 4  ;;  %v22193_v18 = vperm.slane %v9710_v1, %v19327_v57  ;;  %v10160_v14 = vrot.slane %v9982_v49, 4  ;;  %v22196_v56 = vperm.slane %v10172_v48, %v19312_v42 }
 0x96e   : > { %v9538_v2 = vperm.slane %v9532_v59, %v19327_v57  ;;  %v9542_v39 = vperm.slane %v9534_v32, %v19327_v57  ;;  %v9980_v7 = vsel %vm753_vm2, 0.0, %v9979_v22  ;;  %v10001_v52 = vrot.slane %v22085_v25, 4 }
 0x96f   : > { %v9578_v13 = vsel %vm753_vm2, %v9444_v5, %v9577_v30  ;;  %v22206_v33 = vperm.slane %v9576_v38, %v19312_v42  ;;  %v22209_v49 = vsel %vm753_vm2, %v9696_v3, %v9711_v53  ;;  %v9559_v8 = vrot.slane %v9550_v58, 4 }
 0x970   : > { %v9561_v26 = vrot.slane %v9554_v9, 4  ;;  %v10166_v32 = vsel %vm753_vm2, %v22146_v17, %v22144_v55  ;;  %v9698_v1 = vsel %vm753_vm2, %v9697_v40, %v22182_v41  ;;  %v9721_v22 = vrot.slane %v22193_v18, 4 }
 0x971   : > { %v10161_v48 = vsel %vm753_vm2, %v10160_v14, %v9980_v7  ;;  %v10189_v5 = vrot.slane %v22196_v56, 4  ;;  %v9555_v30 = vrot.slane %v9538_v2, 4  ;;  %v9557_v59 = vrot.slane %v9542_v39, 4 }
 0x972   : > { %v22220_v53 = vperm.slane %v9578_v13, %v19312_v42  ;;  %v9990_v3 = vsel %vm753_vm2, %v22110_v20, %v9989_v45  ;;  %v10155_v55 = vsel %vm753_vm2, %v9981_v44, %v9962_v28  ;;  %v22227_v17 = vperm.slane %v10166_v32, %v19312_v42 }
 0x973   : > { %v9987_v38 = vrot.slane %v22110_v20, 4  ;;  %v9560_v40 = vsel %vm753_vm2, 0.0, %v9559_v8  ;;  %v9562_v14 = vsel %vm753_vm2, 0.0, %v9561_v26  ;;  %v10002_v39 = vsel %vm753_vm2, %v22125_v36, %v10001_v52 }
 0x974   : > { %v22235_v7 = vperm.slane %v10161_v48, %v19312_v42  ;;  %v9740_v45 = vsel %vm753_vm2, %v9561_v26, %v9550_v58  ;;  %v9998_v13 = vperm.slane %v9990_v3, %v19312_v42  ;;  %v9999_v28 = vrot.slane %v22125_v36, 4  ;;  %v22248_v48 = vpop.permute.xlu2 %9899 }
 0x975   : > { %v10190_v44 = vsel %vm753_vm2, %v10189_v5, %v22227_v17  ;;  %v9558_v20 = vsel %vm753_vm2, 0.0, %v9557_v59  ;;  %v22245_v32 = vperm.slane %v10155_v55, %v19312_v42  ;;  %v9988_v58 = vsel %vm753_vm2, %v9987_v38, %v22048_v47 }
 0x976   : > { %v10177_v52 = vrot.slane %v22235_v7, 4  ;;  %v10010_v26 = vperm.slane %v10002_v39, %v19312_v42  ;;  %v10196_v36 = vperm.slane %v10190_v44, %v19327_v57  ;;  %v9704_v5 = vperm.slane %v9698_v1, %v19327_v57 }
 0x977   : > { %v9556_v3 = vsel %vm753_vm2, 0.0, %v9555_v30  ;;  %v22257_v63 = vperm.slane %v9740_v45, %v19312_v42  ;;  %v9745_v55 = vrot.slane %v9562_v14, 4  ;;  %v10025_v9 = vrot.slane %v9998_v13, 4 }
 0x978   : > { %v10178_v8 = vsel %vm753_vm2, %v10177_v52, %v22245_v32  ;;  %v10000_v4 = vsel %vm753_vm2, %v9999_v28, %v22085_v25  ;;  %v10201_v38 = vrot.slane %v10196_v36, 4  ;;  %v9729_v39 = vsel %vm753_vm2, %v9557_v59, %v9538_v2 }
 0x979   : > { %v10184_v47 = vperm.slane %v10178_v8, %v19327_v57  ;;  %v9734_v44 = vrot.slane %v9558_v20, 4  ;;  %v9994_v1 = vperm.slane %v9988_v58, %v19312_v42  ;;  %v9722_v30 = vsel %vm753_vm2, %v9721_v22, %v9704_v5 }
 0x97a   : > { %v10023_v45 = vrot.slane %v10010_v26, 4  ;;  %v10026_v14 = vsel %vm753_vm2, %v10010_v26, %v10025_v9  ;;  %v10006_v25 = vperm.slane %v10000_v4, %v19312_v42  ;;  %v10860_v8 = vsel %vm2169_vm3, %v9722_v30, 0 }
 0x97b   : > { %v10202_v35 = vsel %vm753_vm2, %v10201_v38, %v10184_v47  ;;  %v10203_v52 = vrot.slane %v10184_v47, 4  ;;  %v22274_v2 = vperm.slane %v9729_v39, %v19312_v42  ;;  %v9746_v59 = vsel %vm753_vm2, %v9745_v55, %v9560_v40  ;;  %v22284_v38 = vpop.permute.xlu1 %9911 }
 0x97c   : > { %v10863_v28 = vsel %vm2169_vm3, %v10202_v35, 0  ;;  %v9723_v20 = vrot.slane %v9704_v5, 4  ;;  %v9735_v9 = vsel %vm753_vm2, %v9734_v44, %v9556_v3  ;;  %v10034_v58 = vperm.slane %v10026_v14, %v19327_v57 }
 0x97d   : > { %v22280_v26 = vand.u32 4294901760, %v10863_v28  ;;  %v10204_v4 = vsel %vm753_vm2, %v10196_v36, %v10203_v52  ;;  %v10013_v47 = vrot.slane %v9994_v1, 4  ;;  %v10024_v35 = vsel %vm753_vm2, %v10023_v45, %v9998_v13  ;;  %v9432_v36 = vpop.permute.xlu2 %9431 }
 0x97e   : > { %v11015_v39 = vsel %vm2169_vm3, %v10204_v4, 0  ;;  %v22287_v30 = vand.u32 4294901760, %v10860_v8  ;;  %v22290_v40 = vperm.slane %v9746_v59, %v19312_v42  ;;  %v10191_v5 = vrot.slane %v22227_v17, 4 }
 0x97f   : > { %v10011_v3 = vrot.slane %v10006_v25, 4  ;;  %10881 = vmatpush.xpose.msra.mxu2 %v22280_v26  ;;  %v10907_v55 = vsub.f32 %v10863_v28, %v22280_v26  ;;  %v10014_v44 = vsel %vm753_vm2, %v10006_v25, %v10013_v47  ;;  %v22296_v13 = vand.u32 4294901760, %v11015_v39 }
 0x980   : > { %v22299_v45 = vsub.f32 %v10860_v8, %v22287_v30  ;;  %v9724_v14 = vsel %vm753_vm2, %v22193_v18, %v9723_v20  ;;  %v22304_v52 = vperm.slane %v10024_v35, %v19327_v57  ;;  %v22306_v17 = vrot.slane %v10034_v58, 4 }
 0x981   : > { %v10908_v59 = vand.u32 4294901760, %v10907_v55  ;;  %v11012_v28 = vsel %vm2169_vm3, %v9724_v14, 0  ;;  %11109 = vmatpush.xpose.msrb.mxu1 %v22296_v13  ;;  %v22313_v8 = vsub.f32 %v11015_v39, %v22296_v13  ;;  %v9563_v18 = vrot.slane %v9432_v36, 4 }
 0x982   : > { %v25602_v25 = vand.u32 4294901760, %v22299_v45  ;;  %v22315_v47 = vand.u32 4294901760, %v11012_v28  ;;  %v10012_v20 = vsel %vm753_vm2, %v10011_v3, %v9994_v1  ;;  %v10179_v58 = vrot.slane %v22245_v32, 4 }
 0x983   : > { %10934 = vmatpush.xpose.msrb.mxu2 %v10907_v55  ;;  %v10192_v35 = vsel %vm753_vm2, %v22196_v56, %v10191_v5  ;;  %v10022_v14 = vperm.slane %v10014_v44, %v19327_v57  ;;  %11086 = vmatpush.xpose.msrb.mxu0 %v22313_v8  ;;  %v10039_v1 = vrot.slane %v22304_v52, 4  ;;  %v10042_v32 = vsel %vm753_vm2, 0.0, %v22306_v17 }
 0x984   : > { %v10885_v4 = vsub.f32 %v22299_v45, %v25602_v25  ;;  %v22327_v39 = vsub.f32 %v11012_v28, %v22315_v47  ;;  %v22330_v22 = vperm.slane %v10192_v35, %v19327_v57  ;;  %v10180_v56 = vsel %vm753_vm2, %v22235_v7, %v10179_v58  ;;  %v22354_v58 = vpop.permute.xlu1 %9923 }
 0x985   : > { %v10909_v5 = vsub.f32 %v10907_v55, %v10908_v59  ;;  %v10188_v25 = vperm.slane %v10180_v56, %v19327_v57  ;;  %v22341_v43 = vperm.slane %v9735_v9, %v19312_v42  ;;  %v10018_v35 = vperm.slane %v10012_v20, %v19327_v57 }
 0x986   : > { %v10886_v3 = vand.u32 4294901760, %v10885_v4  ;;  %v25603_v44 = vand.u32 4294901760, %v22327_v39  ;;  %v10205_v28 = vrot.slane %v22330_v22, 4  ;;  %11089 = vmatmul.f32.vlgmr.msrb.gmra.mxu0 %v22327_v39  ;;  %v25667_v10 = vrot.slane %v22182_v41, 4 }
 0x987   : > { %v10910_v23 = vand.u32 4294901760, %v10909_v5  ;;  %v9564_v55 = vsel %vm753_vm2, %v9563_v18, %v22028_v15  ;;  %v10037_v4 = vrot.slane %v10022_v14, 4  ;;  %v22358_v20 = vperm.slane %v22209_v49, %v19327_v57 }
 0x988   : > { %v9700_v7 = vsel %vm753_vm2, %v22174_v37, %v25667_v10  ;;  %10887 = vmatmul.f32.vlgmr.msra.gmra.mxu2 %v10886_v3  ;;  %11113 = vmatmul.f32.vlgmr.msrb.gmra.mxu1 %v25603_v44  ;;  %v10206_v9 = vsel %vm753_vm2, %v10205_v28, %v10188_v25  ;;  %v10225_v41 = vrot.slane %v10042_v32, 4  ;;  %v10043_v56 = vrot.slane %v22284_v38, 4 }
 0x989   : > { %v25668_v10 = vrot.slane %v22062_v31, 4  ;;  %10983 = vmatpush.xpose.msra.mxu2 %v10908_v59  ;;  %v11167_v18 = vsel %vm2169_vm3, %v10206_v9, 0  ;;  %10911 = vmatpush.xpose.msra.mxu3 %v10910_v23  ;;  %v10040_v14 = vsel %vm753_vm2, 0.0, %v10039_v1  ;;  %v22371_v49 = vperm.slane %v9700_v7, %v19327_v57 }
 0x98a   : > { %v22367_v5 = vand.u32 4294901760, %v11167_v18  ;;  %v9725_v32 = vrot.slane %v22358_v20, 4  ;;  %v9763_v3 = vrot.slane %v22290_v40, 4  ;;  %v22376_v28 = vperm.slane %v9564_v55, %v19312_v42 }
 0x98b   : > { %v10046_v37 = vsel %vm753_vm2, %v22284_v38, %v25668_v10  ;;  %v10035_v59 = vrot.slane %v10018_v35, 4  ;;  %v25669_v9 = vrot.slane %v22248_v48, 4  ;;  %v25670_v1 = vrot.slane %v22257_v63, 4 }
 0x98c   : > { %v25671_v7 = vrot.slane %v22028_v15, 4  ;;  %v10054_v60 = vperm.slane %v10046_v37, %v19312_v42  ;;  %11185 = vmatpush.xpose.msra.mxu0 %v22367_v5  ;;  %v10055_v55 = vrot.slane %v22354_v58, 4  ;;  %10913 = vmatmul.f32.vlgmr.msra.gmra.mxu3 %v22287_v30  ;;  %v10226_v24 = vsel %vm753_vm2, %v10225_v41, %v10040_v14 }
 0x98d   : > { %10957 = vmatpush.xpose.msrb.mxu3 %v22280_v26  ;;  %v10058_v23 = vsel %vm753_vm2, %v22354_v58, %v25669_v9  ;;  %v22386_v10 = vsel %vm753_vm2, %v22290_v40, %v25670_v1  ;;  %v10038_v9 = vsel %vm753_vm2, 0.0, %v10037_v4  ;;  %v22398_v27 = vsub.f32 %v11167_v18, %v22367_v5 }
 0x98e   : > { %v9566_v44 = vsel %vm753_vm2, %v9432_v36, %v25671_v7  ;;  %v10207_v15 = vrot.slane %v10188_v25, 4  ;;  %v10044_v36 = vsel %vm753_vm2, %v10043_v56, %v22062_v31  ;;  %v10066_v37 = vperm.slane %v10058_v23, %v19312_v42 }
 0x98f   : > { %v9726_v1 = vsel %vm753_vm2, %v9725_v32, %v22371_v49  ;;  %v9764_v7 = vsel %vm753_vm2, %v9763_v3, %v22257_v63  ;;  %v22410_v41 = vperm.slane %v9566_v44, %v19312_v42  ;;  %v10214_v25 = vrot.slane %v10038_v9, 4  ;;  %v22420_v32 = vpop.permute.xlu0 %9421 }
 0x990   : > { %v22415_v14 = vperm.slane %v10226_v24, %v19312_v42  ;;  %v10081_v56 = vrot.slane %v10054_v60, 4  ;;  %v10056_v23 = vsel %vm753_vm2, %v10055_v55, %v22248_v48  ;;  %10937 = vmatmul.f32.vlgmr.msrb.gmra.mxu2 %v22299_v45  ;;  %v10050_v63 = vperm.slane %v10044_v36, %v19312_v42 }
 0x991   : > { %11005 = vmatpush.xpose.msra.mxu3 %v22280_v26  ;;  %v10036_v26 = vsel %vm753_vm2, 0.0, %v10035_v59  ;;  %v11212_v44 = vand.u32 4294901760, %v22398_v27  ;;  %11033 = vmatpush.xpose.msrb.mxu2 %v22296_v13  ;;  %v11164_v3 = vsel %vm2169_vm3, %v9726_v1, 0  ;;  %v10208_v24 = vsel %vm753_vm2, %v22330_v22, %v10207_v15 }
 0x992   : > { %v10209_v59 = vsel %vm753_vm2, %v10037_v4, %v10018_v35  ;;  %v10079_v9 = vrot.slane %v10066_v37, 4  ;;  %v10082_v55 = vsel %vm753_vm2, %v10066_v37, %v10081_v56  ;;  %v22430_v40 = vand.u32 4294901760, %v11164_v3 }
 0x993   : > { %v10220_v36 = vsel %vm753_vm2, %v22306_v17, %v22304_v52  ;;  %v10062_v18 = vperm.slane %v10056_v23, %v19312_v42  ;;  %v11213_v21 = vsub.f32 %v22398_v27, %v11212_v44  ;;  %11287 = vmatpush.xpose.msrb.mxu0 %v11212_v44  ;;  %v11060_v1 = vand.u32 4294901760, %v22313_v8 }
 0x994   : > { %v10215_v22 = vsel %vm753_vm2, %v10214_v25, %v10036_v26  ;;  %v10243_v35 = vrot.slane %v22415_v14, 4  ;;  %v22441_v4 = vsub.f32 %v11164_v3, %v22430_v40  ;;  %v11319_v15 = vsel %vm2169_vm3, %v10208_v24, 0 }
 0x995   : > { %v25672_v37 = vand.u32 4294901760, %v22299_v45  ;;  %v10069_v52 = vrot.slane %v10050_v63, 4  ;;  %v10090_v17 = vperm.slane %v10082_v55, %v19327_v57  ;;  %v11214_v56 = vand.u32 4294901760, %v11213_v21 }
 0x996   : > { %v11061_v23 = vsub.f32 %v22313_v8, %v11060_v1  ;;  %v22449_v44 = vperm.slane %v10220_v36, %v19312_v42  ;;  %v10080_v26 = vsel %vm753_vm2, %v10079_v9, %v10054_v60  ;;  %v9727_v25 = vrot.slane %v22371_v49, 4 }
 0x997   : > { %10961 = vmatmul.f32.vlgmr.msrb.gmra.mxu3 %v25672_v37  ;;  %v25604_v3 = vand.u32 4294901760, %v22441_v4  ;;  %v9601_v24 = vrot.slane %v22410_v41, 4  ;;  %v10070_v45 = vsel %vm753_vm2, %v10062_v18, %v10069_v52  ;;  %11215 = vmatpush.xpose.msra.mxu1 %v11214_v56  ;;  %v22456_v37 = vand.u32 4294901760, %v11319_v15 }
 0x998   : > { %v11062_v55 = vand.u32 4294901760, %v11061_v23  ;;  %v10067_v21 = vrot.slane %v10062_v18, 4  ;;  %10985 = vmatmul.f32.vlgmr.msra.gmra.mxu2 %v22287_v30  ;;  %v22464_v60 = vperm.slane %v10215_v22, %v19312_v42  ;;  %v10244_v49 = vsel %vm753_vm2, %v10243_v35, %v22449_v44 }
 0x999   : > { %v11189_v8 = vsub.f32 %v22441_v4, %v25604_v3  ;;  %v22469_v9 = vperm.slane %v10080_v26, %v19327_v57  ;;  %v22471_v36 = vrot.slane %v10090_v17, 4  ;;  %11135 = vmatpush.xpose.msra.mxu2 %v11060_v1  ;;  %v22474_v18 = vperm.slane %v10209_v59, %v19312_v42  ;;  %v9446_v59 = vpop.permute.xlu0 %9445 }
 0x99a   : > { %11063 = vmatpush.xpose.msrb.mxu3 %v11062_v55  ;;  %v22477_v52 = vperm.slane %v10244_v49, %v19327_v57  ;;  %11217 = vmatmul.f32.vlgmr.msra.gmra.mxu1 %v22430_v40  ;;  %v10231_v56 = vrot.slane %v22464_v60, 4  ;;  %v25673_v35 = vand.u32 4294901760, %v22327_v39  ;;  %v9728_v17 = vsel %vm753_vm2, %v22358_v20, %v9727_v25 }
 0x99b   : > { %11309 = vmatpush.xpose.msrb.mxu1 %v22367_v5  ;;  %v11190_v22 = vand.u32 4294901760, %v11189_v8  ;;  %v22487_v1 = vperm.slane %v9764_v7, %v19327_v57  ;;  %v10078_v26 = vperm.slane %v10070_v45, %v19327_v57  ;;  %v22492_v55 = vsub.f32 %v11319_v15, %v22456_v37 }
 0x99c   : > { %v11037_v23 = vsub.f32 %v22327_v39, %v25673_v35  ;;  %v10255_v8 = vrot.slane %v22477_v52, 4  ;;  %v9633_v49 = vrot.slane %v22420_v32, 4  ;;  %v9602_v39 = vsel %vm753_vm2, %v22220_v53, %v9601_v24 }
 0x99d   : > { %v10068_v20 = vsel %vm753_vm2, %v10067_v21, %v10050_v63  ;;  %11191 = vmatmul.f32.vlgmr.msra.gmra.mxu0 %v11190_v22  ;;  %v10232_v7 = vsel %vm753_vm2, %v10231_v56, %v22474_v18  ;;  %v10095_v25 = vrot.slane %v22469_v9, 4  ;;  %v10098_v15 = vsel %vm753_vm2, 0.0, %v22471_v36 }
 0x99e   : > { %11390 = vmatpush.xpose.msra.mxu0 %v22492_v55  ;;  %v10238_v45 = vperm.slane %v10232_v7, %v19327_v57  ;;  %v11316_v24 = vsel %vm2169_vm3, %v9728_v17, 0  ;;  %v25674_v63 = vrot.slane %v22376_v28, 4  ;;  %v9631_v22 = vrot.slane %v9446_v59, 4 }
 0x99f   : > { %11413 = vmatpush.xpose.msra.mxu1 %v22456_v37  ;;  %11007 = vmatmul.f32.vlgmr.msra.gmra.mxu3 %v22287_v30  ;;  %v11038_v30 = vand.u32 4294901760, %v11037_v23  ;;  %v25675_v56 = vrot.slane %v22341_v43, 4  ;;  %v22518_v3 = vperm.slane %v10068_v20, %v19327_v57  ;;  %v22520_v7 = vrot.slane %v10078_v26, 4 }
 0x9a0   : > { %11157 = vmatpush.xpose.msra.mxu3 %v22296_v13  ;;  %v9590_v21 = vsel %vm753_vm2, %v22206_v33, %v25674_v63  ;;  %v22522_v13 = vpop.permute.xlu1 %10371  ;;  %v10256_v17 = vsel %vm753_vm2, %v10255_v8, %v10238_v45  ;;  %v9775_v19 = vrot.slane %v22487_v1, 4  ;;  %v9610_v63 = vperm.slane %v9602_v39, %v19327_v57 }
 0x9a1   : > { %v9752_v35 = vsel %vm753_vm2, %v25675_v56, %v22274_v2  ;;  %v10279_v34 = vrot.slane %v10098_v15, 4  ;;  %v11471_v23 = vsel %vm2169_vm3, %v10256_v17, 0  ;;  %11039 = vmatmul.f32.vlgmr.msrb.gmra.mxu2 %v11038_v30  ;;  %v22528_v46 = vand.u32 4294901760, %v11316_v24 }
 0x9a2   : > { %v9598_v56 = vperm.slane %v9590_v21, %v19327_v57  ;;  %v10096_v20 = vsel %vm753_vm2, 0.0, %v10095_v25  ;;  %v22532_v26 = vand.u32 4294901760, %v11471_v23  ;;  %11238 = vmatpush.xpose.msrb.mxu2 %v22398_v27  ;;  %v22536_v8 = vperm.slane %v9752_v35, %v19327_v57  ;;  %11311 = vmatmul.f32.vlgmr.msrb.gmra.mxu1 %v22430_v40 }
 0x9a3   : > { %v25676_v39 = vrot.slane %v22206_v33, 4  ;;  %v25677_v30 = vrot.slane %v22220_v53, 4  ;;  %v22548_v25 = vsel %vm753_vm2, %v9631_v22, %v22420_v32  ;;  %v22551_v21 = vsel %vm753_vm2, %v9446_v59, %v9633_v49 }
 0x9a4   : > { %v10091_v27 = vrot.slane %v22518_v3, 4  ;;  %v10094_v33 = vsel %vm753_vm2, 0.0, %v22520_v7  ;;  %v9776_v53 = vsel %vm753_vm2, %v9775_v19, %v22536_v8  ;;  %v10280_v32 = vsel %vm753_vm2, %v10279_v34, %v10096_v20 }
 0x9a5   : > { %v9588_v15 = vsel %vm753_vm2, %v25676_v39, %v22376_v28  ;;  %v9600_v17 = vsel %vm753_vm2, %v25677_v30, %v22410_v41  ;;  %v22558_v28 = vsub.f32 %v11471_v23, %v22532_v26  ;;  %v22562_v41 = vrot.slane %v9610_v63, 4  ;;  %11289 = vmatmul.f32.vlgmr.msrb.gmra.mxu0 %v22430_v40 }
 0x9a6   : > { %v22567_v59 = vsub.f32 %v11316_v24, %v22528_v46  ;;  %v10257_v49 = vrot.slane %v10238_v45, 4  ;;  %v22571_v22 = vperm.slane %v9588_v15, %v19327_v57  ;;  %v22574_v35 = vperm.slane %v9600_v17, %v19327_v57  ;;  %11489 = vmatpush.xpose.msrb.mxu0 %v22532_v26 }
 0x9a7   : > { %11065 = vmatmul.f32.vlgmr.msrb.gmra.mxu3 %v22315_v47  ;;  %v22576_v23 = vrot.slane %v9598_v56, 4  ;;  %v11516_v34 = vand.u32 4294901760, %v22558_v28  ;;  %v10268_v19 = vrot.slane %v10094_v33, 4  ;;  %v10233_v40 = vrot.slane %v22474_v18, 4 }
 0x9a8   : > { %11261 = vmatpush.xpose.msrb.mxu3 %v22367_v5  ;;  %v11468_v24 = vsel %vm2169_vm3, %v9776_v53, 0  ;;  %v11364_v45 = vand.u32 4294901760, %v22492_v55  ;;  %v10245_v63 = vrot.slane %v22449_v44, 4  ;;  %v10092_v20 = vsel %vm753_vm2, 0.0, %v10091_v27  ;;  %v22606_v33 = vpop.permute.xlu1 %9913 }
 0x9a9   : > { %v22587_v56 = vperm.slane %v10280_v32, %v19312_v42  ;;  %v11517_v39 = vsub.f32 %v22558_v28, %v11516_v34  ;;  %v9618_v15 = vsel %vm753_vm2, 0.0, %v22562_v41  ;;  %v11340_v5 = vand.u32 4294901760, %v22567_v59  ;;  %11137 = vmatmul.f32.vlgmr.msra.gmra.mxu2 %v22315_v47 }
 0x9aa   : > { %v22594_v18 = vand.u32 4294901760, %v11468_v24  ;;  %v10258_v30 = vsel %vm753_vm2, %v22477_v52, %v10257_v49  ;;  %v22600_v44 = vsel %vm753_vm2, 0.0, %v22576_v23  ;;  %v9615_v17 = vrot.slane %v22574_v35, 4  ;;  %11337 = vmatpush.xpose.msra.mxu2 %v22456_v37 }
 0x9ab   : > { %v10274_v27 = vsel %vm753_vm2, %v22471_v36, %v22469_v9  ;;  %v11518_v53 = vand.u32 4294901760, %v11517_v39  ;;  %v10269_v32 = vsel %vm753_vm2, %v10268_v19, %v10092_v20  ;;  %11417 = vmatmul.f32.vlgmr.msra.gmra.mxu1 %v11340_v5  ;;  %v11365_v49 = vsub.f32 %v22492_v55, %v11364_v45  ;;  %v22630_v20 = vpop.permute.xlu2 %9901 }
 0x9ac   : > { %v22611_v52 = vsub.f32 %v11468_v24, %v22594_v18  ;;  %v10234_v29 = vsel %vm753_vm2, %v22464_v60, %v10233_v40  ;;  %v9799_v54 = vrot.slane %v9618_v15, 4  ;;  %v10297_v6 = vrot.slane %v22587_v56, 4 }
 0x9ad   : > { %11519 = vmatpush.xpose.msrb.mxu1 %v11518_v53  ;;  %v11623_v9 = vsel %vm2169_vm3, %v10258_v30, 0  ;;  %v10246_v36 = vsel %vm753_vm2, %v22415_v14, %v10245_v63  ;;  %11393 = vmatmul.f32.vlgmr.msra.gmra.mxu0 %v22567_v59  ;;  %v11366_v24 = vand.u32 4294901760, %v11365_v49  ;;  %v22624_v55 = vperm.slane %v10234_v29, %v19327_v57 }
 0x9ae   : > { %v25607_v19 = vand.u32 4294901760, %v22611_v52  ;;  %v22627_v60 = vperm.slane %v10246_v36, %v19327_v57  ;;  %v9611_v40 = vrot.slane %v22571_v22, 4  ;;  %v10263_v14 = vsel %vm753_vm2, %v22520_v7, %v22518_v3  ;;  %11591 = vmatpush.xpose.msra.mxu0 %v11516_v34 }
 0x9af   : > { %v22636_v63 = vperm.slane %v10269_v32, %v19312_v42  ;;  %v22639_v39 = vperm.slane %v10274_v27, %v19312_v42  ;;  %11159 = vmatmul.f32.vlgmr.msra.gmra.mxu3 %v22315_v47  ;;  %v9777_v29 = vrot.slane %v22536_v8, 4  ;;  %v25678_v3 = vrot.slane %v22274_v2, 4 }
 0x9b0   : > { %v11493_v15 = vsub.f32 %v22611_v52, %v25607_v19  ;;  %11367 = vmatpush.xpose.msra.mxu3 %v11366_v24  ;;  %v10259_v30 = vrot.slane %v22627_v60, 4  ;;  %v9616_v27 = vsel %vm753_vm2, 0.0, %v9615_v17  ;;  %v9788_v34 = vrot.slane %v22600_v44, 4 }
 0x9b1   : > { %11613 = vmatpush.xpose.msra.mxu1 %v22532_v26  ;;  %v9754_v7 = vsel %vm753_vm2, %v22341_v43, %v25678_v3  ;;  %v22653_v53 = vand.u32 4294901760, %v11623_v9  ;;  %v22657_v47 = vperm.slane %v22386_v10, %v19327_v57  ;;  %v9800_v8 = vsel %vm753_vm2, %v9799_v54, %v9616_v27  ;;  %11241 = vmatmul.f32.vlgmr.msrb.gmra.mxu2 %v22441_v4 }
 0x9b2   : > { %v10298_v32 = vsel %vm753_vm2, %v10297_v6, %v22639_v39  ;;  %v10260_v43 = vsel %vm753_vm2, %v10259_v30, %v22624_v55  ;;  %v22666_v2 = vperm.slane %v9754_v7, %v19327_v57  ;;  %v22669_v44 = vperm.slane %v10263_v14, %v19312_v42  ;;  %11439 = vmatpush.xpose.msrb.mxu2 %v11364_v45  ;;  %v22710_v7 = vpop.permute.xlu0 %10373 }
 0x9b3   : > { %v11775_v10 = vsel %vm2169_vm3, %v10260_v43, 0  ;;  %v11341_v17 = vsub.f32 %v22567_v59, %v11340_v5  ;;  %v9779_v54 = vrot.slane %v22657_v47, 4  ;;  %11521 = vmatmul.f32.vlgmr.msrb.gmra.mxu1 %v22594_v18  ;;  %v11494_v6 = vand.u32 4294901760, %v11493_v15  ;;  %v22688_v59 = vpop.permute.xlu1 %9925 }
 0x9b4   : > { %v22675_v49 = vand.u32 4294901760, %v11775_v10  ;;  %v9778_v36 = vsel %vm753_vm2, %v22487_v1, %v9777_v29  ;;  %v10285_v24 = vrot.slane %v22636_v63, 4  ;;  %v22682_v14 = vperm.slane %v22548_v25, %v19312_v42  ;;  %25679 = vst [vmem:[#allocation41_spill] sm:$0xff] %v22688_v59 }
 0x9b5   : > { %v22686_v45 = vperm.slane %v22551_v21, %v19312_v42  ;;  %11717 = vmatpush.xpose.msrb.mxu1 %v22653_v53  ;;  %v22692_v5 = vsub.f32 %v11623_v9, %v22653_v53  ;;  %v22695_v15 = vperm.slane %v10298_v32, %v19327_v57  ;;  %v10099_v1 = vrot.slane %v22606_v33, 4  ;;  %11495 = vmatmul.f32.vlgmr.msrb.gmra.mxu0 %v11494_v6  ;;  %v9434_v6 = vpop.permute.xlu2 %9433 }
 0x9b6   : > { %v22699_v25 = vsub.f32 %v11775_v10, %v22675_v49  ;;  %v9780_v21 = vsel %vm753_vm2, %v9779_v54, %v22666_v2  ;;  %v10286_v29 = vsel %vm753_vm2, %v10285_v24, %v22669_v44  ;;  %v9612_v30 = vsel %vm753_vm2, 0.0, %v9611_v40 }
 0x9b7   : > { %v22707_v9 = vperm.slane %v9800_v8, %v19312_v42  ;;  %v10113_v3 = vrot.slane %v22630_v20, 4  ;;  %11694 = vmatpush.xpose.msrb.mxu0 %v22692_v5  ;;  %v25680_v27 = vand.u32 4294901760, %v22441_v4  ;;  %v11620_v32 = vsel %vm2169_vm3, %v9778_v36, 0 }
 0x9b8   : > { %v9789_v43 = vsel %vm753_vm2, %v9788_v34, %v9612_v30  ;;  %v10111_v10 = vrot.slane %v22688_v59, 4  ;;  %v25608_v40 = vand.u32 4294901760, %v22699_v25  ;;  %v11342_v54 = vand.u32 4294901760, %v11341_v17 }
 0x9b9   : > { %11265 = vmatmul.f32.vlgmr.msrb.gmra.mxu3 %v25680_v27  ;;  %v9783_v8 = vsel %vm753_vm2, %v22576_v23, %v22571_v22  ;;  %v11772_v24 = vsel %vm2169_vm3, %v9780_v21, 0  ;;  %v22725_v4 = vperm.slane %v10286_v29, %v19327_v57  ;;  %v10309_v36 = vrot.slane %v22695_v15, 4 }
 0x9ba   : > { %11461 = vmatpush.xpose.msrb.mxu3 %v22456_v37  ;;  %v10100_v34 = vsel %vm753_vm2, %v10099_v1, %v22072_v0  ;;  %v25681_v30 = vrot.slane %v22072_v0, 4  ;;  %v11821_v22 = vsub.f32 %v22699_v25, %v25608_v40  ;;  %11343 = vmatmul.f32.vlgmr.msra.gmra.mxu2 %v11342_v54  ;;  %v22737_v23 = vand.u32 4294901760, %v11620_v32 }
 0x9bb   : > { %v22740_v17 = vperm.slane %v9789_v43, %v19312_v42  ;;  %v9794_v21 = vsel %vm753_vm2, %v22562_v41, %v22574_v35  ;;  %v9817_v1 = vrot.slane %v22707_v9, 4  ;;  %v10114_v29 = vsel %vm753_vm2, %v22688_v59, %v10113_v3  ;;  %11542 = vmatpush.xpose.msra.mxu2 %v22558_v28  ;;  %11615 = vmatmul.f32.vlgmr.msra.gmra.mxu1 %v22594_v18 }
 0x9bc   : > { %v10102_v37 = vsel %vm753_vm2, %v22606_v33, %v25681_v30  ;;  %v9619_v27 = vrot.slane %v9434_v6, 4  ;;  %v10112_v54 = vsel %vm753_vm2, %v10111_v10, %v22630_v20  ;;  %v11822_v30 = vand.u32 4294901760, %v11821_v22 }
 0x9bd   : > { %v22752_v43 = vand.u32 4294901760, %v11772_v24  ;;  %v25682_v19 = vrot.slane %v22044_v62, 4  ;;  %v10106_v35 = vperm.slane %v10100_v34, %v19312_v42  ;;  %v10110_v40 = vperm.slane %v10102_v37, %v19312_v42  ;;  %11593 = vmatmul.f32.vlgmr.msra.gmra.mxu0 %v22594_v18 }
 0x9be   : > { %v10310_v28 = vsel %vm753_vm2, %v10309_v36, %v22725_v4  ;;  %v22762_v3 = vperm.slane %v9783_v8, %v19312_v42  ;;  %v10122_v10 = vperm.slane %v10114_v29, %v19312_v42  ;;  %11823 = vmatpush.xpose.msra.mxu1 %v11822_v30  ;;  %v22767_v22 = vsub.f32 %v11620_v32, %v22737_v23 }
 0x9bf   : > { %v9622_v41 = vsel %vm753_vm2, %v9434_v6, %v25682_v19  ;;  %v22771_v6 = vperm.slane %v9794_v21, %v19312_v42  ;;  %v9805_v34 = vrot.slane %v22740_v17, 4  ;;  %v10118_v36 = vperm.slane %v10112_v54, %v19312_v42  ;;  %11793 = vmatpush.xpose.msra.mxu0 %v22675_v49 }
 0x9c0   : > { %v10261_v8 = vrot.slane %v22624_v55, 4  ;;  %v22781_v18 = vperm.slane %v9622_v41, %v19312_v42  ;;  %v10421_v32 = vrot.slane %v22522_v13, 4  ;;  %v22786_v21 = vsub.f32 %v11772_v24, %v22752_v43  ;;  %v22793_v41 = vpop.permute.xlu2 %10379 }
 0x9c1   : > { %11369 = vmatmul.f32.vlgmr.msra.gmra.mxu3 %v22528_v46  ;;  %v12079_v29 = vsel %vm2169_vm3, %v10310_v28, 0  ;;  %v9818_v54 = vsel %vm753_vm2, %v9817_v1, %v22771_v6  ;;  %v9620_v55 = vsel %vm753_vm2, %v9619_v27, %v22044_v62  ;;  %v10125_v30 = vrot.slane %v10106_v35, 4 }
 0x9c2   : > { %11565 = vmatpush.xpose.msra.mxu3 %v22532_v26  ;;  %v10137_v19 = vrot.slane %v10110_v40, 4  ;;  %v10135_v16 = vrot.slane %v10122_v10, 4  ;;  %v11644_v50 = vand.u32 4294901760, %v22767_v22  ;;  %11441 = vmatmul.f32.vlgmr.msrb.gmra.mxu2 %v22528_v46  ;;  %v25683_v26 = vand.u32 4294901760, %v22692_v5 }
 0x9c3   : > { %v10123_v1 = vrot.slane %v10118_v36, 4  ;;  %11641 = vmatpush.xpose.msrb.mxu2 %v22653_v53  ;;  %v10262_v62 = vsel %vm753_vm2, %v22627_v60, %v10261_v8  ;;  %v22806_v27 = vand.u32 4294901760, %v12079_v29  ;;  %v22809_v51 = vperm.slane %v9818_v54, %v19327_v57 }
 0x9c4   : > { %v11669_v24 = vsub.f32 %v22692_v5, %v25683_v26  ;;  %v10138_v11 = vsel %vm753_vm2, %v10122_v10, %v10137_v19  ;;  %v22812_v12 = vperm.slane %v9620_v55, %v19312_v42  ;;  %11721 = vmatmul.f32.vlgmr.msrb.gmra.mxu1 %v11644_v50  ;;  %v10299_v10 = vrot.slane %v22639_v39, 4 }
 0x9c5   : > { %v10126_v19 = vsel %vm753_vm2, %v10118_v36, %v10125_v30  ;;  %v10433_v61 = vrot.slane %v22793_v41, 4  ;;  %11917 = vmatpush.xpose.msrb.mxu1 %v22675_v49  ;;  %v10136_v8 = vsel %vm753_vm2, %v10135_v16, %v10110_v40  ;;  %v10146_v54 = vperm.slane %v10138_v11, %v19327_v57  ;;  %11697 = vmatmul.f32.vlgmr.msrb.gmra.mxu0 %v22767_v22 }
 0x9c6   : > { %v11927_v55 = vsel %vm2169_vm3, %v10262_v62, 0  ;;  %v11670_v26 = vand.u32 4294901760, %v11669_v24  ;;  %v10124_v39 = vsel %vm753_vm2, %v10123_v1, %v10106_v35  ;;  %v25684_v36 = vand.u32 4294901760, %v22699_v25 }
 0x9c7   : > { %v22778_v37 = vpop.permute.xlu0 %10387  ;;  %v22831_v30 = vsub.f32 %v12079_v29, %v22806_v27  ;;  %v9806_v16 = vsel %vm753_vm2, %v9805_v34, %v22762_v3  ;;  %v10134_v40 = vperm.slane %v10126_v19, %v19327_v57  ;;  %v9781_v24 = vrot.slane %v22666_v2, 4 }
 0x9c8   : > { %v10422_v28 = vsel %vm753_vm2, %v22778_v37, %v10421_v32  ;;  %v10287_v32 = vrot.slane %v22669_v44, 4  ;;  %11895 = vmatpush.xpose.msrb.mxu0 %v25684_v36  ;;  %v25685_v44 = vand.u32 4294901760, %v22786_v21  ;;  %v22845_v29 = vperm.slane %v10136_v8, %v19327_v57 }
 0x9c9   : > { %v10430_v60 = vperm.slane %v10422_v28, %v19312_v42  ;;  %11463 = vmatmul.f32.vlgmr.msrb.gmra.mxu3 %v22528_v46  ;;  %v22847_v28 = vand.u32 4294901760, %v11927_v55  ;;  %v22851_v62 = vperm.slane %v10124_v39, %v19327_v57  ;;  %v22855_v2 = vperm.slane %v9806_v16, %v19327_v57 }
 0x9ca   : > { %v11797_v35 = vsub.f32 %v22786_v21, %v25685_v44  ;;  %11671 = vmatpush.xpose.msrb.mxu3 %v11670_v26  ;;  %11545 = vmatmul.f32.vlgmr.msra.gmra.mxu2 %v22611_v52  ;;  %v9829_v26 = vrot.slane %v22809_v51, 4  ;;  %v22860_v19 = vrot.slane %v10146_v54, 4  ;;  %v25686_v8 = vand.u32 4294901760, %v22692_v5 }
 0x9cb   : > { %v10457_v34 = vrot.slane %v10430_v60, 4  ;;  %v12124_v36 = vand.u32 4294901760, %v22831_v30  ;;  %v11645_v16 = vsub.f32 %v22767_v22, %v11644_v50  ;;  %v9782_v59 = vsel %vm753_vm2, %v22657_v47, %v9781_v24 }
 0x9cc   : > { %11743 = vmatpush.xpose.msra.mxu2 %v25686_v8  ;;  %11825 = vmatmul.f32.vlgmr.msra.gmra.mxu1 %v22752_v43  ;;  %v22873_v5 = vsub.f32 %v11927_v55, %v22847_v28  ;;  %v10288_v54 = vsel %vm753_vm2, %v22636_v63, %v10287_v32  ;;  %v9830_v50 = vsel %vm753_vm2, %v9829_v26, %v22855_v2  ;;  %v10151_v55 = vrot.slane %v22845_v29, 4 }
 0x9cd   : > { %12021 = vmatpush.xpose.msra.mxu1 %v22847_v28  ;;  %v12125_v63 = vsub.f32 %v22831_v30, %v12124_v36  ;;  %v25687_v32 = vand.u32 4294901760, %v22611_v52  ;;  %v11646_v24 = vand.u32 4294901760, %v11645_v16  ;;  %v12076_v8 = vsel %vm2169_vm3, %v9830_v50, 0 }
 0x9ce   : > { %v10147_v52 = vrot.slane %v22851_v62, 4 }
 0x9cf   : > { %v22835_v11 = vpop.permute.xlu1 %10395 }
 0x9d0   : > { %v10434_v46 = vsel %vm753_vm2, %v22835_v11, %v10433_v61  ;;  %v10300_v61 = vsel %vm753_vm2, %v22587_v56, %v10299_v10 }
 0x9d1   : > { %v10442_v1 = vperm.slane %v10434_v46, %v19312_v42  ;;  %v11798_v46 = vand.u32 4294901760, %v11797_v35  ;;  %v22881_v35 = vrot.slane %v10134_v40, 4  ;;  %11569 = vmatmul.f32.vlgmr.msra.gmra.mxu3 %v25687_v32  ;;  %v11924_v40 = vsel %vm2169_vm3, %v9782_v59, 0 }
 0x9d2   : > { %11765 = vmatpush.xpose.msra.mxu3 %v22653_v53  ;;  %11647 = vmatmul.f32.vlgmr.msrb.gmra.mxu2 %v11646_v24  ;;  %v22907_v53 = vand.u32 4294901760, %v11924_v40  ;;  %v22918_v32 = vand.u32 4294901760, %v12076_v8 }
 0x9d3   : > { %v10455_v44 = vrot.slane %v10442_v1, 4  ;;  %v10458_v39 = vsel %vm753_vm2, %v10442_v1, %v10457_v34  ;;  %v22879_v34 = vperm.slane %v10300_v61, %v19327_v57  ;;  %11799 = vmatmul.f32.vlgmr.msra.gmra.mxu0 %v11798_v46  ;;  %v22899_v61 = vperm.slane %v10288_v54, %v19327_v57  ;;  %11846 = vmatpush.xpose.msrb.mxu2 %v22699_v25 }
 0x9d4   : > { %v10466_v56 = vperm.slane %v10458_v39, %v19327_v57  ;;  %11998 = vmatpush.xpose.msra.mxu0 %v22873_v5  ;;  %v10150_v59 = vsel %vm753_vm2, 0.0, %v22881_v35  ;;  %11919 = vmatmul.f32.vlgmr.msrb.gmra.mxu1 %v22752_v43  ;;  %v25688_v25 = vrot.slane %v22781_v18, 4 }
 0x9d5   : > { %v10456_v10 = vsel %vm753_vm2, %v10455_v44, %v10430_v60  ;;  %v10154_v60 = vsel %vm753_vm2, 0.0, %v22860_v19  ;;  %v10313_v46 = vrot.slane %v22879_v34, 4 }
 0x9d6   : > { %v10462_v47 = vperm.slane %v10456_v10, %v19327_v57  ;;  %v10473_v22 = vrot.slane %v10466_v56, 4  ;;  %v10333_v56 = vrot.slane %v10154_v60, 4  ;;  %v12126_v10 = vand.u32 4294901760, %v12125_v63 }
 0x9d7   : > { %v9645_v60 = vrot.slane %v22812_v12, 4  ;;  %v9658_v63 = vsel %vm753_vm2, %v22686_v45, %v25688_v25 }
 0x9d8   : > { %v10471_v1 = vrot.slane %v10462_v47, 4  ;;  %v10474_v26 = vsel %vm753_vm2, 0.0, %v10473_v22  ;;  %v10654_v44 = vsel %vm753_vm2, %v10473_v22, %v10462_v47  ;;  %v9655_v47 = vrot.slane %v22686_v45, 4  ;;  %12127 = vmatpush.xpose.msrb.mxu1 %v12126_v10 }
 0x9d9   : > { %v10659_v39 = vrot.slane %v10474_v26, 4  ;;  %v22912_v54 = vperm.slane %v10654_v44, %v19312_v42  ;;  %v10152_v22 = vsel %vm753_vm2, 0.0, %v10151_v55  ;;  %v10314_v55 = vsel %vm753_vm2, %v10313_v46, %v22899_v61  ;;  %11673 = vmatmul.f32.vlgmr.msrb.gmra.mxu3 %v22737_v23 }
 0x9da   : > { %v10472_v16 = vsel %vm753_vm2, 0.0, %v10471_v1  ;;  %v9819_v26 = vrot.slane %v22771_v6, 4  ;;  %v10322_v44 = vrot.slane %v10150_v59, 4  ;;  %v10334_v45 = vsel %vm753_vm2, %v10333_v56, %v10152_v22  ;;  %11869 = vmatpush.xpose.msrb.mxu3 %v22675_v49  ;;  %11745 = vmatmul.f32.vlgmr.msra.gmra.mxu2 %v22737_v23 }
 0x9db   : > { %v10660_v50 = vsel %vm753_vm2, %v10659_v39, %v10472_v16  ;;  %v10679_v1 = vrot.slane %v22912_v54, 4  ;;  %11897 = vmatmul.f32.vlgmr.msrb.gmra.mxu0 %v22752_v43  ;;  %v22934_v39 = vsub.f32 %v11924_v40, %v22907_v53  ;;  %v11972_v16 = vand.u32 4294901760, %v22873_v5  ;;  %11945 = vmatpush.xpose.msra.mxu2 %v22847_v28 }
 0x9dc   : > { %v22921_v24 = vperm.slane %v10660_v50, %v19312_v42  ;;  %v10148_v50 = vsel %vm753_vm2, 0.0, %v10147_v52  ;;  %12097 = vmatpush.xpose.msrb.mxu0 %v22806_v27  ;;  %v10311_v46 = vrot.slane %v22725_v4, 4  ;;  %v9666_v43 = vperm.slane %v9658_v63, %v19327_v57 }
 0x9dd   : > { %v22949_v40 = vsub.f32 %v12076_v8, %v22918_v32  ;;  %v12383_v52 = vsel %vm2169_vm3, %v10314_v55, 0  ;;  %v9646_v59 = vsel %vm753_vm2, %v22682_v14, %v9645_v60  ;;  %v9656_v56 = vsel %vm753_vm2, %v9655_v47, %v22781_v18 }
 0x9de   : > { %v22944_v6 = vsel %vm753_vm2, %v22921_v24, %v10679_v1  ;;  %v10323_v4 = vsel %vm753_vm2, %v10322_v44, %v10148_v50  ;;  %v22958_v10 = vperm.slane %v10334_v45, %v19312_v42  ;;  %v11948_v22 = vand.u32 4294901760, %v22934_v39 }
 0x9df   : > { %v11973_v49 = vsub.f32 %v22873_v5, %v11972_v16  ;;  %v9807_v8 = vrot.slane %v22762_v3, 4  ;;  %v9820_v25 = vsel %vm753_vm2, %v22707_v9, %v9819_v26  ;;  %v10312_v18 = vsel %vm753_vm2, %v22695_v15, %v10311_v46 }
 0x9e0   : > { %v22969_v47 = vand.u32 4294901760, %v12383_v52  ;;  %v9643_v60 = vrot.slane %v22682_v14, 4  ;;  %v22972_v63 = vrot.slane %v9666_v43, 4  ;;  %12025 = vmatmul.f32.vlgmr.msra.gmra.mxu1 %v11948_v22  ;;  %v12100_v1 = vand.u32 4294901760, %v22949_v40 }
 0x9e1   : > { %v9654_v5 = vperm.slane %v9646_v59, %v19327_v57  ;;  %v22977_v3 = vperm.slane %v9656_v56, %v19327_v57  ;;  %v22980_v9 = vperm.slane %v10323_v4, %v19312_v42  ;;  %v10328_v15 = vsel %vm753_vm2, %v22860_v19, %v22845_v29  ;;  %12221 = vmatpush.xpose.msra.mxu1 %v22806_v27 }
 0x9e2   : > { %v10351_v14 = vrot.slane %v22958_v10, 4  ;;  %v12231_v55 = vsel %vm2169_vm3, %v10312_v18, 0  ;;  %v11974_v26 = vand.u32 4294901760, %v11973_v49  ;;  %v22990_v44 = vperm.slane %v9820_v25, %v19327_v57  ;;  %11767 = vmatmul.f32.vlgmr.msra.gmra.mxu3 %v22737_v23  ;;  %11849 = vmatmul.f32.vlgmr.msrb.gmra.mxu2 %v22786_v21 }
 0x9e3   : > { %12001 = vmatmul.f32.vlgmr.msra.gmra.mxu0 %v22934_v39  ;;  %v9644_v50 = vsel %vm753_vm2, %v9643_v60, %v22812_v12  ;;  %v22998_v29 = vsub.f32 %v12383_v52, %v22969_v47  ;;  %v9808_v19 = vsel %vm753_vm2, %v22740_v17, %v9807_v8  ;;  %v9674_v45 = vsel %vm753_vm2, 0.0, %v22972_v63  ;;  %12047 = vmatpush.xpose.msrb.mxu2 %v11972_v16 }
 0x9e4   : > { %12199 = vmatpush.xpose.msra.mxu0 %v12124_v36  ;;  %v23005_v46 = vperm.slane %v10328_v15, %v19312_v42  ;;  %v9831_v43 = vrot.slane %v22855_v2, 4  ;;  %v12101_v12 = vsub.f32 %v22949_v40, %v12100_v1  ;;  %11975 = vmatpush.xpose.msra.mxu3 %v11974_v26  ;;  %v23011_v23 = vrot.slane %v9654_v5, 4 }
 0x9e5   : > { %v9671_v36 = vrot.slane %v22977_v3, 4  ;;  %v10317_v17 = vsel %vm753_vm2, %v22881_v35, %v22851_v62  ;;  %v23017_v52 = vand.u32 4294901760, %v12231_v55  ;;  %v23023_v2 = vperm.slane %v9808_v19, %v19327_v57 }
 0x9e6   : > { %v10352_v59 = vsel %vm753_vm2, %v10351_v14, %v23005_v46  ;;  %v9833_v56 = vrot.slane %v22990_v44, 4  ;;  %v10339_v4 = vrot.slane %v22980_v9, 4  ;;  %v9650_v49 = vperm.slane %v9644_v50, %v19327_v57 }
 0x9e7   : > { %v9853_v8 = vrot.slane %v9674_v45, 4  ;;  %v12428_v62 = vand.u32 4294901760, %v22998_v29  ;;  %v23030_v35 = vperm.slane %v10317_v17, %v19312_v42  ;;  %v12102_v25 = vand.u32 4294901760, %v12101_v12 }
 0x9e8   : > { %12129 = vmatmul.f32.vlgmr.msrb.gmra.mxu1 %v22918_v32  ;;  %v11949_v18 = vsub.f32 %v22934_v39, %v11948_v22  ;;  %v9832_v60 = vsel %vm753_vm2, %v22809_v51, %v9831_v43  ;;  %v9670_v5 = vsel %vm753_vm2, 0.0, %v23011_v23  ;;  %v23040_v16 = vsub.f32 %v12231_v55, %v23017_v52 }
 0x9e9   : > { %12325 = vmatpush.xpose.msrb.mxu1 %v23017_v52  ;;  %v23043_v15 = vperm.slane %v10352_v59, %v19327_v57  ;;  %v9672_v14 = vsel %vm753_vm2, 0.0, %v9671_v36  ;;  %v9834_v39 = vsel %vm753_vm2, %v9833_v56, %v23023_v2  ;;  %v10340_v51 = vsel %vm753_vm2, %v10339_v4, %v23030_v35 }
 0x9ea   : > { %v9667_v22 = vrot.slane %v9650_v49, 4  ;;  %v9854_v26 = vsel %vm753_vm2, %v9853_v8, %v9672_v14  ;;  %v12429_v55 = vsub.f32 %v22998_v29, %v12428_v62  ;;  %v25689_v50 = vand.u32 4294901760, %v22786_v21 }
 0x9eb   : > { %12103 = vmatmul.f32.vlgmr.msrb.gmra.mxu0 %v12102_v25  ;;  %v12228_v19 = vsel %vm2169_vm3, %v9832_v60, 0  ;;  %v9842_v45 = vrot.slane %v9670_v5, 4  ;;  %v11950_v43 = vand.u32 4294901760, %v11949_v18  ;;  %v12380_v12 = vsel %vm2169_vm3, %v9834_v39, 0 }
 0x9ec   : > { %12302 = vmatpush.xpose.msrb.mxu0 %v23040_v16  ;;  %11873 = vmatmul.f32.vlgmr.msrb.gmra.mxu3 %v25689_v50  ;;  %v23061_v36 = vperm.slane %v10340_v51, %v19327_v57  ;;  %v10363_v17 = vrot.slane %v23043_v15, 4  ;;  %v23065_v59 = vperm.slane %v9854_v26, %v19312_v42  ;;  %v23067_v56 = vand.u32 4294901760, %v12228_v19 }
 0x9ed   : > { %12069 = vmatpush.xpose.msrb.mxu3 %v22847_v28  ;;  %11951 = vmatmul.f32.vlgmr.msra.gmra.mxu2 %v11950_v43  ;;  %v9668_v21 = vsel %vm753_vm2, 0.0, %v9667_v22  ;;  %v12430_v4 = vand.u32 4294901760, %v12429_v55  ;;  %v23073_v8 = vand.u32 4294901760, %v12380_v12  ;;  %v9848_v25 = vsel %vm753_vm2, %v22972_v63, %v22977_v3 }
 0x9ee   : > { %12150 = vmatpush.xpose.msra.mxu2 %v22831_v30  ;;  %v9843_v28 = vsel %vm753_vm2, %v9842_v45, %v9668_v21  ;;  %v10364_v18 = vsel %vm753_vm2, %v10363_v17, %v23061_v36  ;;  %v9871_v60 = vrot.slane %v23065_v59, 4  ;;  %v12251_v30 = vsub.f32 %v12228_v19, %v23067_v56 }
 0x9ef   : > { %v12276_v5 = vand.u32 4294901760, %v23040_v16  ;;  %v23085_v14 = vperm.slane %v9843_v28, %v19312_v42  ;;  %v10419_v39 = vrot.slane %v22778_v37, 4  ;;  %v10315_v63 = vrot.slane %v22899_v61, 4 }
 0x9f0   : > { %12223 = vmatmul.f32.vlgmr.msra.gmra.mxu1 %v22918_v32  ;;  %v23092_v3 = vperm.slane %v9848_v25, %v19312_v42  ;;  %v23097_v51 = vsub.f32 %v12380_v12, %v23073_v8  ;;  %v12687_v22 = vsel %vm2169_vm3, %v10364_v18, 0  ;;  %v9837_v37 = vsel %vm753_vm2, %v23011_v23, %v9650_v49 }
 0x9f1   : > { %12431 = vmatpush.xpose.msra.mxu1 %v12430_v4  ;;  %v12252_v55 = vand.u32 4294901760, %v12251_v30  ;;  %v12277_v61 = vsub.f32 %v23040_v16, %v12276_v5  ;;  %v10316_v50 = vsel %vm753_vm2, %v22879_v34, %v10315_v63  ;;  %v23112_v19 = vand.u32 4294901760, %v12687_v22 }
 0x9f2   : > { %v9872_v26 = vsel %vm753_vm2, %v9871_v60, %v23092_v3  ;;  %v12404_v49 = vand.u32 4294901760, %v23097_v51  ;;  %v23118_v16 = vperm.slane %v9837_v37, %v19312_v42  ;;  %v12535_v43 = vsel %vm2169_vm3, %v10316_v50, 0 }
 0x9f3   : > { %12201 = vmatmul.f32.vlgmr.msra.gmra.mxu0 %v22918_v32  ;;  %v10431_v32 = vrot.slane %v22835_v11, 4  ;;  %v9859_v11 = vrot.slane %v23085_v14, 4  ;;  %v23121_v45 = vperm.slane %v9872_v26, %v19327_v57  ;;  %v12278_v12 = vand.u32 4294901760, %v12277_v61 }
 0x9f4   : > { %12401 = vmatpush.xpose.msra.mxu0 %v22969_v47  ;;  %11977 = vmatmul.f32.vlgmr.msra.gmra.mxu3 %v22907_v53  ;;  %v23132_v17 = vsub.f32 %v12687_v22, %v23112_v19  ;;  %v12405_v4 = vsub.f32 %v23097_v51, %v12404_v49  ;;  %v10341_v28 = vrot.slane %v23030_v35, 4  ;;  %v23141_v25 = vand.u32 4294901760, %v12535_v43 }
 0x9f5   : > { %12173 = vmatpush.xpose.msra.mxu3 %v22806_v27  ;;  %12049 = vmatmul.f32.vlgmr.msrb.gmra.mxu2 %v22907_v53  ;;  %v10420_v27 = vsel %vm753_vm2, %v10419_v39, %v22522_v13  ;;  %v10432_v23 = vsel %vm753_vm2, %v10431_v32, %v22793_v41  ;;  %v10353_v13 = vrot.slane %v23005_v46, 4  ;;  %v9860_v21 = vsel %vm753_vm2, %v9859_v11, %v23118_v16 }
 0x9f6   : > { %12249 = vmatpush.xpose.msrb.mxu2 %v23017_v52  ;;  %v10426_v34 = vperm.slane %v10420_v27, %v19312_v42  ;;  %v10438_v41 = vperm.slane %v10432_v23, %v19312_v42  ;;  %v9835_v46 = vrot.slane %v23023_v2, 4  ;;  %v9883_v18 = vrot.slane %v23121_v45, 4 }
 0x9f7   : > { %v10354_v2 = vsel %vm753_vm2, %v22958_v10, %v10353_v13  ;;  %v12732_v39 = vand.u32 4294901760, %v23132_v17  ;;  %v12406_v35 = vand.u32 4294901760, %v12405_v4  ;;  %v12253_v32 = vsub.f32 %v12251_v30, %v12252_v55 }
 0x9f8   : > { %12329 = vmatmul.f32.vlgmr.msrb.gmra.mxu1 %v12252_v55  ;;  %v10443_v60 = vrot.slane %v10438_v41, 4  ;;  %v9836_v22 = vsel %vm753_vm2, %v22990_v44, %v9835_v46  ;;  %v23157_v37 = vsub.f32 %v12535_v43, %v23141_v25  ;;  %v23160_v10 = vperm.slane %v10354_v2, %v19327_v57 }
 0x9f9   : > { %12525 = vmatpush.xpose.msrb.mxu1 %v22969_v47  ;;  %v10342_v26 = vsel %vm753_vm2, %v22980_v9, %v10341_v28  ;;  %v12733_v44 = vsub.f32 %v23132_v17, %v12732_v39  ;;  %v12532_v55 = vsel %vm2169_vm3, %v9836_v22, 0  ;;  %v12254_v11 = vand.u32 4294901760, %v12253_v32 }
 0x9fa   : > { %v10444_v61 = vsel %vm753_vm2, %v10443_v60, %v10426_v34  ;;  %v23178_v27 = vperm.slane %v10342_v26, %v19327_v57  ;;  %v10367_v50 = vrot.slane %v23160_v10, 4  ;;  %v23181_v23 = vand.u32 4294901760, %v12532_v55 }
 0x9fb   : > { %12305 = vmatmul.f32.vlgmr.msrb.gmra.mxu0 %v12251_v30  ;;  %v12734_v13 = vand.u32 4294901760, %v12733_v44  ;;  %v9861_v28 = vrot.slane %v23118_v16, 4 }
 0x9fc   : > { %12503 = vmatpush.xpose.msrb.mxu0 %v12428_v62  ;;  %12071 = vmatmul.f32.vlgmr.msrb.gmra.mxu3 %v22907_v53  ;;  %v10445_v62 = vrot.slane %v10426_v34, 4  ;;  %v23145_v53 = vperm.slane %v9860_v21, %v19327_v57  ;;  %v12555_v43 = vsub.f32 %v12532_v55, %v23181_v23 }
 0x9fd   : > { %12279 = vmatpush.xpose.msrb.mxu3 %v12278_v12  ;;  %12153 = vmatmul.f32.vlgmr.msra.gmra.mxu2 %v22949_v40  ;;  %v10450_v40 = vperm.slane %v10444_v61, %v19327_v57  ;;  %v12580_v12 = vand.u32 4294901760, %v23157_v37  ;;  %v9395_v61 = vld [vmem:[#allocation9] sm:$0xff] }
 0x9fe   : > { %12351 = vmatpush.xpose.msra.mxu2 %v12276_v5  ;;  %v10446_v63 = vsel %vm753_vm2, %v10438_v41, %v10445_v62  ;;  %v9884_v5 = vsel %vm753_vm2, %v9883_v18, %v23145_v53  ;;  %v9873_v41 = vrot.slane %v23092_v3, 4  ;;  %v12556_v3 = vand.u32 4294901760, %v12555_v43 }
 0x9ff   : > { %v10454_v30 = vperm.slane %v10446_v63, %v19327_v57  ;;  %v12684_v9 = vsel %vm2169_vm3, %v9884_v5, 0  ;;  %v10467_v21 = vrot.slane %v10450_v40, 4  ;;  %v12581_v18 = vsub.f32 %v23157_v37, %v12580_v12 }
 0xa00   : > { %12433 = vmatmul.f32.vlgmr.msra.gmra.mxu1 %v23073_v8  ;;  %v23186_v34 = vand.u32 4294901760, %v12684_v9  ;;  %v9874_v2 = vsel %vm753_vm2, %v23065_v59, %v9873_v41  ;;  %v9862_v5 = vsel %vm753_vm2, %v23085_v14, %v9861_v28  ;;  %v9885_v26 = vrot.slane %v23145_v53, 4 }
 0xa01   : > { %12629 = vmatpush.xpose.msra.mxu1 %v23141_v25  ;;  %v12582_v32 = vand.u32 4294901760, %v12581_v18  ;;  %v23219_v22 = vperm.slane %v9874_v2, %v19327_v57  ;;  %v23245_v14 = vperm.slane %v9862_v5, %v19327_v57 }
 0xa02   : > { %v23200_v4 = vsub.f32 %v12684_v9, %v23186_v34  ;;  %v9886_v41 = vsel %vm753_vm2, %v23121_v45, %v9885_v26 }
 0xa03   : > { %12407 = vmatmul.f32.vlgmr.msra.gmra.mxu0 %v12406_v35  ;;  %v23239_v55 = vpop.f32.mrf.mxu0  ;;  %v9887_v53 = vrot.slane %v23219_v22, 4  ;;  %v12836_v45 = vsel %vm2169_vm3, %v9886_v41, 0 }
 0xa04   : > { %12606 = vmatpush.xpose.msra.mxu0 %v23157_v37  ;;  %12177 = vmatmul.f32.vlgmr.msra.gmra.mxu3 %v12100_v1  ;;  %v10469_v1 = vrot.slane %v10454_v30, 4  ;;  %v12708_v16 = vand.u32 4294901760, %v23200_v4 }
 0xa05   : > { %12373 = vmatpush.xpose.msra.mxu3 %v23017_v52  ;;  %12255 = vmatmul.f32.vlgmr.msrb.gmra.mxu2 %v12254_v11  ;;  %v10368_v52 = vsel %vm753_vm2, %v10367_v50, %v23178_v27 }
 0xa06   : > { %12454 = vmatpush.xpose.msrb.mxu2 %v22998_v29  ;;  %v10470_v46 = vsel %vm753_vm2, 0.0, %v10469_v1  ;;  %v10365_v29 = vrot.slane %v23061_v36, 4  ;;  %v10468_v36 = vsel %vm753_vm2, 0.0, %v10467_v21  ;;  %v12709_v30 = vsub.f32 %v23200_v4, %v12708_v16 }
 0xa07   : > { %v10648_v62 = vrot.slane %v10470_v46, 4  ;;  %v10643_v9 = vsel %vm753_vm2, %v10469_v1, %v10450_v40 }
 0xa08   : > { %12527 = vmatmul.f32.vlgmr.msrb.gmra.mxu1 %v23073_v8 }
 0xa09   : > { %12735 = vmatpush.xpose.msrb.mxu1 %v12734_v13  ;;  %v10649_v35 = vsel %vm753_vm2, %v10648_v62, %v10468_v36  ;;  %v12710_v13 = vand.u32 4294901760, %v12709_v30 }
 0xa0a   : > { %v23236_v44 = vperm.slane %v10649_v35, %v19312_v42 }
 0xa0b   : > { %12505 = vmatmul.f32.vlgmr.msrb.gmra.mxu0 %v23073_v8  ;;  %v12991_v8 = vsel %vm2169_vm3, %v10368_v52, 0  ;;  %v10888_v63 = vpop.f32.mrf.mxu2  ;;  %v12557_v52 = vsub.f32 %v12555_v43, %v12556_v3 }
 0xa0c   : > { %12705 = vmatpush.xpose.msrb.mxu0 %v23112_v19  ;;  %12281 = vmatmul.f32.vlgmr.msrb.gmra.mxu3 %v23067_v56  ;;  %v23212_v60 = vand.u32 4294901760, %v12991_v8  ;;  %v10665_v21 = vrot.slane %v23236_v44, 4 }
 0xa0d   : > { %12477 = vmatpush.xpose.msrb.mxu3 %v22969_v47  ;;  %12353 = vmatmul.f32.vlgmr.msra.gmra.mxu2 %v23067_v56  ;;  %v10366_v47 = vsel %vm753_vm2, %v23043_v15, %v10365_v29  ;;  %v23223_v15 = vpop.f32.mrf.mxu1  ;;  %v9888_v29 = vsel %vm753_vm2, %v9887_v53, %v23245_v14  ;;  %v12558_v28 = vand.u32 4294901760, %v12557_v52 }
 0xa0e   : > { %12553 = vmatpush.xpose.msra.mxu2 %v23141_v25  ;;  %v12839_v59 = vsel %vm2169_vm3, %v10366_v47, 0  ;;  %v23227_v37 = vsub.f32 %v12991_v8, %v23212_v60  ;;  %v12988_v18 = vsel %vm2169_vm3, %v9888_v29, 0  ;;  %v9889_v29 = vrot.slane %v23245_v14, 4 }
 0xa0f   : > { %v10914_v11 = vpop.f32.mrf.mxu3 }
 0xa10   : > { %12633 = vmatmul.f32.vlgmr.msra.gmra.mxu1 %v12556_v3  ;;  %v13036_v50 = vand.u32 4294901760, %v23227_v37 }
 0xa11   : > { %12829 = vmatpush.xpose.msra.mxu1 %v23112_v19 }
 0xa13   : > { %12609 = vmatmul.f32.vlgmr.msra.gmra.mxu0 %v12555_v43  ;;  %v10938_v1 = vpop.f32.mrf.mxu2  ;;  %v23263_v43 = vperm.slane %v10643_v9, %v19312_v42 }
 0xa14   : > { %12807 = vmatpush.xpose.msra.mxu0 %v12732_v39  ;;  %12375 = vmatmul.f32.vlgmr.msra.gmra.mxu3 %v23067_v56  ;;  %v10677_v39 = vrot.slane %v22921_v24, 4  ;;  %v23241_v56 = vand.u32 4294901760, %v12839_v59  ;;  %v10889_v24 = vadd.f32 %v10888_v63, %v9395_v61  ;;  %v23287_v63 = vand.u32 4294901760, %v12988_v18 }
 0xa15   : > { %12583 = vmatpush.xpose.msra.mxu3 %v12582_v32  ;;  %12457 = vmatmul.f32.vlgmr.msrb.gmra.mxu2 %v23097_v51  ;;  %v10666_v2 = vsel %vm753_vm2, %v10665_v21, %v23263_v43  ;;  %v23281_v51 = vand.u32 4294901760, %v12836_v45  ;;  %v9396_v21 = vld [vmem:[#allocation9 + $0x8] sm:$0xff] }
 0xa16   : > { %12655 = vmatpush.xpose.msrb.mxu2 %v12580_v12  ;;  %v10678_v46 = vsel %vm753_vm2, %v10677_v39, %v22912_v54  ;;  %v23258_v40 = vsub.f32 %v12839_v59, %v23241_v56  ;;  %v10915_v12 = vadd.f32 %v10914_v11, %v10889_v24  ;;  %v13037_v54 = vsub.f32 %v23227_v37, %v13036_v50 }
 0xa17   : > { %v23273_v8 = vperm.slane %v10678_v46, %v19327_v57  ;;  %v23276_v62 = vpop.f32.mrf.mxu1  ;;  %v23290_v35 = vperm.slane %v10666_v2, %v19327_v57  ;;  %v12859_v5 = vsub.f32 %v12836_v45, %v23281_v51  ;;  %v23301_v39 = vsub.f32 %v12988_v18, %v23287_v63 }
 0xa18   : > { %12737 = vmatmul.f32.vlgmr.msrb.gmra.mxu1 %v23186_v34  ;;  %v10939_v36 = vadd.f32 %v10938_v1, %v10915_v12  ;;  %v13038_v47 = vand.u32 4294901760, %v13037_v54  ;;  %v12884_v26 = vand.u32 4294901760, %v23258_v40 }
 0xa19   : > { %12933 = vmatpush.xpose.msrb.mxu1 %v23241_v56  ;;  %v10689_v59 = vrot.slane %v23273_v8, 4  ;;  %v12860_v53 = vand.u32 4294901760, %v12859_v5  ;;  %v13012_v52 = vand.u32 4294901760, %v23301_v39 }
 0xa1a   : > { %v10962_v3 = vpop.f32.mrf.mxu3  ;;  %v12885_v24 = vsub.f32 %v23258_v40, %v12884_v26 }
 0xa1b   : > { %12711 = vmatmul.f32.vlgmr.msrb.gmra.mxu0 %v12710_v13  ;;  %v10986_v32 = vpop.f32.mrf.mxu2  ;;  %v10690_v61 = vsel %vm753_vm2, %v10689_v59, %v23290_v35  ;;  %v13013_v45 = vsub.f32 %v23301_v39, %v13012_v52  ;;  %v12861_v59 = vsub.f32 %v12859_v5, %v12860_v53 }
 0xa1c   : > { %12910 = vmatpush.xpose.msrb.mxu0 %v23258_v40  ;;  %12481 = vmatmul.f32.vlgmr.msrb.gmra.mxu3 %v12404_v49  ;;  %v23283_v49 = vpop.f32.mrf.mxu0  ;;  %v23316_v13 = vand.u32 4294901760, %v10690_v61  ;;  %v10667_v40 = vrot.slane %v23263_v43, 4  ;;  %v12886_v12 = vand.u32 4294901760, %v12885_v24 }
 0xa1d   : > { %12677 = vmatpush.xpose.msrb.mxu3 %v23141_v25  ;;  %12559 = vmatmul.f32.vlgmr.msra.gmra.mxu2 %v12558_v28  ;;  %v10963_v25 = vadd.f32 %v10962_v3, %v10939_v36  ;;  %v10688_v3 = vperm.slane %v22944_v6, %v19327_v57  ;;  %v12862_v24 = vand.u32 4294901760, %v12861_v59 }
 0xa1e   : > { %12758 = vmatpush.xpose.msra.mxu2 %v23132_v17  ;;  %v10369_v17 = vrot.slane %v23178_v27, 4  ;;  %v10668_v14 = vsel %vm753_vm2, %v23236_v44, %v10667_v40 }
 0xa1f   : > { %v10987_v30 = vadd.f32 %v10986_v32, %v10963_v25  ;;  %v10676_v36 = vperm.slane %v10668_v14, %v19327_v57  ;;  %v13014_v25 = vand.u32 4294901760, %v13013_v45  ;;  %v9890_v32 = vsel %vm753_vm2, %v23219_v22, %v9889_v29  ;;  %v9398_v14 = vld [vmem:[#allocation9 + $0x18] sm:$0xff] }
 0xa20   : > { %12831 = vmatmul.f32.vlgmr.msra.gmra.mxu1 %v23186_v34  ;;  %v13140_v22 = vsel %vm2169_vm3, %v9890_v32, 0 }
 0xa21   : > { %13039 = vmatpush.xpose.msra.mxu1 %v13038_v47  ;;  %v10693_v47 = vrot.slane %v10688_v3, 4 }
 0xa22   : > { %v11008_v11 = vpop.f32.mrf.mxu3 }
 0xa23   : > { %12809 = vmatmul.f32.vlgmr.msra.gmra.mxu0 %v23186_v34  ;;  %v23305_v34 = vpop.f32.mrf.mxu1  ;;  %v23308_v9 = vadd.f32 %v11008_v11, %v10987_v30  ;;  %v10695_v30 = vrot.slane %v10676_v36, 4 }
 0xa24   : > { %13009 = vmatpush.xpose.msra.mxu0 %v23212_v60  ;;  %12585 = vmatmul.f32.vlgmr.msra.gmra.mxu3 %v23181_v23  ;;  %v23311_v27 = vpop.f32.mrf.mxu0  ;;  %v11040_v46 = vpop.f32.mrf.mxu2 }
 0xa25   : > { %12781 = vmatpush.xpose.msra.mxu3 %v23112_v19  ;;  %12657 = vmatmul.f32.vlgmr.msrb.gmra.mxu2 %v23181_v23  ;;  %v10370_v19 = vsel %vm753_vm2, %v23160_v10, %v10369_v17  ;;  %v13291_v41 = vsel %vm2169_vm3, %v23308_v9, -inf  ;;  %v23328_v10 = vsub.f32 %v10690_v61, %v23316_v13  ;;  %v11041_v54 = vadd.f32 %v11040_v46, %v9396_v21 }
 0xa26   : > { %12857 = vmatpush.xpose.msrb.mxu2 %v23241_v56  ;;  %13292 = vmax.xlane.f32.xlu2 %v13291_v41  ;;  %v13143_v1 = vsel %vm2169_vm3, %v10370_v19, 0  ;;  %v23365_v19 = vand.u32 4294901760, %v13140_v22 }
 0xa27   : > { %v23334_v43 = vand.u32 4294901760, %v13143_v1  ;;  %v13721_v2 = vand.u32 4294901760, %v23328_v10 }
 0xa28   : > { %12937 = vmatmul.f32.vlgmr.msrb.gmra.mxu1 %v12860_v53 }
 0xa29   : > { %13133 = vmatpush.xpose.msrb.mxu1 %v23212_v60  ;;  %v13187_v44 = vsub.f32 %v13143_v1, %v23334_v43  ;;  %v13722_v11 = vsub.f32 %v23328_v10, %v13721_v2  ;;  %v13163_v1 = vsub.f32 %v13140_v22, %v23365_v19 }
 0xa2a   : > { %v11066_v28 = vpop.f32.mrf.mxu3 }
 0xa2b   : > { %12913 = vmatmul.f32.vlgmr.msrb.gmra.mxu0 %v12859_v5  ;;  %v9397_v5 = vld [vmem:[#allocation9 + $0x10] sm:$0xff]  ;;  %v13723_v46 = vand.u32 4294901760, %v13722_v11  ;;  %v13164_v29 = vand.u32 4294901760, %v13163_v1 }
 0xa2c   : > { %13111 = vmatpush.xpose.msrb.mxu0 %v13036_v50  ;;  %12679 = vmatmul.f32.vlgmr.msrb.gmra.mxu3 %v23181_v23  ;;  %v23338_v50 = vpop.f32.mrf.mxu1  ;;  %v11067_v23 = vadd.f32 %v11066_v28, %v11041_v54  ;;  %v23343_v18 = vpop.f32.mrf.mxu0  ;;  %v11193_v41 = vadd.f32 %v23283_v49, %v9397_v5  ;;  %v13188_v49 = vand.u32 4294901760, %v13187_v44 }
 0xa2d   : > { %12887 = vmatpush.xpose.msrb.mxu3 %v12886_v12  ;;  %12761 = vmatmul.f32.vlgmr.msra.gmra.mxu2 %v23200_v4  ;;  %v11138_v17 = vpop.f32.mrf.mxu2  ;;  %v13165_v32 = vsub.f32 %v13163_v1, %v13164_v29 }
 0xa2e   : > { %12959 = vmatpush.xpose.msra.mxu2 %v12884_v26  ;;  %v11091_v6 = vadd.f32 %v23239_v55, %v11067_v23  ;;  %v23354_v26 = vsel %vm753_vm2, %v10693_v47, %v10676_v36  ;;  %v23362_v55 = vsel %vm753_vm2, %v10688_v3, %v10695_v30  ;;  %v13189_v45 = vsub.f32 %v13187_v44, %v13188_v49  ;;  %v9399_v30 = vld [vmem:[#allocation9 + $0x20] sm:$0xff] }
 0xa2f   : > { %v10691_v47 = vrot.slane %v23290_v35, 4  ;;  %v13166_v11 = vand.u32 4294901760, %v13165_v32 }
 0xa30   : > { %13041 = vmatmul.f32.vlgmr.msra.gmra.mxu1 %v23287_v63  ;;  %v11115_v61 = vadd.f32 %v23223_v15, %v11091_v6 }
 0xa31   : > { %13237 = vmatpush.xpose.msra.mxu1 %v23334_v43 }
 0xa32   : > { %v11139_v53 = vadd.f32 %v11138_v17, %v11115_v61  ;;  %v11160_v15 = vpop.f32.mrf.mxu3 }
 0xa33   : > { %13015 = vmatmul.f32.vlgmr.msra.gmra.mxu0 %v13014_v25 }
 0xa34   : > { %13214 = vmatpush.xpose.msra.mxu0 %v13187_v44  ;;  %12785 = vmatmul.f32.vlgmr.msra.gmra.mxu3 %v12708_v16  ;;  %v11496_v21 = vpop.f32.mrf.mxu0  ;;  %v23369_v4 = vadd.f32 %v11160_v15, %v11139_v53  ;;  %v23371_v16 = vpop.f32.mrf.mxu1 }
 0xa35   : > { %12981 = vmatpush.xpose.msra.mxu3 %v23241_v56  ;;  %12863 = vmatmul.f32.vlgmr.msrb.gmra.mxu2 %v12862_v24  ;;  %v11242_v40 = vpop.f32.mrf.mxu2 }
 0xa36   : > { %13062 = vmatpush.xpose.msrb.mxu2 %v23227_v37  ;;  %v13294_v56 = vsel %vm2169_vm3, %v23369_v4, -inf  ;;  %v11219_v37 = vadd.f32 %v23276_v62, %v11193_v41 }
 0xa37   : > { %13295 = vmax.xlane.f32.xlu1 %v13294_v56  ;;  %v9400_v56 = vld [vmem:[#allocation9 + $0x28] sm:$0xff] }
 0xa38   : > { %13135 = vmatmul.f32.vlgmr.msrb.gmra.mxu1 %v23287_v63  ;;  %v11243_v12 = vadd.f32 %v11242_v40, %v11219_v37 }
 0xa39   : > { %13724 = vmatpush.msrb.mxu1 %v13723_v46 }
 0xa3b   : > { %13113 = vmatmul.f32.vlgmr.msrb.gmra.mxu0 %v23287_v63 }
 0xa3c   : > { %13694 = vmatpush.msrb.mxu0 %v23316_v13  ;;  %12889 = vmatmul.f32.vlgmr.msrb.gmra.mxu3 %v23281_v51  ;;  %v11266_v54 = vpop.f32.mrf.mxu3  ;;  %v11594_v28 = vpop.f32.mrf.mxu0 }
 0xa3d   : > { %13085 = vmatpush.xpose.msrb.mxu3 %v23212_v60  ;;  %12961 = vmatmul.f32.vlgmr.msra.gmra.mxu2 %v23281_v51  ;;  %v11267_v63 = vadd.f32 %v11266_v54, %v11243_v12  ;;  %v11344_v62 = vpop.f32.mrf.mxu2  ;;  %v11616_v23 = vpop.f32.mrf.mxu1  ;;  %v13190_v60 = vand.u32 4294901760, %v13189_v45 }
 0xa3e   : > { %13161 = vmatpush.xpose.msra.mxu2 %v23334_v43  ;;  %v11345_v25 = vadd.f32 %v11344_v62, %v9398_v14 }
 0xa3f   : > { %v11291_v3 = vadd.f32 %v23311_v27, %v11267_v63 }
 0xa40   : > { %13241 = vmatmul.f32.vlgmr.msra.gmra.mxu1 %v13164_v29 }
 0xa41   : > { %13818 = vmatpush.msra.mxu1 %v23316_v13  ;;  %v23388_v36 = vadd.f32 %v23305_v34, %v11291_v3  ;;  %v9401_v3 = vld [vmem:[#allocation9 + $0x30] sm:$0xff] }
 0xa43   : > { %13217 = vmatmul.f32.vlgmr.msra.gmra.mxu0 %v13163_v1  ;;  %v13297_v6 = vsel %vm2169_vm3, %v23388_v36, -inf }
 0xa44   : > { %13796 = vmatpush.msra.mxu0 %v13721_v2  ;;  %12983 = vmatmul.f32.vlgmr.msra.gmra.mxu3 %v23281_v51  ;;  %v11370_v27 = vpop.f32.mrf.mxu3  ;;  %v10692_v2 = vsel %vm753_vm2, %v23273_v8, %v10691_v47  ;;  %v11698_v51 = vpop.f32.mrf.mxu0 }
 0xa45   : > { %13191 = vmatpush.xpose.msra.mxu3 %v13190_v60  ;;  %13065 = vmatmul.f32.vlgmr.msrb.gmra.mxu2 %v23301_v39  ;;  %v11371_v59 = vadd.f32 %v11370_v27, %v11345_v25  ;;  %v11442_v44 = vpop.f32.mrf.mxu2  ;;  %v23397_v35 = vand.u32 4294901760, %v10692_v2  ;;  %v11722_v61 = vpop.f32.mrf.mxu1 }
 0xa46   : > { %13298 = vmax.xlane.f32.xlu0 %v13297_v6  ;;  %13263 = vmatpush.xpose.msrb.mxu2 %v13188_v49 }
 0xa47   : > { %v11395_v34 = vadd.f32 %v23343_v18, %v11371_v59  ;;  %v23404_v5 = vsub.f32 %v10692_v2, %v23397_v35  ;;  %v11497_v18 = vadd.f32 %v11496_v21, %v9399_v30 }
 0xa49   : > { %v11419_v17 = vadd.f32 %v23338_v50, %v11395_v34  ;;  %v13870_v24 = vand.u32 4294901760, %v23404_v5 }
 0xa4b   : > { %v11443_v22 = vadd.f32 %v11442_v44, %v11419_v17  ;;  %v13871_v21 = vsub.f32 %v23404_v5, %v13870_v24  ;;  %v9402_v17 = vld [vmem:[#allocation9 + $0x38] sm:$0xff] }
 0xa4c   : > { %13089 = vmatmul.f32.vlgmr.msrb.gmra.mxu3 %v13012_v52  ;;  %v11464_v8 = vpop.f32.mrf.mxu3 }
 0xa4d   : > { %13285 = vmatpush.xpose.msrb.mxu3 %v23334_v43  ;;  %13167 = vmatmul.f32.vlgmr.msra.gmra.mxu2 %v13166_v11  ;;  %v23407_v53 = vadd.f32 %v11464_v8, %v11443_v22  ;;  %v11546_v50 = vpop.f32.mrf.mxu2  ;;  %v11523_v43 = vadd.f32 %v23371_v16, %v11497_v18  ;;  %v11826_v15 = vpop.f32.mrf.mxu1  ;;  %v13872_v1 = vand.u32 4294901760, %v13871_v21 }
 0xa4e   : > { %13747 = vmatpush.msra.mxu2 %v23328_v10 }
 0xa4f   : > { %v13300_v39 = vsel %vm2169_vm3, %v23407_v53, -inf  ;;  %v11547_v10 = vadd.f32 %v11546_v50, %v11523_v43 }
 0xa50   : > { %v11800_v52 = vpop.f32.mrf.mxu0  ;;  %13301 = vmax.xlane.f32.xlu2 %v13300_v39  ;;  %10375 = vrot.lane.b32.xlu1 %v22062_v31, %s18991_s9 }
 0xa54   : > { %13193 = vmatmul.f32.vlgmr.msra.gmra.mxu3 %v23365_v19  ;;  %v11570_v41 = vpop.f32.mrf.mxu3 }
 0xa55   : > { %13770 = vmatpush.msra.mxu3 %v23316_v13  ;;  %13265 = vmatmul.f32.vlgmr.msrb.gmra.mxu2 %v23365_v19  ;;  %v11571_v46 = vadd.f32 %v11570_v41, %v11547_v10  ;;  %v11648_v40 = vpop.f32.mrf.mxu2  ;;  %v11920_v54 = vpop.f32.mrf.mxu1  ;;  %v9403_v10 = vld [vmem:[#allocation9 + $0x40] sm:$0xff] }
 0xa56   : > { %13843 = vmatpush.msrb.mxu2 %v23397_v35  ;;  %v11649_v49 = vadd.f32 %v11648_v40, %v9400_v56 }
 0xa57   : > { %v11595_v16 = vadd.f32 %v11594_v28, %v11571_v46 }
 0xa58   : > { %v11898_v13 = vpop.f32.mrf.mxu0 }
 0xa59   : > { %v23423_v31 = vadd.f32 %v11616_v23, %v11595_v16 }
 0xa5b   : > { %v13303_v37 = vsel %vm2169_vm3, %v23423_v31, -inf }
 0xa5c   : > { %13287 = vmatmul.f32.vlgmr.msrb.gmra.mxu3 %v23365_v19  ;;  %v11674_v12 = vpop.f32.mrf.mxu3  ;;  %13304 = vmax.xlane.f32.xlu0 %v13303_v37  ;;  %v11801_v19 = vadd.f32 %v11800_v52, %v9401_v3 }
 0xa5d   : > { %13873 = vmatpush.msrb.mxu3 %v13872_v1  ;;  %v11675_v29 = vadd.f32 %v11674_v12, %v11649_v49  ;;  %v11746_v63 = vpop.f32.mrf.mxu2  ;;  %v12026_v6 = vpop.f32.mrf.mxu1 }
 0xa5e   : > { %v11827_v27 = vadd.f32 %v11826_v15, %v11801_v19 }
 0xa5f   : > { %v11699_v45 = vadd.f32 %v11698_v51, %v11675_v29 }
 0xa60   : > { %v12002_v14 = vpop.f32.mrf.mxu0 }
 0xa61   : > { %v11723_v28 = vadd.f32 %v11722_v61, %v11699_v45 }
 0xa63   : > { %v11747_v62 = vadd.f32 %v11746_v63, %v11723_v28  ;;  %v9404_v63 = vld [vmem:[#allocation9 + $0x48] sm:$0xff] }
 0xa65   : > { %v11768_v60 = vpop.f32.mrf.mxu3  ;;  %v11850_v47 = vpop.f32.mrf.mxu2 }
 0xa66   : > { %v23427_v23 = vadd.f32 %v11768_v60, %v11747_v62  ;;  %v11851_v59 = vadd.f32 %v11850_v47, %v11827_v27  ;;  %v12130_v61 = vpop.f32.mrf.mxu1 }
 0xa68   : > { %v13306_v25 = vsel %vm2169_vm3, %v23427_v23, -inf  ;;  %v12104_v51 = vpop.f32.mrf.mxu0 }
 0xa69   : > { %13307 = vmax.xlane.f32.xlu0 %v13306_v25  ;;  %v12105_v46 = vadd.f32 %v12104_v51, %v9403_v10 }
 0xa6b   : > { %v12131_v1 = vadd.f32 %v12130_v61, %v12105_v46  ;;  %v9406_v46 = vld [vmem:[#allocation9 + $0x58] sm:$0xff] }
 0xa6e   : > { %v12224_v41 = vpop.f32.mrf.mxu1 }
 0xa6f   : > { %v11874_v2 = vpop.f32.mrf.mxu3 }
 0xa70   : > { %v11875_v32 = vadd.f32 %v11874_v2, %v11851_v59  ;;  %v11952_v44 = vpop.f32.mrf.mxu2  ;;  %v12202_v52 = vpop.f32.mrf.mxu0  ;;  %v9405_v2 = vld [vmem:[#allocation9 + $0x50] sm:$0xff] }
 0xa71   : > { %v11953_v11 = vadd.f32 %v11952_v44, %v9402_v17  ;;  %v23443_v59 = vpop.permute.xlu2 %10381 }
 0xa72   : > { %v11899_v34 = vadd.f32 %v11898_v13, %v11875_v32 }
 0xa74   : > { %v23431_v30 = vadd.f32 %v11920_v54, %v11899_v34 }
 0xa76   : > { %v13309_v22 = vsel %vm2169_vm3, %v23431_v30, -inf  ;;  %v12330_v29 = vpop.f32.mrf.mxu1 }
 0xa77   : > { %v11978_v8 = vpop.f32.mrf.mxu3  ;;  %13310 = vmax.xlane.f32.xlu2 %v13309_v22 }
 0xa78   : > { %v11979_v18 = vadd.f32 %v11978_v8, %v11953_v11  ;;  %v12050_v39 = vpop.f32.mrf.mxu2  ;;  %v12306_v13 = vpop.f32.mrf.mxu0 }
 0xa7a   : > { %v12003_v50 = vadd.f32 %v12002_v14, %v11979_v18 }
 0xa7c   : > { %v12027_v43 = vadd.f32 %v12026_v6, %v12003_v50 }
 0xa7e   : > { %v12051_v15 = vadd.f32 %v12050_v39, %v12027_v43  ;;  %v12434_v6 = vpop.f32.mrf.mxu1 }
 0xa7f   : > { %v12072_v21 = vpop.f32.mrf.mxu3 }
 0xa80   : > { %v23435_v16 = vadd.f32 %v12072_v21, %v12051_v15  ;;  %v12154_v40 = vpop.f32.mrf.mxu2  ;;  %v12408_v14 = vpop.f32.mrf.mxu0 }
 0xa81   : > { %v12155_v49 = vadd.f32 %v12154_v40, %v12131_v1  ;;  %v12409_v34 = vadd.f32 %v12408_v14, %v9405_v2  ;;  %v23461_v2 = vpop.permute.xlu0 %10397 }
 0xa82   : > { %v13312_v56 = vsel %vm2169_vm3, %v23435_v16, -inf }
 0xa83   : > { %13313 = vmax.xlane.f32.xlu1 %v13312_v56  ;;  %v12435_v22 = vadd.f32 %v12434_v6, %v12409_v34  ;;  %v23452_v56 = vpop.permute.xlu1 %10389 }
 0xa86   : > { %v12528_v8 = vpop.f32.mrf.mxu1 }
 0xa87   : > { %v12178_v37 = vpop.f32.mrf.mxu3 }
 0xa88   : > { %v12179_v12 = vadd.f32 %v12178_v37, %v12155_v49  ;;  %v12256_v45 = vpop.f32.mrf.mxu2  ;;  %v12506_v17 = vpop.f32.mrf.mxu0 }
 0xa89   : > { %v12257_v3 = vadd.f32 %v12256_v45, %v9404_v63  ;;  %v9407_v63 = vld [vmem:[#allocation9 + $0x60] sm:$0xff] }
 0xa8a   : > { %v12203_v54 = vadd.f32 %v12202_v52, %v12179_v12 }
 0xa8c   : > { %v23439_v28 = vadd.f32 %v12224_v41, %v12203_v54 }
 0xa8e   : > { %v13315_v62 = vsel %vm2169_vm3, %v23439_v28, -inf  ;;  %v12634_v49 = vpop.f32.mrf.mxu1 }
 0xa8f   : > { %v12282_v60 = vpop.f32.mrf.mxu3  ;;  %13316 = vmax.xlane.f32.xlu1 %v13315_v62 }
 0xa90   : > { %v12283_v19 = vadd.f32 %v12282_v60, %v12257_v3  ;;  %v12354_v25 = vpop.f32.mrf.mxu2  ;;  %v12610_v21 = vpop.f32.mrf.mxu0 }
 0xa92   : > { %v12307_v47 = vadd.f32 %v12306_v13, %v12283_v19 }
 0xa94   : > { %v12331_v27 = vadd.f32 %v12330_v29, %v12307_v47 }
 0xa96   : > { %v12355_v32 = vadd.f32 %v12354_v25, %v12331_v27  ;;  %v12738_v6 = vpop.f32.mrf.mxu1 }
 0xa97   : > { %v12376_v51 = vpop.f32.mrf.mxu3 }
 0xa98   : > { %v23445_v44 = vadd.f32 %v12376_v51, %v12355_v32  ;;  %v12458_v61 = vpop.f32.mrf.mxu2  ;;  %v12712_v3 = vpop.f32.mrf.mxu0 }
 0xa99   : > { %v13293_v18 = vpop.xlane.xlu2 %13292  ;;  %v12459_v50 = vadd.f32 %v12458_v61, %v12435_v22  ;;  %v12713_v25 = vadd.f32 %v12712_v3, %v9407_v63 }
 0xa9a   : > { %v13318_v11 = vsel %vm2169_vm3, %v23445_v44, -inf  ;;  %v13339_v39 = vsub.f32 %v23308_v9, %v13293_v18 }
 0xa9b   : > { %13319 = vmax.xlane.f32.xlu2 %v13318_v11  ;;  %v12739_v34 = vadd.f32 %v12738_v6, %v12713_v25 }
 0xa9c   : > { %v13355_v10 = vmul.f32 1.442695, %v13339_v39 }
 0xa9e   : > { %18643 = vpow2.f32 %v13355_v10 }
 0xa9f   : > { %v12482_v52 = vpop.f32.mrf.mxu3 }
 0xaa0   : > { %v12483_v43 = vadd.f32 %v12482_v52, %v12459_v50  ;;  %v12560_v41 = vpop.f32.mrf.mxu2  ;;  %v12832_v52 = vpop.f32.mrf.mxu1 }
 0xaa1   : > { %v12561_v1 = vadd.f32 %v12560_v41, %v9406_v46 }
 0xaa2   : > { %v12507_v15 = vadd.f32 %v12506_v17, %v12483_v43 }
 0xaa4   : > { %v23450_v40 = vadd.f32 %v12528_v8, %v12507_v15  ;;  %v23456_v54 = vpop.eup %18643  ;;  %v12810_v8 = vpop.f32.mrf.mxu0 }
 0xaa5   : > { %v13387_v60 = vsel %vm2169_vm3, %v23456_v54, 0.0 }
 0xaa6   : > { %v13321_v13 = vsel %vm2169_vm3, %v23450_v40, -inf }
 0xaa7   : > { %v12586_v37 = vpop.f32.mrf.mxu3  ;;  %13322 = vmax.xlane.f32.xlu2 %v13321_v13 }
 0xaa8   : > { %v12587_v9 = vadd.f32 %v12586_v37, %v12561_v1  ;;  %v12658_v29 = vpop.f32.mrf.mxu2  ;;  %v23499_v25 = vpop.f32.mrf.mxu1 }
 0xaaa   : > { %v12611_v12 = vadd.f32 %v12610_v21, %v12587_v9  ;;  %v13296_v14 = vpop.xlane.xlu1 %13295 }
 0xaab   : > { %v13340_v19 = vsub.f32 %v23369_v4, %v13296_v14 }
 0xaac   : > { %v12635_v45 = vadd.f32 %v12634_v49, %v12611_v12 }
 0xaad   : > { %v13357_v27 = vmul.f32 1.442695, %v13340_v19 }
 0xaae   : > { %v12659_v62 = vadd.f32 %v12658_v29, %v12635_v45 }
 0xaaf   : > { %v12680_v47 = vpop.f32.mrf.mxu3  ;;  %13388 = vadd.xlane.f32.xlu2 %v13387_v60  ;;  %18645 = vpow2.f32 %v13357_v27  ;;  %v9409_v27 = vld [vmem:[#allocation9 + $0x70] sm:$0xff] }
 0xab0   : > { %v23463_v32 = vadd.f32 %v12680_v47, %v12659_v62  ;;  %v12762_v51 = vpop.f32.mrf.mxu2  ;;  %v12914_v47 = vpop.f32.mrf.mxu0 }
 0xab1   : > { %v12763_v17 = vadd.f32 %v12762_v51, %v12739_v34 }
 0xab2   : > { %v13324_v61 = vsel %vm2169_vm3, %v23463_v32, -inf }
 0xab5   : > { %v23467_v4 = vpop.eup %18645 }
 0xab6   : > { %v13390_v39 = vsel %vm2169_vm3, %v23467_v4, 0.0 }
 0xab7   : > { %v12786_v11 = vpop.f32.mrf.mxu3  ;;  %13325 = vmax.xlane.f32.xlu2 %v13324_v61  ;;  %13391 = vadd.xlane.f32.xlu1 %v13390_v39 }
 0xab8   : > { %v12787_v22 = vadd.f32 %v12786_v11, %v12763_v17  ;;  %v13016_v51 = vpop.f32.mrf.mxu0 }
 0xab9   : > { %v13299_v50 = vpop.xlane.xlu0 %13298  ;;  %v13017_v17 = vadd.f32 %v13016_v51, %v9409_v27 }
 0xaba   : > { %v12811_v18 = vadd.f32 %v12810_v8, %v12787_v22  ;;  %v13341_v43 = vsub.f32 %v23388_v36, %v13299_v50 }
 0xabc   : > { %v23472_v10 = vadd.f32 %v12832_v52, %v12811_v18  ;;  %v13359_v15 = vmul.f32 1.442695, %v13341_v43  ;;  %v10477_v43 = vrot.slane %v22710_v7, 4 }
 0xabe   : > { %v13327_v41 = vsel %vm2169_vm3, %v23472_v10, -inf  ;;  %18647 = vpow2.f32 %v13359_v15  ;;  %v10489_v15 = vrot.slane %v23443_v59, 4 }
 0xabf   : > { %13328 = vmax.xlane.f32.xlu2 %v13327_v41  ;;  %v12890_v19 = vpop.f32.mrf.mxu3 }
 0xac0   : > { %v13114_v41 = vpop.f32.mrf.mxu0 }
 0xac2   : > { %v23507_v18 = vpop.permute.xlu1 %10375 }
 0xac3   : > { %v13302_v46 = vpop.xlane.xlu2 %13301 }
 0xac4   : > { %v23476_v21 = vpop.eup %18647  ;;  %v13342_v13 = vsub.f32 %v23407_v53, %v13302_v46 }
 0xac5   : > { %v13393_v1 = vsel %vm2169_vm3, %v23476_v21, 0.0 }
 0xac6   : > { %13394 = vadd.xlane.f32.xlu0 %v13393_v1  ;;  %v13361_v49 = vmul.f32 1.442695, %v13342_v13  ;;  %v10478_v1 = vsel %vm753_vm2, %v23452_v56, %v10477_v43  ;;  %v10487_v13 = vrot.slane %v23461_v2, 4 }
 0xac7   : > { %v23503_v6 = vpop.f32.mrf.mxu3 }
 0xac8   : > { %18649 = vpow2.f32 %v13361_v49  ;;  %v9408_v49 = vld [vmem:[#allocation9 + $0x68] sm:$0xff] }
 0xace   : > { %v23481_v36 = vpop.eup %18649 }
 0xacf   : > { %v13305_v37 = vpop.xlane.xlu0 %13304  ;;  %v13396_v9 = vsel %vm2169_vm3, %v23481_v36, 0.0 }
 0xad0   : > { %v13343_v12 = vsub.f32 %v23423_v31, %v13305_v37  ;;  %13397 = vadd.xlane.f32.xlu2 %v13396_v9  ;;  %v12864_v31 = vpop.f32.mrf.mxu2 }
 0xad2   : > { %v13363_v29 = vmul.f32 1.442695, %v13343_v12  ;;  %v10486_v12 = vperm.slane %v10478_v1, %v19312_v42 }
 0xad4   : > { %18651 = vpow2.f32 %v13363_v29 }
 0xada   : > { %v23486_v45 = vpop.eup %18651 }
 0xadb   : > { %v13399_v53 = vsel %vm2169_vm3, %v23486_v45, 0.0 }
 0xadc   : > { %v13308_v63 = vpop.xlane.xlu0 %13307  ;;  %13400 = vadd.xlane.f32.xlu0 %v13399_v53 }
 0xadd   : > { %v13344_v3 = vsub.f32 %v23427_v23, %v13308_v63  ;;  %v23501_v23 = vpop.f32.mrf.mxu2  ;;  %v12865_v63 = vadd.f32 %v12864_v31, %v9408_v49 }
 0xadf   : > { %v13365_v62 = vmul.f32 1.442695, %v13344_v3  ;;  %v10488_v3 = vsel %vm753_vm2, %v10487_v13, %v23443_v59  ;;  %v12891_v27 = vadd.f32 %v12890_v19, %v12865_v63 }
 0xae1   : > { %18653 = vpow2.f32 %v13365_v62 }
 0xae5   : > { %v13066_v61 = vpop.f32.mrf.mxu2 }
 0xae7   : > { %v23491_v14 = vpop.eup %18653 }
 0xae8   : > { %v13402_v60 = vsel %vm2169_vm3, %v23491_v14, 0.0  ;;  %10391 = vrot.lane.b32.xlu2 %v22284_v38, %s18991_s9  ;;  %v13042_v38 = vpop.f32.mrf.mxu1 }
 0xae9   : > { %13403 = vadd.xlane.f32.xlu1 %v13402_v60  ;;  %v13043_v11 = vadd.f32 %v13042_v38, %v13017_v17  ;;  %v10494_v17 = vperm.slane %v10488_v3, %v19312_v42  ;;  %v9410_v38 = vld [vmem:[#allocation9 + $0x78] sm:$0xff] }
 0xaea   : > { %v13311_v34 = vpop.xlane.xlu2 %13310 }
 0xaeb   : > { %v13067_v22 = vadd.f32 %v13066_v61, %v13043_v11  ;;  %v13345_v46 = vsub.f32 %v23431_v30, %v13311_v34  ;;  %v10513_v34 = vrot.slane %v10486_v12, 4 }
 0xaed   : > { %v13367_v53 = vmul.f32 1.442695, %v13345_v46  ;;  %v13168_v59 = vpop.f32.mrf.mxu2 }
 0xaf0   : > { %10383 = vrot.lane.b32.xlu0 %v22248_v48, %s18991_s9  ;;  %v13090_v48 = vpop.f32.mrf.mxu3  ;;  %v13136_v29 = vpop.f32.mrf.mxu1 }
 0xaf1   : > { %v13091_v39 = vadd.f32 %v13090_v48, %v13067_v22  ;;  %v12915_v22 = vadd.f32 %v12914_v47, %v12891_v27 }
 0xaf3   : > { %v13115_v37 = vadd.f32 %v13114_v41, %v13091_v39  ;;  %v10499_v39 = vrot.slane %v10494_v17, 4  ;;  %v12939_v46 = vadd.f32 %v23499_v25, %v12915_v22 }
 0xaf5   : > { %v23525_v62 = vadd.f32 %v13136_v29, %v13115_v37  ;;  %v13218_v37 = vpop.f32.mrf.mxu0  ;;  %v12963_v25 = vadd.f32 %v23501_v23, %v12939_v46 }
 0xaf6   : > { %v13314_v30 = vpop.xlane.xlu1 %13313 }
 0xaf7   : > { %v13333_v11 = vsel %vm2169_vm3, %v23525_v62, -inf  ;;  %v23565_v23 = vadd.f32 %v23503_v6, %v12963_v25 }
 0xb02   : > { %10399 = vrot.lane.b32.xlu1 %v22354_v58, %s18991_s9  ;;  %v10475_v58 = vrot.slane %v23452_v56, 4 }
 0xb04   : > { %v10476_v9 = vsel %vm753_vm2, %v10475_v58, %v22710_v7  ;;  %v13346_v7 = vsub.f32 %v23435_v16, %v13314_v30  ;;  %v13194_v16 = vpop.f32.mrf.mxu3  ;;  %v13317_v30 = vpop.xlane.xlu1 %13316 }
 0xb0e   : > { %v13320_v8 = vpop.xlane.xlu2 %13319 }
 0xb0f   : > { %v13348_v50 = vsub.f32 %v23445_v44, %v13320_v8  ;;  %v10490_v44 = vsel %vm753_vm2, %v23461_v2, %v10489_v15  ;;  %v10482_v2 = vperm.slane %v10476_v9, %v19312_v42  ;;  %v13169_v8 = vadd.f32 %v13168_v59, %v9410_v38 }
 0xb10   : > { %v10498_v56 = vperm.slane %v10490_v44, %v19312_v42 }
 0xb11   : > { %v13373_v52 = vmul.f32 1.442695, %v13348_v50  ;;  %v10501_v48 = vrot.slane %v10482_v2, 4  ;;  %v13369_v50 = vmul.f32 1.442695, %v13346_v7  ;;  %v13195_v15 = vadd.f32 %v13194_v16, %v13169_v8 }
 0xb12   : > { %v10511_v61 = vrot.slane %v10498_v56, 4  ;;  %v10514_v19 = vsel %vm753_vm2, %v10498_v56, %v10513_v34  ;;  %v10500_v13 = vsel %vm753_vm2, %v10499_v39, %v10482_v2  ;;  %v13242_v56 = vpop.f32.mrf.mxu1 }
 0xb13   : > { %18655 = vpow2.f32 %v13373_v52  ;;  %v10502_v52 = vsel %vm753_vm2, %v10494_v17, %v10501_v48  ;;  %v10522_v58 = vperm.slane %v10514_v19, %v19327_v57  ;;  %v13219_v9 = vadd.f32 %v13218_v37, %v13195_v15 }
 0xb14   : > { %18657 = vpow2.f32 %v13367_v53  ;;  %v10512_v43 = vsel %vm753_vm2, %v10511_v61, %v10486_v12  ;;  %v10510_v1 = vperm.slane %v10502_v52, %v19327_v57  ;;  %v23555_v63 = vperm.slane %v10500_v13, %v19327_v57 }
 0xb15   : > { %18659 = vpow2.f32 %v13369_v50  ;;  %v23546_v49 = vperm.slane %v10512_v43, %v19327_v57  ;;  %v23548_v44 = vrot.slane %v10522_v58, 4  ;;  %v13243_v27 = vadd.f32 %v13242_v56, %v13219_v9  ;;  %v13288_v50 = vpop.f32.mrf.mxu3 }
 0xb16   : > { %v23557_v53 = vrot.slane %v10510_v1, 4  ;;  %v13347_v48 = vsub.f32 %v23439_v28, %v13317_v30  ;;  %v13330_v43 = vsel %vm2169_vm3, %v23565_v23, -inf  ;;  %v23582_v13 = vand.u32 4294901760, %v23354_v26 }
 0xb17   : > { %v10527_v3 = vrot.slane %v23546_v49, 4 }
 0xb18   : > { %v10526_v34 = vsel %vm753_vm2, 0.0, %v23557_v53  ;;  %v13371_v1 = vmul.f32 1.442695, %v13347_v48  ;;  %v10697_v48 = vsel %vm753_vm2, %v23557_v53, %v23555_v63 }
 0xb19   : > { %v23527_v60 = vpop.eup %18655  ;;  %v10528_v59 = vsel %vm753_vm2, 0.0, %v10527_v3  ;;  %v10702_v8 = vrot.slane %v10526_v34, 4 }
 0xb1a   : > { %v13323_v51 = vpop.xlane.xlu2 %13322  ;;  %v13414_v31 = vsel %vm2169_vm3, %v23527_v60, 0.0  ;;  %13334 = vmax.xlane.f32.xlu0 %v13333_v11  ;;  %v23540_v41 = vpop.eup %18657 }
 0xb1b   : > { %13415 = vadd.xlane.f32.xlu2 %v13414_v31  ;;  %v13349_v12 = vsub.f32 %v23450_v40, %v13323_v51  ;;  %v13405_v29 = vsel %vm2169_vm3, %v23540_v41, 0.0  ;;  %v23560_v2 = vpop.eup %18659  ;;  %v10530_v40 = vsel %vm753_vm2, 0.0, %v23548_v44  ;;  %v10523_v31 = vrot.slane %v23555_v63, 4  ;;  %v13266_v11 = vpop.f32.mrf.mxu2 }
 0xb1c   : > { %v10713_v61 = vrot.slane %v10530_v40, 4  ;;  %v13267_v22 = vadd.f32 %v13266_v11, %v13243_v27  ;;  %v13408_v6 = vsel %vm2169_vm3, %v23560_v2, 0.0  ;;  %v23600_v27 = vsub.f32 %v23354_v26, %v23582_v13 }
 0xb1d   : > { %v13375_v7 = vmul.f32 1.442695, %v13349_v12  ;;  %v10524_v58 = vsel %vm753_vm2, 0.0, %v10523_v31  ;;  %v23638_v63 = vperm.slane %v10697_v48, %v19312_v42 }
 0xb1e   : > { %v10714_v46 = vsel %vm753_vm2, %v10713_v61, %v10528_v59  ;;  %v23584_v37 = vadd.f32 %v13288_v50, %v13267_v22  ;;  %v10703_v3 = vsel %vm753_vm2, %v10702_v8, %v10524_v58  ;;  %v14019_v61 = vand.u32 4294901760, %v23600_v27 }
 0xb1f   : > { %v23590_v25 = vperm.slane %v10714_v46, %v19312_v42  ;;  %v23652_v46 = vand.u32 4294901760, %v23362_v55 }
 0xb20   : > { %v14020_v58 = vsub.f32 %v23600_v27, %v14019_v61 }
 0xb22   : > { %v13389_v47 = vpop.xlane.xlu2 %13388  ;;  %13406 = vadd.xlane.f32.xlu0 %v13405_v29 }
 0xb23   : > { %18661 = vrcp.f32 %v13389_v47  ;;  %v13446_v39 = vand.u32 2147483648, %v13389_v47  ;;  %v13444_v28 = vand.u32 2147483647, %v13389_v47  ;;  %vm13440_vm8 = vweird.f32 %v13389_v47 }
 0xb24   : > { %18663 = vpow2.f32 %v13375_v7 }
 0xb25   : > { %v13447_v12 = vor.u32 1.1754944e-38, %v13446_v39  ;;  %vm13445_vm10 = vcmp.eq.f32.partialorder %v13444_v28, 8.507059e+37 }
 0xb29   : > { %v18662_v51 = vpop.eup %18661 }
 0xb2a   : > { %v13436_v17 = vmul.f32 %v18662_v51, %v13389_v47  ;;  %v13326_v38 = vpop.xlane.xlu2 %13325  ;;  %13409 = vadd.xlane.f32.xlu0 %v13408_v6  ;;  %vm13441_vm7 = vweird.f32 %v18662_v51  ;;  %v23587_v29 = vpop.eup %18663  ;;  %v13336_v47 = vsel %vm2169_vm3, %v23584_v37, -inf }
 0xb2b   : > { %v13350_v19 = vsub.f32 %v23463_v32, %v13326_v38  ;;  %v23578_v32 = vpop.xlane.xlu1 %13391  ;;  %vm13442_vm9 = vmor %vm13440_vm8, %vm13441_vm7  ;;  %v13417_v31 = vsel %vm2169_vm3, %v23587_v29, 0.0 }
 0xb2c   : > { %v13437_v16 = vsub.f32 1.0, %v13436_v17  ;;  %13331 = vmax.xlane.f32.xlu1 %v13330_v43  ;;  %v10731_v17 = vrot.slane %v23590_v25, 4  ;;  %v13460_v8 = vand.u32 2147483648, %v23578_v32  ;;  %vm13454_vm12 = vweird.f32 %v23578_v32 }
 0xb2d   : > { %v13377_v52 = vmul.f32 1.442695, %v13350_v19 }
 0xb2e   : > { %v13438_v15 = vmul.f32 %v18662_v51, %v13437_v16 }
 0xb2f   : > { %18665 = vpow2.f32 %v13377_v52  ;;  %v13458_v52 = vand.u32 2147483647, %v23578_v32 }
 0xb30   : > { %v13439_v9 = vadd.f32 %v18662_v51, %v13438_v15  ;;  %18667 = vrcp.f32 %v23578_v32 }
 0xb31   : > { %18669 = vpow2.f32 %v13371_v1  ;;  %vm13459_vm14 = vcmp.eq.f32.partialorder %v13458_v52, 8.507059e+37 }
 0xb32   : > { %v13443_v30 = vsel %vm13442_vm9, %v18662_v51, %v13439_v9  ;;  %v10708_v51 = vsel %vm753_vm2, %v23548_v44, %v23546_v49  ;;  %13337 = vmax.xlane.f32.xlu0 %v13336_v47  ;;  %v23654_v1 = vpop.xlane.xlu2 %13328 }
 0xb33   : > { %v13448_v56 = vsel %vm13445_vm10, %v13447_v12, %v13443_v30  ;;  %v23621_v44 = vperm.slane %v10708_v51, %v19312_v42 }
 0xb34   : > { %v23594_v40 = vmul.f32 %v23456_v54, %v13448_v56  ;;  %v23610_v54 = vperm.slane %v10703_v3, %v19312_v42  ;;  %13418 = vadd.xlane.f32.xlu1 %v13417_v31  ;;  %v23665_v31 = vsub.f32 %v23362_v55, %v23652_v46 }
 0xb35   : > { %v23602_v7 = vpop.eup %18665  ;;  %v10732_v6 = vsel %vm753_vm2, %v10731_v17, %v23621_v44 }
 0xb36   : > { %v18668_v34 = vpop.eup %18667  ;;  %v13420_v26 = vsel %vm2169_vm3, %v23602_v7, 0.0  ;;  %v13676_v38 = vsel %vm2169_vm3, %v23594_v40, 0  ;;  %v10719_v16 = vrot.slane %v23610_v54, 4  ;;  %v23648_v15 = vperm.slane %v10732_v6, %v19327_v57 }
 0xb37   : > { %v13450_v59 = vmul.f32 %v18668_v34, %v23578_v32  ;;  %13421 = vadd.xlane.f32.xlu2 %v13420_v26  ;;  %v23618_v49 = vand.u32 4294901760, %v13676_v38  ;;  %v23624_v11 = vpop.eup %18669  ;;  %vm13455_vm11 = vweird.f32 %v18668_v34  ;;  %v14021_v32 = vand.u32 4294901760, %v14020_v58 }
 0xb38   : > { %v13411_v53 = vsel %vm2169_vm3, %v23624_v11, 0.0  ;;  %vm13456_vm13 = vmor %vm13454_vm12, %vm13455_vm11  ;;  %v10720_v12 = vsel %vm753_vm2, %v10719_v16, %v23638_v63  ;;  %v14168_v55 = vand.u32 4294901760, %v23665_v31 }
 0xb39   : > { %v13451_v19 = vsub.f32 1.0, %v13450_v59  ;;  %13726 = vmatmul.f32.vlgmr.msrb.gmra.mxu1 %v23618_v49  ;;  %v13696_v22 = vsub.f32 %v13676_v38, %v23618_v49  ;;  %v13395_v50 = vpop.xlane.xlu0 %13394  ;;  %v23668_v17 = vperm.slane %v10720_v12, %v19327_v57 }
 0xb3a   : > { %13919 = vmatpush.msrb.mxu1 %v23397_v35  ;;  %18671 = vrcp.f32 %v13395_v50  ;;  %13412 = vadd.xlane.f32.xlu0 %v13411_v53  ;;  %v13474_v59 = vand.u32 2147483648, %v13395_v50  ;;  %vm13468_vm5 = vweird.f32 %v13395_v50  ;;  %v14169_v52 = vsub.f32 %v23665_v31, %v14168_v55 }
 0xb3b   : > { %v13452_v39 = vmul.f32 %v18668_v34, %v13451_v19  ;;  %13750 = vmatmul.f32.vlgmr.msra.gmra.mxu2 %v13696_v22  ;;  %v13697_v43 = vand.u32 4294901760, %v13696_v22 }
 0xb3c   : > { %13945 = vmatpush.msra.mxu2 %v13870_v24  ;;  %v13461_v24 = vor.u32 1.1754944e-38, %v13460_v8 }
 0xb3d   : > { %v13453_v28 = vadd.f32 %v18668_v34, %v13452_v39  ;;  %13774 = vmatmul.f32.vlgmr.msra.gmra.mxu3 %v13697_v43  ;;  %v13698_v9 = vsub.f32 %v13696_v22, %v13697_v43  ;;  %v13472_v22 = vand.u32 2147483647, %v13395_v50  ;;  %v13475_v39 = vor.u32 1.1754944e-38, %v13474_v59 }
 0xb3e   : > { %13967 = vmatpush.msra.mxu3 %v23397_v35 }
 0xb3f   : > { %v13457_v30 = vsel %vm13456_vm13, %v18668_v34, %v13453_v28  ;;  %v13699_v56 = vand.u32 4294901760, %v13698_v9  ;;  %v10743_v34 = vrot.slane %v23648_v15, 4  ;;  %vm13473_vm7 = vcmp.eq.f32.partialorder %v13472_v22, 8.507059e+37 }
 0xb40   : > { %v13462_v3 = vsel %vm13459_vm14, %v13461_v24, %v13457_v30  ;;  %v18672_v47 = vpop.eup %18671  ;;  %v10733_v30 = vrot.slane %v23621_v44, 4  ;;  %v10721_v44 = vrot.slane %v23638_v63, 4 }
 0xb41   : > { %v23660_v51 = vmul.f32 %v23467_v4, %v13462_v3  ;;  %13820 = vmatmul.f32.vlgmr.msra.gmra.mxu1 %v23618_v49  ;;  %v13464_v26 = vmul.f32 %v18672_v47, %v13395_v50  ;;  %13700 = vmatmul.f32.vlgmr.msrb.gmra.mxu0 %v13699_v56  ;;  %v10744_v48 = vsel %vm753_vm2, %v10743_v34, %v23668_v17  ;;  %vm13469_vm15 = vweird.f32 %v18672_v47 }
 0xb42   : > { %14022 = vmatpush.msra.mxu1 %v14021_v32  ;;  %13896 = vmatpush.msrb.mxu0 %v23404_v5  ;;  %vm13470_vm6 = vmor %vm13468_vm5, %vm13469_vm15  ;;  %v23688_v53 = vand.u32 4294901760, %v10744_v48  ;;  %v16561_v50 = vrot.slane %v23594_v40, 4  ;;  %v14170_v3 = vand.u32 4294901760, %v14169_v52 }
 0xb43   : > { %v13825_v35 = vsel %vm2169_vm3, %v23660_v51, 0  ;;  %v13465_v4 = vsub.f32 1.0, %v13464_v26  ;;  %v23681_v5 = vpop.xlane.xlu2 %13397 }
 0xb44   : > { %v23674_v38 = vand.u32 4294901760, %v13825_v35  ;;  %18673 = vrcp.f32 %v23681_v5  ;;  %v23697_v56 = vsub.f32 %v10744_v48, %v23688_v53  ;;  %vm13482_vm9 = vweird.f32 %v23681_v5 }
 0xb45   : > { %v13466_v19 = vmul.f32 %v18672_v47, %v13465_v4  ;;  %v13488_v4 = vand.u32 2147483648, %v23681_v5 }
 0xb46   : > { %v13845_v16 = vsub.f32 %v13825_v35, %v23674_v38  ;;  %13875 = vmatmul.f32.vlgmr.msrb.gmra.mxu3 %v23674_v38  ;;  %v10734_v35 = vsel %vm753_vm2, %v23590_v25, %v10733_v30 }
 0xb47   : > { %14068 = vmatpush.msrb.mxu3 %v23582_v13  ;;  %v13467_v6 = vadd.f32 %v18672_v47, %v13466_v19  ;;  %v13489_v48 = vor.u32 1.1754944e-38, %v13488_v4 }
 0xb48   : > { %v13846_v8 = vand.u32 4294901760, %v13845_v16 }
 0xb49   : > { %v13471_v43 = vsel %vm13470_vm6, %v18672_v47, %v13467_v6  ;;  %13798 = vmatmul.f32.vlgmr.msra.gmra.mxu0 %v23618_v49  ;;  %v10745_v49 = vrot.slane %v23668_v17, 4 }
 0xb4a   : > { %13923 = vmatmul.f32.vlgmr.msrb.gmra.mxu1 %v13846_v8  ;;  %v13847_v58 = vsub.f32 %v13845_v16, %v13846_v8  ;;  %v13476_v28 = vsel %vm13473_vm7, %v13475_v39, %v13471_v43  ;;  %13992 = vmatpush.msra.mxu0 %v23582_v13  ;;  %v18674_v12 = vpop.eup %18673  ;;  %v16573_v8 = vrot.slane %v23660_v51, 4 }
 0xb4b   : > { %14116 = vmatpush.msrb.mxu1 %v23582_v13  ;;  %v13661_v24 = vmul.f32 %v23476_v21, %v13476_v28  ;;  %v13478_v13 = vmul.f32 %v18674_v12, %v23681_v5  ;;  %v10746_v63 = vsel %vm753_vm2, %v23648_v15, %v10745_v49  ;;  %vm13483_vm8 = vweird.f32 %v18674_v12 }
 0xb4c   : > { %v13848_v9 = vand.u32 4294901760, %v13847_v58  ;;  %vm13484_vm10 = vmor %vm13482_vm9, %vm13483_vm8  ;;  %v23739_v22 = vand.u32 4294901760, %v10746_v63  ;;  %v25690_v58 = vld [vmem:[#allocation41_spill] sm:$0xff] }
 0xb4d   : > { %v16559_v32 = vrot.slane %v13661_v24, 4  ;;  %v23701_v47 = vsel %vm753_vm2, %v13661_v24, %v16561_v50  ;;  %v13974_v21 = vsel %vm2169_vm3, %v13661_v24, 0  ;;  %v13479_v17 = vsub.f32 1.0, %v13478_v13  ;;  %10377 = vrot.lane.b32.xlu1 %v22072_v0, %s18991_s9 }
 0xb4e   : > { %13849 = vmatmul.f32.vlgmr.msrb.gmra.mxu2 %v13848_v9  ;;  %13969 = vmatmul.f32.vlgmr.msra.gmra.mxu3 %v23674_v38  ;;  %v23716_v26 = vand.u32 4294901760, %v13974_v21  ;;  %v13486_v0 = vand.u32 2147483647, %v23681_v5  ;;  %v10722_v5 = vsel %vm753_vm2, %v23610_v54, %v10721_v44  ;;  %v23754_v28 = vsub.f32 %v10746_v63, %v23739_v22 }
 0xb4f   : > { %14045 = vmatpush.msrb.mxu2 %v23600_v27  ;;  %14171 = vmatpush.msra.mxu3 %v14170_v3  ;;  %v23710_v34 = vsel %vm753_vm2, %v16559_v32, %v23594_v40  ;;  %v14317_v40 = vand.u32 4294901760, %v23697_v56  ;;  %v13480_v59 = vmul.f32 %v18674_v12, %v13479_v17  ;;  %v23729_v25 = vpop.xlane.xlu0 %13400  ;;  %v10730_v54 = vperm.slane %v10722_v5, %v19327_v57 }
 0xb50   : > { %10393 = vrot.lane.b32.xlu2 %v22606_v33, %s18991_s9  ;;  %10385 = vrot.lane.b32.xlu0 %v22630_v20, %s18991_s9  ;;  %v13994_v33 = vsub.f32 %v13974_v21, %v23716_v26  ;;  %18675 = vrcp.f32 %v23729_v25  ;;  %vm13487_vm11 = vcmp.eq.f32.partialorder %v13486_v0, 8.507059e+37  ;;  %v13502_v49 = vand.u32 2147483648, %v23729_v25 }
 0xb51   : > { %13899 = vmatmul.f32.vlgmr.msrb.gmra.mxu0 %v13845_v16  ;;  %v13481_v20 = vadd.f32 %v18674_v12, %v13480_v59  ;;  %v14318_v19 = vsub.f32 %v23697_v56, %v14317_v40  ;;  %v23742_v16 = vperm.slane %v10734_v35, %v19327_v57  ;;  %v14466_v32 = vand.u32 4294901760, %v23754_v28 }
 0xb52   : > { %14024 = vmatmul.f32.vlgmr.msra.gmra.mxu1 %v23716_v26  ;;  %14094 = vmatpush.msrb.mxu0 %v14019_v61  ;;  %v13995_v15 = vand.u32 4294901760, %v13994_v33  ;;  %v13500_v44 = vand.u32 2147483647, %v23729_v25  ;;  %vm13496_vm13 = vweird.f32 %v23729_v25  ;;  %v13503_v63 = vor.u32 1.1754944e-38, %v13502_v49 }
 0xb53   : > { %14217 = vmatpush.msra.mxu1 %v23652_v46  ;;  %v13485_v27 = vsel %vm13484_vm10, %v18674_v12, %v13481_v20  ;;  %v10747_v50 = vrot.slane %v23742_v16, 4  ;;  %v14467_v59 = vsub.f32 %v23754_v28, %v14466_v32 }
 0xb54   : > { %v13996_v61 = vsub.f32 %v13994_v33, %v13995_v15  ;;  %v13490_v6 = vsel %vm13487_vm11, %v13489_v48, %v13485_v27  ;;  %vm13501_vm15 = vcmp.eq.f32.partialorder %v13500_v44, 8.507059e+37  ;;  %v10749_v27 = vrot.slane %v10730_v54, 4 }
 0xb55   : > { %v13662_v39 = vmul.f32 %v23481_v36, %v13490_v6  ;;  %v10748_v13 = vsel %vm753_vm2, %v10747_v50, %v10730_v54  ;;  %v14468_v48 = vand.u32 4294901760, %v14467_v59  ;;  %v10533_v59 = vrot.slane %v23507_v18, 4 }
 0xb56   : > { %13947 = vmatmul.f32.vlgmr.msra.gmra.mxu2 %v23674_v38  ;;  %14072 = vmatmul.f32.vlgmr.msrb.gmra.mxu3 %v13995_v15  ;;  %v13997_v52 = vand.u32 4294901760, %v13996_v61  ;;  %v18676_v43 = vpop.eup %18675  ;;  %v14319_v38 = vand.u32 4294901760, %v14318_v19  ;;  %v23784_v0 = vand.u32 4294901760, %v10748_v13 }
 0xb57   : > { %14141 = vmatpush.msra.mxu2 %v23652_v46  ;;  %14265 = vmatpush.msrb.mxu3 %v23652_v46  ;;  %v16571_v24 = vrot.slane %v13662_v39, 4  ;;  %v23759_v46 = vsel %vm753_vm2, %v13662_v39, %v16573_v8  ;;  %v13492_v9 = vmul.f32 %v18676_v43, %v23729_v25  ;;  %v14123_v36 = vsel %vm2169_vm3, %v13662_v39, 0 }
 0xb58   : > { %10401 = vrot.lane.b32.xlu0 %v25690_v58, %s18991_s9  ;;  %v23769_v3 = vand.u32 4294901760, %v14123_v36  ;;  %vm13497_vm12 = vweird.f32 %v18676_v43  ;;  %v23793_v19 = vsub.f32 %v10748_v13, %v23784_v0  ;;  %v10750_v39 = vsel %vm753_vm2, %v23742_v16, %v10749_v27 }
 0xb59   : > { %13998 = vmatmul.f32.vlgmr.msra.gmra.mxu0 %v13997_v52  ;;  %v23767_v12 = vsel %vm753_vm2, %v16571_v24, %v23660_v51  ;;  %v13493_v30 = vsub.f32 1.0, %v13492_v9  ;;  %vm13498_vm14 = vmor %vm13496_vm13, %vm13497_vm12  ;;  %v23810_v50 = vand.u32 4294901760, %v10750_v39 }
 0xb5a   : > { %14118 = vmatmul.f32.vlgmr.msrb.gmra.mxu1 %v23716_v26  ;;  %14194 = vmatpush.msra.mxu0 %v23665_v31  ;;  %v14143_v17 = vsub.f32 %v14123_v36, %v23769_v3  ;;  %v14615_v8 = vand.u32 4294901760, %v23793_v19 }
 0xb5b   : > { %14320 = vmatpush.msrb.mxu1 %v14319_v38  ;;  %v13494_v21 = vmul.f32 %v18676_v43, %v13493_v30  ;;  %v23819_v49 = vsub.f32 %v10750_v39, %v23810_v50 }
 0xb5c   : > { %v13404_v51 = vpop.xlane.xlu1 %13403  ;;  %v14144_v4 = vand.u32 4294901760, %v14143_v17  ;;  %v14616_v16 = vsub.f32 %v23793_v19, %v14615_v8 }
 0xb5d   : > { %18677 = vrcp.f32 %v13404_v51  ;;  %v13495_v35 = vadd.f32 %v18676_v43, %v13494_v21  ;;  %v13516_v6 = vand.u32 2147483648, %v13404_v51  ;;  %vm13510_vm6 = vweird.f32 %v13404_v51 }
 0xb5e   : > { %14048 = vmatmul.f32.vlgmr.msrb.gmra.mxu2 %v13994_v33  ;;  %14173 = vmatmul.f32.vlgmr.msra.gmra.mxu3 %v23769_v3  ;;  %v14145_v31 = vsub.f32 %v14143_v17, %v14144_v4  ;;  %v14617_v30 = vand.u32 4294901760, %v14616_v16  ;;  %v16582_v16 = vperm.slane %v23759_v46, %v19312_v42 }
 0xb5f   : > { %14243 = vmatpush.msrb.mxu2 %v14168_v55  ;;  %14366 = vmatpush.msra.mxu3 %v23688_v53  ;;  %v13499_v33 = vsel %vm13498_vm14, %v18676_v43, %v13495_v35  ;;  %v13514_v43 = vand.u32 2147483647, %v13404_v51  ;;  %v13517_v54 = vor.u32 1.1754944e-38, %v13516_v6 }
 0xb60   : > { %v13504_v55 = vsel %vm13501_vm15, %v13503_v63, %v13499_v33  ;;  %v14146_v20 = vand.u32 4294901760, %v14145_v31 }
 0xb61   : > { %14096 = vmatmul.f32.vlgmr.msrb.gmra.mxu0 %v23716_v26  ;;  %v23790_v25 = vmul.f32 %v23486_v45, %v13504_v55  ;;  %v13351_v45 = vsub.f32 %v23472_v10, %v23654_v1  ;;  %vm13515_vm8 = vcmp.eq.f32.partialorder %v13514_v43, 8.507059e+37 }
 0xb62   : > { %14221 = vmatmul.f32.vlgmr.msra.gmra.mxu1 %v14144_v4  ;;  %14290 = vmatpush.msrb.mxu0 %v23688_v53  ;;  %v10384_v63 = vpop.permute.xlu0 %10383 }
 0xb63   : > { %14414 = vmatpush.msra.mxu1 %v23688_v53  ;;  %v18678_v15 = vpop.eup %18677  ;;  %v14272_v53 = vsel %vm2169_vm3, %v23790_v25, 0  ;;  %v13379_v10 = vmul.f32 1.442695, %v13351_v45  ;;  %v10545_v55 = vrot.slane %v10384_v63, 4 }
 0xb64   : > { %v13506_v61 = vmul.f32 %v18678_v15, %v13404_v51  ;;  %v14291_v5 = vand.u32 4294901760, %v14272_v53  ;;  %vm13511_vm5 = vweird.f32 %v18678_v15 }
 0xb65   : > { %vm13512_vm7 = vmor %vm13510_vm6, %vm13511_vm5  ;;  %18679 = vpow2.f32 %v13379_v10 }
 0xb66   : > { %14147 = vmatmul.f32.vlgmr.msra.gmra.mxu2 %v14146_v20  ;;  %14267 = vmatmul.f32.vlgmr.msrb.gmra.mxu3 %v23769_v3  ;;  %v13507_v26 = vsub.f32 1.0, %v13506_v61  ;;  %v14292_v58 = vsub.f32 %v14272_v53, %v14291_v5 }
 0xb67   : > { %14343 = vmatpush.msra.mxu2 %v23697_v56  ;;  %14469 = vmatpush.msrb.mxu3 %v14468_v48 }
 0xb68   : > { %v13508_v52 = vmul.f32 %v18678_v15, %v13507_v26  ;;  %v14293_v38 = vand.u32 4294901760, %v14292_v58 }
 0xb69   : > { %14197 = vmatmul.f32.vlgmr.msra.gmra.mxu0 %v14143_v17 }
 0xb6a   : > { %14322 = vmatmul.f32.vlgmr.msrb.gmra.mxu1 %v14291_v5  ;;  %14392 = vmatpush.msra.mxu0 %v14317_v40  ;;  %v13509_v1 = vadd.f32 %v18678_v15, %v13508_v52  ;;  %v14294_v56 = vsub.f32 %v14292_v58, %v14293_v38 }
 0xb6b   : > { %14515 = vmatpush.msrb.mxu1 %v23739_v22  ;;  %v23825_v44 = vpop.eup %18679 }
 0xb6c   : > { %v13513_v24 = vsel %vm13512_vm7, %v18678_v15, %v13509_v1  ;;  %v14295_v36 = vand.u32 4294901760, %v14294_v56  ;;  %v13423_v17 = vsel %vm2169_vm3, %v23825_v44, 0.0 }
 0xb6d   : > { %v13518_v40 = vsel %vm13515_vm8, %v13517_v54, %v13513_v24 }
 0xb6e   : > { %14245 = vmatmul.f32.vlgmr.msrb.gmra.mxu2 %v23769_v3  ;;  %14370 = vmatmul.f32.vlgmr.msra.gmra.mxu3 %v14293_v38  ;;  %v23816_v9 = vmul.f32 %v23491_v14, %v13518_v40  ;;  %v16566_v40 = vperm.slane %v23710_v34, %v19312_v42 }
 0xb6f   : > { %14439 = vmatpush.msrb.mxu2 %v23739_v22  ;;  %14563 = vmatpush.msra.mxu3 %v23739_v22  ;;  %v14764_v22 = vand.u32 4294901760, %v23819_v49 }
 0xb70   : > { %v14421_v3 = vsel %vm2169_vm3, %v23816_v9, 0 }
 0xb71   : > { %14296 = vmatmul.f32.vlgmr.msrb.gmra.mxu0 %v14295_v36  ;;  %v14440_v13 = vand.u32 4294901760, %v14421_v3  ;;  %v14765_v35 = vsub.f32 %v23819_v49, %v14764_v22  ;;  %v16570_v36 = vperm.slane %v23701_v47, %v19312_v42 }
 0xb72   : > { %14416 = vmatmul.f32.vlgmr.msra.gmra.mxu1 %v14291_v5  ;;  %14492 = vmatpush.msrb.mxu0 %v23754_v28 }
 0xb73   : > { %14618 = vmatpush.msra.mxu1 %v14617_v30  ;;  %v14441_v21 = vsub.f32 %v14421_v3, %v14440_v13  ;;  %v14766_v28 = vand.u32 4294901760, %v14765_v35 }
 0xb74   : > { %v10400_v33 = vpop.permute.xlu1 %10399 }
 0xb75   : > { %v14442_v14 = vand.u32 4294901760, %v14441_v21  ;;  %v10546_v15 = vsel %vm753_vm2, %v10400_v33, %v10545_v55  ;;  %v10543_v48 = vrot.slane %v10400_v33, 4 }
 0xb76   : > { %14346 = vmatmul.f32.vlgmr.msra.gmra.mxu2 %v14292_v58  ;;  %14471 = vmatmul.f32.vlgmr.msrb.gmra.mxu3 %v14440_v13  ;;  %v10554_v27 = vperm.slane %v10546_v15, %v19312_v42 }
 0xb77   : > { %14541 = vmatpush.msra.mxu2 %v14466_v32  ;;  %14664 = vmatpush.msrb.mxu3 %v23784_v0  ;;  %v14443_v51 = vsub.f32 %v14441_v21, %v14442_v14  ;;  %v10392_v32 = vpop.permute.xlu2 %10391  ;;  %v10544_v45 = vsel %vm753_vm2, %v10543_v48, %v10384_v63 }
 0xb78   : > { %13424 = vadd.xlane.f32.xlu1 %v13423_v17  ;;  %v10534_v31 = vsel %vm753_vm2, %v10392_v32, %v10533_v59  ;;  %v10531_v20 = vrot.slane %v10392_v32, 4  ;;  %v10550_v6 = vperm.slane %v10544_v45, %v19312_v42 }
 0xb79   : > { %14394 = vmatmul.f32.vlgmr.msra.gmra.mxu0 %v14291_v5  ;;  %v14444_v4 = vand.u32 4294901760, %v14443_v51  ;;  %v10567_v5 = vrot.slane %v10554_v27, 4  ;;  %v16597_v51 = vrot.slane %v16570_v36, 4 }
 0xb7a   : > { %14519 = vmatmul.f32.vlgmr.msrb.gmra.mxu1 %v14442_v14  ;;  %14588 = vmatpush.msra.mxu0 %v23784_v0  ;;  %v10532_v61 = vsel %vm753_vm2, %v10531_v20, %v23507_v18  ;;  %v10555_v18 = vrot.slane %v10550_v6, 4  ;;  %v16595_v14 = vrot.slane %v16582_v16, 4 }
 0xb7b   : > { %14712 = vmatpush.msrb.mxu1 %v23784_v0  ;;  %v10542_v0 = vperm.slane %v10534_v31, %v19312_v42  ;;  %v10538_v26 = vperm.slane %v10532_v61, %v19312_v42  ;;  %v16598_v63 = vsel %vm753_vm2, %v16582_v16, %v16597_v51 }
 0xb7c   : > { %v16596_v20 = vsel %vm753_vm2, %v16595_v14, %v16570_v36  ;;  %v16606_v45 = vperm.slane %v16598_v63, %v19327_v57 }
 0xb7d   : > { %v10569_v53 = vrot.slane %v10542_v0, 4  ;;  %v10557_v39 = vrot.slane %v10538_v26, 4  ;;  %v10568_v52 = vsel %vm753_vm2, %v10567_v5, %v10542_v0  ;;  %v10556_v30 = vsel %vm753_vm2, %v10555_v18, %v10538_v26 }
 0xb7e   : > { %14445 = vmatmul.f32.vlgmr.msrb.gmra.mxu2 %v14444_v4  ;;  %14565 = vmatmul.f32.vlgmr.msra.gmra.mxu3 %v14440_v13  ;;  %v10574_v1 = vperm.slane %v10568_v52, %v19327_v57  ;;  %v10562_v34 = vperm.slane %v10556_v30, %v19327_v57  ;;  %v16585_v4 = vrot.slane %v16566_v40, 4 }
 0xb7f   : > { %14641 = vmatpush.msrb.mxu2 %v23793_v19  ;;  %14767 = vmatpush.msra.mxu3 %v14766_v28  ;;  %v10570_v19 = vsel %vm753_vm2, %v10554_v27, %v10569_v53  ;;  %v10558_v58 = vsel %vm753_vm2, %v10550_v6, %v10557_v39  ;;  %v16602_v27 = vperm.slane %v16596_v20, %v19327_v57 }
 0xb80   : > { %v10566_v24 = vperm.slane %v10558_v58, %v19327_v57  ;;  %v10579_v33 = vrot.slane %v10562_v34, 4 }
 0xb81   : > { %14495 = vmatmul.f32.vlgmr.msrb.gmra.mxu0 %v14441_v21  ;;  %v16611_v58 = vrot.slane %v16602_v27, 4 }
 0xb82   : > { %14690 = vmatpush.msrb.mxu0 %v14615_v8  ;;  %v10578_v8 = vperm.slane %v10570_v19, %v19327_v57  ;;  %v10581_v17 = vrot.slane %v10566_v24, 4  ;;  %v10580_v39 = vsel %vm753_vm2, 0.0, %v10579_v33 }
 0xb84   : > { %v10585_v38 = vrot.slane %v10578_v8, 4  ;;  %v10582_v31 = vsel %vm753_vm2, 0.0, %v10581_v17  ;;  %v23897_v26 = vsel %vm753_vm2, %v10581_v17, %v10562_v34 }
 0xb85   : > { %v10756_v5 = vrot.slane %v10582_v31, 4 }
 0xb86   : > { %14543 = vmatmul.f32.vlgmr.msra.gmra.mxu2 %v14440_v13  ;;  %v16578_v13 = vperm.slane %v23767_v12, %v19312_v42  ;;  %v10586_v21 = vsel %vm753_vm2, 0.0, %v10585_v38  ;;  %v23892_v61 = vsel %vm753_vm2, %v10585_v38, %v10574_v1 }
 0xb87   : > { %14737 = vmatpush.msra.mxu2 %v23810_v50  ;;  %v10767_v47 = vrot.slane %v10586_v21, 4 }
 0xb88   : > { %v16583_v28 = vrot.slane %v16578_v13, 4  ;;  %v16586_v55 = vsel %vm753_vm2, %v16578_v13, %v16585_v4 }
 0xb89   : > { %v16594_v48 = vperm.slane %v16586_v55, %v19327_v57 }
 0xb8a   : > { %v16584_v53 = vsel %vm753_vm2, %v16583_v28, %v16566_v40 }
 0xb8b   : > { %v16590_v6 = vperm.slane %v16584_v53, %v19327_v57  ;;  %v16609_v18 = vrot.slane %v16594_v48, 4 }
 0xb8d   : > { %v13335_v10 = vpop.xlane.xlu0 %13334  ;;  %v16607_v38 = vrot.slane %v16590_v6, 4  ;;  %v16610_v21 = vsel %vm753_vm2, 0.0, %v16609_v18  ;;  %v23921_v51 = vsel %vm753_vm2, %v16609_v18, %v16590_v6 }
 0xb8e   : > { %v23854_v43 = vpop.xlane.xlu2 %13415  ;;  %v13353_v54 = vsub.f32 %v23525_v62, %v13335_v10  ;;  %v10583_v62 = vrot.slane %v10574_v1, 4  ;;  %v16788_v4 = vrot.slane %v16610_v21, 4 }
 0xb8f   : > { %18681 = vrcp.f32 %v23854_v43  ;;  %vm13566_vm9 = vweird.f32 %v23854_v43  ;;  %v13572_v16 = vand.u32 2147483648, %v23854_v43 }
 0xb90   : > { %v13383_v56 = vmul.f32 1.442695, %v13353_v54  ;;  %v10584_v32 = vsel %vm753_vm2, 0.0, %v10583_v62  ;;  %v16613_v54 = vrot.slane %v16606_v45, 4  ;;  %v16608_v62 = vsel %vm753_vm2, 0.0, %v16607_v38 }
 0xb91   : > { %v10768_v15 = vsel %vm753_vm2, %v10767_v47, %v10584_v32  ;;  %v13570_v47 = vand.u32 2147483647, %v23854_v43  ;;  %v10757_v32 = vsel %vm753_vm2, %v10756_v5, %v10580_v39  ;;  %v23944_v20 = vsel %vm753_vm2, %v16788_v4, %v16608_v62 }
 0xb92   : > { %18683 = vpow2.f32 %v13383_v56  ;;  %v23903_v52 = vperm.slane %v10768_v15, %v19312_v42  ;;  %v16614_v17 = vsel %vm753_vm2, 0.0, %v16613_v54  ;;  %v23925_v28 = vsel %vm753_vm2, %v16613_v54, %v16602_v27 }
 0xb93   : > { %v13573_v15 = vor.u32 1.1754944e-38, %v13572_v16  ;;  %vm13571_vm5 = vcmp.eq.f32.partialorder %v13570_v47, 8.507059e+37  ;;  %v18732_v47 = vld [vmem:[%s19176_s13 + $0x30] sm:$0xff] }
 0xb94   : > { %v10785_v27 = vrot.slane %v23903_v52, 4 }
 0xb95   : > { %v23868_v3 = vpop.eup %18681  ;;  %v23876_v35 = vpop.xlane.xlu0 %13406 }
 0xb96   : > { %v13562_v46 = vmul.f32 %v23868_v3, %v23854_v43  ;;  %18685 = vrcp.f32 %v23876_v35  ;;  %vm13567_vm10 = vweird.f32 %v23868_v3  ;;  %v13528_v24 = vand.u32 2147483647, %v23876_v35 }
 0xb97   : > { %v13530_v30 = vand.u32 2147483648, %v23876_v35  ;;  %vm23932_vm12 = vmor %vm13566_vm9, %vm13567_vm10  ;;  %vm13524_vm13 = vweird.f32 %v23876_v35 }
 0xb98   : > { %v13563_v12 = vsub.f32 1.0, %v13562_v46  ;;  %v23881_v59 = vpop.eup %18683  ;;  %v16612_v46 = vsel %vm753_vm2, 0.0, %v16611_v58  ;;  %vm13529_vm15 = vcmp.eq.f32.partialorder %v13528_v24, 8.507059e+37 }
 0xb99   : > { %v13429_v0 = vsel %vm2169_vm3, %v23881_v59, 0.0  ;;  %v13531_v55 = vor.u32 1.1754944e-38, %v13530_v30 }
 0xb9a   : > { %13430 = vadd.xlane.f32.xlu0 %v13429_v0  ;;  %v13564_v19 = vmul.f32 %v23868_v3, %v13563_v12 }
 0xb9c   : > { %v18686_v8 = vpop.eup %18685  ;;  %v13565_v40 = vadd.f32 %v23868_v3, %v13564_v19 }
 0xb9d   : > { %v13520_v10 = vmul.f32 %v18686_v8, %v23876_v35  ;;  %v23907_v1 = vpop.xlane.xlu0 %13409  ;;  %vm13525_vm11 = vweird.f32 %v18686_v8 }
 0xb9e   : > { %18687 = vrcp.f32 %v23907_v1  ;;  %v13569_v31 = vsel %vm23932_vm12, %v23868_v3, %v13565_v40  ;;  %vm13526_vm14 = vmor %vm13524_vm13, %vm13525_vm11  ;;  %v13544_v16 = vand.u32 2147483648, %v23907_v1  ;;  %vm13538_vm7 = vweird.f32 %v23907_v1 }
 0xb9f   : > { %v13332_v56 = vpop.xlane.xlu1 %13331  ;;  %v13521_v36 = vsub.f32 1.0, %v13520_v10  ;;  %v13574_v5 = vsel %vm13571_vm5, %v13573_v15, %v13569_v31  ;;  %v23973_v10 = vperm.slane %v10757_v32, %v19312_v42 }
 0xba0   : > { %v13352_v13 = vsub.f32 %v23565_v23, %v13332_v56  ;;  %v16799_v23 = vrot.slane %v16614_v17, 4  ;;  %v13545_v4 = vor.u32 1.1754944e-38, %v13544_v16 }
 0xba1   : > { %v13522_v14 = vmul.f32 %v18686_v8, %v13521_v36  ;;  %v10773_v40 = vrot.slane %v23973_v10, 4 }
 0xba2   : > { %v13381_v34 = vmul.f32 1.442695, %v13352_v13  ;;  %v23947_v43 = vsel %vm753_vm2, %v16799_v23, %v16612_v46 }
 0xba3   : > { %v13523_v63 = vadd.f32 %v18686_v8, %v13522_v14 }
 0xba4   : > { %18689 = vpow2.f32 %v13381_v34  ;;  %v23937_v33 = vpop.eup %18687 }
 0xba5   : > { %v13527_v0 = vsel %vm13526_vm14, %v18686_v8, %v13523_v63  ;;  %v13534_v35 = vmul.f32 %v23937_v33, %v23907_v1  ;;  %v13338_v48 = vpop.xlane.xlu0 %13337  ;;  %v23960_v8 = vperm.slane %v23892_v61, %v19312_v42  ;;  %vm13539_vm6 = vweird.f32 %v23937_v33 }
 0xba6   : > { %v13532_v3 = vsel %vm13529_vm15, %v13531_v55, %v13527_v0  ;;  %v13354_v53 = vsub.f32 %v23584_v37, %v13338_v48  ;;  %v23970_v37 = vperm.slane %v23897_v26, %v19312_v42  ;;  %v13542_v26 = vand.u32 2147483647, %v23907_v1  ;;  %vm23997_vm8 = vmor %vm13538_vm7, %vm13539_vm6 }
 0xba7   : > { %v23953_v45 = vpop.xlane.xlu1 %13418  ;;  %v13535_v19 = vsub.f32 1.0, %v13534_v35  ;;  %v23963_v39 = vmul.f32 %v23540_v41, %v13532_v3  ;;  %v10786_v61 = vsel %vm753_vm2, %v10785_v27, %v23960_v8  ;;  %v23979_v41 = vmul.f32 %v23527_v60, %v13574_v5 }
 0xba8   : > { %18691 = vrcp.f32 %v23953_v45  ;;  %v13385_v18 = vmul.f32 1.442695, %v13354_v53  ;;  %v10775_v36 = vrot.slane %v23970_v37, 4  ;;  %v23995_v30 = vperm.slane %v10786_v61, %v19327_v57 }
 0xba9   : > { %v13536_v38 = vmul.f32 %v23937_v33, %v13535_v19  ;;  %v14570_v56 = vsel %vm2169_vm3, %v23963_v39, 0  ;;  %v16685_v46 = vrot.slane %v23979_v41, 4  ;;  %v13584_v17 = vand.u32 2147483647, %v23953_v45 }
 0xbaa   : > { %v23956_v6 = vpop.xlane.xlu2 %13421  ;;  %v23966_v58 = vpop.eup %18689  ;;  %v24001_v1 = vand.u32 4294901760, %v14570_v56  ;;  %v13586_v23 = vand.u32 2147483648, %v23953_v45  ;;  %vm13543_vm9 = vcmp.eq.f32.partialorder %v13542_v26, 8.507059e+37  ;;  %vm13580_vm10 = vweird.f32 %v23953_v45 }
 0xbab   : > { %18693 = vrcp.f32 %v23956_v6  ;;  %v13537_v54 = vadd.f32 %v23937_v33, %v13536_v38  ;;  %v13426_v24 = vsel %vm2169_vm3, %v23966_v58, 0.0  ;;  %v13598_v63 = vand.u32 2147483647, %v23956_v6 }
 0xbac   : > { %18695 = vpow2.f32 %v13385_v18  ;;  %13427 = vadd.xlane.f32.xlu2 %v13426_v24  ;;  %14620 = vmatmul.f32.vlgmr.msra.gmra.mxu1 %v24001_v1  ;;  %vm13594_vm11 = vweird.f32 %v23956_v6  ;;  %v14590_v15 = vsub.f32 %v14570_v56, %v24001_v1  ;;  %vm24027_vm13 = vcmp.eq.f32.partialorder %v13584_v17, 8.507059e+37 }
 0xbad   : > { %v24003_v62 = vpop.xlane.xlu0 %13412  ;;  %v13541_v14 = vsel %vm23997_vm8, %v23937_v33, %v13537_v54  ;;  %14813 = vmatpush.msra.mxu1 %v23810_v50  ;;  %v13600_v48 = vand.u32 2147483648, %v23956_v6  ;;  %v13587_v27 = vor.u32 1.1754944e-38, %v13586_v23  ;;  %vm24036_vm15 = vcmp.eq.f32.partialorder %v13598_v63, 8.507059e+37 }
 0xbae   : > { %v23990_v60 = vpop.eup %18691  ;;  %17063 = vrot.lane.b32.xlu0 %v18732_v47, %s18996_s29  ;;  %18697 = vrcp.f32 %v24003_v62  ;;  %v13546_v31 = vsel %vm13543_vm9, %v13545_v4, %v13541_v14  ;;  %14644 = vmatmul.f32.vlgmr.msrb.gmra.mxu2 %v14590_v15  ;;  %v14591_v53 = vand.u32 4294901760, %v14590_v15  ;;  %v10774_v26 = vsel %vm753_vm2, %v10773_v40, %v23970_v37 }
 0xbaf   : > { %v13576_v34 = vmul.f32 %v23990_v60, %v23953_v45  ;;  %vm13581_vm12 = vweird.f32 %v23990_v60  ;;  %v24033_v5 = vmul.f32 %v23560_v2, %v13546_v31  ;;  %14839 = vmatpush.msrb.mxu2 %v14764_v22  ;;  %v10797_v24 = vrot.slane %v23995_v30, 4 }
 0xbb0   : > { %vm24046_vm5 = vmor %vm13580_vm10, %vm13581_vm12  ;;  %14668 = vmatmul.f32.vlgmr.msrb.gmra.mxu3 %v14591_v53  ;;  %v14592_v16 = vsub.f32 %v14590_v15, %v14591_v53  ;;  %v13601_v45 = vor.u32 1.1754944e-38, %v13600_v48  ;;  %vm13552_vm7 = vweird.f32 %v24003_v62  ;;  %v13558_v40 = vand.u32 2147483648, %v24003_v62 }
 0xbb1   : > { %v18694_v21 = vpop.eup %18693  ;;  %v13577_v12 = vsub.f32 1.0, %v13576_v34  ;;  %14861 = vmatpush.msrb.mxu3 %v23810_v50  ;;  %v10780_v34 = vperm.slane %v10774_v26, %v19327_v57  ;;  %v14719_v47 = vsel %vm2169_vm3, %v24033_v5, 0  ;;  %v10787_v53 = vrot.slane %v23960_v8, 4 }
 0xbb2   : > { %v13590_v32 = vmul.f32 %v18694_v21, %v23956_v6  ;;  %v24021_v33 = vpop.eup %18695  ;;  %vm13595_vm14 = vweird.f32 %v18694_v21  ;;  %v14593_v14 = vand.u32 4294901760, %v14592_v16  ;;  %v24075_v4 = vand.u32 4294901760, %v14719_v47 }
 0xbb3   : > { %v13578_v0 = vmul.f32 %v23990_v60, %v13577_v12  ;;  %v13432_v38 = vsel %vm2169_vm3, %v24021_v33, 0.0  ;;  %vm13596_vm6 = vmor %vm13594_vm11, %vm13595_vm14  ;;  %v10799_v23 = vrot.slane %v10780_v34, 4  ;;  %v13556_v12 = vand.u32 2147483647, %v24003_v62 }
 0xbb4   : > { %v13591_v55 = vsub.f32 1.0, %v13590_v32  ;;  %v18698_v61 = vpop.eup %18697  ;;  %13433 = vadd.xlane.f32.xlu1 %v13432_v38  ;;  %14714 = vmatmul.f32.vlgmr.msrb.gmra.mxu1 %v24001_v1  ;;  %v24089_v15 = vsub.f32 %v14719_v47, %v24075_v4 }
 0xbb5   : > { %v13579_v19 = vadd.f32 %v23990_v60, %v13578_v0  ;;  %v13548_v56 = vmul.f32 %v18698_v61, %v24003_v62  ;;  %14594 = vmatmul.f32.vlgmr.msra.gmra.mxu0 %v14593_v14  ;;  %vm13553_vm8 = vweird.f32 %v18698_v61  ;;  %v10800_v0 = vsel %vm753_vm2, %v23995_v30, %v10799_v23 }
 0xbb6   : > { %v13592_v3 = vmul.f32 %v18694_v21, %v13591_v55  ;;  %v24078_v63 = vpop.f32.mrf.mxu1  ;;  %14790 = vmatpush.msra.mxu0 %v23819_v49  ;;  %vm13554_vm9 = vmor %vm13552_vm7, %vm13553_vm8  ;;  %v13559_v30 = vor.u32 1.1754944e-38, %v13558_v40  ;;  %vm13557_vm10 = vcmp.eq.f32.partialorder %v13556_v12, 8.507059e+37  ;;  %v10776_v14 = vsel %vm753_vm2, %v23973_v10, %v10775_v36 }
 0xbb7   : > { %v13583_v22 = vsel %vm24046_vm5, %v23990_v60, %v13579_v19  ;;  %v13549_v17 = vsub.f32 1.0, %v13548_v56  ;;  %v14740_v19 = vand.u32 4294901760, %v24089_v15  ;;  %v10788_v56 = vsel %vm753_vm2, %v23903_v52, %v10787_v53  ;;  %v18733_v53 = vld [vmem:[%s19176_s13 + $0x38] sm:$0xff] }
 0xbb8   : > { %v13593_v2 = vadd.f32 %v18694_v21, %v13592_v3  ;;  %v13588_v60 = vsel %vm24027_vm13, %v13587_v27, %v13583_v22  ;;  %v24100_v3 = vand.u32 4294901760, %v10800_v0  ;;  %14769 = vmatmul.f32.vlgmr.msra.gmra.mxu3 %v24075_v4  ;;  %v10784_v47 = vperm.slane %v10776_v14, %v19327_v57 }
 0xbb9   : > { %v13550_v32 = vmul.f32 %v18698_v61, %v13549_v17  ;;  %v24094_v35 = vmul.f32 %v23587_v29, %v13588_v60  ;;  %v10394_v29 = vpop.permute.xlu2 %10393 }
 0xbba   : > { %v13597_v13 = vsel %vm13596_vm6, %v18694_v21, %v13593_v2  ;;  %v10798_v21 = vsel %vm753_vm2, %v10797_v24, %v10780_v34  ;;  %v14741_v2 = vsub.f32 %v24089_v15, %v14740_v19  ;;  %v24117_v62 = vsub.f32 %v10800_v0, %v24100_v3 }
 0xbbb   : > { %v13602_v6 = vsel %vm24036_vm15, %v13601_v45, %v13597_v13  ;;  %v14885_v31 = vand.u32 4294901760, %v10798_v21  ;;  %v13551_v48 = vadd.f32 %v18698_v61, %v13550_v32  ;;  %v16671_v26 = vrot.slane %v24094_v35, 4 }
 0xbbc   : > { %v24072_v50 = vmul.f32 %v23602_v7, %v13602_v6  ;;  %14817 = vmatmul.f32.vlgmr.msra.gmra.mxu1 %v14740_v19  ;;  %v10587_v22 = vrot.slane %v10394_v29, 4  ;;  %v14742_v13 = vand.u32 4294901760, %v14741_v2 }
 0xbbd   : > { %v24096_v49 = vsub.f32 %v10798_v21, %v14885_v31  ;;  %v13555_v18 = vsel %vm13554_vm9, %v18698_v61, %v13551_v48  ;;  %14962 = vmatpush.msra.mxu3 %v14885_v31  ;;  %14692 = vmatmul.f32.vlgmr.msrb.gmra.mxu0 %v24001_v1  ;;  %v15062_v1 = vand.u32 4294901760, %v24117_v62  ;;  %v10796_v21 = vperm.slane %v10788_v56, %v19327_v57 }
 0xbbe   : > { %v16683_v55 = vrot.slane %v24072_v50, 4  ;;  %v24086_v7 = vsel %vm753_vm2, %v24072_v50, %v16685_v46  ;;  %v24098_v27 = vpop.f32.mrf.mxu0  ;;  %v13560_v54 = vsel %vm13557_vm10, %v13559_v30, %v13555_v18  ;;  %14886 = vmatpush.msrb.mxu0 %v14885_v31  ;;  %14743 = vmatmul.f32.vlgmr.msra.gmra.mxu2 %v14742_v13  ;;  %v24139_v37 = vpop.f32.mrf.mxu1 }
 0xbbf   : > { %v14913_v38 = vand.u32 4294901760, %v24096_v49  ;;  %v10378_v16 = vpop.permute.xlu1 %10377  ;;  %v13667_v24 = vmul.f32 %v23624_v11, %v13560_v54  ;;  %14939 = vmatpush.msra.mxu2 %v24096_v49  ;;  %v15063_v32 = vsub.f32 %v24117_v62, %v15062_v1  ;;  %v24152_v12 = vpop.f32.mrf.mxu2  ;;  %v10801_v48 = vrot.slane %v10796_v21, 4 }
 0xbc0   : > { %v24105_v46 = vsel %vm753_vm2, %v16683_v55, %v23979_v41  ;;  %v24113_v8 = vpop.f32.mrf.mxu3  ;;  %v10589_v40 = vrot.slane %v10378_v16, 4  ;;  %v10588_v6 = vsel %vm753_vm2, %v10587_v22, %v10378_v16  ;;  %14863 = vmatmul.f32.vlgmr.msrb.gmra.mxu3 %v24075_v4  ;;  %v10803_v16 = vrot.slane %v10784_v47, 4 }
 0xbc1   : > { %v14914_v61 = vsub.f32 %v24096_v49, %v14913_v38  ;;  %v24130_v34 = vsel %vm753_vm2, %v16671_v26, %v13667_v24  ;;  %v16673_v11 = vrot.slane %v13667_v24, 4  ;;  %v14868_v36 = vsel %vm2169_vm3, %v13667_v24, 0 }
 0xbc2   : > { %v10386_v45 = vpop.permute.xlu0 %10385  ;;  %v10590_v52 = vsel %vm753_vm2, %v10394_v29, %v10589_v40  ;;  %v10594_v23 = vperm.slane %v10588_v6, %v19312_v42  ;;  %v24155_v0 = vand.u32 4294901760, %v14868_v36  ;;  %v15017_v49 = vsel %vm2169_vm3, %v23979_v41, 0 }
 0xbc3   : > { %v14915_v60 = vand.u32 4294901760, %v14914_v61  ;;  %v24137_v17 = vsel %vm753_vm2, %v24094_v35, %v16673_v11  ;;  %v10598_v55 = vperm.slane %v10590_v52, %v19312_v42  ;;  %v15064_v30 = vand.u32 4294901760, %v15063_v32 }
 0xbc4   : > { %17065 = vrot.lane.b32.xlu2 %v18733_v53, %s18996_s29  ;;  %v24161_v29 = vand.u32 4294901760, %v15017_v49  ;;  %v24164_v19 = vsub.f32 %v14868_v36, %v24155_v0  ;;  %v10802_v2 = vsel %vm753_vm2, %v10801_v48, %v10784_v47  ;;  %v10613_v26 = vrot.slane %v10594_v23, 4 }
 0xbc5   : > { %14916 = vmatpush.msrb.mxu1 %v14915_v60  ;;  %15065 = vmatpush.msrb.mxu3 %v15064_v30  ;;  %v24172_v22 = vand.u32 4294901760, %v10802_v2  ;;  %v10625_v61 = vrot.slane %v10598_v55, 4  ;;  %v10804_v40 = vsel %vm753_vm2, %v10796_v21, %v10803_v16  ;;  %v13728_v47 = vadd.f32 %v24078_v63, %v24098_v27 }
 0xbc6   : > { %v24142_v10 = vpop.f32.mrf.mxu0  ;;  %14918 = vmatmul.f32.vlgmr.msrb.gmra.mxu1 %v24155_v0  ;;  %14793 = vmatmul.f32.vlgmr.msra.gmra.mxu0 %v24089_v15  ;;  %v14889_v13 = vand.u32 4294901760, %v24164_v19  ;;  %v24184_v11 = vsub.f32 %v15017_v49, %v24161_v29  ;;  %v24186_v60 = vand.u32 4294901760, %v10804_v40 }
 0xbc7   : > { %15010 = vmatpush.msra.mxu1 %v14885_v31  ;;  %v10601_v31 = vrot.slane %v10386_v45, 4  ;;  %14988 = vmatpush.msra.mxu0 %v14913_v38  ;;  %v24181_v15 = vsub.f32 %v10802_v2, %v24172_v22  ;;  %v24199_v48 = vpop.f32.mrf.mxu1  ;;  %v18734_v2 = vld [vmem:[%s19176_s13 + $0x28] sm:$0xff] }
 0xbc8   : > { %14841 = vmatmul.f32.vlgmr.msrb.gmra.mxu2 %v24075_v4  ;;  %v14890_v4 = vsub.f32 %v24164_v19, %v14889_v13  ;;  %14966 = vmatmul.f32.vlgmr.msra.gmra.mxu3 %v14889_v13 }
 0xbc9   : > { %v24167_v18 = vpop.f32.mrf.mxu3  ;;  %15111 = vmatpush.msrb.mxu1 %v24100_v3  ;;  %15035 = vmatpush.msrb.mxu2 %v24100_v3  ;;  %v15211_v32 = vand.u32 4294901760, %v24181_v15 }
 0xbca   : > { %v10402_v54 = vpop.permute.xlu0 %10401  ;;  %15159 = vmatpush.msra.mxu3 %v24100_v3  ;;  %v14891_v30 = vand.u32 4294901760, %v14890_v4  ;;  %v15038_v3 = vand.u32 4294901760, %v24184_v11  ;;  %v16787_v4 = vperm.slane %v23921_v51, %v19312_v42 }
 0xbcb   : > { %v10599_v41 = vrot.slane %v10402_v54, 4  ;;  %v10602_v24 = vsel %vm753_vm2, %v10402_v54, %v10601_v31 }
 0xbcc   : > { %v10610_v56 = vperm.slane %v10602_v24, %v19312_v42  ;;  %v24216_v24 = vsub.f32 %v10804_v40, %v24186_v60 }
 0xbcd   : > { %v10600_v14 = vsel %vm753_vm2, %v10599_v41, %v10386_v45  ;;  %v16617_v45 = vrot.slane %v23790_v25, 4  ;;  %17061 = vrot.lane.b32.xlu1 %v18734_v2, %s18996_s29  ;;  %v15212_v41 = vsub.f32 %v24181_v15, %v15211_v32 }
 0xbce   : > { %v10606_v38 = vperm.slane %v10600_v14, %v19312_v42  ;;  %v10623_v6 = vrot.slane %v10610_v56, 4  ;;  %v10626_v52 = vsel %vm753_vm2, %v10610_v56, %v10625_v61  ;;  %v24191_v36 = vpop.f32.mrf.mxu0  ;;  %15012 = vmatmul.f32.vlgmr.msra.gmra.mxu1 %v24155_v0  ;;  %14892 = vmatmul.f32.vlgmr.msrb.gmra.mxu0 %v14891_v30  ;;  %v15360_v30 = vand.u32 4294901760, %v24216_v24 }
 0xbcf   : > { %v10634_v21 = vperm.slane %v10626_v52, %v19327_v57  ;;  %15088 = vmatpush.msrb.mxu0 %v24117_v62 }
 0xbd0   : > { %v10611_v49 = vrot.slane %v10606_v38, 4  ;;  %v10614_v53 = vsel %vm753_vm2, %v10606_v38, %v10613_v26  ;;  %v10624_v31 = vsel %vm753_vm2, %v10623_v6, %v10598_v55  ;;  %v16629_v26 = vrot.slane %v23816_v9, 4  ;;  %14942 = vmatmul.f32.vlgmr.msra.gmra.mxu2 %v24164_v19  ;;  %15067 = vmatmul.f32.vlgmr.msrb.gmra.mxu3 %v24161_v29 }
 0xbd1   : > { %v13850_v54 = vpop.f32.mrf.mxu2  ;;  %v10622_v63 = vperm.slane %v10614_v53, %v19327_v57  ;;  %v10630_v27 = vperm.slane %v10624_v31, %v19327_v57  ;;  %v10641_v16 = vrot.slane %v10634_v21, 4  ;;  %v13752_v38 = vadd.f32 %v24152_v12, %v13728_v47  ;;  %v24222_v52 = vpop.f32.mrf.mxu3  ;;  %15137 = vmatpush.msra.mxu2 %v15062_v1  ;;  %15260 = vmatpush.msrb.mxu3 %v24172_v22 }
 0xbd2   : > { %v10612_v55 = vsel %vm753_vm2, %v10611_v49, %v10594_v23  ;;  %v15213_v23 = vand.u32 4294901760, %v15212_v41  ;;  %v15166_v53 = vsel %vm2169_vm3, %v24094_v35, 0  ;;  %v15039_v35 = vsub.f32 %v24184_v11, %v15038_v3 }
 0xbd3   : > { %v10618_v61 = vperm.slane %v10612_v55, %v19327_v57  ;;  %v10637_v56 = vrot.slane %v10622_v63, 4  ;;  %v10639_v13 = vrot.slane %v10630_v27, 4  ;;  %v10642_v14 = vsel %vm753_vm2, 0.0, %v10641_v16 }
 0xbd4   : > { %v10821_v6 = vrot.slane %v10642_v14, 4  ;;  %v10816_v47 = vsel %vm753_vm2, %v10641_v16, %v10630_v27  ;;  %15214 = vmatpush.msra.mxu1 %v15213_v23  ;;  %v16798_v19 = vperm.slane %v23925_v28, %v19312_v42  ;;  %v13776_v27 = vadd.f32 %v24113_v8, %v13752_v38 }
 0xbd5   : > { %v10635_v40 = vrot.slane %v10618_v61, 4  ;;  %v10638_v21 = vsel %vm753_vm2, 0.0, %v10637_v56  ;;  %v10640_v49 = vsel %vm753_vm2, 0.0, %v10639_v13  ;;  %v24249_v16 = vand.u32 4294901760, %v15166_v53 }
 0xbd6   : > { %v10810_v12 = vrot.slane %v10638_v21, 4  ;;  %v10822_v31 = vsel %vm753_vm2, %v10821_v6, %v10640_v49  ;;  %v13999_v51 = vpop.f32.mrf.mxu0  ;;  %v16793_v41 = vperm.slane %v23944_v20, %v19312_v42  ;;  %v16615_v55 = vrot.slane %v23963_v39, 4  ;;  %v14025_v6 = vpop.f32.mrf.mxu1  ;;  %15115 = vmatmul.f32.vlgmr.msrb.gmra.mxu1 %v15038_v3  ;;  %14990 = vmatmul.f32.vlgmr.msra.gmra.mxu0 %v24155_v0 }
 0xbd7   : > { %v10636_v2 = vsel %vm753_vm2, 0.0, %v10635_v40  ;;  %v24238_v63 = vperm.slane %v10822_v31, %v19312_v42  ;;  %v24255_v13 = vperm.slane %v10816_v47, %v19312_v42  ;;  %v16804_v8 = vperm.slane %v23947_v43, %v19312_v42  ;;  %15308 = vmatpush.msrb.mxu1 %v24172_v22  ;;  %15184 = vmatpush.msra.mxu0 %v24172_v22 }
 0xbd8   : > { %v10811_v62 = vsel %vm753_vm2, %v10810_v12, %v10636_v2  ;;  %v24261_v14 = vadd.f32 %v24142_v10, %v13776_v27  ;;  %v10805_v38 = vsel %vm753_vm2, %v10637_v56, %v10618_v61  ;;  %v13877_v23 = vadd.f32 %v24167_v18, %v13850_v54  ;;  %15161 = vmatmul.f32.vlgmr.msra.gmra.mxu3 %v24161_v29 }
 0xbd9   : > { %v24247_v1 = vpop.f32.mrf.mxu2  ;;  %v10839_v28 = vrot.slane %v24238_v63, 4  ;;  %v15361_v20 = vsub.f32 %v24216_v24, %v15360_v30  ;;  %v14026_v40 = vadd.f32 %v14025_v6, %v13999_v51  ;;  %v15040_v21 = vand.u32 4294901760, %v15039_v35  ;;  %v14073_v22 = vpop.f32.mrf.mxu3 }
 0xbda   : > { %v24271_v43 = vperm.slane %v10811_v62, %v19312_v42  ;;  %v24277_v18 = vsub.f32 %v15166_v53, %v24249_v16  ;;  %v15315_v54 = vsel %vm2169_vm3, %v24072_v50, 0  ;;  %v16805_v0 = vrot.slane %v16793_v41, 4 }
 0xbdb   : > { %v10840_v10 = vsel %vm753_vm2, %v10839_v28, %v24255_v13  ;;  %15041 = vmatmul.f32.vlgmr.msrb.gmra.mxu2 %v15040_v21  ;;  %v24283_v61 = vperm.slane %v10805_v38, %v19312_v42  ;;  %v16817_v49 = vrot.slane %v16804_v8, 4  ;;  %v16807_v12 = vrot.slane %v16787_v4, 4 }
 0xbdc   : > { %v10846_v3 = vperm.slane %v10840_v10, %v19327_v57  ;;  %v10827_v56 = vrot.slane %v24271_v43, 4  ;;  %15237 = vmatpush.msrb.mxu2 %v24181_v15  ;;  %v15362_v47 = vand.u32 4294901760, %v15361_v20  ;;  %v16806_v31 = vsel %vm753_vm2, %v16805_v0, %v16787_v4 }
 0xbdd   : > { %v16819_v51 = vrot.slane %v16798_v19, 4  ;;  %v16812_v2 = vperm.slane %v16806_v31, %v19327_v57  ;;  %v16818_v35 = vsel %vm753_vm2, %v16817_v49, %v16798_v19  ;;  %v16808_v27 = vsel %vm753_vm2, %v16793_v41, %v16807_v12 }
 0xbde   : > { %v10851_v53 = vrot.slane %v10846_v3, 4  ;;  %v10828_v50 = vsel %vm753_vm2, %v10827_v56, %v24283_v61  ;;  %15363 = vmatpush.msra.mxu3 %v15362_v47  ;;  %v14097_v62 = vpop.f32.mrf.mxu0  ;;  %v15187_v38 = vand.u32 4294901760, %v24277_v18  ;;  %v16824_v4 = vperm.slane %v16818_v35, %v19327_v57  ;;  %15216 = vmatmul.f32.vlgmr.msra.gmra.mxu1 %v24249_v16 }
 0xbdf   : > { %v10834_v6 = vperm.slane %v10828_v50, %v19327_v57  ;;  %v16816_v20 = vperm.slane %v16808_v27, %v19327_v57  ;;  %v13901_v21 = vadd.f32 %v24191_v36, %v13877_v23  ;;  %v16831_v0 = vrot.slane %v16812_v2, 4  ;;  %15091 = vmatmul.f32.vlgmr.msrb.gmra.mxu0 %v24184_v11  ;;  %15409 = vmatpush.msra.mxu1 %v24186_v60  ;;  %v14119_v23 = vpop.f32.mrf.mxu1 }
 0xbe0   : > { %v16820_v56 = vsel %vm753_vm2, %v16804_v8, %v16819_v51  ;;  %v24301_v19 = vand.u32 4294901760, %v15315_v54  ;;  %15286 = vmatpush.msrb.mxu0 %v15211_v32  ;;  %v16829_v50 = vrot.slane %v16824_v4, 4  ;;  %v16627_v15 = vrot.slane %v24033_v5, 4  ;;  %15264 = vmatmul.f32.vlgmr.msrb.gmra.mxu3 %v15187_v38 }
 0xbe1   : > { %v14049_v28 = vpop.f32.mrf.mxu2  ;;  %v10852_v41 = vsel %vm753_vm2, %v10851_v53, %v10834_v6  ;;  %v10853_v49 = vrot.slane %v10834_v6, 4  ;;  %v16828_v12 = vperm.slane %v16820_v56, %v19327_v57  ;;  %v24310_v36 = vsel %vm753_vm2, %v16824_v4, %v16831_v0  ;;  %15457 = vmatpush.msrb.mxu3 %v24186_v60 }
 0xbe2   : > { %v14050_v10 = vadd.f32 %v14049_v28, %v14026_v40  ;;  %v24307_v31 = vand.u32 4294901760, %v10852_v41  ;;  %v16835_v8 = vrot.slane %v16816_v20, 4  ;;  %v15188_v40 = vsub.f32 %v24277_v18, %v15187_v38 }
 0xbe3   : > { %v10854_v53 = vsel %vm753_vm2, %v10846_v3, %v10853_v49  ;;  %v16833_v51 = vrot.slane %v16828_v12, 4  ;;  %15139 = vmatmul.f32.vlgmr.msra.gmra.mxu2 %v24161_v29  ;;  %v13822_v32 = vadd.f32 %v24139_v37, %v24261_v14  ;;  %v24333_v29 = vsel %vm753_vm2, %v16829_v50, %v16812_v2 }
 0xbe4   : > { %v14074_v47 = vadd.f32 %v14073_v22, %v14050_v10  ;;  %v24318_v22 = vsub.f32 %v10852_v41, %v24307_v31  ;;  %v24320_v35 = vand.u32 4294901760, %v10854_v53  ;;  %v24323_v27 = vsel %vm753_vm2, %v16828_v12, %v16835_v8  ;;  %15333 = vmatpush.msra.mxu2 %v24186_v60 }
 0xbe5   : > { %v24330_v3 = vsel %vm753_vm2, %v16833_v51, %v16816_v20  ;;  %v16618_v28 = vsel %vm753_vm2, %v23963_v39, %v16617_v45  ;;  %v24344_v37 = vsub.f32 %v15315_v54, %v24301_v19  ;;  %v16630_v2 = vsel %vm753_vm2, %v24033_v5, %v16629_v26 }
 0xbe6   : > { %v14098_v11 = vadd.f32 %v14097_v62, %v14074_v47  ;;  %v16616_v62 = vsel %vm753_vm2, %v16615_v55, %v23790_v25  ;;  %v15509_v14 = vand.u32 4294901760, %v24318_v22  ;;  %v10841_v6 = vrot.slane %v24255_v13, 4  ;;  %v14174_v25 = vpop.f32.mrf.mxu3  ;;  %v14198_v13 = vpop.f32.mrf.mxu0  ;;  %15310 = vmatmul.f32.vlgmr.msrb.gmra.mxu1 %v24249_v16 }
 0xbe7   : > { %v13925_v55 = vadd.f32 %v24199_v48, %v13901_v21  ;;  %v15189_v45 = vand.u32 4294901760, %v15188_v40  ;;  %v24358_v20 = vsub.f32 %v10854_v53, %v24320_v35  ;;  %v16628_v5 = vsel %vm753_vm2, %v16627_v15, %v23816_v9  ;;  %v14222_v40 = vpop.f32.mrf.mxu1 }
 0xbe8   : > { %v14120_v4 = vadd.f32 %v14119_v23, %v14098_v11  ;;  %v15510_v54 = vsub.f32 %v24318_v22, %v15509_v14  ;;  %v16061_v26 = vrot.slane %v13822_v32, 4  ;;  %v10829_v60 = vrot.slane %v24283_v61, 4  ;;  %15365 = vmatmul.f32.vlgmr.msra.gmra.mxu3 %v24301_v19 }
 0xbe9   : > { %v14148_v39 = vpop.f32.mrf.mxu2  ;;  %v13949_v48 = vadd.f32 %v24247_v1, %v13925_v55  ;;  %v24366_v21 = vperm.slane %v16618_v28, %v19312_v42  ;;  %15190 = vmatmul.f32.vlgmr.msra.gmra.mxu0 %v15189_v45  ;;  %v15336_v56 = vand.u32 4294901760, %v24344_v37  ;;  %v16622_v41 = vperm.slane %v16616_v62, %v19312_v42  ;;  %15558 = vmatpush.msra.mxu3 %v24307_v31 }
 0xbea   : > { %v14175_v38 = vadd.f32 %v14174_v25, %v14148_v39  ;;  %v15511_v0 = vand.u32 4294901760, %v15510_v54  ;;  %v16638_v9 = vperm.slane %v16630_v2, %v19312_v42  ;;  %v16059_v49 = vrot.slane %v14120_v4, 4  ;;  %15386 = vmatpush.msra.mxu0 %v24216_v24 }
 0xbeb   : > { %v16062_v1 = vsel %vm753_vm2, %v14120_v4, %v16061_v26  ;;  %v24373_v12 = vpop.xlane.xlu1 %13424  ;;  %v16634_v61 = vperm.slane %v16628_v5, %v19312_v42  ;;  %v10842_v47 = vsel %vm753_vm2, %v24238_v63, %v10841_v6  ;;  %15240 = vmatmul.f32.vlgmr.msrb.gmra.mxu2 %v24277_v18  ;;  %v15658_v8 = vand.u32 4294901760, %v24358_v20 }
 0xbec   : > { %v14199_v10 = vadd.f32 %v14198_v13, %v14175_v38  ;;  %18699 = vrcp.f32 %v24373_v12  ;;  %15512 = vmatpush.msrb.mxu1 %v15511_v0  ;;  %v13971_v23 = vadd.f32 %v24222_v52, %v13949_v48  ;;  %15435 = vmatpush.msrb.mxu2 %v15360_v30  ;;  %v10830_v53 = vsel %vm753_vm2, %v24271_v43, %v10829_v60 }
 0xbed   : > { %v16653_v51 = vrot.slane %v24366_v21, 4  ;;  %v16070_v63 = vperm.slane %v16062_v1, %v19312_v42  ;;  %v15337_v18 = vsub.f32 %v24344_v37, %v15336_v56  ;;  %v16641_v11 = vrot.slane %v16622_v41, 4 }
 0xbee   : > { %v14223_v50 = vadd.f32 %v14222_v40, %v14199_v10  ;;  %v16060_v15 = vsel %vm753_vm2, %v16059_v49, %v13822_v32  ;;  %v24393_v24 = vperm.slane %v10830_v53, %v19327_v57  ;;  %v24396_v30 = vperm.slane %v10842_v47, %v19327_v57  ;;  %v14268_v55 = vpop.f32.mrf.mxu3  ;;  %15413 = vmatmul.f32.vlgmr.msra.gmra.mxu1 %v15336_v56 }
 0xbef   : > { %v16639_v43 = vrot.slane %v16634_v61, 4  ;;  %v16651_v62 = vrot.slane %v16638_v9, 4  ;;  %v15659_v2 = vsub.f32 %v24358_v20, %v15658_v8  ;;  %v24403_v6 = vperm.slane %v24086_v7, %v19312_v42  ;;  %15606 = vmatpush.msra.mxu1 %v24307_v31 }
 0xbf0   : > { %v16073_v32 = vrot.slane %v13971_v23, 4  ;;  %v10855_v4 = vrot.slane %v24396_v30, 4  ;;  %v24407_v25 = vsel %vm753_vm2, %v16638_v9, %v16653_v51  ;;  %v16066_v45 = vperm.slane %v16060_v15, %v19312_v42  ;;  %15459 = vmatmul.f32.vlgmr.msrb.gmra.mxu3 %v24301_v19 }
 0xbf1   : > { %v14246_v52 = vpop.f32.mrf.mxu2  ;;  %v16097_v38 = vrot.slane %v16070_v63, 4  ;;  %15288 = vmatmul.f32.vlgmr.msrb.gmra.mxu0 %v24249_v16  ;;  %v15338_v54 = vand.u32 4294901760, %v15337_v18  ;;  %v13612_v26 = vand.u32 2147483647, %v24373_v12  ;;  %v24418_v13 = vsel %vm753_vm2, %v16634_v61, %v16641_v11 }
 0xbf2   : > { %v14247_v28 = vadd.f32 %v14246_v52, %v14223_v50  ;;  %v18700_v39 = vpop.eup %18699  ;;  %15482 = vmatpush.msrb.mxu0 %v24307_v31  ;;  %v10856_v48 = vsel %vm753_vm2, %v10855_v4, %v24393_v24  ;;  %v13614_v60 = vand.u32 2147483648, %v24373_v12  ;;  %v15660_v0 = vand.u32 4294901760, %v15659_v2 }
 0xbf3   : > { %v13604_v7 = vmul.f32 %v18700_v39, %v24373_v12  ;;  %15339 = vmatmul.f32.vlgmr.msra.gmra.mxu2 %v15338_v54  ;;  %v24425_v31 = vsel %vm753_vm2, %v16639_v43, %v16622_v41  ;;  %v24429_v49 = vsel %vm753_vm2, %v16651_v62, %v24366_v21  ;;  %v16085_v1 = vrot.slane %v16066_v45, 4 }
 0xbf4   : > { %v14269_v5 = vadd.f32 %v14268_v55, %v14247_v28  ;;  %15535 = vmatpush.msra.mxu2 %v24318_v22  ;;  %vm13609_vm11 = vweird.f32 %v18700_v39  ;;  %v24433_v47 = vand.u32 4294901760, %v10856_v48  ;;  %15661 = vmatpush.msrb.mxu3 %v15660_v0  ;;  %v24439_v41 = vperm.slane %v24105_v46, %v19312_v42 }
 0xbf5   : > { %v13605_v56 = vsub.f32 1.0, %v13604_v7  ;;  %v24443_v21 = vperm.slane %v24130_v34, %v19312_v42  ;;  %vm13608_vm12 = vweird.f32 %v24373_v12  ;;  %v13615_v43 = vor.u32 1.1754944e-38, %v13614_v60 }
 0xbf6   : > { %v16071_v16 = vrot.slane %v14269_v5, 4  ;;  %v16074_v10 = vsel %vm753_vm2, %v14269_v5, %v16073_v32  ;;  %vm13610_vm13 = vmor %vm13608_vm12, %vm13609_vm11  ;;  %vm13613_vm14 = vcmp.eq.f32.partialorder %v13612_v26, 8.507059e+37  ;;  %v24457_v2 = vsub.f32 %v10856_v48, %v24433_v47 }
 0xbf7   : > { %v16082_v9 = vperm.slane %v16074_v10, %v19312_v42  ;;  %v13606_v40 = vmul.f32 %v18700_v39, %v13605_v56  ;;  %v16707_v7 = vrot.slane %v24403_v6, 4  ;;  %v16697_v10 = vrot.slane %v24443_v21, 4 }
 0xbf8   : > { %v16072_v61 = vsel %vm753_vm2, %v16071_v16, %v13971_v23  ;;  %v15807_v16 = vand.u32 4294901760, %v24457_v2 }
 0xbf9   : > { %v16078_v53 = vperm.slane %v16072_v61, %v19312_v42  ;;  %v16095_v51 = vrot.slane %v16082_v9, 4  ;;  %v16098_v18 = vsel %vm753_vm2, %v16082_v9, %v16097_v38  ;;  %v13607_v50 = vadd.f32 %v18700_v39, %v13606_v40  ;;  %15389 = vmatmul.f32.vlgmr.msra.gmra.mxu0 %v24344_v37 }
 0xbfa   : > { %v16106_v23 = vperm.slane %v16098_v18, %v19327_v57  ;;  %15584 = vmatpush.msra.mxu0 %v15509_v14  ;;  %v16682_v37 = vperm.slane %v24137_v17, %v19312_v42 }
 0xbfb   : > { %v16083_v11 = vrot.slane %v16078_v53, 4  ;;  %v16086_v15 = vsel %vm753_vm2, %v16078_v53, %v16085_v1  ;;  %v16096_v52 = vsel %vm753_vm2, %v16095_v51, %v16070_v63  ;;  %v13611_v34 = vsel %vm13610_vm13, %v18700_v39, %v13607_v50  ;;  %15437 = vmatmul.f32.vlgmr.msrb.gmra.mxu2 %v24301_v19 }
 0xbfc   : > { %v16094_v46 = vperm.slane %v16086_v15, %v19327_v57  ;;  %v16102_v62 = vperm.slane %v16096_v52, %v19327_v57  ;;  %v16113_v28 = vrot.slane %v16106_v23, 4  ;;  %v13616_v63 = vsel %vm13613_vm14, %v13615_v43, %v13611_v34  ;;  %15631 = vmatpush.msrb.mxu2 %v24320_v35 }
 0xbfd   : > { %v16084_v12 = vsel %vm753_vm2, %v16083_v11, %v16066_v45  ;;  %v24464_v39 = vmul.f32 %v23825_v44, %v13616_v63  ;;  %v16695_v19 = vrot.slane %v24439_v41, 4  ;;  %v16709_v1 = vrot.slane %v16682_v37, 4 }
 0xbfe   : > { %v16090_v32 = vperm.slane %v16084_v12, %v19327_v57  ;;  %v16109_v55 = vrot.slane %v16094_v46, 4  ;;  %v16111_v4 = vrot.slane %v16102_v62, 4  ;;  %v16114_v45 = vsel %vm753_vm2, 0.0, %v16113_v28 }
 0xbff   : > { %v16294_v22 = vsel %vm753_vm2, %v16113_v28, %v16102_v62  ;;  %v16299_v14 = vrot.slane %v16114_v45, 4  ;;  %v15464_v44 = vsel %vm2169_vm3, %v24464_v39, 0  ;;  %v16696_v23 = vsel %vm753_vm2, %v16695_v19, %v24443_v21 }
 0xc00   : > { %v16107_v38 = vrot.slane %v16090_v32, 4  ;;  %v16110_v54 = vsel %vm753_vm2, 0.0, %v16109_v55  ;;  %v16112_v5 = vsel %vm753_vm2, 0.0, %v16111_v4  ;;  %v16283_v17 = vsel %vm753_vm2, %v16109_v55, %v16090_v32 }
 0xc01   : > { %v24476_v26 = vand.u32 4294901760, %v15464_v44  ;;  %v16287_v60 = vperm.slane %v16283_v17, %v19312_v42  ;;  %v16288_v0 = vrot.slane %v16110_v54, 4  ;;  %v16298_v56 = vperm.slane %v16294_v22, %v19312_v42 }
 0xc02   : > { %v16108_v48 = vsel %vm753_vm2, 0.0, %v16107_v38  ;;  %v16300_v9 = vsel %vm753_vm2, %v16299_v14, %v16112_v5  ;;  %v16650_v50 = vperm.slane %v24418_v13, %v19327_v57  ;;  %v15808_v52 = vsub.f32 %v24457_v2, %v15807_v16 }
 0xc03   : > { %15514 = vmatmul.f32.vlgmr.msrb.gmra.mxu1 %v24476_v26  ;;  %v15484_v61 = vsub.f32 %v15464_v44, %v24476_v26  ;;  %v16304_v40 = vperm.slane %v16300_v9, %v19312_v42  ;;  %v16307_v53 = vrot.slane %v16287_v60, 4  ;;  %v16289_v51 = vsel %vm753_vm2, %v16288_v0, %v16108_v48 }
 0xc04   : > { %15707 = vmatpush.msrb.mxu1 %v24320_v35  ;;  %v16319_v18 = vrot.slane %v16298_v56, 4  ;;  %v16293_v15 = vperm.slane %v16289_v51, %v19312_v42  ;;  %v16698_v21 = vsel %vm753_vm2, %v24439_v41, %v16697_v10  ;;  %v16702_v62 = vperm.slane %v16696_v23, %v19327_v57 }
 0xc05   : > { %15538 = vmatmul.f32.vlgmr.msra.gmra.mxu2 %v15484_v61  ;;  %v15485_v11 = vand.u32 4294901760, %v15484_v61  ;;  %v16317_v43 = vrot.slane %v16304_v40, 4  ;;  %v16708_v13 = vsel %vm753_vm2, %v16707_v7, %v16682_v37  ;;  %v16706_v55 = vperm.slane %v16698_v21, %v19327_v57 }
 0xc06   : > { %15733 = vmatpush.msra.mxu2 %v15658_v8  ;;  %v16320_v46 = vsel %vm753_vm2, %v16304_v40, %v16319_v18  ;;  %v16308_v28 = vsel %vm753_vm2, %v16293_v15, %v16307_v53  ;;  %v16305_v63 = vrot.slane %v16293_v15, 4  ;;  %v16710_v41 = vsel %vm753_vm2, %v24403_v6, %v16709_v1 }
 0xc07   : > { %15562 = vmatmul.f32.vlgmr.msra.gmra.mxu3 %v15485_v11  ;;  %v16328_v34 = vperm.slane %v16320_v46, %v19327_v57  ;;  %v15486_v12 = vsub.f32 %v15484_v61, %v15485_v11  ;;  %v16316_v8 = vperm.slane %v16308_v28, %v19327_v57  ;;  %v16318_v32 = vsel %vm753_vm2, %v16317_v43, %v16298_v56 }
 0xc08   : > { %15755 = vmatpush.msra.mxu3 %v24320_v35  ;;  %v16306_v45 = vsel %vm753_vm2, %v16305_v63, %v16287_v60  ;;  %v16646_v22 = vperm.slane %v24425_v31, %v19327_v57  ;;  %v16714_v35 = vperm.slane %v16708_v13, %v19327_v57  ;;  %v15809_v5 = vand.u32 4294901760, %v15808_v52  ;;  %v24548_v52 = vpop.f32.mrf.mxu1 }
 0xc09   : > { %v16333_v4 = vrot.slane %v16328_v34, 4  ;;  %v15487_v37 = vand.u32 4294901760, %v15486_v12  ;;  %v16335_v14 = vrot.slane %v16316_v8, 4  ;;  %v24516_v38 = vperm.slane %v16306_v45, %v19327_v57 }
 0xc0a   : > { %v24522_v6 = vperm.slane %v16318_v32, %v19327_v57  ;;  %v16718_v19 = vperm.slane %v16710_v41, %v19327_v57  ;;  %v16719_v44 = vrot.slane %v16702_v62, 4  ;;  %v16721_v17 = vrot.slane %v16706_v55, 4 }
 0xc0b   : > { %v16334_v54 = vsel %vm753_vm2, %v16333_v4, %v16316_v8  ;;  %15488 = vmatmul.f32.vlgmr.msrb.gmra.mxu0 %v15487_v37  ;;  %15608 = vmatmul.f32.vlgmr.msra.gmra.mxu1 %v24476_v26  ;;  %v16336_v31 = vsel %vm753_vm2, %v16328_v34, %v16335_v14  ;;  %v16331_v7 = vrot.slane %v24516_v38, 4  ;;  %v16658_v60 = vperm.slane %v24429_v49, %v19327_v57 }
 0xc0c   : > { %16519 = vrot.lane.b32.xlu1 %v16334_v54, %s18997_s7  ;;  %15684 = vmatpush.msrb.mxu0 %v24358_v20  ;;  %v16725_v48 = vrot.slane %v16718_v19, 4  ;;  %v16663_v10 = vrot.slane %v16646_v22, 4  ;;  %v16665_v0 = vrot.slane %v16650_v50, 4  ;;  %v16722_v9 = vsel %vm753_vm2, 0.0, %v16721_v17 }
 0xc0d   : > { %16535 = vrot.lane.b32.xlu2 %v16336_v31, %s18999_s10  ;;  %15810 = vmatpush.msra.mxu1 %v15809_v5  ;;  %v16332_v56 = vsel %vm753_vm2, %v24522_v6, %v16331_v7  ;;  %v16723_v1 = vrot.slane %v16714_v35, 4  ;;  %v16891_v20 = vsel %vm753_vm2, %v16721_v17, %v16702_v62  ;;  %v24537_v61 = vpop.xlane.xlu0 %13430  ;;  %v16896_v53 = vrot.slane %v16722_v9, 4  ;;  %v18735_v5 = vld [vmem:[%s19176_s13 + $0x20] sm:$0xff] }
 0xc0e   : > { %16503 = vrot.lane.b32.xlu0 %v16332_v56, %s18998_s8  ;;  %v16726_v40 = vsel %vm753_vm2, 0.0, %v16725_v48  ;;  %v16902_v51 = vsel %vm753_vm2, %v16725_v48, %v16714_v35  ;;  %v16662_v49 = vperm.slane %v24407_v25, %v19327_v57  ;;  %18701 = vrcp.f32 %v24537_v61 }
 0xc0f   : > { %v16720_v18 = vsel %vm753_vm2, 0.0, %v16719_v44  ;;  %v16907_v50 = vrot.slane %v16726_v40, 4  ;;  %v16664_v11 = vsel %vm753_vm2, 0.0, %v16663_v10  ;;  %v16666_v15 = vsel %vm753_vm2, 0.0, %v16665_v0 }
 0xc10   : > { %v16897_v23 = vsel %vm753_vm2, %v16896_v53, %v16720_v18  ;;  %v16724_v43 = vsel %vm753_vm2, 0.0, %v16723_v1  ;;  %v24552_v46 = vperm.slane %v16891_v20, %v19312_v42  ;;  %v16667_v21 = vrot.slane %v16658_v60, 4  ;;  %v24600_v18 = vpop.f32.mrf.mxu0 }
 0xc11   : > { %v24555_v25 = vperm.slane %v16897_v23, %v19312_v42  ;;  %v16908_v62 = vsel %vm753_vm2, %v16907_v50, %v16724_v43  ;;  %v16669_v13 = vrot.slane %v16662_v49, 4  ;;  %v16837_v28 = vsel %vm753_vm2, %v16665_v0, %v16646_v22  ;;  %v24602_v23 = vpop.f32.mrf.mxu1 }
 0xc12   : > { %v16842_v34 = vrot.slane %v16666_v15, 4  ;;  %v24562_v12 = vperm.slane %v16902_v51, %v19312_v42  ;;  %v24565_v63 = vperm.slane %v16908_v62, %v19312_v42  ;;  %v16668_v32 = vsel %vm753_vm2, 0.0, %v16667_v21  ;;  %v24607_v62 = vpop.f32.mrf.mxu3 }
 0xc13   : > { %15586 = vmatmul.f32.vlgmr.msra.gmra.mxu0 %v24476_v26  ;;  %v16913_v8 = vrot.slane %v24555_v25, 4  ;;  %v16670_v26 = vsel %vm753_vm2, 0.0, %v16669_v13  ;;  %v16841_v55 = vperm.slane %v16837_v28, %v19312_v42  ;;  %v16848_v4 = vsel %vm753_vm2, %v16669_v13, %v16658_v60 }
 0xc14   : > { %15780 = vmatpush.msra.mxu0 %v24433_v47  ;;  %v16843_v41 = vsel %vm753_vm2, %v16842_v34, %v16664_v11  ;;  %v18702_v37 = vpop.eup %18701  ;;  %v16925_v22 = vrot.slane %v24565_v63, 4  ;;  %v16852_v35 = vperm.slane %v16848_v4, %v19312_v42  ;;  %v16853_v31 = vrot.slane %v16670_v26, 4 }
 0xc15   : > { %v16914_v45 = vsel %vm753_vm2, %v16913_v8, %v24552_v46  ;;  %v16847_v14 = vperm.slane %v16843_v41, %v19312_v42  ;;  %v13632_v54 = vmul.f32 %v18702_v37, %v24537_v61  ;;  %v13640_v7 = vand.u32 2147483647, %v24537_v61 }
 0xc16   : > { %17059 = vrot.lane.b32.xlu0 %v18735_v5, %s18996_s29  ;;  %v24582_v19 = vperm.slane %v16914_v45, %v19327_v57  ;;  %v16926_v44 = vsel %vm753_vm2, %v16925_v22, %v24562_v12  ;;  %v16873_v48 = vrot.slane %v16852_v35, 4  ;;  %v16854_v56 = vsel %vm753_vm2, %v16853_v31, %v16668_v32 }
 0xc17   : > { %v16859_v17 = vrot.slane %v16847_v14, 4  ;;  %v13633_v60 = vsub.f32 1.0, %v13632_v54  ;;  %v24588_v10 = vperm.slane %v16926_v44, %v19327_v57  ;;  %v13642_v9 = vand.u32 2147483648, %v24537_v61 }
 0xc18   : > { %v16939_v0 = vrot.slane %v24582_v19, 4  ;;  %v16858_v1 = vperm.slane %v16854_v56, %v19312_v42  ;;  %v16861_v40 = vrot.slane %v16841_v55, 4  ;;  %vm13637_vm15 = vweird.f32 %v18702_v37 }
 0xc19   : > { %v16860_v20 = vsel %vm753_vm2, %v16859_v17, %v16841_v55  ;;  %v13634_v53 = vmul.f32 %v18702_v37, %v13633_v60  ;;  %vm13636_vm5 = vweird.f32 %v24537_v61  ;;  %v13643_v13 = vor.u32 1.1754944e-38, %v13642_v9  ;;  %v24636_v17 = vpop.f32.mrf.mxu0 }
 0xc1a   : > { %v24597_v51 = vsel %vm753_vm2, %v24588_v10, %v16939_v0  ;;  %v16866_v49 = vperm.slane %v16860_v20, %v19327_v57  ;;  %v16871_v50 = vrot.slane %v16858_v1, 4  ;;  %v16874_v11 = vsel %vm753_vm2, %v16858_v1, %v16873_v48  ;;  %vm13638_vm6 = vmor %vm13636_vm5, %vm13637_vm15  ;;  %v24638_v48 = vpop.f32.mrf.mxu1  ;;  %v24640_v60 = vpop.f32.mrf.mxu3 }
 0xc1b   : > { %v13635_v15 = vadd.f32 %v18702_v37, %v13634_v53  ;;  %v16862_v21 = vsel %vm753_vm2, %v16847_v14, %v16861_v40  ;;  %v16882_v8 = vperm.slane %v16874_v11, %v19327_v57  ;;  %vm13641_vm7 = vcmp.eq.f32.partialorder %v13640_v7, 8.507059e+37 }
 0xc1c   : > { %v16885_v43 = vrot.slane %v16866_v49, 4  ;;  %v16872_v28 = vsel %vm753_vm2, %v16871_v50, %v16852_v35  ;;  %v16870_v34 = vperm.slane %v16862_v21, %v19327_v57  ;;  %v16729_v4 = vrot.slane %v24464_v39, 4  ;;  %v24618_v35 = vpop.f32.mrf.mxu2 }
 0xc1d   : > { %v13639_v32 = vsel %vm13638_vm6, %v18702_v37, %v13635_v15  ;;  %v16878_v26 = vperm.slane %v16872_v28, %v19327_v57  ;;  %v16887_v61 = vrot.slane %v16882_v8, 4  ;;  %v10857_v0 = vrot.slane %v24393_v24, 4 }
 0xc1e   : > { %v13644_v55 = vsel %vm13641_vm7, %v13643_v13, %v13639_v32  ;;  %v16889_v41 = vrot.slane %v16870_v34, 4  ;;  %v16915_v20 = vrot.slane %v24552_v46, 4 }
 0xc1f   : > { %v13673_v45 = vmul.f32 %v23881_v59, %v13644_v55  ;;  %v24616_v22 = vsel %vm753_vm2, %v16878_v26, %v16885_v43  ;;  %v16883_v14 = vrot.slane %v16878_v26, 4  ;;  %v13428_v54 = vpop.xlane.xlu2 %13427  ;;  %v24624_v37 = vsel %vm753_vm2, %v16887_v61, %v16870_v34 }
 0xc20   : > { %v24621_v5 = vsel %vm753_vm2, %v16882_v8, %v16889_v41  ;;  %18703 = vrcp.f32 %v13428_v54  ;;  %v10858_v53 = vsel %vm753_vm2, %v24396_v30, %v10857_v0  ;;  %v13628_v11 = vand.u32 2147483648, %v13428_v54 }
 0xc21   : > { %v16727_v31 = vrot.slane %v13673_v45, 4  ;;  %v24627_v7 = vsel %vm753_vm2, %v13673_v45, %v16729_v4  ;;  %v24634_v44 = vsel %vm753_vm2, %v16883_v14, %v16866_v49  ;;  %v16927_v49 = vrot.slane %v24562_v12, 4  ;;  %v24657_v30 = vpop.f32.mrf.mxu0 }
 0xc22   : > { %v15762_v50 = vsel %vm2169_vm3, %v13673_v45, 0  ;;  %v16916_v24 = vsel %vm753_vm2, %v24555_v25, %v16915_v20  ;;  %v13626_v43 = vand.u32 2147483647, %v13428_v54  ;;  %v24653_v13 = vand.u32 4294901760, %v10858_v53  ;;  %v24662_v55 = vpop.f32.mrf.mxu3 }
 0xc23   : > { %v24631_v59 = vsel %vm753_vm2, %v16727_v31, %v24464_v39  ;;  %v16924_v46 = vperm.slane %v16916_v24, %v19327_v57  ;;  %v16928_v28 = vsel %vm753_vm2, %v24565_v63, %v16927_v49  ;;  %vm13622_vm9 = vweird.f32 %v13428_v54 }
 0xc24   : > { %v24644_v40 = vpop.f32.mrf.mxu2  ;;  %v16936_v34 = vperm.slane %v16928_v28, %v19327_v57  ;;  %v24660_v25 = vand.u32 4294901760, %v15762_v50  ;;  %v13629_v26 = vor.u32 1.1754944e-38, %v13628_v11  ;;  %vm13627_vm11 = vcmp.eq.f32.partialorder %v13626_v43, 8.507059e+37 }
 0xc25   : > { %v16943_v8 = vrot.slane %v16924_v46, 4  ;;  %v24665_v63 = vsub.f32 %v10858_v53, %v24653_v13 }
 0xc26   : > { %v18704_v56 = vpop.eup %18703  ;;  %v16941_v4 = vrot.slane %v16936_v34, 4 }
 0xc27   : > { %v13618_v9 = vmul.f32 %v18704_v56, %v13428_v54  ;;  %v13434_v1 = vpop.xlane.xlu1 %13433  ;;  %vm13623_vm8 = vweird.f32 %v18704_v56  ;;  %v24668_v14 = vsel %vm753_vm2, %v16936_v34, %v16943_v8 }
 0xc28   : > { %18705 = vrcp.f32 %v13434_v1  ;;  %vm13624_vm10 = vmor %vm13622_vm9, %vm13623_vm8  ;;  %v24672_v0 = vsel %vm753_vm2, %v16941_v4, %v16924_v46  ;;  %v13654_v20 = vand.u32 2147483647, %v13434_v1  ;;  %vm13650_vm13 = vweird.f32 %v13434_v1 }
 0xc29   : > { %v13619_v39 = vsub.f32 1.0, %v13618_v9  ;;  %v14621_v21 = vpop.f32.mrf.mxu1  ;;  %v16937_v9 = vrot.slane %v24588_v10, 4 }
 0xc2a   : > { %vm13655_vm15 = vcmp.eq.f32.partialorder %v13654_v20, 8.507059e+37 }
 0xc2b   : > { %v13620_v15 = vmul.f32 %v18704_v56, %v13619_v39  ;;  %v24676_v39 = vsub.f32 %v15762_v50, %v24660_v25  ;;  %v15956_v50 = vand.u32 4294901760, %v24665_v63 }
 0xc2c   : > { %v24678_v49 = vpop.f32.mrf.mxu2 }
 0xc2d   : > { %v13621_v12 = vadd.f32 %v18704_v56, %v13620_v15 }
 0xc2e   : > { %v18706_v32 = vpop.eup %18705 }
 0xc2f   : > { %v13625_v41 = vsel %vm13624_vm10, %v18704_v56, %v13621_v12  ;;  %v13646_v61 = vmul.f32 %v18706_v32, %v13434_v1  ;;  %v13656_v56 = vand.u32 2147483648, %v13434_v1  ;;  %vm13651_vm12 = vweird.f32 %v18706_v32 }
 0xc30   : > { %v13630_v45 = vsel %vm13627_vm11, %v13629_v26, %v13625_v41  ;;  %vm13652_vm14 = vmor %vm13650_vm13, %vm13651_vm12  ;;  %v15783_v12 = vand.u32 4294901760, %v24676_v39 }
 0xc31   : > { %v13672_v54 = vmul.f32 %v23966_v58, %v13630_v45  ;;  %v13647_v31 = vsub.f32 1.0, %v13646_v61  ;;  %v24683_v58 = vsel %vm753_vm2, %v16937_v9, %v24582_v19  ;;  %v24685_v24 = vpop.f32.mrf.mxu1  ;;  %v13657_v46 = vor.u32 1.1754944e-38, %v13656_v56 }
 0xc32   : > { %v14595_v43 = vpop.f32.mrf.mxu0  ;;  %v14324_v19 = vadd.f32 %v24548_v52, %v24600_v18  ;;  %v15957_v52 = vsub.f32 %v24665_v63, %v15956_v50 }
 0xc33   : > { %v13648_v53 = vmul.f32 %v18706_v32, %v13647_v31  ;;  %v15613_v11 = vsel %vm2169_vm3, %v13672_v54, 0  ;;  %v14669_v8 = vpop.f32.mrf.mxu3  ;;  %v14622_v26 = vadd.f32 %v14621_v21, %v14595_v43  ;;  %v16741_v4 = vrot.slane %v13672_v54, 4 }
 0xc34   : > { %v24687_v15 = vand.u32 4294901760, %v15613_v11  ;;  %v14348_v61 = vadd.f32 %v24618_v35, %v14324_v19  ;;  %v14645_v9 = vpop.f32.mrf.mxu2 }
 0xc35   : > { %v13649_v10 = vadd.f32 %v18706_v32, %v13648_v53  ;;  %v14646_v35 = vadd.f32 %v14645_v9, %v14622_v26  ;;  %v15958_v53 = vand.u32 4294901760, %v15957_v52 }
 0xc36   : > { %15663 = vmatmul.f32.vlgmr.msrb.gmra.mxu3 %v24687_v15  ;;  %v15633_v28 = vsub.f32 %v15613_v11, %v24687_v15  ;;  %v14372_v20 = vadd.f32 %v24607_v62, %v14348_v61  ;;  %v14473_v11 = vadd.f32 %v24640_v60, %v24644_v40  ;;  %v17066_v62 = vpop.permute.xlu2 %17065 }
 0xc37   : > { %v13653_v34 = vsel %vm13652_vm14, %v18706_v32, %v13649_v10  ;;  %15856 = vmatpush.msrb.mxu3 %v24433_v47  ;;  %v15784_v32 = vsub.f32 %v24676_v39, %v15783_v12  ;;  %v24720_v40 = vand.u32 4294901760, %v17066_v62 }
 0xc38   : > { %v13658_v1 = vsel %vm13655_vm15, %v13657_v46, %v13653_v34  ;;  %15687 = vmatmul.f32.vlgmr.msrb.gmra.mxu0 %v15633_v28  ;;  %v15634_v41 = vand.u32 4294901760, %v15633_v28  ;;  %v14497_v19 = vadd.f32 %v24657_v30, %v14473_v11 }
 0xc39   : > { %v13674_v45 = vmul.f32 %v24021_v33, %v13658_v1  ;;  %15882 = vmatpush.msrb.mxu0 %v15807_v16  ;;  %v14818_v10 = vpop.f32.mrf.mxu1  ;;  %v15785_v43 = vand.u32 4294901760, %v15784_v32 }
 0xc3a   : > { %15711 = vmatmul.f32.vlgmr.msrb.gmra.mxu1 %v15634_v41  ;;  %v15635_v18 = vsub.f32 %v15633_v28, %v15634_v41  ;;  %v14693_v56 = vpop.f32.mrf.mxu0  ;;  %v14396_v28 = vadd.f32 %v24636_v17, %v14372_v20  ;;  %v14521_v41 = vadd.f32 %v24638_v48, %v14497_v19 }
 0xc3b   : > { %v16739_v31 = vrot.slane %v13674_v45, 4  ;;  %v24705_v21 = vsel %vm753_vm2, %v13674_v45, %v16741_v4  ;;  %15904 = vmatpush.msrb.mxu1 %v24433_v47  ;;  %v14770_v46 = vpop.f32.mrf.mxu3  ;;  %v14670_v47 = vadd.f32 %v14669_v8, %v14646_v35  ;;  %v15911_v60 = vsel %vm2169_vm3, %v13674_v45, 0 }
 0xc3c   : > { %v15636_v33 = vand.u32 4294901760, %v15635_v18  ;;  %v24732_v17 = vand.u32 4294901760, %v15911_v60  ;;  %v14418_v8 = vadd.f32 %v24602_v23, %v14396_v28  ;;  %v14545_v45 = vadd.f32 %v24678_v49, %v14521_v41 }
 0xc3d   : > { %v24710_v16 = vsel %vm753_vm2, %v16739_v31, %v13672_v54  ;;  %v16329_v54 = vrot.slane %v24522_v6, 4  ;;  %v14694_v34 = vadd.f32 %v14693_v56, %v14670_v47  ;;  %v24730_v6 = vsub.f32 %v17066_v62, %v24720_v40 }
 0xc3e   : > { %15637 = vmatmul.f32.vlgmr.msrb.gmra.mxu2 %v15636_v33  ;;  %15757 = vmatmul.f32.vlgmr.msra.gmra.mxu3 %v24687_v15  ;;  %v15931_v48 = vsub.f32 %v15911_v60, %v24732_v17 }
 0xc3f   : > { %15833 = vmatpush.msrb.mxu2 %v24457_v2  ;;  %15959 = vmatpush.msra.mxu3 %v15958_v53  ;;  %v24726_v2 = vsel %vm753_vm2, %v16329_v54, %v24516_v38  ;;  %v17153_v30 = vand.u32 4294901760, %v24730_v6  ;;  %v14716_v61 = vadd.f32 %v24685_v24, %v14694_v34 }
 0xc40   : > { %15786 = vmatmul.f32.vlgmr.msra.gmra.mxu0 %v15785_v43  ;;  %v15932_v31 = vand.u32 4294901760, %v15931_v48 }
 0xc41   : > { %15982 = vmatpush.msra.mxu0 %v24665_v63  ;;  %v14744_v1 = vpop.f32.mrf.mxu2  ;;  %v17154_v23 = vsub.f32 %v24730_v6, %v17153_v30 }
 0xc42   : > { %15812 = vmatmul.f32.vlgmr.msra.gmra.mxu1 %v24660_v25  ;;  %v14771_v4 = vadd.f32 %v14770_v46, %v14744_v1  ;;  %v15933_v11 = vsub.f32 %v15931_v48, %v15932_v31 }
 0xc43   : > { %16005 = vmatpush.msra.mxu1 %v24653_v13  ;;  %v14794_v26 = vpop.f32.mrf.mxu0  ;;  %v14864_v38 = vpop.f32.mrf.mxu3  ;;  %v17155_v24 = vand.u32 4294901760, %v17154_v23 }
 0xc44   : > { %v14795_v52 = vadd.f32 %v14794_v26, %v14771_v4  ;;  %v24745_v18 = vpop.f32.mrf.mxu1 }
 0xc46   : > { %15735 = vmatmul.f32.vlgmr.msra.gmra.mxu2 %v24687_v15  ;;  %15860 = vmatmul.f32.vlgmr.msrb.gmra.mxu3 %v15783_v12  ;;  %v16117_v15 = vrot.slane %v14418_v8, 4  ;;  %v16115_v12 = vrot.slane %v14716_v61, 4  ;;  %v14819_v49 = vadd.f32 %v14818_v10, %v14795_v52 }
 0xc47   : > { %15929 = vmatpush.msra.mxu2 %v24653_v13  ;;  %16053 = vmatpush.msrb.mxu3 %v24653_v13  ;;  %v14567_v13 = vadd.f32 %v24662_v55, %v14545_v45 }
 0xc48   : > { %15884 = vmatmul.f32.vlgmr.msrb.gmra.mxu0 %v24660_v25  ;;  %v16118_v32 = vsel %vm753_vm2, %v14716_v61, %v16117_v15  ;;  %v16116_v33 = vsel %vm753_vm2, %v16115_v12, %v14418_v8 }
 0xc49   : > { %17099 = vmatpush.msrb.mxu0 %v24720_v40  ;;  %v16126_v56 = vperm.slane %v16118_v32, %v19312_v42  ;;  %v16129_v55 = vrot.slane %v14567_v13, 4  ;;  %v16122_v10 = vperm.slane %v16116_v33, %v19312_v42 }
 0xc4a   : > { %15906 = vmatmul.f32.vlgmr.msrb.gmra.mxu1 %v24660_v25 }
 0xc4b   : > { %17156 = vmatpush.msrb.mxu1 %v17155_v24  ;;  %v14842_v9 = vpop.f32.mrf.mxu2  ;;  %v24753_v35 = vpop.f32.mrf.mxu0  ;;  %v16153_v47 = vrot.slane %v16126_v56, 4  ;;  %v16141_v54 = vrot.slane %v16122_v10, 4 }
 0xc4c   : > { %v14843_v20 = vadd.f32 %v14842_v9, %v14819_v49  ;;  %v24759_v25 = vpop.f32.mrf.mxu3  ;;  %v24766_v46 = vpop.f32.mrf.mxu1 }
 0xc4e   : > { %15836 = vmatmul.f32.vlgmr.msrb.gmra.mxu2 %v24676_v39  ;;  %15961 = vmatmul.f32.vlgmr.msra.gmra.mxu3 %v24732_v17  ;;  %v14865_v53 = vadd.f32 %v14864_v38, %v14843_v20 }
 0xc4f   : > { %16031 = vmatpush.msrb.mxu2 %v15956_v50  ;;  %17250 = vmatpush.msra.mxu3 %v24720_v40  ;;  %v15934_v50 = vand.u32 4294901760, %v15933_v11 }
 0xc50   : > { %15985 = vmatmul.f32.vlgmr.msra.gmra.mxu0 %v15931_v48  ;;  %v16127_v43 = vrot.slane %v14865_v53, 4  ;;  %v16130_v39 = vsel %vm753_vm2, %v14865_v53, %v16129_v55 }
 0xc51   : > { %v16138_v62 = vperm.slane %v16130_v39, %v19312_v42 }
 0xc52   : > { %16009 = vmatmul.f32.vlgmr.msra.gmra.mxu1 %v15932_v31  ;;  %v16128_v63 = vsel %vm753_vm2, %v16127_v43, %v14567_v13 }
 0xc53   : > { %v16134_v28 = vperm.slane %v16128_v63, %v19312_v42  ;;  %v16151_v60 = vrot.slane %v16138_v62, 4  ;;  %v16154_v19 = vsel %vm753_vm2, %v16138_v62, %v16153_v47  ;;  %v24772_v34 = vpop.f32.mrf.mxu2  ;;  %v24774_v8 = vpop.f32.mrf.mxu0 }
 0xc54   : > { %v16162_v1 = vperm.slane %v16154_v19, %v19327_v57  ;;  %v24780_v4 = vpop.f32.mrf.mxu3  ;;  %v24789_v49 = vpop.f32.mrf.mxu1 }
 0xc55   : > { %v16139_v26 = vrot.slane %v16134_v28, 4  ;;  %v16142_v41 = vsel %vm753_vm2, %v16134_v28, %v16141_v54  ;;  %v16152_v61 = vsel %vm753_vm2, %v16151_v60, %v16126_v56  ;;  %v17064_v19 = vpop.permute.xlu0 %17063 }
 0xc56   : > { %15935 = vmatmul.f32.vlgmr.msra.gmra.mxu2 %v15934_v50  ;;  %16055 = vmatmul.f32.vlgmr.msrb.gmra.mxu3 %v24732_v17  ;;  %v16150_v38 = vperm.slane %v16142_v41, %v19327_v57  ;;  %v16158_v23 = vperm.slane %v16152_v61, %v19327_v57  ;;  %v16169_v45 = vrot.slane %v16162_v1, 4  ;;  %v17062_v50 = vpop.permute.xlu1 %17061 }
 0xc57   : > { %17206 = vmatpush.msra.mxu2 %v24730_v6  ;;  %v16140_v52 = vsel %vm753_vm2, %v16139_v26, %v16122_v10  ;;  %v24806_v26 = vand.u32 4294901760, %v17062_v50 }
 0xc58   : > { %v16146_v48 = vperm.slane %v16140_v52, %v19327_v57  ;;  %v16165_v24 = vrot.slane %v16150_v38, 4  ;;  %v16167_v15 = vrot.slane %v16158_v23, 4  ;;  %v16170_v12 = vsel %vm753_vm2, 0.0, %v16169_v45 }
 0xc59   : > { %v16353_v13 = vrot.slane %v16170_v12, 4  ;;  %v16348_v32 = vsel %vm753_vm2, %v16169_v45, %v16158_v23 }
 0xc5a   : > { %v16163_v31 = vrot.slane %v16146_v48, 4  ;;  %v16166_v9 = vsel %vm753_vm2, 0.0, %v16165_v24  ;;  %v16168_v33 = vsel %vm753_vm2, 0.0, %v16167_v15  ;;  %v16337_v20 = vsel %vm753_vm2, %v16165_v24, %v16146_v48 }
 0xc5b   : > { %v16341_v53 = vperm.slane %v16337_v20, %v19312_v42  ;;  %v16342_v11 = vrot.slane %v16166_v9, 4  ;;  %v16352_v10 = vperm.slane %v16348_v32, %v19312_v42  ;;  %v16354_v39 = vsel %vm753_vm2, %v16353_v13, %v16168_v33 }
 0xc5c   : > { %v24794_v55 = vpop.f32.mrf.mxu0  ;;  %v16164_v43 = vsel %vm753_vm2, 0.0, %v16163_v31  ;;  %v16358_v62 = vperm.slane %v16354_v39, %v19312_v42  ;;  %v24803_v54 = vpop.f32.mrf.mxu3  ;;  %v24825_v9 = vsub.f32 %v17062_v50, %v24806_v26 }
 0xc5d   : > { %v16343_v47 = vsel %vm753_vm2, %v16342_v11, %v16164_v43  ;;  %v16361_v63 = vrot.slane %v16341_v53, 4  ;;  %v16373_v60 = vrot.slane %v16352_v10, 4  ;;  %v15217_v33 = vpop.f32.mrf.mxu1  ;;  %v14920_v43 = vadd.f32 %v24745_v18, %v24753_v35 }
 0xc5e   : > { %v15042_v56 = vpop.f32.mrf.mxu2  ;;  %16033 = vmatmul.f32.vlgmr.msrb.gmra.mxu2 %v24732_v17  ;;  %v16347_v28 = vperm.slane %v16343_v47, %v19312_v42  ;;  %v16371_v1 = vrot.slane %v16358_v62, 4  ;;  %v24808_v17 = vand.u32 4294901760, %v17064_v19 }
 0xc5f   : > { %v16374_v61 = vsel %vm753_vm2, %v16358_v62, %v16373_v60  ;;  %v14944_v47 = vadd.f32 %v24772_v34, %v14920_v43  ;;  %v15069_v35 = vadd.f32 %v24780_v4, %v15042_v56 }
 0xc60   : > { %v16362_v41 = vsel %vm753_vm2, %v16347_v28, %v16361_v63  ;;  %v16359_v38 = vrot.slane %v16347_v28, 4  ;;  %v16382_v45 = vperm.slane %v16374_v61, %v19327_v57  ;;  %17252 = vmatpush.msra.mxu3 %v24808_v17  ;;  %17101 = vmatpush.msrb.mxu0 %v24808_v17  ;;  %v16372_v48 = vsel %vm753_vm2, %v16371_v1, %v16352_v10 }
 0xc61   : > { %v16370_v23 = vperm.slane %v16362_v41, %v19327_v57  ;;  %v24819_v24 = vsub.f32 %v17064_v19, %v24808_v17  ;;  %v24833_v11 = vperm.slane %v16372_v48, %v19327_v57  ;;  %v14968_v18 = vadd.f32 %v24759_v25, %v14944_v47 }
 0xc62   : > { %v16360_v52 = vsel %vm753_vm2, %v16359_v38, %v16341_v53  ;;  %v16387_v12 = vrot.slane %v16382_v45, 4  ;;  %17254 = vmatpush.msra.mxu3 %v24806_v26  ;;  %17103 = vmatpush.msrb.mxu0 %v24806_v26  ;;  %v17165_v1 = vand.u32 4294901760, %v24825_v9 }
 0xc63   : > { %v16389_v32 = vrot.slane %v16370_v23, 4  ;;  %v24822_v31 = vperm.slane %v16360_v52, %v19327_v57  ;;  %17209 = vmatpush.msra.mxu2 %v24819_v24  ;;  %v17159_v63 = vand.u32 4294901760, %v24819_v24 }
 0xc64   : > { %v16388_v20 = vsel %vm753_vm2, %v16387_v12, %v16370_v23  ;;  %v15265_v62 = vpop.f32.mrf.mxu3  ;;  %v14992_v23 = vadd.f32 %v24774_v8, %v14968_v18  ;;  %v17166_v25 = vsub.f32 %v24825_v9, %v17165_v1 }
 0xc65   : > { %v16390_v53 = vsel %vm753_vm2, %v16382_v45, %v16389_v32  ;;  %v16385_v10 = vrot.slane %v24822_v31, 4  ;;  %16521 = vrot.lane.b32.xlu1 %v16388_v20, %s18997_s7  ;;  %17212 = vmatpush.msra.mxu2 %v24825_v9  ;;  %v17160_v41 = vsub.f32 %v24819_v24, %v17159_v63  ;;  %v15311_v61 = vpop.f32.mrf.mxu1  ;;  %v15093_v45 = vadd.f32 %v24794_v55, %v15069_v35 }
 0xc66   : > { %v15140_v15 = vpop.f32.mrf.mxu2  ;;  %v15191_v13 = vpop.f32.mrf.mxu0  ;;  %16537 = vrot.lane.b32.xlu0 %v16390_v53, %s18999_s10  ;;  %v17167_v56 = vand.u32 4294901760, %v17166_v25  ;;  %v15014_v32 = vadd.f32 %v24766_v46, %v14992_v23 }
 0xc67   : > { %v16386_v39 = vsel %vm753_vm2, %v24833_v11, %v16385_v10  ;;  %v15218_v50 = vadd.f32 %v15217_v33, %v15191_v13  ;;  %v17161_v38 = vand.u32 4294901760, %v17160_v41  ;;  %v15117_v33 = vadd.f32 %v24789_v49, %v15093_v45  ;;  %v16536_v41 = vpop.permute.xlu2 %16535 }
 0xc68   : > { %16505 = vrot.lane.b32.xlu2 %v16386_v39, %s18998_s8  ;;  %v16173_v10 = vrot.slane %v15014_v32, 4 }
 0xc69   : > { %17162 = vmatpush.msrb.mxu1 %v17161_v38  ;;  %v15141_v8 = vadd.f32 %v15140_v15, %v15117_v33 }
 0xc6b   : > { %17168 = vmatpush.msrb.mxu1 %v17167_v56  ;;  %v15163_v39 = vadd.f32 %v24803_v54, %v15141_v8 }
 0xc6c   : > { %v15366_v4 = vpop.f32.mrf.mxu3 }
 0xc6d   : > { %v15414_v43 = vpop.f32.mrf.mxu1 }
 0xc6e   : > { %v15241_v28 = vpop.f32.mrf.mxu2  ;;  %v15289_v60 = vpop.f32.mrf.mxu0 }
 0xc6f   : > { %v15242_v19 = vadd.f32 %v15241_v28, %v15218_v50 }
 0xc71   : > { %v15266_v34 = vadd.f32 %v15265_v62, %v15242_v19  ;;  %v16185_v19 = vrot.slane %v15163_v39, 4 }
 0xc73   : > { %v15290_v52 = vadd.f32 %v15289_v60, %v15266_v34 }
 0xc74   : > { %v15460_v49 = vpop.f32.mrf.mxu3 }
 0xc75   : > { %v15312_v48 = vadd.f32 %v15311_v61, %v15290_v52 }
 0xc76   : > { %v15340_v12 = vpop.f32.mrf.mxu2  ;;  %v15390_v13 = vpop.f32.mrf.mxu0 }
 0xc77   : > { %v15367_v20 = vadd.f32 %v15366_v4, %v15340_v12  ;;  %v16171_v55 = vrot.slane %v15312_v48, 4  ;;  %v16174_v47 = vsel %vm753_vm2, %v15312_v48, %v16173_v10 }
 0xc78   : > { %v16182_v46 = vperm.slane %v16174_v47, %v19312_v42 }
 0xc79   : > { %v15391_v53 = vadd.f32 %v15390_v13, %v15367_v20  ;;  %v16172_v50 = vsel %vm753_vm2, %v16171_v55, %v15014_v32 }
 0xc7a   : > { %v16178_v34 = vperm.slane %v16172_v50, %v19312_v42  ;;  %v16209_v25 = vrot.slane %v16182_v46, 4 }
 0xc7b   : > { %v15415_v62 = vadd.f32 %v15414_v43, %v15391_v53 }
 0xc7e   : > { %v15438_v28 = vpop.f32.mrf.mxu2  ;;  %v16520_v35 = vpop.permute.xlu1 %16519 }
 0xc7f   : > { %v15439_v60 = vadd.f32 %v15438_v28, %v15415_v62 }
 0xc80   : > { %v16504_v18 = vpop.permute.xlu0 %16503 }
 0xc81   : > { %v16547_v15 = vsel %vm2169_vm3, %v24726_v2, %v16504_v18  ;;  %v15461_v54 = vadd.f32 %v15460_v49, %v15439_v60  ;;  %v16197_v2 = vrot.slane %v16178_v34, 4 }
 0xc82   : > { %v16551_v61 = vsel %vm7862_vm0, %v16547_v15, %v16520_v35  ;;  %v16738_v15 = vperm.slane %v24627_v7, %v19312_v42 }
 0xc83   : > { %v16555_v38 = vsel %vm7867_vm4, %v16551_v61, %v16536_v41  ;;  %v16183_v23 = vrot.slane %v15461_v54, 4  ;;  %v16186_v45 = vsel %vm753_vm2, %v15461_v54, %v16185_v19 }
 0xc84   : > { %v17075_v52 = vsel %vm405_vm1, %v16555_v38, 0  ;;  %v16194_v4 = vperm.slane %v16186_v45, %v19312_v42 }
 0xc85   : > { %v24871_v56 = vand.u32 4294901760, %v17075_v52  ;;  %v16184_v48 = vsel %vm753_vm2, %v16183_v23, %v15163_v39 }
 0xc86   : > { %v16190_v12 = vperm.slane %v16184_v48, %v19312_v42  ;;  %v16207_v13 = vrot.slane %v16194_v4, 4  ;;  %v16210_v32 = vsel %vm753_vm2, %v16194_v4, %v16209_v25 }
 0xc87   : > { %v17107_v33 = vsub.f32 %v17075_v52, %v24871_v56  ;;  %v16218_v20 = vperm.slane %v16210_v32, %v19327_v57  ;;  %v16750_v52 = vperm.slane %v24705_v21, %v19312_v42  ;;  %v16734_v21 = vperm.slane %v24631_v59, %v19312_v42 }
 0xc88   : > { %v17060_v8 = vpop.permute.xlu0 %17059  ;;  %v16195_v53 = vrot.slane %v16190_v12, 4  ;;  %v16198_v55 = vsel %vm753_vm2, %v16190_v12, %v16197_v2  ;;  %v16208_v10 = vsel %vm753_vm2, %v16207_v13, %v16182_v46 }
 0xc89   : > { %v24880_v43 = vand.u32 4294901760, %v17060_v8  ;;  %v16206_v47 = vperm.slane %v16198_v55, %v19327_v57  ;;  %v16214_v39 = vperm.slane %v16208_v10, %v19327_v57  ;;  %v16225_v62 = vrot.slane %v16218_v20, 4 }
 0xc8a   : > { %v16196_v50 = vsel %vm753_vm2, %v16195_v53, %v16178_v34  ;;  %v17108_v60 = vand.u32 4294901760, %v17107_v33  ;;  %v16765_v20 = vrot.slane %v16738_v15, 4  ;;  %v16763_v55 = vrot.slane %v16750_v52, 4 }
 0xc8b   : > { %v17170_v28 = vsub.f32 %v17060_v8, %v24880_v43  ;;  %17256 = vmatpush.msra.mxu3 %v24880_v43  ;;  %17105 = vmatpush.msrb.mxu0 %v24880_v43  ;;  %v16202_v18 = vperm.slane %v16196_v50, %v19327_v57  ;;  %v16221_v49 = vrot.slane %v16206_v47, 4  ;;  %v16223_v46 = vrot.slane %v16214_v39, 4 }
 0xc8c   : > { %v16226_v35 = vsel %vm753_vm2, 0.0, %v16225_v62  ;;  %17260 = vmatmul.f32.vlgmr.msra.gmra.mxu3 %v17108_v60  ;;  %v17109_v34 = vsub.f32 %v17107_v33, %v17108_v60  ;;  %v16402_v4 = vsel %vm753_vm2, %v16225_v62, %v16214_v39  ;;  %v16753_v39 = vrot.slane %v16734_v21, 4 }
 0xc8d   : > { %17297 = vmatpush.msra.mxu0 %v17153_v30  ;;  %v16407_v19 = vrot.slane %v16226_v35, 4  ;;  %v17171_v41 = vand.u32 4294901760, %v17170_v28  ;;  %17215 = vmatpush.msra.mxu2 %v17170_v28  ;;  %v16222_v54 = vsel %vm753_vm2, 0.0, %v16221_v49  ;;  %v16219_v61 = vrot.slane %v16202_v18, 4 }
 0xc8e   : > { %17218 = vmatmul.f32.vlgmr.msra.gmra.mxu2 %v17107_v33  ;;  %v16224_v38 = vsel %vm753_vm2, 0.0, %v16223_v46  ;;  %v16391_v23 = vsel %vm753_vm2, %v16221_v49, %v16202_v18  ;;  %v16396_v6 = vrot.slane %v16222_v54, 4  ;;  %v17110_v30 = vand.u32 4294901760, %v17109_v34 }
 0xc8f   : > { %17301 = vmatpush.msra.mxu0 %v17159_v63  ;;  %v17172_v45 = vsub.f32 %v17170_v28, %v17171_v41  ;;  %v16395_v7 = vperm.slane %v16391_v23, %v19312_v42  ;;  %v16220_v25 = vsel %vm753_vm2, 0.0, %v16219_v61  ;;  %v16408_v2 = vsel %vm753_vm2, %v16407_v19, %v16224_v38 }
 0xc90   : > { %17111 = vmatmul.f32.vlgmr.msrb.gmra.mxu0 %v17110_v30  ;;  %v16397_v63 = vsel %vm753_vm2, %v16396_v6, %v16220_v25  ;;  %v16406_v48 = vperm.slane %v16402_v4, %v19312_v42  ;;  %v16412_v12 = vperm.slane %v16408_v2, %v19312_v42  ;;  %v16746_v33 = vperm.slane %v24710_v16, %v19312_v42 }
 0xc91   : > { %17305 = vmatpush.msra.mxu0 %v17165_v1  ;;  %v17173_v24 = vand.u32 4294901760, %v17172_v45  ;;  %v16401_v13 = vperm.slane %v16397_v63, %v19312_v42  ;;  %v16415_v32 = vrot.slane %v16395_v7, 4  ;;  %v16766_v18 = vsel %vm753_vm2, %v16750_v52, %v16765_v20 }
 0xc92   : > { %v16427_v9 = vrot.slane %v16406_v48, 4  ;;  %v16425_v1 = vrot.slane %v16412_v12, 4  ;;  %v16751_v50 = vrot.slane %v16746_v33, 4  ;;  %v16764_v34 = vsel %vm753_vm2, %v16763_v55, %v16738_v15 }
 0xc93   : > { %17309 = vmatpush.msra.mxu0 %v17171_v41  ;;  %17174 = vmatpush.msrb.mxu1 %v17173_v24  ;;  %v16416_v8 = vsel %vm753_vm2, %v16401_v13, %v16415_v32  ;;  %v16413_v53 = vrot.slane %v16401_v13, 4  ;;  %v16754_v41 = vsel %vm753_vm2, %v16746_v33, %v16753_v39  ;;  %v16770_v61 = vperm.slane %v16764_v34, %v19327_v57  ;;  %v15489_v34 = vpop.f32.mrf.mxu0 }
 0xc94   : > { %17176 = vmatmul.f32.vlgmr.msrb.gmra.mxu1 %v24871_v56  ;;  %v16424_v10 = vperm.slane %v16416_v8, %v19327_v57  ;;  %v16428_v59 = vsel %vm753_vm2, %v16412_v12, %v16427_v9  ;;  %v16426_v47 = vsel %vm753_vm2, %v16425_v1, %v16406_v48  ;;  %v16762_v54 = vperm.slane %v16754_v41, %v19327_v57 }
 0xc95   : > { %17340 = vmatpush.msra.mxu1 %v24720_v40  ;;  %v16436_v16 = vperm.slane %v16428_v59, %v19327_v57  ;;  %v16414_v62 = vsel %vm753_vm2, %v16413_v53, %v16395_v7  ;;  %v24929_v46 = vperm.slane %v16426_v47, %v19327_v57  ;;  %v16774_v40 = vperm.slane %v16766_v18, %v19327_v57 }
 0xc96   : > { %v16443_v28 = vrot.slane %v16424_v10, 4  ;;  %v24924_v60 = vperm.slane %v16414_v62, %v19327_v57  ;;  %v16383_v15 = vrot.slane %v24833_v11, 4  ;;  %v16777_v30 = vrot.slane %v16762_v54, 4  ;;  %v15563_v54 = vpop.f32.mrf.mxu3 }
 0xc97   : > { %17342 = vmatpush.msra.mxu1 %v24808_v17  ;;  %v16441_v49 = vrot.slane %v16436_v16, 4  ;;  %v16781_v38 = vrot.slane %v16774_v40, 4  ;;  %v16779_v45 = vrot.slane %v16770_v61, 4 }
 0xc98   : > { %v16444_v35 = vsel %vm753_vm2, %v16436_v16, %v16443_v28  ;;  %v16439_v19 = vrot.slane %v24924_v60, 4  ;;  %v24953_v25 = vsel %vm753_vm2, %v16383_v15, %v24822_v31 }
 0xc99   : > { %17344 = vmatpush.msra.mxu1 %v24806_v26  ;;  %v16442_v17 = vsel %vm753_vm2, %v16441_v49, %v16424_v10  ;;  %16539 = vrot.lane.b32.xlu0 %v16444_v35, %s18999_s10  ;;  %v16752_v26 = vsel %vm753_vm2, %v16751_v50, %v16734_v21  ;;  %v16782_v7 = vsel %vm753_vm2, 0.0, %v16781_v38  ;;  %v16956_v52 = vsel %vm753_vm2, %v16781_v38, %v16770_v61  ;;  %v15539_v38 = vpop.f32.mrf.mxu2 }
 0xc9a   : > { %16523 = vrot.lane.b32.xlu1 %v16442_v17, %s18997_s7  ;;  %v16440_v23 = vsel %vm753_vm2, %v24929_v46, %v16439_v19  ;;  %v16758_v6 = vperm.slane %v16752_v26, %v19327_v57  ;;  %v16780_v2 = vsel %vm753_vm2, 0.0, %v16779_v45  ;;  %v16960_v63 = vperm.slane %v16956_v52, %v19312_v42  ;;  %v15515_v17 = vpop.f32.mrf.mxu1 }
 0xc9b   : > { %17346 = vmatpush.msra.mxu1 %v24880_v43  ;;  %16507 = vrot.lane.b32.xlu2 %v16440_v23, %s18998_s8  ;;  %v16778_v43 = vsel %vm753_vm2, 0.0, %v16777_v30  ;;  %v16961_v48 = vrot.slane %v16782_v7, 4  ;;  %v15587_v61 = vpop.f32.mrf.mxu0 }
 0xc9c   : > { %v16775_v4 = vrot.slane %v16758_v6, 4  ;;  %v16945_v24 = vsel %vm753_vm2, %v16777_v30, %v16758_v6  ;;  %v16950_v11 = vrot.slane %v16778_v43, 4  ;;  %v16981_v32 = vrot.slane %v16960_v63, 4 }
 0xc9d   : > { %v16949_v21 = vperm.slane %v16945_v24, %v19312_v42  ;;  %v16962_v31 = vsel %vm753_vm2, %v16961_v48, %v16780_v2  ;;  %v15516_v43 = vadd.f32 %v15515_v17, %v15489_v34 }
 0xc9e   : > { %v16776_v12 = vsel %vm753_vm2, 0.0, %v16775_v4  ;;  %v16966_v9 = vperm.slane %v16962_v31, %v19312_v42  ;;  %v16437_v4 = vrot.slane %v24929_v46, 4 }
 0xc9f   : > { %v16951_v13 = vsel %vm753_vm2, %v16950_v11, %v16776_v12  ;;  %v16969_v1 = vrot.slane %v16949_v21, 4  ;;  %v15540_v11 = vadd.f32 %v15539_v38, %v15516_v43 }
 0xca0   : > { %v16955_v33 = vperm.slane %v16951_v13, %v19312_v42  ;;  %v16979_v8 = vrot.slane %v16966_v9, 4  ;;  %v16982_v55 = vsel %vm753_vm2, %v16966_v9, %v16981_v32  ;;  %v24988_v24 = vsel %vm753_vm2, %v16437_v4, %v24924_v60 }
 0xca1   : > { %v16990_v59 = vperm.slane %v16982_v55, %v19327_v57  ;;  %v15564_v32 = vadd.f32 %v15563_v54, %v15540_v11 }
 0xca2   : > { %v16967_v20 = vrot.slane %v16955_v33, 4  ;;  %v16970_v53 = vsel %vm753_vm2, %v16955_v33, %v16969_v1  ;;  %v16980_v39 = vsel %vm753_vm2, %v16979_v8, %v16960_v63  ;;  %v15609_v23 = vpop.f32.mrf.mxu1 }
 0xca3   : > { %v16978_v10 = vperm.slane %v16970_v53, %v19327_v57  ;;  %v16986_v62 = vperm.slane %v16980_v39, %v19327_v57  ;;  %v16995_v50 = vrot.slane %v16990_v59, 4  ;;  %v15588_v9 = vadd.f32 %v15587_v61, %v15564_v32 }
 0xca4   : > { %v16968_v47 = vsel %vm753_vm2, %v16967_v20, %v16949_v21 }
 0xca5   : > { %v16974_v16 = vperm.slane %v16968_v47, %v19327_v57  ;;  %v16997_v28 = vrot.slane %v16978_v10, 4  ;;  %v24974_v49 = vsel %vm753_vm2, %v16995_v50, %v16978_v10  ;;  %v16991_v35 = vrot.slane %v16986_v62, 4 }
 0xca6   : > { %v15610_v53 = vadd.f32 %v15609_v23, %v15588_v9 }
 0xca7   : > { %v16993_v18 = vrot.slane %v16974_v16, 4  ;;  %v24977_v40 = vsel %vm753_vm2, %v16990_v59, %v16997_v28  ;;  %v24983_v41 = vsel %vm753_vm2, %v16991_v35, %v16974_v16 }
 0xca8   : > { %v16229_v54 = vrot.slane %v15610_v53, 4 }
 0xca9   : > { %v24980_v19 = vsel %vm753_vm2, %v16986_v62, %v16993_v18 }
 0xcb5   : > { %v15688_v15 = vpop.f32.mrf.mxu0 }
 0xcb7   : > { %v15712_v6 = vpop.f32.mrf.mxu1 }
 0xcb9   : > { %v15664_v26 = vpop.f32.mrf.mxu3 }
 0xcbd   : > { %v15787_v7 = vpop.f32.mrf.mxu0 }
 0xcbf   : > { %v15813_v2 = vpop.f32.mrf.mxu1 }
 0xcc0   : > { %v15814_v48 = vadd.f32 %v15813_v2, %v15787_v7 }
 0xcc1   : > { %v15638_v30 = vpop.f32.mrf.mxu2  ;;  %v15758_v45 = vpop.f32.mrf.mxu3 }
 0xcc2   : > { %v15665_v13 = vadd.f32 %v15664_v26, %v15638_v30  ;;  %v16506_v46 = vpop.permute.xlu2 %16505 }
 0xcc3   : > { %v16548_v60 = vsel %vm2169_vm3, %v24953_v25, %v16506_v46 }
 0xcc4   : > { %v15689_v20 = vadd.f32 %v15688_v15, %v15665_v13 }
 0xcc5   : > { %v15885_v12 = vpop.f32.mrf.mxu0 }
 0xcc6   : > { %v15713_v59 = vadd.f32 %v15712_v6, %v15689_v20 }
 0xcc7   : > { %v15907_v1 = vpop.f32.mrf.mxu1 }
 0xcc9   : > { %v15736_v52 = vpop.f32.mrf.mxu2  ;;  %v15861_v63 = vpop.f32.mrf.mxu3 }
 0xcca   : > { %v15737_v18 = vadd.f32 %v15736_v52, %v15713_v59 }
 0xccc   : > { %v15759_v25 = vadd.f32 %v15758_v45, %v15737_v18 }
 0xccd   : > { %v15986_v50 = vpop.f32.mrf.mxu0 }
 0xcce   : > { %v16241_v11 = vrot.slane %v15759_v25, 4 }
 0xccf   : > { %v16010_v23 = vpop.f32.mrf.mxu1 }
 0xcd1   : > { %v15837_v21 = vpop.f32.mrf.mxu2  ;;  %v15962_v55 = vpop.f32.mrf.mxu3 }
 0xcd2   : > { %v15838_v31 = vadd.f32 %v15837_v21, %v15814_v48 }
 0xcd4   : > { %v15862_v33 = vadd.f32 %v15861_v63, %v15838_v31 }
 0xcd6   : > { %v15886_v8 = vadd.f32 %v15885_v12, %v15862_v33 }
 0xcd7   : > { %v16522_v39 = vpop.permute.xlu1 %16521 }
 0xcd8   : > { %v15908_v47 = vadd.f32 %v15907_v1, %v15886_v8  ;;  %v16538_v16 = vpop.permute.xlu0 %16537  ;;  %v16552_v28 = vsel %vm7862_vm0, %v16548_v60, %v16522_v39 }
 0xcd9   : > { %v15936_v10 = vpop.f32.mrf.mxu2  ;;  %v16556_v35 = vsel %vm7867_vm4, %v16552_v28, %v16538_v16  ;;  %v16056_v2 = vpop.f32.mrf.mxu3 }
 0xcda   : > { %v15963_v62 = vadd.f32 %v15962_v55, %v15936_v10  ;;  %v17078_v17 = vsel %vm405_vm1, %v16556_v35, 0  ;;  %v16227_v61 = vrot.slane %v15908_v47, 4  ;;  %v16230_v26 = vsel %vm753_vm2, %v15908_v47, %v16229_v54 }
 0xcdb   : > { %v24995_v38 = vand.u32 4294901760, %v17078_v17  ;;  %v16238_v43 = vperm.slane %v16230_v26, %v19312_v42 }
 0xcdc   : > { %v15987_v34 = vadd.f32 %v15986_v50, %v15963_v62  ;;  %v16228_v7 = vsel %vm753_vm2, %v16227_v61, %v15610_v53 }
 0xcdd   : > { %v17115_v15 = vsub.f32 %v17078_v17, %v24995_v38  ;;  %17180 = vmatmul.f32.gmra.mxu1 %v24995_v38  ;;  %v16234_v48 = vperm.slane %v16228_v7, %v19312_v42  ;;  %v16265_v31 = vrot.slane %v16238_v43, 4 }
 0xcde   : > { %v16011_v6 = vadd.f32 %v16010_v23, %v15987_v34 }
 0xcdf   : > { %17223 = vmatmul.f32.gmra.mxu2 %v17115_v15  ;;  %v17116_v52 = vand.u32 4294901760, %v17115_v15  ;;  %v16253_v9 = vrot.slane %v16234_v48, 4 }
 0xce1   : > { %v16034_v30 = vpop.f32.mrf.mxu2  ;;  %17266 = vmatmul.f32.gmra.mxu3 %v17116_v52  ;;  %v17117_v45 = vsub.f32 %v17115_v15, %v17116_v52 }
 0xce2   : > { %v16035_v4 = vadd.f32 %v16034_v30, %v16011_v6 }
 0xce3   : > { %v17118_v13 = vand.u32 4294901760, %v17117_v45 }
 0xce4   : > { %v16057_v63 = vadd.f32 %v16056_v2, %v16035_v4 }
 0xce5   : > { %17119 = vmatmul.f32.gmra.mxu0 %v17118_v13 }
 0xce6   : > { %v16239_v12 = vrot.slane %v16057_v63, 4  ;;  %v16242_v21 = vsel %vm753_vm2, %v16057_v63, %v16241_v11 }
 0xce7   : > { %v16250_v32 = vperm.slane %v16242_v21, %v19312_v42 }
 0xce8   : > { %v16240_v33 = vsel %vm753_vm2, %v16239_v12, %v15759_v25 }
 0xce9   : > { %v16246_v1 = vperm.slane %v16240_v33, %v19312_v42  ;;  %v16263_v20 = vrot.slane %v16250_v32, 4  ;;  %v16266_v8 = vsel %vm753_vm2, %v16250_v32, %v16265_v31 }
 0xcea   : > { %v16274_v46 = vperm.slane %v16266_v8, %v19327_v57 }
 0xceb   : > { %v16251_v53 = vrot.slane %v16246_v1, 4  ;;  %v16254_v55 = vsel %vm753_vm2, %v16246_v1, %v16253_v9  ;;  %v16264_v10 = vsel %vm753_vm2, %v16263_v20, %v16238_v43 }
 0xcec   : > { %v16262_v60 = vperm.slane %v16254_v55, %v19327_v57  ;;  %v16270_v59 = vperm.slane %v16264_v10, %v19327_v57  ;;  %v16281_v47 = vrot.slane %v16274_v46, 4  ;;  %v25701_v46 = vld [vmem:[#allocation40_spill] sm:$0xff] }
 0xced   : > { %v16252_v39 = vsel %vm753_vm2, %v16251_v53, %v16234_v48 }
 0xcee   : > { %v16258_v16 = vperm.slane %v16252_v39, %v19327_v57  ;;  %v16277_v62 = vrot.slane %v16262_v60, 4  ;;  %v16279_v50 = vrot.slane %v16270_v59, 4  ;;  %v16282_v28 = vsel %vm753_vm2, 0.0, %v16281_v47 }
 0xcef   : > { %v16461_v18 = vrot.slane %v16282_v28, 4  ;;  %v16456_v35 = vsel %vm753_vm2, %v16281_v47, %v16270_v59 }
 0xcf0   : > { %v16278_v34 = vsel %vm753_vm2, 0.0, %v16277_v62  ;;  %v16275_v17 = vrot.slane %v16258_v16, 4  ;;  %v16280_v54 = vsel %vm753_vm2, 0.0, %v16279_v50  ;;  %v16445_v61 = vsel %vm753_vm2, %v16277_v62, %v16258_v16 }
 0xcf1   : > { %v16450_v23 = vrot.slane %v16278_v34, 4  ;;  %v16449_v25 = vperm.slane %v16445_v61, %v19312_v42  ;;  %v16460_v26 = vperm.slane %v16456_v35, %v19312_v42  ;;  %v16462_v15 = vsel %vm753_vm2, %v16461_v18, %v16280_v54 }
 0xcf2   : > { %v16276_v6 = vsel %vm753_vm2, 0.0, %v16275_v17  ;;  %v16466_v30 = vperm.slane %v16462_v15, %v19312_v42 }
 0xcf3   : > { %v16451_v7 = vsel %vm753_vm2, %v16450_v23, %v16276_v6  ;;  %v16469_v52 = vrot.slane %v16449_v25, 4  ;;  %v16481_v4 = vrot.slane %v16460_v26, 4 }
 0xcf4   : > { %v16455_v43 = vperm.slane %v16451_v7, %v19312_v42  ;;  %v16479_v2 = vrot.slane %v16466_v30, 4 }
 0xcf5   : > { %v16482_v11 = vsel %vm753_vm2, %v16466_v30, %v16481_v4  ;;  %v16508_v53 = vpop.permute.xlu2 %16507 }
 0xcf6   : > { %v16470_v63 = vsel %vm753_vm2, %v16455_v43, %v16469_v52  ;;  %v16490_v45 = vperm.slane %v16482_v11, %v19327_v57  ;;  %v16467_v48 = vrot.slane %v16455_v43, 4  ;;  %v16480_v31 = vsel %vm753_vm2, %v16479_v2, %v16460_v26 }
 0xcf7   : > { %v16478_v12 = vperm.slane %v16470_v63, %v19327_v57  ;;  %v16486_v1 = vperm.slane %v16480_v31, %v19327_v57  ;;  %v16549_v10 = vsel %vm2169_vm3, %v24988_v24, %v16508_v53 }
 0xcf8   : > { %v16495_v21 = vrot.slane %v16490_v45, 4  ;;  %v16468_v13 = vsel %vm753_vm2, %v16467_v48, %v16449_v25 }
 0xcf9   : > { %v16497_v32 = vrot.slane %v16478_v12, 4  ;;  %v16474_v33 = vperm.slane %v16468_v13, %v19327_v57  ;;  %v16491_v18 = vrot.slane %v16486_v1, 4 }
 0xcfa   : > { %v16496_v42 = vsel %vm753_vm2, %v16495_v21, %v16478_v12 }
 0xcfb   : > { %16525 = vrot.lane.b32.xlu1 %v16496_v42, %s18997_s7  ;;  %v16498_v9 = vsel %vm753_vm2, %v16490_v45, %v16497_v32  ;;  %v16493_v20 = vrot.slane %v16474_v33, 4  ;;  %v16492_v35 = vsel %vm753_vm2, %v16491_v18, %v16474_v33 }
 0xcfc   : > { %16541 = vrot.lane.b32.xlu0 %v16498_v9, %s18999_s10 }
 0xcfd   : > { %v16494_v8 = vsel %vm753_vm2, %v16486_v1, %v16493_v20 }
 0xcfe   : > { %16509 = vrot.lane.b32.xlu2 %v16494_v8, %s18998_s8 }
 0xd06   : > { %17071 = vrot.lane.b32.xlu2 %v25701_v46, %s18996_s29 }
 0xd0b   : > { %v16540_v55 = vpop.permute.xlu0 %16539 }
 0xd0c   : > { %v16524_v60 = vpop.permute.xlu1 %16523 }
 0xd0d   : > { %v16553_v59 = vsel %vm7862_vm0, %v16549_v10, %v16524_v60  ;;  %v17112_v4 = vpop.f32.mrf.mxu0  ;;  %v25702_v10 = vld [vmem:[#allocation36_spill] sm:$0xff] }
 0xd0e   : > { %v16557_v57 = vsel %vm7867_vm4, %v16553_v59, %v16540_v55 }
 0xd0f   : > { %v17081_v47 = vsel %vm405_vm1, %v16557_v57, 0 }
 0xd10   : > { %v17122_v39 = vand.u32 4294901760, %v17081_v47 }
 0xd11   : > { %v17177_v52 = vpop.f32.mrf.mxu1 }
 0xd12   : > { %v17123_v16 = vsub.f32 %v17081_v47, %v17122_v39  ;;  %17184 = vmatmul.f32.gmra.mxu1 %v17122_v39 }
 0xd14   : > { %17228 = vmatmul.f32.gmra.mxu2 %v17123_v16  ;;  %v17124_v62 = vand.u32 4294901760, %v17123_v16 }
 0xd16   : > { %17272 = vmatmul.f32.gmra.mxu3 %v17124_v62  ;;  %v17125_v50 = vsub.f32 %v17123_v16, %v17124_v62 }
 0xd18   : > { %v17126_v28 = vand.u32 4294901760, %v17125_v50 }
 0xd1a   : > { %17127 = vmatmul.f32.gmra.mxu0 %v17126_v28 }
 0xd58   : > { %v16510_v24 = vpop.permute.xlu2 %16509 }
 0xd59   : > { %v16550_v34 = vsel %vm2169_vm3, %v16492_v35, %v16510_v24 }
 0xd5a   : > { %v17181_v43 = vpop.f32.mrf.mxu1 }
 0xd60   : > { %v17072_v63 = vpop.permute.xlu2 %17071 }
 0xd61   : > { %v17113_v12 = vadd.f32 %v17112_v4, %v17072_v63  ;;  %v25704_v4 = vld [vmem:[#allocation38_spill] sm:$0xff] }
 0xd62   : > { %v17120_v2 = vpop.f32.mrf.mxu0 }
 0xd63   : > { %v17178_v21 = vadd.f32 %v17177_v52, %v17113_v12  ;;  %v17121_v31 = vadd.f32 %v17120_v2, %v17072_v63 }
 0xd65   : > { %v17182_v42 = vadd.f32 %v17181_v43, %v17121_v31 }
 0xd6d   : > { %v16526_v17 = vpop.permute.xlu1 %16525 }
 0xd6e   : > { %v16554_v54 = vsel %vm7862_vm0, %v16550_v34, %v16526_v17  ;;  %v16542_v61 = vpop.permute.xlu0 %16541  ;;  %v25703_v34 = vld [vmem:[#allocation37_spill] sm:$0xff] }
 0xd6f   : > { %v16558_v23 = vsel %vm7867_vm4, %v16554_v54, %v16542_v61 }
 0xd70   : > { %v17084_v25 = vsel %vm405_vm1, %v16558_v23, 0 }
 0xd71   : > { %v17130_v26 = vand.u32 4294901760, %v17084_v25 }
 0xd73   : > { %v17131_v15 = vsub.f32 %v17084_v25, %v17130_v26  ;;  %17188 = vmatmul.f32.gmra.mxu1 %v17130_v26 }
 0xd75   : > { %17233 = vmatmul.f32.gmra.mxu2 %v17131_v15  ;;  %v17132_v6 = vand.u32 4294901760, %v17131_v15 }
 0xd77   : > { %17278 = vmatmul.f32.gmra.mxu3 %v17132_v6  ;;  %v17133_v30 = vsub.f32 %v17131_v15, %v17132_v6 }
 0xd79   : > { %v17134_v7 = vand.u32 4294901760, %v17133_v30 }
 0xd7b   : > { %17135 = vmatmul.f32.gmra.mxu0 %v17134_v7  ;;  %17348 = vmatmul.f32.vlgmr.msra.gmra.mxu1 %v24871_v56 }
 0xd83   : > { %17311 = vmatmul.f32.vlgmr.msra.gmra.mxu0 %v24871_v56  ;;  %17352 = vmatmul.f32.gmra.mxu1 %v24995_v38  ;;  %v17219_v56 = vpop.f32.mrf.mxu2 }
 0xd84   : > { %v17220_v32 = vadd.f32 %v17219_v56, %v17178_v21 }
 0xd8b   : > { %17315 = vmatmul.f32.gmra.mxu0 %v24995_v38  ;;  %17356 = vmatmul.f32.gmra.mxu1 %v17122_v39  ;;  %v17261_v38 = vpop.f32.mrf.mxu3  ;;  %v17224_v8 = vpop.f32.mrf.mxu2 }
 0xd8c   : > { %v17262_v9 = vadd.f32 %v17261_v38, %v17220_v32  ;;  %v17225_v46 = vadd.f32 %v17224_v8, %v17182_v42 }
 0xd8f   : > { %v17185_v11 = vpop.f32.mrf.mxu1 }
 0xd93   : > { %17319 = vmatmul.f32.gmra.mxu0 %v17122_v39  ;;  %17360 = vmatmul.f32.gmra.mxu1 %v17130_v26  ;;  %v17267_v59 = vpop.f32.mrf.mxu3 }
 0xd94   : > { %v17268_v47 = vadd.f32 %v17267_v59, %v17225_v46 }
 0xd97   : > { %v17128_v45 = vpop.f32.mrf.mxu0  ;;  %v17229_v28 = vpop.f32.mrf.mxu2 }
 0xd98   : > { %v17129_v53 = vadd.f32 %v17128_v45, %v17072_v63 }
 0xd9a   : > { %v17186_v39 = vadd.f32 %v17185_v11, %v17129_v53 }
 0xd9b   : > { %17323 = vmatmul.f32.gmra.mxu0 %v17130_v26  ;;  %v17273_v54 = vpop.f32.mrf.mxu3 }
 0xd9c   : > { %v17230_v18 = vadd.f32 %v17229_v28, %v17186_v39 }
 0xd9e   : > { %v17274_v61 = vadd.f32 %v17273_v54, %v17230_v18  ;;  %v25707_v18 = vld [vmem:[#allocation35_spill] sm:$0xff]  ;;  %v25710_v54 = vld [vmem:[#allocation26_spill] sm:$0xff] }
 0xdf0   : > { %v17189_v48 = vpop.f32.mrf.mxu1 }
 0xdf8   : > { %v17136_v13 = vpop.f32.mrf.mxu0  ;;  %v17349_v33 = vpop.f32.mrf.mxu1 }
 0xdf9   : > { %v17137_v35 = vadd.f32 %v17136_v13, %v17072_v63  ;;  %v17234_v30 = vpop.f32.mrf.mxu2  ;;  %v25705_v13 = vld [vmem:[#allocation39_spill] sm:$0xff] }
 0xdfa   : > { %v17279_v2 = vpop.f32.mrf.mxu3 }
 0xdfb   : > { %v17190_v23 = vadd.f32 %v17189_v48, %v17137_v35  ;;  %v25708_v35 = vld [vmem:[#allocation19_spill] sm:$0xff] }
 0xdfd   : > { %v17235_v7 = vadd.f32 %v17234_v30, %v17190_v23  ;;  %v25712_v23 = vld [vmem:[#allocation30_spill] sm:$0xff]  ;;  %v25717_v30 = vld [vmem:[#allocation21_spill] sm:$0xff] }
 0xdff   : > { %v17280_v11 = vadd.f32 %v17279_v2, %v17235_v7 }
 0xe00   : > { %v17312_v1 = vpop.f32.mrf.mxu0  ;;  %v17353_v57 = vpop.f32.mrf.mxu1 }
 0xe01   : > { %v17313_v20 = vadd.f32 %v17312_v1, %v17262_v9 }
 0xe03   : > { %v17350_v55 = vadd.f32 %v17349_v33, %v17313_v20  ;;  %v25706_v33 = vld [vmem:[#allocation34_spill] sm:$0xff] }
 0xe05   : > { %v17364_v60 = vadd.f32 %v17350_v55, %v25702_v10 }
 0xe07   : > { %v17368_v16 = vsel %vm405_vm1, %v17364_v60, 0.0 }
 0xe08   : > { %v17316_v62 = vpop.f32.mrf.mxu0  ;;  %17369 = vadd.xlane.f32.xlu1 %v17368_v16  ;;  %v17357_v26 = vpop.f32.mrf.mxu1 }
 0xe09   : > { %v17317_v50 = vadd.f32 %v17316_v62, %v17268_v47 }
 0xe0b   : > { %v17354_v24 = vadd.f32 %v17353_v57, %v17317_v50 }
 0xe0d   : > { %v17365_v17 = vadd.f32 %v17354_v24, %v25703_v34  ;;  %v25094_v24 = vld [vmem:[%s19176_s13 + $0xa0] sm:$0xff] }
 0xe0e   : > { %v25097_v34 = vperm.slane %v25094_v24, 2 }
 0xe0f   : > { %v17371_v25 = vsel %vm405_vm1, %v17365_v17, 0.0 }
 0xe10   : > { %v17320_v15 = vpop.f32.mrf.mxu0  ;;  %17372 = vadd.xlane.f32.xlu0 %v17371_v25  ;;  %v17361_v21 = vpop.f32.mrf.mxu1  ;;  %v25713_v25 = vld [vmem:[#allocation27_spill] sm:$0xff] }
 0xe11   : > { %v17321_v6 = vadd.f32 %v17320_v15, %v17274_v61  ;;  %v25711_v61 = vld [vmem:[#allocation20_spill] sm:$0xff]  ;;  %v25715_v15 = vld [vmem:[#allocation22_spill] sm:$0xff] }
 0xe13   : > { %v17358_v52 = vadd.f32 %v17357_v26, %v17321_v6  ;;  %v25714_v26 = vld [vmem:[#allocation31_spill] sm:$0xff] }
 0xe14   : > { %v25716_v6 = vld [vmem:[#allocation23_spill] sm:$0xff] }
 0xe15   : > { %v17366_v43 = vadd.f32 %v17358_v52, %v25704_v4 }
 0xe17   : > { %v17374_v63 = vsel %vm405_vm1, %v17366_v43, 0.0 }
 0xe18   : > { %v17324_v45 = vpop.f32.mrf.mxu0  ;;  %17375 = vadd.xlane.f32.xlu2 %v17374_v63 }
 0xe19   : > { %v17325_v12 = vadd.f32 %v17324_v45, %v17280_v11 }
 0xe1b   : > { %v17362_v48 = vadd.f32 %v17361_v21, %v17325_v12 }
 0xe1d   : > { %v17367_v56 = vadd.f32 %v17362_v48, %v25705_v13  ;;  %v393_v13 = vld [vmem:[%s19176_s13 + $0x50] sm:$0xff] }
 0xe1f   : > { %v17377_v31 = vsel %vm405_vm1, %v17367_v56, 0.0 }
 0xe20   : > { %17378 = vadd.xlane.f32.xlu1 %v17377_v31 }
 0xe7b   : > { %v17370_v32 = vpop.xlane.xlu1 %17369 }
 0xe7c   : > { %v17380_v38 = vmul.f32 %v17370_v32, %v25706_v33  ;;  %v25181_v32 = vand.u32 4294901760, %v393_v13 }
 0xe7e   : > { %v25066_v42 = vsub.f32 %v17364_v60, %v17380_v38 }
 0xe80   : > { %v17388_v9 = vmul.f32 %v25066_v42, %v25066_v42 }
 0xe82   : > { %v17392_v1 = vsel %vm405_vm1, %v17388_v9, 0.0  ;;  %v391_v9 = vld [vmem:[%s19176_s13 + $0x40] sm:$0xff] }
 0xe83   : > { %v17373_v20 = vpop.xlane.xlu0 %17372  ;;  %17393 = vadd.xlane.f32.xlu0 %v17392_v1 }
 0xe84   : > { %v17381_v8 = vmul.f32 %v17373_v20, %v25706_v33 }
 0xe86   : > { %v25072_v46 = vsub.f32 %v17365_v17, %v17381_v8  ;;  %v25709_v17 = vld [vmem:[#allocation18_spill] sm:$0xff]  ;;  %v25186_v8 = vand.u32 4294901760, %v391_v9 }
 0xe88   : > { %v17389_v53 = vmul.f32 %v25072_v46, %v25072_v46 }
 0xe8a   : > { %v17395_v55 = vsel %vm405_vm1, %v17389_v53, 0.0 }
 0xe8b   : > { %v17376_v10 = vpop.xlane.xlu2 %17375  ;;  %17396 = vadd.xlane.f32.xlu2 %v17395_v55 }
 0xe8c   : > { %v17382_v60 = vmul.f32 %v17376_v10, %v25706_v33 }
 0xe8e   : > { %v25078_v59 = vsub.f32 %v17366_v43, %v17382_v60  ;;  %v17555_v60 = vsub.f32 %v393_v13, %v25181_v32 }
 0xe90   : > { %v17390_v57 = vmul.f32 %v25078_v59, %v25078_v59 }
 0xe92   : > { %v17398_v47 = vsel %vm405_vm1, %v17390_v57, 0.0 }
 0xe93   : > { %17399 = vadd.xlane.f32.xlu1 %v17398_v47  ;;  %v17379_v39 = vpop.xlane.xlu1 %17378 }
 0xe94   : > { %v17383_v16 = vmul.f32 %v17379_v39, %v25706_v33  ;;  %v17567_v39 = vsub.f32 %v391_v9, %v25186_v8 }
 0xe96   : > { %v25084_v62 = vsub.f32 %v17367_v56, %v17383_v16  ;;  %v392_v56 = vld [vmem:[%s19176_s13 + $0x48] sm:$0xff] }
 0xe97   : > { %v25183_v38 = vand.u32 4294901760, %v392_v56 }
 0xe98   : > { %v17391_v50 = vmul.f32 %v25084_v62, %v25084_v62 }
 0xe99   : > { %v17561_v57 = vsub.f32 %v392_v56, %v25183_v38 }
 0xe9a   : > { %v17401_v28 = vsel %vm405_vm1, %v17391_v50, 0.0  ;;  %v17556_v50 = vand.u32 4294901760, %v17555_v60 }
 0xe9b   : > { %17402 = vadd.xlane.f32.xlu0 %v17401_v28  ;;  %v17562_v28 = vand.u32 4294901760, %v17561_v57 }
 0xea3   : > { %17456 = vrot.lane.b32.xlu2 %v25707_v18, %s18995_s28 }
 0xeab   : > { %8318 = vrot.lane.b32.xlu2 %v25708_v35, %s18998_s8 }
 0xeac   : > { %17463 = vrot.lane.b32.xlu1 %v25707_v18, %s18996_s29 }
 0xeaf   : > { %17766 = vrot.lane.b32.xlu0 %v25097_v34, %s18995_s28 }
 0xeb3   : > { %8332 = vrot.lane.b32.xlu2 %v25709_v17, %s18997_s7 }
 0xeb4   : > { %8320 = vrot.lane.b32.xlu1 %v25710_v54, %s18998_s8  ;;  %v17568_v54 = vand.u32 4294901760, %v17567_v39 }
 0xeb7   : > { %8316 = vrot.lane.b32.xlu0 %v25711_v61, %s18998_s8 }
 0xebb   : > { %8338 = vrot.lane.b32.xlu2 %v25712_v23, %s18997_s7 }
 0xebc   : > { %8336 = vrot.lane.b32.xlu1 %v25713_v25, %s18997_s7  ;;  %v17557_v25 = vsub.f32 %v17555_v60, %v17556_v50 }
 0xebf   : > { %8322 = vrot.lane.b32.xlu0 %v25714_v26, %s18998_s8  ;;  %v17563_v26 = vsub.f32 %v17561_v57, %v17562_v28 }
 0xec3   : > { %17007 = vrot.lane.b32.xlu2 %v24597_v51, %s18998_s8  ;;  %v25718_v51 = vld [vmem:[#allocation32_spill] sm:$0xff] }
 0xec4   : > { %17005 = vrot.lane.b32.xlu1 %v24616_v22, %s18998_s8  ;;  %v25719_v22 = vld [vmem:[#allocation28_spill] sm:$0xff] }
 0xec7   : > { %8334 = vrot.lane.b32.xlu0 %v25715_v15, %s18997_s7  ;;  %v17569_v15 = vsub.f32 %v17567_v39, %v17568_v54 }
 0xecb   : > { %8350 = vrot.lane.b32.xlu2 %v25716_v6, %s18999_s10 }
 0xecc   : > { %8348 = vrot.lane.b32.xlu1 %v25717_v30, %s18999_s10 }
 0xecf   : > { %17003 = vrot.lane.b32.xlu0 %v24310_v36, %s18998_s8 }
 0xed3   : > { %17019 = vrot.lane.b32.xlu2 %v24330_v3, %s18997_s7 }
 0xed4   : > { %8354 = vrot.lane.b32.xlu1 %v25718_v51, %s18999_s10  ;;  %v17558_v51 = vand.u32 4294901760, %v17557_v25 }
 0xed7   : > { %17009 = vrot.lane.b32.xlu0 %v24980_v19, %s18998_s8 }
 0xedb   : > { %17025 = vrot.lane.b32.xlu2 %v24974_v49, %s18997_s7 }
 0xedc   : > { %17023 = vrot.lane.b32.xlu1 %v24672_v0, %s18997_s7 }
 0xedf   : > { %8352 = vrot.lane.b32.xlu0 %v25719_v22, %s18999_s10  ;;  %v17564_v22 = vand.u32 4294901760, %v17563_v26 }
 0xee3   : > { %17039 = vrot.lane.b32.xlu2 %v24668_v14, %s18999_s10 }
 0xee4   : > { %17037 = vrot.lane.b32.xlu1 %v24621_v5, %s18999_s10 }
 0xee7   : > { %17021 = vrot.lane.b32.xlu0 %v24624_v37, %s18997_s7  ;;  %v394_v37 = vld [vmem:[%s19176_s13 + $0x58] sm:$0xff] }
 0xeef   : > { %17035 = vrot.lane.b32.xlu0 %v24323_v27, %s18999_s10 }
 0xef6   : > { %v17394_v36 = vpop.xlane.xlu0 %17393 }
 0xef7   : > { %v17404_v3 = vmul.f32 %v17394_v36, %v25706_v33  ;;  %17041 = vrot.lane.b32.xlu0 %v24977_v40, %s18999_s10  ;;  %v25163_v40 = vand.u32 4294901760, %v394_v37 }
 0xef9   : > { %v25150_v0 = vadd.f32 1e-05, %v17404_v3  ;;  %v17549_v2 = vsub.f32 %v394_v37, %v25163_v40  ;;  %17647 = vmatpush.msrb.mxu1 %v25163_v40  ;;  %17496 = vmatpush.msrb.mxu2 %v25163_v40 }
 0xefb   : > { %18707 = vrsqrt.f32 %v25150_v0  ;;  %v17550_v12 = vand.u32 4294901760, %v17549_v2  ;;  %17603 = vmatpush.msrb.mxu0 %v17549_v2  ;;  %17649 = vmatpush.msrb.mxu1 %v25181_v32  ;;  %vm17418_vm6 = vweird.f32 %v25150_v0 }
 0xefc   : > { %17498 = vmatpush.msrb.mxu2 %v25181_v32 }
 0xefd   : > { %v17551_v48 = vsub.f32 %v17549_v2, %v17550_v12  ;;  %17606 = vmatpush.msrb.mxu0 %v17555_v60  ;;  %17651 = vmatpush.msrb.mxu1 %v25183_v38 }
 0xefe   : > { %v17397_v14 = vpop.xlane.xlu2 %17396  ;;  %17500 = vmatpush.msrb.mxu2 %v25183_v38 }
 0xeff   : > { %v17405_v49 = vmul.f32 %v17397_v14, %v25706_v33  ;;  %v17552_v20 = vand.u32 4294901760, %v17551_v48  ;;  %17609 = vmatpush.msrb.mxu0 %v17561_v57  ;;  %17653 = vmatpush.msrb.mxu1 %v25186_v8 }
 0xf00   : > { %17502 = vmatpush.msrb.mxu2 %v25186_v8 }
 0xf01   : > { %v25154_v5 = vpop.eup %18707  ;;  %v25156_v19 = vadd.f32 1e-05, %v17405_v49  ;;  %17553 = vmatpush.msrb.mxu3 %v17552_v20  ;;  %17612 = vmatpush.msrb.mxu0 %v17567_v39  ;;  %v17570_v49 = vand.u32 4294901760, %v17569_v15 }
 0xf02   : > { %v17413_v27 = vmul.f32 %v25154_v5, %v25150_v0  ;;  %vm17419_vm2 = vweird.f32 %v25154_v5  ;;  %17694 = vmatpush.msra.mxu2 %v17550_v12 }
 0xf03   : > { %18709 = vrsqrt.f32 %v25156_v19  ;;  %vm25211_vm7 = vmor %vm17418_vm6, %vm17419_vm2  ;;  %vm17428_vm8 = vweird.f32 %v25156_v19  ;;  %17559 = vmatpush.msrb.mxu3 %v17558_v51  ;;  %vm17769_vm2 = vcmask 523264  }
 0xf04   : > { %v17414_v7 = vmul.f32 %v25154_v5, %v17413_v27  ;;  %17698 = vmatpush.msra.mxu2 %v17556_v50 }
 0xf05   : > { %17565 = vmatpush.msrb.mxu3 %v17564_v22 }
 0xf06   : > { %v25165_v52 = vpop.permute.xlu2 %17456  ;;  %v17400_v4 = vpop.xlane.xlu1 %17399  ;;  %v17415_v63 = vmul.f32 0.5, %v17414_v7  ;;  %17702 = vmatpush.msra.mxu2 %v17562_v28  ;;  %v25722_v28 = vld [vmem:[#allocation29_spill] sm:$0xff] }
 0xf07   : > { %v17406_v43 = vmul.f32 %v17400_v4, %v25706_v33  ;;  %17571 = vmatpush.msrb.mxu3 %v17570_v49 }
 0xf08   : > { %v17416_v1 = vsub.f32 1.5, %v17415_v63  ;;  %17706 = vmatpush.msra.mxu2 %v17568_v54 }
 0xf09   : > { %v25171_v11 = vpop.eup %18709  ;;  %v25173_v45 = vadd.f32 1e-05, %v17406_v43  ;;  %17737 = vmatpush.msra.mxu3 %v25163_v40 }
 0xf0a   : > { %v17423_v21 = vmul.f32 %v25171_v11, %v25156_v19  ;;  %v17417_v35 = vmul.f32 %v25154_v5, %v17416_v1  ;;  %vm17429_vm5 = vweird.f32 %v25171_v11 }
 0xf0b   : > { %18711 = vrsqrt.f32 %v25173_v45  ;;  %vm17430_vm9 = vmor %vm17428_vm8, %vm17429_vm5  ;;  %vm17438_vm11 = vweird.f32 %v25173_v45  ;;  %17739 = vmatpush.msra.mxu3 %v25181_v32 }
 0xf0c   : > { %v17424_v31 = vmul.f32 %v25171_v11, %v17423_v21  ;;  %v17421_v3 = vsel %vm25211_vm7, %v25154_v5, %v17417_v35  ;;  %vm18261_vm7 = vcmask 785408  }
 0xf0d   : > { %v17452_v7 = vmul.f32 %v17421_v3, %v25066_v42  ;;  %17741 = vmatpush.msra.mxu3 %v25183_v38 }
 0xf0e   : > { %v17425_v53 = vmul.f32 0.5, %v17424_v31  ;;  %v25188_v55 = vpop.permute.xlu2 %8318  ;;  %v17403_v10 = vpop.xlane.xlu0 %17402 }
 0xf0f   : > { %v17407_v47 = vmul.f32 %v17403_v10, %v25706_v33  ;;  %17743 = vmatpush.msra.mxu3 %v25186_v8 }
 0xf10   : > { %v17426_v16 = vsub.f32 1.5, %v17425_v53 }
 0xf11   : > { %v18712_v18 = vpop.eup %18711  ;;  %v25199_v17 = vadd.f32 1e-05, %v17407_v47 }
 0xf12   : > { %v17427_v61 = vmul.f32 %v25171_v11, %v17426_v16  ;;  %v17433_v23 = vmul.f32 %v18712_v18, %v25173_v45  ;;  %vm17439_vm10 = vweird.f32 %v18712_v18 }
 0xf13   : > { %18713 = vrsqrt.f32 %v25199_v17  ;;  %vm17440_vm12 = vmor %vm17438_vm11, %vm17439_vm10  ;;  %vm17448_vm14 = vweird.f32 %v25199_v17 }
 0xf14   : > { %v17434_v30 = vmul.f32 %v18712_v18, %v17433_v23  ;;  %v17431_v36 = vsel %vm17430_vm9, %v25171_v11, %v17427_v61  ;;  %v17459_v11 = vmul.f32 %v25165_v52, %v17452_v7 }
 0xf15   : > { %v17453_v37 = vmul.f32 %v17431_v36, %v25072_v46 }
 0xf16   : > { %v17435_v0 = vmul.f32 0.5, %v17434_v30  ;;  %v25222_v14 = vpop.permute.xlu2 %8332  ;;  %v25723_v30 = vld [vmem:[#allocation33_spill] sm:$0xff] }
 0xf17   : > { %v17460_v63 = vmul.f32 %v25165_v52, %v17453_v37 }
 0xf18   : > { %v17436_v19 = vsub.f32 1.5, %v17435_v0 }
 0xf19   : > { %v18714_v27 = vpop.eup %18713 }
 0xf1a   : > { %v17437_v4 = vmul.f32 %v18712_v18, %v17436_v19  ;;  %v17443_v5 = vmul.f32 %v18714_v27, %v25199_v17  ;;  %vm17449_vm13 = vweird.f32 %v18714_v27 }
 0xf1b   : > { %vm17450_vm15 = vmor %vm17448_vm14, %vm17449_vm13 }
 0xf1c   : > { %v17441_v43 = vsel %vm17440_vm12, %v18712_v18, %v17437_v4  ;;  %v17444_v2 = vmul.f32 %v18714_v27, %v17443_v5  ;;  %v25724_v4 = vld [vmem:[#allocation25_spill] sm:$0xff] }
 0xf1d   : > { %v17454_v46 = vmul.f32 %v17441_v43, %v25078_v59  ;;  %v8361_v5 = vsel %vm2169_vm3, %v25724_v4, %v25188_v55 }
 0xf1e   : > { %v17445_v42 = vmul.f32 0.5, %v17444_v2  ;;  %v8339_v12 = vpop.permute.xlu2 %8338  ;;  %v17464_v45 = vpop.permute.xlu1 %17463 }
 0xf1f   : > { %v17461_v21 = vmul.f32 %v25165_v52, %v17454_v46  ;;  %v25234_v48 = vadd.f32 %v17464_v45, %v17459_v11  ;;  %v25236_v13 = vadd.f32 %v17464_v45, %v17460_v63  ;;  %v25725_v46 = vld [vmem:[#allocation24_spill] sm:$0xff] }
 0xf20   : > { %v17446_v40 = vsub.f32 1.5, %v17445_v42 }
 0xf21   : > { %v17472_v56 = vsel %vm405_vm1, %v25234_v48, 0  ;;  %v17475_v59 = vsel %vm405_vm1, %v25236_v13, 0  ;;  %v25243_v31 = vpop.permute.xlu0 %17766  ;;  %v25251_v38 = vadd.f32 %v17464_v45, %v17461_v21 }
 0xf22   : > { %v17447_v32 = vmul.f32 %v18714_v27, %v17446_v40  ;;  %v25247_v9 = vand.u32 4294901760, %v17472_v56  ;;  %v25249_v1 = vand.u32 4294901760, %v17475_v59 }
 0xf23   : > { %v17478_v16 = vsel %vm405_vm1, %v25251_v38, 0 }
 0xf24   : > { %v17451_v20 = vsel %vm17450_vm15, %v18714_v27, %v17447_v32  ;;  %v17504_v53 = vsub.f32 %v17472_v56, %v25247_v9  ;;  %17573 = vmatmul.f32.vlgmr.msrb.gmra.mxu3 %v25247_v9  ;;  %v17512_v47 = vsub.f32 %v17475_v59, %v25249_v1  ;;  %v17519_v61 = vand.u32 4294901760, %v17478_v16 }
 0xf25   : > { %v17455_v10 = vmul.f32 %v17451_v20, %v25084_v62 }
 0xf26   : > { %v17008_v60 = vpop.permute.xlu2 %17007  ;;  %17615 = vmatmul.f32.vlgmr.msrb.gmra.mxu0 %v17504_v53  ;;  %v8321_v8 = vpop.permute.xlu1 %8320  ;;  %v17505_v57 = vand.u32 4294901760, %v17504_v53  ;;  %v17513_v54 = vand.u32 4294901760, %v17512_v47  ;;  %v17520_v26 = vsub.f32 %v17478_v16, %v17519_v61 }
 0xf27   : > { %v17462_v39 = vmul.f32 %v25165_v52, %v17455_v10  ;;  %v25262_v50 = vsel %vm2169_vm3, %v24683_v58, %v17008_v60  ;;  %v8362_v18 = vsel %vm2169_vm3, %v25722_v28, %v8321_v8 }
 0xf28   : > { %17657 = vmatmul.f32.vlgmr.msrb.gmra.mxu1 %v17505_v57  ;;  %v17506_v62 = vsub.f32 %v17504_v53, %v17505_v57  ;;  %v17514_v25 = vsub.f32 %v17512_v47, %v17513_v54  ;;  %v17521_v36 = vand.u32 4294901760, %v17520_v26  ;;  %v402_v57 = vld [vmem:[%s19176_s13 + $0x98] sm:$0xff] }
 0xf29   : > { %v8317_v35 = vpop.permute.xlu0 %8316  ;;  %v25266_v23 = vadd.f32 %v17464_v45, %v17462_v39  ;;  %v400_v39 = vld [vmem:[%s19176_s13 + $0x88] sm:$0xff]  ;;  %v25314_v16 = vand.u32 4294901760, %v402_v57 }
 0xf2a   : > { %v17507_v17 = vand.u32 4294901760, %v17506_v62  ;;  %v17515_v22 = vand.u32 4294901760, %v17514_v25  ;;  %v17522_v27 = vsub.f32 %v17520_v26, %v17521_v36  ;;  %v8360_v42 = vsel %vm2169_vm3, %v25725_v46, %v8317_v35 }
 0xf2b   : > { %v17481_v58 = vsel %vm405_vm1, %v25266_v23, 0  ;;  %v25318_v28 = vand.u32 4294901760, %v400_v39  ;;  %17974 = vmatpush.msrb.mxu3 %v25314_v16  ;;  %17791 = vmatpush.msra.mxu0 %v25314_v16 }
 0xf2c   : > { %17508 = vmatmul.f32.vlgmr.msrb.gmra.mxu2 %v17507_v17  ;;  %17577 = vmatmul.f32.gmra.mxu3 %v25249_v1  ;;  %v17527_v3 = vand.u32 4294901760, %v17481_v58  ;;  %v17523_v11 = vand.u32 4294901760, %v17522_v27  ;;  %v397_v27 = vld [vmem:[%s19176_s13 + $0x70] sm:$0xff] }
 0xf2d   : > { %v25327_v62 = vsub.f32 %v400_v39, %v25318_v28  ;;  %v25363_v4 = vand.u32 4294901760, %v397_v27 }
 0xf2e   : > { %17620 = vmatmul.f32.gmra.mxu0 %v17512_v47  ;;  %v8337_v52 = vpop.permute.xlu1 %8336  ;;  %v8351_v49 = vpop.permute.xlu2 %8350  ;;  %v17528_v37 = vsub.f32 %v17481_v58, %v17527_v3  ;;  %v401_v47 = vld [vmem:[%s19176_s13 + $0x90] sm:$0xff] }
 0xf2f   : > { %v25272_v15 = vsel %vm7862_vm0, %v8362_v18, %v8337_v52  ;;  %v17861_v52 = vand.u32 4294901760, %v25327_v62 }
 0xf30   : > { %17663 = vmatmul.f32.gmra.mxu1 %v17513_v54  ;;  %v17529_v63 = vand.u32 4294901760, %v17528_v37 }
 0xf31   : > { %v8323_v6 = vpop.permute.xlu0 %8322  ;;  %v17862_v58 = vsub.f32 %v25327_v62, %v17861_v52 }
 0xf32   : > { %v8363_v51 = vsel %vm2169_vm3, %v25723_v30, %v8323_v6  ;;  %v17530_v55 = vsub.f32 %v17528_v37, %v17529_v63 }
 0xf33   : > { %v25277_v0 = vsel %vm7862_vm0, %v8363_v51, %v8339_v12  ;;  %v17863_v51 = vand.u32 4294901760, %v17862_v58 }
 0xf34   : > { %17516 = vmatmul.f32.gmra.mxu2 %v17515_v22  ;;  %17581 = vmatmul.f32.gmra.mxu3 %v17519_v61  ;;  %v17531_v59 = vand.u32 4294901760, %v17530_v55 }
 0xf36   : > { %17625 = vmatmul.f32.gmra.mxu0 %v17520_v26  ;;  %v17006_v19 = vpop.permute.xlu1 %17005  ;;  %v25292_v40 = vpop.permute.xlu2 %17019 }
 0xf37   : > { %v17048_v7 = vsel %vm2169_vm3, %v24634_v44, %v17006_v19  ;;  %v8364_v44 = vsel %vm7862_vm0, %v8360_v42, %v25222_v14  ;;  %v398_v19 = vld [vmem:[%s19176_s13 + $0x78] sm:$0xff] }
 0xf38   : > { %17669 = vmatmul.f32.gmra.mxu1 %v17521_v36 }
 0xf39   : > { %v8335_v43 = vpop.permute.xlu0 %8334 }
 0xf3a   : > { %v8365_v2 = vsel %vm7862_vm0, %v8361_v5, %v8335_v43  ;;  %v396_v5 = vld [vmem:[%s19176_s13 + $0x68] sm:$0xff]  ;;  %v395_v43 = vld [vmem:[%s19176_s13 + $0x60] sm:$0xff] }
 0xf3b   : > { %v8369_v12 = vsel %vm7867_vm4, %v8365_v2, %v8351_v49  ;;  %v399_v49 = vld [vmem:[%s19176_s13 + $0x80] sm:$0xff]  ;;  %v25372_v46 = vand.u32 4294901760, %v395_v43  ;;  %s18271_s13 = scalar_lea.sflag [#allocation5], %s19173_s1 }
 0xf3c   : > { %18227 = vrot.lane.b32.xlu1 %v8369_v12, %s18996_s29  ;;  %17524 = vmatmul.f32.gmra.mxu2 %v17523_v11 }
 0xf3d   : > { %17585 = vmatmul.f32.gmra.mxu3 %v17527_v3 }
 0xf3e   : > { %17630 = vmatmul.f32.gmra.mxu0 %v17528_v37  ;;  %v8349_v45 = vpop.permute.xlu1 %8348  ;;  %v17026_v20 = vpop.permute.xlu2 %17025  ;;  %v25359_v37 = vand.u32 4294901760, %v399_v49 }
 0xf3f   : > { %v8368_v21 = vsel %vm7867_vm4, %v8364_v44, %v8349_v45  ;;  %v25379_v44 = vsub.f32 %v397_v27, %v25363_v4 }
 0xf40   : > { %17675 = vmatmul.f32.gmra.mxu1 %v17529_v63  ;;  %18225 = vrot.lane.b32.xlu0 %v8368_v21, %s18996_s29  ;;  %v25370_v63 = vand.u32 4294901760, %v396_v5  ;;  %v17866_v42 = vsub.f32 %v399_v49, %v25359_v37  ;;  %v25387_v21 = vsub.f32 %v395_v43, %v25372_v46 }
 0xf41   : > { %v25295_v56 = vpop.permute.xlu0 %17003 }
 0xf42   : > { %v25383_v55 = vsub.f32 %v396_v5, %v25370_v63 }
 0xf44   : > { %17532 = vmatmul.f32.gmra.mxu2 %v17531_v59  ;;  %v17867_v59 = vand.u32 4294901760, %v17866_v42 }
 0xf45   : > { %17745 = vmatmul.f32.vlgmr.msra.gmra.mxu3 %v25247_v9 }
 0xf49   : > { %v17010_v32 = vpop.permute.xlu0 %17009 }
 0xf4a   : > { %v17050_v14 = vsel %vm2169_vm3, %v24983_v41, %v17010_v32 }
 0xf4b   : > { %v25301_v53 = vsel %vm7862_vm0, %v17050_v14, %v17026_v20  ;;  %v17879_v20 = vand.u32 4294901760, %v25379_v44 }
 0xf4c   : > { %17708 = vmatmul.f32.vlgmr.msra.gmra.mxu2 %v25247_v9  ;;  %v25316_v9 = vand.u32 4294901760, %v401_v47 }
 0xf4d   : > { %17749 = vmatmul.f32.gmra.mxu3 %v25249_v1  ;;  %v17880_v39 = vsub.f32 %v25379_v44, %v17879_v20 }
 0xf4e   : > { %v25324_v18 = vsub.f32 %v401_v47, %v25316_v9  ;;  %17976 = vmatpush.msrb.mxu3 %v25316_v9  ;;  %17793 = vmatpush.msra.mxu0 %v25316_v9 }
 0xf4f   : > { %v17881_v49 = vand.u32 4294901760, %v17880_v39 }
 0xf50   : > { %17978 = vmatpush.msrb.mxu3 %v25318_v28  ;;  %17795 = vmatpush.msra.mxu0 %v25318_v28 }
 0xf51   : > { %v25305_v10 = vpop.permute.xlu0 %8352 }
 0xf52   : > { %17980 = vmatpush.msrb.mxu3 %v25359_v37  ;;  %17797 = vmatpush.msra.mxu0 %v25359_v37 }
 0xf54   : > { %17712 = vmatmul.f32.gmra.mxu2 %v25249_v1  ;;  %v25321_v1 = vsub.f32 %v402_v57, %v25314_v16  ;;  %v17868_v57 = vsub.f32 %v17866_v42, %v17867_v59 }
 0xf55   : > { %17753 = vmatmul.f32.gmra.mxu3 %v17519_v61 }
 0xf56   : > { %v17849_v54 = vand.u32 4294901760, %v25321_v1  ;;  %17922 = vmatpush.msrb.mxu2 %v25321_v1 }
 0xf58   : > { %v17850_v25 = vsub.f32 %v25321_v1, %v17849_v54  ;;  %17925 = vmatpush.msrb.mxu2 %v25324_v18 }
 0xf59   : > { %v17022_v60 = vpop.permute.xlu0 %17021 }
 0xf5a   : > { %v25309_v8 = vsel %vm7862_vm0, %v17048_v7, %v17022_v60  ;;  %v17851_v6 = vand.u32 4294901760, %v17850_v25  ;;  %17928 = vmatpush.msrb.mxu2 %v25327_v62  ;;  %v25361_v7 = vand.u32 4294901760, %v398_v19  ;;  %v17885_v60 = vand.u32 4294901760, %v25383_v55 }
 0xf5c   : > { %17716 = vmatmul.f32.gmra.mxu2 %v17519_v61  ;;  %v17855_v61 = vand.u32 4294901760, %v25324_v18  ;;  %17852 = vmatpush.msra.mxu1 %v17851_v6  ;;  %v25376_v12 = vsub.f32 %v398_v19, %v25361_v7  ;;  %v17886_v6 = vsub.f32 %v25383_v55, %v17885_v60 }
 0xf5d   : > { %17757 = vmatmul.f32.gmra.mxu3 %v17527_v3  ;;  %17931 = vmatpush.msrb.mxu2 %v17866_v42 }
 0xf5e   : > { %v17856_v26 = vsub.f32 %v25324_v18, %v17855_v61  ;;  %v17873_v32 = vand.u32 4294901760, %v25376_v12  ;;  %17982 = vmatpush.msrb.mxu3 %v25361_v7  ;;  %17799 = vmatpush.msra.mxu0 %v25361_v7  ;;  %v17887_v5 = vand.u32 4294901760, %v17886_v6 }
 0xf5f   : > { %17934 = vmatpush.msrb.mxu2 %v25376_v12 }
 0xf60   : > { %v17857_v30 = vand.u32 4294901760, %v17856_v26  ;;  %v17874_v47 = vsub.f32 %v25376_v12, %v17873_v32  ;;  %17984 = vmatpush.msrb.mxu3 %v25363_v4  ;;  %17801 = vmatpush.msra.mxu0 %v25363_v4 }
 0xf61   : > { %17937 = vmatpush.msrb.mxu2 %v25379_v44 }
 0xf62   : > { %17858 = vmatpush.msra.mxu1 %v17857_v30  ;;  %v17875_v58 = vand.u32 4294901760, %v17874_v47  ;;  %17986 = vmatpush.msrb.mxu3 %v25370_v63 }
 0xf63   : > { %17803 = vmatpush.msra.mxu0 %v25370_v63  ;;  %17940 = vmatpush.msrb.mxu2 %v25383_v55 }
 0xf64   : > { %17720 = vmatmul.f32.gmra.mxu2 %v17527_v3  ;;  %17864 = vmatpush.msra.mxu1 %v17863_v51 }
 0xf65   : > { %17988 = vmatpush.msrb.mxu3 %v25372_v46  ;;  %17805 = vmatpush.msra.mxu0 %v25372_v46 }
 0xf66   : > { %17943 = vmatpush.msrb.mxu2 %v25387_v21 }
 0xf67   : > { %18025 = vmatpush.msrb.mxu0 %v17849_v54 }
 0xf69   : > { %18029 = vmatpush.msrb.mxu0 %v17855_v61 }
 0xf6b   : > { %18033 = vmatpush.msrb.mxu0 %v17861_v52 }
 0xf6d   : > { %18037 = vmatpush.msrb.mxu0 %v17867_v59 }
 0xf6f   : > { %18041 = vmatpush.msrb.mxu0 %v17873_v32 }
 0xf71   : > { %18045 = vmatpush.msrb.mxu0 %v17879_v20 }
 0xf73   : > { %18049 = vmatpush.msrb.mxu0 %v17885_v60 }
 0xfa3   : > { %v17616_v45 = vpop.f32.mrf.mxu0 }
 0xfa5   : > { %v17658_v25 = vpop.f32.mrf.mxu1 }
 0xfa7   : > { %v17574_v41 = vpop.f32.mrf.mxu3 }
 0xfab   : > { %v17621_v43 = vpop.f32.mrf.mxu0 }
 0xfaf   : > { %v17509_v35 = vpop.f32.mrf.mxu2  ;;  %v25331_v17 = vpop.f32.mrf.mxu3 }
 0xfb0   : > { %v17510_v2 = vadd.f32 %v17509_v35, %v25097_v34  ;;  %v17891_v35 = vand.u32 4294901760, %v25387_v21 }
 0xfb2   : > { %v17575_v14 = vadd.f32 %v17574_v41, %v17510_v2  ;;  %v17869_v41 = vand.u32 4294901760, %v17868_v57  ;;  %v17892_v19 = vsub.f32 %v25387_v21, %v17891_v35  ;;  %18053 = vmatpush.msrb.mxu0 %v17891_v35 }
 0xfb3   : > { %v17626_v52 = vpop.f32.mrf.mxu0 }
 0xfb4   : > { %v17617_v51 = vadd.f32 %v17616_v45, %v17575_v14  ;;  %17870 = vmatpush.msra.mxu1 %v17869_v41  ;;  %v17893_v42 = vand.u32 4294901760, %v17892_v19  ;;  %v17664_v45 = vpop.f32.mrf.mxu1 }
 0xfb6   : > { %17876 = vmatpush.msra.mxu1 %v17875_v58  ;;  %v17659_v2 = vadd.f32 %v17658_v25, %v17617_v51 }
 0xfb7   : > { %v17517_v22 = vpop.f32.mrf.mxu2  ;;  %v25352_v36 = vpop.f32.mrf.mxu3 }
 0xfb8   : > { %v17518_v30 = vadd.f32 %v17517_v22, %v25097_v34  ;;  %17882 = vmatpush.msra.mxu1 %v17881_v49 }
 0xfba   : > { %v17579_v22 = vadd.f32 %v25331_v17, %v17518_v30  ;;  %17888 = vmatpush.msra.mxu1 %v17887_v5 }
 0xfbb   : > { %v17631_v21 = vpop.f32.mrf.mxu0 }
 0xfbc   : > { %v17622_v54 = vadd.f32 %v17621_v43, %v17579_v22  ;;  %17894 = vmatpush.msra.mxu1 %v17893_v42  ;;  %v17670_v32 = vpop.f32.mrf.mxu1 }
 0xfbe   : > { %18080 = vmatpush.msrb.mxu1 %v25314_v16  ;;  %v17665_v61 = vadd.f32 %v17664_v45, %v17622_v54 }
 0xfbf   : > { %v25354_v3 = vpop.f32.mrf.mxu2 }
 0xfc0   : > { %v25368_v11 = vpop.f32.mrf.mxu3  ;;  %v17526_v55 = vadd.f32 %v25354_v3, %v25097_v34  ;;  %18082 = vmatpush.msrb.mxu1 %v25316_v9 }
 0xfc2   : > { %v17583_v18 = vadd.f32 %v25352_v36, %v17526_v55  ;;  %18084 = vmatpush.msrb.mxu1 %v25318_v28 }
 0xfc4   : > { %v17627_v36 = vadd.f32 %v17626_v52, %v17583_v18  ;;  %18086 = vmatpush.msrb.mxu1 %v25359_v37  ;;  %v17676_v49 = vpop.f32.mrf.mxu1 }
 0xfc6   : > { %18088 = vmatpush.msrb.mxu1 %v25361_v7 }
 0xfc7   : > { %v17533_v26 = vpop.f32.mrf.mxu2 }
 0xfc8   : > { %v17746_v27 = vpop.f32.mrf.mxu3  ;;  %v17534_v9 = vadd.f32 %v17533_v26, %v25097_v34  ;;  %v17671_v34 = vadd.f32 %v17670_v32, %v17627_v36  ;;  %18090 = vmatpush.msrb.mxu1 %v25363_v4 }
 0xfca   : > { %v17587_v25 = vadd.f32 %v25368_v11, %v17534_v9  ;;  %18092 = vmatpush.msrb.mxu1 %v25370_v63 }
 0xfcc   : > { %v17632_v30 = vadd.f32 %v17631_v21, %v17587_v25  ;;  %18094 = vmatpush.msrb.mxu1 %v25372_v46 }
 0xfcf   : > { %v17709_v12 = vpop.f32.mrf.mxu2 }
 0xfd0   : > { %v17710_v44 = vadd.f32 %v17709_v12, %v17659_v2  ;;  %v17750_v14 = vpop.f32.mrf.mxu3 }
 0xfd2   : > { %v17747_v1 = vadd.f32 %v17746_v27, %v17710_v44  ;;  %v17677_v27 = vadd.f32 %v17676_v49, %v17632_v30 }
 0xfd4   : > { %v17761_v17 = vmax.f32 %v17747_v1, 0.0 }
 0xfd6   : > { %v17771_v62 = vsel %vm17769_vm2, %v17761_v17, 0 }
 0xfd7   : > { %v25425_v57 = vand.u32 4294901760, %v17771_v62  ;;  %v17713_v3 = vpop.f32.mrf.mxu2 }
 0xfd8   : > { %v17714_v47 = vadd.f32 %v17713_v3, %v17665_v61  ;;  %v17754_v41 = vpop.f32.mrf.mxu3  ;;  %v25445_v61 = vperm.slane %v25094_v24, 4 }
 0xfd9   : > { %v17807_v16 = vsub.f32 %v17771_v62, %v25425_v57  ;;  %17896 = vmatmul.f32.vlgmr.msra.gmra.mxu1 %v25425_v57 }
 0xfda   : > { %v17751_v59 = vadd.f32 %v17750_v14, %v17714_v47  ;;  %18210 = vrot.lane.b32.xlu2 %v25445_v61, %s18991_s9 }
 0xfdb   : > { %v17808_v39 = vand.u32 4294901760, %v17807_v16  ;;  %17946 = vmatmul.f32.vlgmr.msrb.gmra.mxu2 %v17807_v16 }
 0xfdc   : > { %v17762_v28 = vmax.f32 %v17751_v59, 0.0 }
 0xfdd   : > { %v17809_v20 = vsub.f32 %v17807_v16, %v17808_v39  ;;  %17992 = vmatmul.f32.vlgmr.msrb.gmra.mxu3 %v17808_v39 }
 0xfde   : > { %v17774_v60 = vsel %vm17769_vm2, %v17762_v28, 0 }
 0xfdf   : > { %v17810_v26 = vand.u32 4294901760, %v17809_v20  ;;  %v17814_v37 = vand.u32 4294901760, %v17774_v60  ;;  %v17717_v58 = vpop.f32.mrf.mxu2 }
 0xfe0   : > { %v17718_v6 = vadd.f32 %v17717_v58, %v17671_v34  ;;  %v17758_v2 = vpop.f32.mrf.mxu3 }
 0xfe1   : > { %17811 = vmatmul.f32.vlgmr.msra.gmra.mxu0 %v17810_v26  ;;  %17900 = vmatmul.f32.gmra.mxu1 %v17814_v37  ;;  %v17815_v7 = vsub.f32 %v17774_v60, %v17814_v37 }
 0xfe2   : > { %v17755_v35 = vadd.f32 %v17754_v41, %v17718_v6 }
 0xfe3   : > { %17951 = vmatmul.f32.gmra.mxu2 %v17815_v7  ;;  %v17816_v11 = vand.u32 4294901760, %v17815_v7 }
 0xfe4   : > { %v17763_v51 = vmax.f32 %v17755_v35, 0.0 }
 0xfe5   : > { %17998 = vmatmul.f32.gmra.mxu3 %v17816_v11  ;;  %v17817_v4 = vsub.f32 %v17815_v7, %v17816_v11 }
 0xfe6   : > { %v17777_v19 = vsel %vm17769_vm2, %v17763_v51, 0 }
 0xfe7   : > { %v17822_v5 = vand.u32 4294901760, %v17777_v19  ;;  %v17721_v43 = vpop.f32.mrf.mxu2  ;;  %v17818_v63 = vand.u32 4294901760, %v17817_v4 }
 0xfe8   : > { %v17722_v22 = vadd.f32 %v17721_v43, %v17677_v27 }
 0xfe9   : > { %17819 = vmatmul.f32.gmra.mxu0 %v17818_v63  ;;  %17904 = vmatmul.f32.gmra.mxu1 %v17822_v5  ;;  %v17823_v42 = vsub.f32 %v17777_v19, %v17822_v5 }
 0xfea   : > { %v17759_v12 = vadd.f32 %v17758_v2, %v17722_v22 }
 0xfeb   : > { %17956 = vmatmul.f32.gmra.mxu2 %v17823_v42  ;;  %v17824_v46 = vand.u32 4294901760, %v17823_v42 }
 0xfec   : > { %v17764_v44 = vmax.f32 %v17759_v12, 0.0 }
 0xfed   : > { %18004 = vmatmul.f32.gmra.mxu3 %v17824_v46  ;;  %v17825_v45 = vsub.f32 %v17823_v42, %v17824_v46 }
 0xfee   : > { %v17780_v55 = vsel %vm17769_vm2, %v17764_v44, 0 }
 0xfef   : > { %v17830_v1 = vand.u32 4294901760, %v17780_v55  ;;  %v17826_v54 = vand.u32 4294901760, %v17825_v45 }
 0xff1   : > { %17827 = vmatmul.f32.gmra.mxu0 %v17826_v54  ;;  %17908 = vmatmul.f32.gmra.mxu1 %v17830_v1  ;;  %v17831_v17 = vsub.f32 %v17780_v55, %v17830_v1 }
 0xff3   : > { %17961 = vmatmul.f32.gmra.mxu2 %v17831_v17  ;;  %v17832_v14 = vand.u32 4294901760, %v17831_v17 }
 0xff5   : > { %18010 = vmatmul.f32.gmra.mxu3 %v17832_v14  ;;  %v17833_v18 = vsub.f32 %v17831_v17, %v17832_v14 }
 0xff7   : > { %v17834_v62 = vand.u32 4294901760, %v17833_v18 }
 0xff9   : > { %17835 = vmatmul.f32.gmra.mxu0 %v17834_v62  ;;  %18096 = vmatmul.f32.vlgmr.msrb.gmra.mxu1 %v25425_v57 }
0x1001   : > { %18055 = vmatmul.f32.vlgmr.msrb.gmra.mxu0 %v25425_v57  ;;  %18100 = vmatmul.f32.gmra.mxu1 %v17814_v37 }
0x1009   : > { %18059 = vmatmul.f32.gmra.mxu0 %v17814_v37  ;;  %18104 = vmatmul.f32.gmra.mxu1 %v17822_v5 }
0x1011   : > { %18063 = vmatmul.f32.gmra.mxu0 %v17822_v5  ;;  %18108 = vmatmul.f32.gmra.mxu1 %v17830_v1 }
0x1019   : > { %18067 = vmatmul.f32.gmra.mxu0 %v17830_v1 }
0x1056   : > { %v17897_v52 = vpop.f32.mrf.mxu1 }
0x105e   : > { %v17812_v3 = vpop.f32.mrf.mxu0  ;;  %v17901_v47 = vpop.f32.mrf.mxu1 }
0x105f   : > { %v17813_v57 = vadd.f32 %v17812_v3, %v25243_v31  ;;  %v17947_v32 = vpop.f32.mrf.mxu2 }
0x1060   : > { %v17993_v28 = vpop.f32.mrf.mxu3 }
0x1061   : > { %v17898_v39 = vadd.f32 %v17897_v52, %v17813_v57 }
0x1063   : > { %v17948_v25 = vadd.f32 %v17947_v32, %v17898_v39 }
0x1065   : > { %v17994_v26 = vadd.f32 %v17993_v28, %v17948_v25 }
0x1066   : > { %v17820_v16 = vpop.f32.mrf.mxu0  ;;  %v17905_v9 = vpop.f32.mrf.mxu1 }
0x1067   : > { %v17821_v24 = vadd.f32 %v17820_v16, %v25243_v31  ;;  %v17952_v34 = vpop.f32.mrf.mxu2 }
0x1068   : > { %v17999_v6 = vpop.f32.mrf.mxu3 }
0x1069   : > { %v17902_v37 = vadd.f32 %v17901_v47, %v17821_v24 }
0x106b   : > { %v17953_v21 = vadd.f32 %v17952_v34, %v17902_v37 }
0x106d   : > { %v18000_v51 = vadd.f32 %v17999_v6, %v17953_v21 }
0x106e   : > { %v17828_v59 = vpop.f32.mrf.mxu0  ;;  %v17909_v36 = vpop.f32.mrf.mxu1 }
0x106f   : > { %v17829_v7 = vadd.f32 %v17828_v59, %v25243_v31  ;;  %v17957_v19 = vpop.f32.mrf.mxu2  ;;  %v8370_v59 = vsel %vm7867_vm4, %v25272_v15, %v25305_v10  ;;  %v17040_v15 = vpop.permute.xlu2 %17039 }
0x1070   : > { %v18005_v2 = vpop.f32.mrf.mxu3 }
0x1071   : > { %v17906_v49 = vadd.f32 %v17905_v9, %v17829_v7 }
0x1073   : > { %v17958_v43 = vadd.f32 %v17957_v19, %v17906_v49 }
0x1075   : > { %v18006_v12 = vadd.f32 %v18005_v2, %v17958_v43 }
0x1076   : > { %v17836_v20 = vpop.f32.mrf.mxu0  ;;  %v18097_v60 = vpop.f32.mrf.mxu1 }
0x1077   : > { %v17837_v63 = vadd.f32 %v17836_v20, %v25243_v31  ;;  %v17962_v1 = vpop.f32.mrf.mxu2  ;;  %v25475_v20 = vpop.permute.xlu2 %18210 }
0x1078   : > { %v18011_v18 = vpop.f32.mrf.mxu3 }
0x1079   : > { %v17910_v46 = vadd.f32 %v17909_v36, %v17837_v63  ;;  %v17036_v36 = vpop.permute.xlu0 %17035 }
0x107b   : > { %v17963_v54 = vadd.f32 %v17962_v1, %v17910_v46 }
0x107d   : > { %v18012_v62 = vadd.f32 %v18011_v18, %v17963_v54 }
0x107e   : > { %v18056_v41 = vpop.f32.mrf.mxu0  ;;  %v18101_v11 = vpop.f32.mrf.mxu1 }
0x107f   : > { %v18057_v58 = vadd.f32 %v18056_v41, %v17994_v26 }
0x1081   : > { %v18098_v35 = vadd.f32 %v18097_v60, %v18057_v58  ;;  %v17042_v28 = vpop.permute.xlu0 %17041 }
0x1083   : > { %v18112_v30 = vadd.f32 %v18098_v35, %v25234_v48 }
0x1085   : > { %v18116_v4 = vsel %vm405_vm1, %v18112_v30, 0.0 }
0x1086   : > { %v18060_v27 = vpop.f32.mrf.mxu0  ;;  %18117 = vadd.xlane.f32.xlu2 %v18116_v4  ;;  %v18105_v44 = vpop.f32.mrf.mxu1 }
0x1087   : > { %v18061_v5 = vadd.f32 %v18060_v27, %v18000_v51 }
0x1089   : > { %v18102_v22 = vadd.f32 %v18101_v11, %v18061_v5 }
0x108b   : > { %v18113_v42 = vadd.f32 %v18102_v22, %v25236_v13  ;;  %v17058_v22 = vsel %vm7867_vm4, %v25301_v53, %v17042_v28 }
0x108d   : > { %v18119_v48 = vsel %vm405_vm1, %v18113_v42, 0.0 }
0x108e   : > { %v18064_v45 = vpop.f32.mrf.mxu0  ;;  %18120 = vadd.xlane.f32.xlu0 %v18119_v48  ;;  %v18109_v3 = vpop.f32.mrf.mxu1 }
0x108f   : > { %v18065_v55 = vadd.f32 %v18064_v45, %v18006_v12 }
0x1091   : > { %v18106_v17 = vadd.f32 %v18105_v44, %v18065_v55 }
0x1093   : > { %v18114_v14 = vadd.f32 %v18106_v17, %v25251_v38  ;;  %v17047_v38 = vsel %vm2169_vm3, %v24333_v29, %v25295_v56  ;;  %v25477_v56 = vpop.permute.xlu0 %18225 }
0x1094   : > { %v17051_v57 = vsel %vm7862_vm0, %v17047_v38, %v25292_v40 }
0x1095   : > { %v18122_v31 = vsel %vm405_vm1, %v18114_v14, 0.0  ;;  %v17055_v32 = vsel %vm7867_vm4, %v17051_v57, %v17036_v36 }
0x1096   : > { %v18068_v52 = vpop.f32.mrf.mxu0  ;;  %18123 = vadd.xlane.f32.xlu1 %v18122_v31 }
0x1097   : > { %v18069_v13 = vadd.f32 %v18068_v52, %v18012_v62 }
0x1099   : > { %v18110_v47 = vadd.f32 %v18109_v3, %v18069_v13 }
0x109b   : > { %v18115_v16 = vadd.f32 %v18110_v47, %v25266_v23  ;;  %v8355_v23 = vpop.permute.xlu1 %8354 }
0x109c   : > { %v8371_v39 = vsel %vm7867_vm4, %v25277_v0, %v8355_v23 }
0x109d   : > { %v18125_v9 = vsel %vm405_vm1, %v18115_v16, 0.0 }
0x109e   : > { %18126 = vadd.xlane.f32.xlu2 %v18125_v9 }
0x10a2   : > { %18229 = vrot.lane.b32.xlu0 %v8370_v59, %s18996_s29 }
0x10a3   : > { %v17024_v10 = vpop.permute.xlu1 %17023 }
0x10a4   : > { %v17053_v5 = vsel %vm7862_vm0, %v25262_v50, %v17024_v10 }
0x10a5   : > { %v17057_v43 = vsel %vm7867_vm4, %v17053_v5, %v17040_v15 }
0x10ab   : > { %v17038_v29 = vpop.permute.xlu1 %17037 }
0x10ac   : > { %v17056_v63 = vsel %vm7867_vm4, %v25309_v8, %v17038_v29 }
0x10af   : > { %18241 = vrot.lane.b32.xlu1 %v17055_v32, %s18995_s28 }
0x10b3   : > { %v25481_v26 = vpop.permute.xlu1 %18227 }
0x10b6   : > { %18231 = vrot.lane.b32.xlu2 %v8371_v39, %s18996_s29 }
0x10f9   : > { %v18118_v25 = vpop.xlane.xlu2 %18117 }
0x10fa   : > { %v18128_v40 = vmul.f32 %v18118_v25, %v25706_v33 }
0x10fc   : > { %v18132_v24 = vsub.f32 %v18112_v30, %v18128_v40 }
0x10fe   : > { %v18136_v60 = vmul.f32 %v18132_v24, %v18132_v24 }
0x1100   : > { %v18140_v34 = vsel %vm405_vm1, %v18136_v60, 0.0 }
0x1101   : > { %18141 = vadd.xlane.f32.xlu1 %v18140_v34  ;;  %v18121_v0 = vpop.xlane.xlu0 %18120 }
0x1102   : > { %v18129_v37 = vmul.f32 %v18121_v0, %v25706_v33 }
0x1104   : > { %v25484_v41 = vsub.f32 %v18113_v42, %v18129_v37 }
0x1106   : > { %v18137_v58 = vmul.f32 %v25484_v41, %v25484_v41 }
0x1108   : > { %v18143_v6 = vsel %vm405_vm1, %v18137_v58, 0.0 }
0x1109   : > { %18144 = vadd.xlane.f32.xlu2 %v18143_v6  ;;  %v18124_v21 = vpop.xlane.xlu1 %18123 }
0x110a   : > { %v18130_v7 = vmul.f32 %v18124_v21, %v25706_v33 }
0x110c   : > { %v25490_v35 = vsub.f32 %v18114_v14, %v18130_v7 }
0x110e   : > { %v18138_v30 = vmul.f32 %v25490_v35, %v25490_v35 }
0x1110   : > { %v18146_v11 = vsel %vm405_vm1, %v18138_v30, 0.0 }
0x1111   : > { %v18127_v51 = vpop.xlane.xlu2 %18126  ;;  %18147 = vadd.xlane.f32.xlu0 %v18146_v11 }
0x1112   : > { %v18131_v49 = vmul.f32 %v18127_v51, %v25706_v33 }
0x1114   : > { %v25496_v4 = vsub.f32 %v18115_v16, %v18131_v49  ;;  %v25514_v48 = vpop.permute.xlu0 %18229 }
0x1116   : > { %v18139_v19 = vmul.f32 %v25496_v4, %v25496_v4 }
0x1118   : > { %v18149_v27 = vsel %vm405_vm1, %v18139_v19, 0.0 }
0x1119   : > { %18150 = vadd.xlane.f32.xlu1 %v18149_v27  ;;  %v25511_v42 = vpop.permute.xlu2 %18231 }
0x1121   : > { %18245 = vrot.lane.b32.xlu2 %v17057_v43, %s18995_s28  ;;  %v18242_v2 = vpop.permute.xlu1 %18241 }
0x1125   : > { %18243 = vrot.lane.b32.xlu0 %v17056_v63, %s18995_s28 }
0x1132   : > { %18247 = vrot.lane.b32.xlu1 %v17058_v22, %s18995_s28 }
0x1174   : > { %v18142_v12 = vpop.xlane.xlu1 %18141 }
0x1175   : > { %v18152_v50 = vmul.f32 %v18142_v12, %v25706_v33 }
0x1177   : > { %v18156_v46 = vadd.f32 1e-05, %v18152_v50 }
0x1179   : > { %18715 = vrsqrt.f32 %v18156_v46  ;;  %vm18166_vm0 = vweird.f32 %v18156_v46 }
0x117c   : > { %v18145_v44 = vpop.xlane.xlu2 %18144 }
0x117d   : > { %v18153_v8 = vmul.f32 %v18145_v44, %v25706_v33 }
0x117f   : > { %v18716_v45 = vpop.eup %18715  ;;  %v18157_v55 = vadd.f32 1e-05, %v18153_v8 }
0x1180   : > { %v18161_v1 = vmul.f32 %v18716_v45, %v18156_v46  ;;  %vm18167_vm3 = vweird.f32 %v18716_v45 }
0x1181   : > { %18717 = vrsqrt.f32 %v18157_v55  ;;  %vm18168_vm4 = vmor %vm18166_vm0, %vm18167_vm3  ;;  %vm18176_vm6 = vweird.f32 %v18157_v55 }
0x1182   : > { %v18162_v53 = vmul.f32 %v18716_v45, %v18161_v1 }
0x1184   : > { %v18163_v54 = vmul.f32 0.5, %v18162_v53  ;;  %v18148_v17 = vpop.xlane.xlu0 %18147  ;;  %v18246_v63 = vpop.permute.xlu2 %18245 }
0x1185   : > { %v18154_v14 = vmul.f32 %v18148_v17, %v25706_v33 }
0x1186   : > { %v18164_v18 = vsub.f32 1.5, %v18163_v54 }
0x1187   : > { %v18718_v62 = vpop.eup %18717  ;;  %v18158_v31 = vadd.f32 1e-05, %v18154_v14 }
0x1188   : > { %v18165_v52 = vmul.f32 %v18716_v45, %v18164_v18  ;;  %v18171_v13 = vmul.f32 %v18718_v62, %v18157_v55  ;;  %vm18177_vm5 = vweird.f32 %v18718_v62 }
0x1189   : > { %18719 = vrsqrt.f32 %v18158_v31  ;;  %vm18178_vm8 = vmor %vm18176_vm6, %vm18177_vm5  ;;  %vm18186_vm10 = vweird.f32 %v18158_v31 }
0x118a   : > { %v18169_v3 = vsel %vm18168_vm4, %v18716_v45, %v18165_v52  ;;  %v18172_v47 = vmul.f32 %v18718_v62, %v18171_v13 }
0x118b   : > { %v18200_v16 = vmul.f32 %v18169_v3, %v18132_v24 }
0x118c   : > { %v18173_v9 = vmul.f32 0.5, %v18172_v47  ;;  %v18151_v59 = vpop.xlane.xlu1 %18150 }
0x118d   : > { %v18205_v38 = vmul.f32 %v25445_v61, %v18200_v16  ;;  %v18155_v36 = vmul.f32 %v18151_v59, %v25706_v33 }
0x118e   : > { %v18174_v57 = vsub.f32 1.5, %v18173_v9 }
0x118f   : > { %v18720_v32 = vpop.eup %18719  ;;  %v18213_v23 = vadd.f32 %v25475_v20, %v18205_v38  ;;  %v18159_v39 = vadd.f32 1e-05, %v18155_v36 }
0x1190   : > { %v18175_v15 = vmul.f32 %v18718_v62, %v18174_v57  ;;  %v18181_v10 = vmul.f32 %v18720_v32, %v18158_v31  ;;  %vm18187_vm9 = vweird.f32 %v18720_v32 }
0x1191   : > { %18217 = vst.msk [vmem:[#allocation2] sm:$0xff] %vm405_vm1, %v18213_v23  ;;  %18721 = vrsqrt.f32 %v18159_v39  ;;  %v18253_v28 = vsel %vm405_vm1, %v18213_v23, %v25477_v56  ;;  %vm18188_vm11 = vmor %vm18186_vm10, %vm18187_vm9  ;;  %vm18196_vm13 = vweird.f32 %v18159_v39 }
0x1192   : > { %v18179_v29 = vsel %vm18178_vm8, %v18718_v62, %v18175_v15  ;;  %v18182_v33 = vmul.f32 %v18720_v32, %v18181_v10  ;;  %v18257_v25 = vsel %vm17769_vm2, %v18253_v28, %v18242_v2 }
0x1193   : > { %v18201_v40 = vmul.f32 %v18179_v29, %v25484_v41  ;;  %v18262_v24 = vsel %vm18261_vm7, %v18257_v25, 0.0 }
0x1194   : > { %v18183_v60 = vmul.f32 0.5, %v18182_v33  ;;  %18266 = vst [vmem:[%s19183_s16] sm:$0xff] %v18262_v24 }
0x1195   : > { %v18206_v34 = vmul.f32 %v25445_v61, %v18201_v40 }
0x1196   : > { %v18184_v0 = vsub.f32 1.5, %v18183_v60 }
0x1197   : > { %v18722_v37 = vpop.eup %18721  ;;  %v18214_v58 = vadd.f32 %v25475_v20, %v18206_v34  ;;  %v18244_v21 = vpop.permute.xlu0 %18243 }
0x1198   : > { %v18185_v6 = vmul.f32 %v18720_v32, %v18184_v0  ;;  %v18191_v56 = vmul.f32 %v18722_v37, %v18159_v39  ;;  %vm18197_vm12 = vweird.f32 %v18722_v37 }
0x1199   : > { %18218 = vst.msk [vmem:[#allocation2 + $0x8] sm:$0xff] %vm405_vm1, %v18214_v58  ;;  %v18254_v41 = vsel %vm405_vm1, %v18214_v58, %v25481_v26  ;;  %vm18198_vm14 = vmor %vm18196_vm13, %vm18197_vm12 }
0x119a   : > { %v18189_v7 = vsel %vm18188_vm11, %v18720_v32, %v18185_v6  ;;  %v18192_v30 = vmul.f32 %v18722_v37, %v18191_v56  ;;  %v18258_v11 = vsel %vm17769_vm2, %v18254_v41, %v18244_v21 }
0x119b   : > { %v18202_v51 = vmul.f32 %v18189_v7, %v25490_v35  ;;  %v18263_v49 = vsel %vm18261_vm7, %v18258_v11, 0.0 }
0x119c   : > { %v18193_v19 = vmul.f32 0.5, %v18192_v30  ;;  %18267 = vst [vmem:[%s19183_s16 + $0x8] sm:$0xff] %v18263_v49 }
0x119d   : > { %v18207_v27 = vmul.f32 %v25445_v61, %v18202_v51 }
0x119e   : > { %v18194_v5 = vsub.f32 1.5, %v18193_v19 }
0x119f   : > { %v18215_v26 = vadd.f32 %v25475_v20, %v18207_v27 }
0x11a0   : > { %v18195_v43 = vmul.f32 %v18722_v37, %v18194_v5 }
0x11a1   : > { %18219 = vst.msk [vmem:[#allocation2 + $0x10] sm:$0xff] %vm405_vm1, %v18215_v26  ;;  %v18255_v35 = vsel %vm405_vm1, %v18215_v26, %v25514_v48 }
0x11a2   : > { %v18199_v22 = vsel %vm18198_vm14, %v18722_v37, %v18195_v43  ;;  %v18259_v2 = vsel %vm17769_vm2, %v18255_v35, %v18246_v63 }
0x11a3   : > { %v18203_v12 = vmul.f32 %v18199_v22, %v25496_v4  ;;  %v18264_v50 = vsel %vm18261_vm7, %v18259_v2, 0.0 }
0x11a4   : > { %18268 = vst [vmem:[%s19183_s16 + $0x10] sm:$0xff] %v18264_v50  ;;  %v18248_v44 = vpop.permute.xlu1 %18247 }
0x11a5   : > { %v18208_v46 = vmul.f32 %v25445_v61, %v18203_v12 }
0x11a7   : > { %v18216_v48 = vadd.f32 %v25475_v20, %v18208_v46 }
0x11a9   : > { %18220 = vst.msk [vmem:[#allocation2 + $0x18] sm:$0xff] %vm405_vm1, %v18216_v48  ;;  %v18256_v4 = vsel %vm405_vm1, %v18216_v48, %v25511_v42 }
0x11aa   : > { %v18260_v8 = vsel %vm17769_vm2, %v18256_v4, %v18248_v44 }
0x11ab   : > { %v18265_v45 = vsel %vm18261_vm7, %v18260_v8, 0.0 }
0x11ac   : > { %18269 = vst [vmem:[%s19183_s16 + $0x18] sm:$0xff] %v18265_v45 }
0x11ad   : > { %18914 = shalt.err (!%p18911_p3)
}
0x11ae   : > { %s19001_s1 = smov 128  }
0x11af   : > { %18469 = dma.vmem_to_hbm [thread:$0]  (%p19137_p7), %s18286_s6, 512, %s18288_s21, %s18271_s13, %s19001_s1, %s19001_s1, %s18998_s8  }
0x11b0 PF: > { %s18302_s16 = sand.u32 1, %s18961_s18   ;;  %p18489_p5 = pnand %p18425_p11, %p19077_p6 }
0x11b1   : > { %s18303_s7 = scalar_lea.sflag [#allocation5], %s18302_s16 }
0x11b2   : > { %p18490_p9 = pneg %p18489_p5 }
0x11b4   : > { %18956 = dma.done.wait (%p18490_p9), %s18303_s7, 512  }
0x11b5   : > { %18958 = vsyncadd (%p18490_p9), %s18303_s7, 4294966784  ;;  %s21_s23 = sadd.s32 1, %s18981_s23   ;;  %s25726_s18 = smov %s18965_s19 }
0x11b6   : > { %p18_p10 = scmp.ge.s32.totalorder %s21_s23, 4   ;;  %s25727_s19 = smov %s18969_s20 }
0x11b7   : > { %s25728_s20 = smov %s19147_s30  ;;  %s25729_s21 = smov %s18977_s22 }
0x11b8   : > { %s25730_s22 = smov %s25732_s15  ;;  %20 = sbr.rel (!%p18_p10) target bundleno = 11 (0xb), region = 108 }
0x11bd   :  { %18309 = vsyncpa [#allocation4], 1 }
0x11be   :  { %18311 = vsyncpa [#allocation4 + $0x1], 1 }
0x11bf   :  { %18312 = vsyncpa [#allocation7], 1 }
0x11c0   :  { %18313 = vsyncpa [#allocation10], 1 }
0x11c1   :  { %18314 = vsyncpa [#allocation5], 1 }
0x11c2   :  { %18316 = vsyncpa [#allocation5 + $0x1], 1 }

</bundles_post_ra>
